<compile_context>
chip_gen: v6e
topology: v6e:2x2x1
jax: 0.10.0
libtpu: 0.0.40
codegen_flags: <defaults>
</compile_context>

<pallas_src>
import numpy as np
import jax
import jax.numpy as jnp
from jax import lax
from jax.experimental import pallas as pl
from jax.experimental.pallas import tpu as pltpu

# ---------------------------------------------------------------------------
# Static problem configuration (Minigrid-like: 7x7x3 image obs, 7 actions)
# ---------------------------------------------------------------------------
H = W = 7
C_IN = 3
N_ACTIONS = 7
ENC = 512                      # obs_encoding_size in Maml_agent

HP, WP = H + 2, W + 2          # zero-padded input spatial dims (conv1 pad=1)
H1, W1, C1 = 7, 7, 16          # conv1: 3x3, stride 1, pad 1
H2, W2, C2 = 6, 6, 32          # conv2: 2x2, valid
H3, W3, C3 = 5, 5, 64          # conv3: 2x2, valid
FLAT = C3 * H3 * W3            # 1600 features after Flatten (PyTorch C,H,W order)

IN_FEATS = HP * WP * C_IN      # 243  (padded image, flattened (h, w, c))
IN_PAD = 256                   # padded to 2 x 128 lanes (zero rows in w1)
LANE = 128                     # actor head padded to one full lane group
OUT_W = 2 * LANE               # packed output: [logits | logp/entropy]
NEG = -1e9                     # "minus infinity" bias for padded action slots


# ---------------------------------------------------------------------------
# Kernel
# ---------------------------------------------------------------------------
def _elu(x):
    # exp stays f32 (safe on v5e; bf16-EUP variant for v6e/v7x not worth the
    # chip-dependent branch here)
    return jnp.where(x > 0, x, jnp.exp(jnp.minimum(x, 0.0)) - 1.0)


def maml_agent_kernel(x_ref, w1_ref, b1_ref, w2_ref, b2_ref, w3_ref, b3_ref,
                      wl_ref, bl_ref, wa_ref, ba_ref, out_ref):
    x = x_ref[...]                                                # (B, 256) bf16

    # conv1 (3x3, pad 1) as one banded matmul + ELU
    a1 = jnp.dot(x, w1_ref[...], preferred_element_type=jnp.float32) + b1_ref[...]
    a1 = _elu(a1).astype(jnp.bfloat16)                            # (B, 784)

    # conv2 (2x2, valid) + ReLU
    a2 = jnp.dot(a1, w2_ref[...], preferred_element_type=jnp.float32) + b2_ref[...]
    a2 = jnp.maximum(a2, 0.0).astype(jnp.bfloat16)                # (B, 1152)

    # conv3 (2x2, valid) + ReLU
    a3 = jnp.dot(a2, w3_ref[...], preferred_element_type=jnp.float32) + b3_ref[...]
    a3 = jnp.maximum(a3, 0.0).astype(jnp.bfloat16)                # (B, 1600) == Flatten

    # Linear(1600 -> 512) + ReLU (single matmul, K=1600)
    hid = jnp.dot(a3, wl_ref[...], preferred_element_type=jnp.float32) + bl_ref[...]
    hid = jnp.maximum(hid, 0.0).astype(jnp.bfloat16)              # (B, 512)

    # actor head, padded to 128 lanes; padded columns have bias NEG -> prob 0
    logits = jnp.dot(hid, wa_ref[...],
                     preferred_element_type=jnp.float32) + ba_ref[...]  # (B, 128) f32

    # Categorical(logits=...): log-softmax + entropy, f32 throughout
    m = jnp.max(logits, axis=-1, keepdims=True)
    z = logits - m
    e = jnp.exp(z)                               # padded cols underflow to exactly 0
    s = jnp.sum(e, axis=-1, keepdims=True)
    log_s = jnp.log(s)
    logp = z - log_s
    # H = log(s) - sum(e*z)/s   (exact; padded lanes contribute 0*(-1e9) = -0.0)
    sum_ez = jnp.sum(e * z, axis=-1, keepdims=True)
    ent = log_s - sum_ez / s                                      # (B, 1)

    # two direct 128-lane slice stores (no concatenate, no temp slab)
    lane = lax.broadcasted_iota(jnp.int32, logits.shape, 1)
    out_ref[:, 0:LANE] = logits
    out_ref[:, LANE:OUT_W] = jnp.where(lane < N_ACTIONS, logp, ent)


# ---------------------------------------------------------------------------
# Parameter setup (deterministic, synthetic: stand-in for orthogonal init)
# ---------------------------------------------------------------------------
def init_params(key):
    ks = jax.random.split(key, 5)

    def w(k, shape, fan_in, gain):
        return (gain / np.sqrt(fan_in)) * jax.random.normal(k, shape, jnp.float32)

    return dict(
        w1=w(ks[0], (C1, C_IN, 3, 3), C_IN * 9, np.sqrt(2)),
        b1=jnp.zeros((C1,), jnp.float32),
        w2=w(ks[1], (C2, C1, 2, 2), C1 * 4, np.sqrt(2)),
        b2=jnp.zeros((C2,), jnp.float32),
        w3=w(ks[2], (C3, C2, 2, 2), C2 * 4, np.sqrt(2)),
        b3=jnp.zeros((C3,), jnp.float32),
        wl=w(ks[3], (ENC, FLAT), FLAT, np.sqrt(2)),
        bl=jnp.zeros((ENC,), jnp.float32),
        wa=w(ks[4], (N_ACTIONS, ENC), ENC, 0.01),
        ba=jnp.zeros((N_ACTIONS,), jnp.float32),
    )


def _banded_conv_matrix(w, hi, wi, ho, wo, rows_pad=None):
    """Dense (hi*wi*ci [padded to rows_pad], ho*wo*co) matrix so a stride-1
    'valid' conv on the per-image row-major (h, w, c) flattening becomes one
    2D matmul."""
    w = np.asarray(w, np.float32)
    co_, ci_, kh, kw = w.shape
    rows = hi * wi * ci_
    mat = np.zeros((rows if rows_pad is None else rows_pad, ho * wo * co_),
                   np.float32)
    for oy in range(ho):
        for ox in range(wo):
            c0 = (oy * wo + ox) * co_
            for dy in range(kh):
                for dx in range(kw):
                    r0 = ((oy + dy) * wi + (ox + dx)) * ci_
                    mat[r0:r0 + ci_, c0:c0 + co_] = w[:, :, dy, dx].T
    return mat


def prepare_kernel_params(p):
    # conv1 weight padded with zero rows 243 -> 256 (matches IN_PAD lanes of x)
    w1 = _banded_conv_matrix(p["w1"], HP, WP, H1, W1, rows_pad=IN_PAD)   # (256, 784)
    w2 = _banded_conv_matrix(p["w2"], H1, W1, H2, W2)                    # (784, 1152)
    w3 = _banded_conv_matrix(p["w3"], H2, W2, H3, W3)                    # (1152, 1600)
    b1 = np.tile(np.asarray(p["b1"], np.float32), H1 * W1)[None, :]
    b2 = np.tile(np.asarray(p["b2"], np.float32), H2 * W2)[None, :]
    b3 = np.tile(np.asarray(p["b3"], np.float32), H3 * W3)[None, :]
    # Reorder the Linear weight from PyTorch's Flatten order (c, h, w) to the
    # kernel's (h, w, c) flattening: Wl[(h*W3+w)*C3 + c, u] = wl[u, c*25 + h*5 + w]
    wl = jnp.transpose(jnp.reshape(p["wl"], (ENC, C3, H3, W3)), (2, 3, 1, 0))
    wl = jnp.reshape(wl, (H3 * W3 * C3, ENC))                            # (1600, 512)
    bl = jnp.reshape(p["bl"], (1, ENC))
    # Actor head padded to a full 128-lane group; padded logits forced to NEG.
    wa = jnp.zeros((ENC, LANE), jnp.float32).at[:, :N_ACTIONS].set(p["wa"].T)
    ba = jnp.full((1, LANE), NEG, jnp.float32).at[0, :N_ACTIONS].set(p["ba"])

    tobf = lambda a: jnp.asarray(a, jnp.bfloat16)
    tof32 = lambda a: jnp.asarray(a, jnp.float32)
    return (tobf(w1), tof32(b1), tobf(w2), tof32(b2), tobf(w3), tof32(b3),
            tobf(wl), tof32(bl), tobf(wa), tof32(ba))


# ---------------------------------------------------------------------------
# pallas_call wrapper
# ---------------------------------------------------------------------------
def _round_up(x, m):
    return ((x + m - 1) // m) * m


def _pick_batch_tile(n):
    n = max(n, 1)
    if n <= 256:
        return _round_up(n, 16)          # bf16 sublane packing for tiny batches
    # choose the tile that minimizes padded rows, preferring 256 on ties
    return min((256, 128), key=lambda t: (_round_up(n, t), -t))


def maml_agent_logits(x_nhwc, kparams):
    """CNN encoder + actor head. Returns (logits, log_softmax, entropy)."""
    n = x_nhwc.shape[0]
    b_tile = _pick_batch_tile(n)                       # images per grid step
    n_pad = _round_up(n, b_tile)
    num_steps = n_pad // b_tile

    # zero-pad H/W (conv1 padding=1), pad the batch, flatten each image (h,w,c),
    # then pad features 243 -> 256 (zero columns hit zero weight rows in w1)
    x = jnp.pad(x_nhwc.astype(jnp.float32),
                ((0, n_pad - n), (1, 1), (1, 1), (0, 0)))
    x2d = jnp.reshape(x, (n_pad, IN_FEATS))
    x2d = jnp.pad(x2d, ((0, 0), (0, IN_PAD - IN_FEATS))).astype(jnp.bfloat16)

    def const_spec(a):
        nd = a.ndim
        # constant across grid steps -> single-buffered (no double-buffer waste)
        return pl.BlockSpec(a.shape, lambda i, _nd=nd: (0,) * _nd,
                            pipeline_mode=pl.Buffered(1))

    grid_spec = pltpu.PrefetchScalarGridSpec(
        num_scalar_prefetch=0,
        grid=(num_steps,),
        in_specs=[pl.BlockSpec((b_tile, IN_PAD), lambda i: (i, 0))]
                 + [const_spec(a) for a in kparams],
        out_specs=pl.BlockSpec((b_tile, OUT_W), lambda i: (i, 0)),
    )

    # Small grids are weight-DMA-bound: megacore sharding would double the
    # weight traffic, so only go "parallel" when the weights amortize.
    semantics = ("parallel",) if num_steps > 2 else ("arbitrary",)

    out = pl.pallas_call(
        maml_agent_kernel,
        out_shape=jax.ShapeDtypeStruct((n_pad, OUT_W), jnp.float32),
        grid_spec=grid_spec,
        compiler_params=pltpu.CompilerParams(
            dimension_semantics=semantics,
            vmem_limit_bytes=28 * 1024 * 1024),
    )(x2d, *kparams)

    logits = out[:n, 0:N_ACTIONS]
    logp = out[:n, LANE:LANE + N_ACTIONS]
    ent = out[:n, LANE + N_ACTIONS]          # entropy lives in the padded lanes
    return logits, logp, ent


def maml_agent_forward(x_nhwc, kparams, rng, action=None):
    """Mirrors Maml_agent.forward: returns (action, log_prob, entropy)."""
    logits, logp, ent = maml_agent_logits(x_nhwc, kparams)
    if action is None:
        # Categorical.sample(): randomness drawn outside the kernel (glue).
        action = jax.random.categorical(rng, logits, axis=-1)
    log_prob = jnp.take_along_axis(logp, action[:, None], axis=-1)[:, 0]
    return action, log_prob, ent


# ---------------------------------------------------------------------------
# Pure-JAX reference of the PyTorch forward (for a structural sanity check)
# ---------------------------------------------------------------------------
def reference_logits(x_nhwc, p):
    dn = ("NCHW", "OIHW", "NCHW")
    x = jnp.transpose(x_nhwc.astype(jnp.float32), (0, 3, 1, 2))
    y = lax.conv_general_dilated(x, p["w1"], (1, 1), ((1, 1), (1, 1)),
                                 dimension_numbers=dn) + p["b1"][None, :, None, None]
    y = jnp.where(y > 0, y, jnp.exp(jnp.minimum(y, 0.0)) - 1.0)
    y = lax.conv_general_dilated(y, p["w2"], (1, 1), "VALID",
                                 dimension_numbers=dn) + p["b2"][None, :, None, None]
    y = jnp.maximum(y, 0.0)
    y = lax.conv_general_dilated(y, p["w3"], (1, 1), "VALID",
                                 dimension_numbers=dn) + p["b3"][None, :, None, None]
    y = jnp.maximum(y, 0.0)
    flat = jnp.reshape(y, (y.shape[0], -1))                 # PyTorch flatten (C,H,W)
    hidden = jnp.maximum(flat @ p["wl"].T + p["bl"], 0.0)
    logits = hidden @ p["wa"].T + p["ba"]
    logp = logits - jax.scipy.special.logsumexp(logits, axis=-1, keepdims=True)
    ent = -jnp.sum(jnp.exp(logp) * logp, axis=-1)
    return logits, logp, ent


# ---------------------------------------------------------------------------
if __name__ == "__main__":
    key = jax.random.PRNGKey(0)
    pkey, xkey, skey, xkey2 = jax.random.split(key, 4)

    params = init_params(pkey)
    kparams = prepare_kernel_params(params)

    # small batch (matches the module's (N, H, W, C) input)
    N = 2
    x = jax.random.uniform(xkey, (N, H, W, C_IN), jnp.float32)

    action, log_prob, entropy = maml_agent_forward(x, kparams, skey)
    jax.block_until_ready((action, log_prob, entropy))

    lk, lpk, ek = maml_agent_logits(x, kparams)
    lr, lpr, er = reference_logits(x, params)
    assert jnp.allclose(lk, lr, atol=1e-2, rtol=1e-2)
    assert jnp.allclose(lpk, lpr, atol=1e-2, rtol=1e-2)
    assert jnp.allclose(ek, er, atol=1e-2, rtol=1e-2)
    assert action.shape == (N,) and log_prob.shape == (N,) and entropy.shape == (N,)

    # larger batch: exercises a multi-step grid and the "parallel" batch axis
    N2 = 384
    x2 = jax.random.uniform(xkey2, (N2, H, W, C_IN), jnp.float32)
    lk2, lpk2, ek2 = maml_agent_logits(x2, kparams)
    lr2, lpr2, er2 = reference_logits(x2, params)
    jax.block_until_ready((lk2, lpk2, ek2))
    assert jnp.allclose(lk2, lr2, atol=1e-2, rtol=1e-2)
    assert jnp.allclose(lpk2, lpr2, atol=1e-2, rtol=1e-2)
    assert jnp.allclose(ek2, er2, atol=1e-2, rtol=1e-2)

    print("KERNEL_OK")
</pallas_src>

<mosaic_0001>
module attributes {stable_mosaic.version = 11 : i64} {
  func.func @maml_agent_kernel(%arg0: i32, %arg1: memref<16x256xbf16, #tpu.memory_space<vmem>>, %arg2: memref<256x784xbf16, #tpu.memory_space<vmem>>, %arg3: memref<1x784xf32, #tpu.memory_space<vmem>>, %arg4: memref<784x1152xbf16, #tpu.memory_space<vmem>>, %arg5: memref<1x1152xf32, #tpu.memory_space<vmem>>, %arg6: memref<1152x1600xbf16, #tpu.memory_space<vmem>>, %arg7: memref<1x1600xf32, #tpu.memory_space<vmem>>, %arg8: memref<1600x512xbf16, #tpu.memory_space<vmem>>, %arg9: memref<1x512xf32, #tpu.memory_space<vmem>>, %arg10: memref<512x128xbf16, #tpu.memory_space<vmem>>, %arg11: memref<1x128xf32, #tpu.memory_space<vmem>>, %arg12: memref<16x256xf32, #tpu.memory_space<vmem>>) attributes {dimension_semantics = [#tpu.dimension_semantics<arbitrary>], iteration_bounds = array<i64: 1>, scalar_prefetch = 0 : i64, scratch_operands = 0 : i64, tpu.core_type = #tpu.core_type<tc>, window_params = [{transform_indices = @transform_0, window_bounds = array<i64: 16, 256>}, {pipeline_mode = #tpu.pipeline_mode<synchronous>, transform_indices = @transform_1, window_bounds = array<i64: 256, 784>}, {pipeline_mode = #tpu.pipeline_mode<synchronous>, transform_indices = @transform_2, window_bounds = array<i64: 1, 784>}, {pipeline_mode = #tpu.pipeline_mode<synchronous>, transform_indices = @transform_3, window_bounds = array<i64: 784, 1152>}, {pipeline_mode = #tpu.pipeline_mode<synchronous>, transform_indices = @transform_4, window_bounds = array<i64: 1, 1152>}, {pipeline_mode = #tpu.pipeline_mode<synchronous>, transform_indices = @transform_5, window_bounds = array<i64: 1152, 1600>}, {pipeline_mode = #tpu.pipeline_mode<synchronous>, transform_indices = @transform_6, window_bounds = array<i64: 1, 1600>}, {pipeline_mode = #tpu.pipeline_mode<synchronous>, transform_indices = @transform_7, window_bounds = array<i64: 1600, 512>}, {pipeline_mode = #tpu.pipeline_mode<synchronous>, transform_indices = @transform_8, window_bounds = array<i64: 1, 512>}, {pipeline_mode = #tpu.pipeline_mode<synchronous>, transform_indices = @transform_9, window_bounds = array<i64: 512, 128>}, {pipeline_mode = #tpu.pipeline_mode<synchronous>, transform_indices = @transform_10, window_bounds = array<i64: 1, 128>}, {transform_indices = @transform_11, window_bounds = array<i64: 16, 256>}]} {
    %c0 = arith.constant 0 : index
    %c0_0 = arith.constant 0 : index
    %0 = vector.load %arg1[%c0, %c0_0] : memref<16x256xbf16, #tpu.memory_space<vmem>>, vector<16x256xbf16>
    %c0_1 = arith.constant 0 : index
    %c0_2 = arith.constant 0 : index
    %1 = vector.load %arg2[%c0_1, %c0_2] : memref<256x784xbf16, #tpu.memory_space<vmem>>, vector<256x784xbf16>
    %cst = arith.constant dense<0.000000e+00> : vector<16x784xf32>
    %2 = tpu.matmul %0, %1, %cst {dimension_numbers = #tpu.dot_dimension_numbers<[1], [0], [0], [1], [0, 0, 1, 1], [], []>} : vector<16x256xbf16>, vector<256x784xbf16>, vector<16x784xf32> -> vector<16x784xf32>
    %c0_3 = arith.constant 0 : index
    %c0_4 = arith.constant 0 : index
    %3 = vector.load %arg3[%c0_3, %c0_4] : memref<1x784xf32, #tpu.memory_space<vmem>>, vector<1x784xf32>
    %4 = vector.broadcast %3 : vector<1x784xf32> to vector<16x784xf32>
    %5 = arith.addf %2, %4 : vector<16x784xf32>
    %cst_5 = arith.constant 0.000000e+00 : f32
    %6 = vector.broadcast %cst_5 : f32 to vector<16x784xf32>
    %7 = arith.cmpf ogt, %5, %6 : vector<16x784xf32>
    %cst_6 = arith.constant 0.000000e+00 : f32
    %8 = vector.broadcast %cst_6 : f32 to vector<16x784xf32>
    %9 = arith.minimumf %5, %8 : vector<16x784xf32>
    %10 = math.exp %9 : vector<16x784xf32>
    %cst_7 = arith.constant 1.000000e+00 : f32
    %11 = vector.broadcast %cst_7 : f32 to vector<16x784xf32>
    %12 = arith.subf %10, %11 : vector<16x784xf32>
    %13 = arith.select %7, %5, %12 : vector<16x784xi1>, vector<16x784xf32>
    %14 = arith.truncf %13 : vector<16x784xf32> to vector<16x784xbf16>
    %c0_8 = arith.constant 0 : index
    %c0_9 = arith.constant 0 : index
    %15 = vector.load %arg4[%c0_8, %c0_9] : memref<784x1152xbf16, #tpu.memory_space<vmem>>, vector<784x1152xbf16>
    %cst_10 = arith.constant dense<0.000000e+00> : vector<16x1152xf32>
    %16 = tpu.matmul %14, %15, %cst_10 {dimension_numbers = #tpu.dot_dimension_numbers<[1], [0], [0], [1], [0, 0, 1, 1], [], []>} : vector<16x784xbf16>, vector<784x1152xbf16>, vector<16x1152xf32> -> vector<16x1152xf32>
    %c0_11 = arith.constant 0 : index
    %c0_12 = arith.constant 0 : index
    %17 = vector.load %arg5[%c0_11, %c0_12] : memref<1x1152xf32, #tpu.memory_space<vmem>>, vector<1x1152xf32>
    %18 = vector.broadcast %17 : vector<1x1152xf32> to vector<16x1152xf32>
    %19 = arith.addf %16, %18 : vector<16x1152xf32>
    %cst_13 = arith.constant 0.000000e+00 : f32
    %20 = vector.broadcast %cst_13 : f32 to vector<16x1152xf32>
    %21 = arith.maximumf %19, %20 : vector<16x1152xf32>
    %22 = arith.truncf %21 : vector<16x1152xf32> to vector<16x1152xbf16>
    %c0_14 = arith.constant 0 : index
    %c0_15 = arith.constant 0 : index
    %23 = vector.load %arg6[%c0_14, %c0_15] : memref<1152x1600xbf16, #tpu.memory_space<vmem>>, vector<1152x1600xbf16>
    %cst_16 = arith.constant dense<0.000000e+00> : vector<16x1600xf32>
    %24 = tpu.matmul %22, %23, %cst_16 {dimension_numbers = #tpu.dot_dimension_numbers<[1], [0], [0], [1], [0, 0, 1, 1], [], []>} : vector<16x1152xbf16>, vector<1152x1600xbf16>, vector<16x1600xf32> -> vector<16x1600xf32>
    %c0_17 = arith.constant 0 : index
    %c0_18 = arith.constant 0 : index
    %25 = vector.load %arg7[%c0_17, %c0_18] : memref<1x1600xf32, #tpu.memory_space<vmem>>, vector<1x1600xf32>
    %26 = vector.broadcast %25 : vector<1x1600xf32> to vector<16x1600xf32>
    %27 = arith.addf %24, %26 : vector<16x1600xf32>
    %cst_19 = arith.constant 0.000000e+00 : f32
    %28 = vector.broadcast %cst_19 : f32 to vector<16x1600xf32>
    %29 = arith.maximumf %27, %28 : vector<16x1600xf32>
    %30 = arith.truncf %29 : vector<16x1600xf32> to vector<16x1600xbf16>
    %c0_20 = arith.constant 0 : index
    %c0_21 = arith.constant 0 : index
    %31 = vector.load %arg8[%c0_20, %c0_21] : memref<1600x512xbf16, #tpu.memory_space<vmem>>, vector<1600x512xbf16>
    %cst_22 = arith.constant dense<0.000000e+00> : vector<16x512xf32>
    %32 = tpu.matmul %30, %31, %cst_22 {dimension_numbers = #tpu.dot_dimension_numbers<[1], [0], [0], [1], [0, 0, 1, 1], [], []>} : vector<16x1600xbf16>, vector<1600x512xbf16>, vector<16x512xf32> -> vector<16x512xf32>
    %c0_23 = arith.constant 0 : index
    %c0_24 = arith.constant 0 : index
    %33 = vector.load %arg9[%c0_23, %c0_24] : memref<1x512xf32, #tpu.memory_space<vmem>>, vector<1x512xf32>
    %34 = vector.broadcast %33 : vector<1x512xf32> to vector<16x512xf32>
    %35 = arith.addf %32, %34 : vector<16x512xf32>
    %cst_25 = arith.constant 0.000000e+00 : f32
    %36 = vector.broadcast %cst_25 : f32 to vector<16x512xf32>
    %37 = arith.maximumf %35, %36 : vector<16x512xf32>
    %38 = arith.truncf %37 : vector<16x512xf32> to vector<16x512xbf16>
    %c0_26 = arith.constant 0 : index
    %c0_27 = arith.constant 0 : index
    %39 = vector.load %arg10[%c0_26, %c0_27] : memref<512x128xbf16, #tpu.memory_space<vmem>>, vector<512x128xbf16>
    %cst_28 = arith.constant dense<0.000000e+00> : vector<16x128xf32>
    %40 = tpu.matmul %38, %39, %cst_28 {dimension_numbers = #tpu.dot_dimension_numbers<[1], [0], [0], [1], [0, 0, 1, 1], [], []>} : vector<16x512xbf16>, vector<512x128xbf16>, vector<16x128xf32> -> vector<16x128xf32>
    %c0_29 = arith.constant 0 : index
    %c0_30 = arith.constant 0 : index
    %41 = vector.load %arg11[%c0_29, %c0_30] : memref<1x128xf32, #tpu.memory_space<vmem>>, vector<1x128xf32>
    %42 = vector.broadcast %41 : vector<1x128xf32> to vector<16x128xf32>
    %43 = arith.addf %40, %42 : vector<16x128xf32>
    %cst_31 = arith.constant dense<0xFF800000> : vector<16xf32>
    %44 = vector.multi_reduction <maximumf>, %43, %cst_31 [1] : vector<16x128xf32> to vector<16xf32>
    %45 = vector.shape_cast %44 : vector<16xf32> to vector<16x1xf32>
    %46 = vector.broadcast %45 : vector<16x1xf32> to vector<16x128xf32>
    %47 = arith.subf %43, %46 : vector<16x128xf32>
    %48 = math.exp %47 : vector<16x128xf32>
    %cst_32 = arith.constant dense<0.000000e+00> : vector<16xf32>
    %49 = vector.multi_reduction <add>, %48, %cst_32 [1] : vector<16x128xf32> to vector<16xf32>
    %50 = vector.shape_cast %49 : vector<16xf32> to vector<16x1xf32>
    %51 = math.log %50 : vector<16x1xf32>
    %52 = vector.broadcast %51 : vector<16x1xf32> to vector<16x128xf32>
    %53 = arith.subf %47, %52 : vector<16x128xf32>
    %54 = arith.mulf %48, %47 : vector<16x128xf32>
    %cst_33 = arith.constant dense<0.000000e+00> : vector<16xf32>
    %55 = vector.multi_reduction <add>, %54, %cst_33 [1] : vector<16x128xf32> to vector<16xf32>
    %56 = vector.shape_cast %55 : vector<16xf32> to vector<16x1xf32>
    %57 = arith.divf %56, %50 : vector<16x1xf32>
    %58 = arith.subf %51, %57 : vector<16x1xf32>
    %59 = tpu.iota {dimensions = array<i32: 1>} : vector<16x128xi32>
    %c0_34 = arith.constant 0 : index
    %c0_35 = arith.constant 0 : index
    %60 = vector.load %arg12[%c0_34, %c0_35] : memref<16x256xf32, #tpu.memory_space<vmem>>, vector<16x128xf32>
    tpu.vector_store %arg12[%c0_34, %c0_35], %43 {strides = array<i32>} : memref<16x256xf32, #tpu.memory_space<vmem>>, vector<16x128xf32>,
    %c7_i32 = arith.constant 7 : i32
    %61 = vector.broadcast %c7_i32 : i32 to vector<16x128xi32>
    %62 = arith.cmpi slt, %59, %61 : vector<16x128xi32>
    %63 = vector.shape_cast %58 : vector<16x1xf32> to vector<16x1xf32>
    %64 = vector.broadcast %63 : vector<16x1xf32> to vector<16x128xf32>
    %65 = arith.select %62, %53, %64 : vector<16x128xi1>, vector<16x128xf32>
    %c0_36 = arith.constant 0 : index
    %c128 = arith.constant 128 : index
    %66 = vector.load %arg12[%c0_36, %c128] : memref<16x256xf32, #tpu.memory_space<vmem>>, vector<16x128xf32>
    tpu.vector_store %arg12[%c0_36, %c128], %65 {strides = array<i32>} : memref<16x256xf32, #tpu.memory_space<vmem>>, vector<16x128xf32>,
    return
  }
  func.func @transform_0(%arg0: i32) -> (i32, i32) {
    %c0_i32 = arith.constant 0 : i32
    %c0_i32_0 = arith.constant 0 : i32
    return %arg0, %c0_i32 : i32, i32
  }
  func.func @transform_1(%arg0: i32) -> (i32, i32) {
    %c0_i32 = arith.constant 0 : i32
    %c0_i32_0 = arith.constant 0 : i32
    %c0_i32_1 = arith.constant 0 : i32
    return %c0_i32, %c0_i32_0 : i32, i32
  }
  func.func @transform_2(%arg0: i32) -> (i32, i32) {
    %c0_i32 = arith.constant 0 : i32
    %c0_i32_0 = arith.constant 0 : i32
    %c0_i32_1 = arith.constant 0 : i32
    return %c0_i32, %c0_i32_0 : i32, i32
  }
  func.func @transform_3(%arg0: i32) -> (i32, i32) {
    %c0_i32 = arith.constant 0 : i32
    %c0_i32_0 = arith.constant 0 : i32
    %c0_i32_1 = arith.constant 0 : i32
    return %c0_i32, %c0_i32_0 : i32, i32
  }
  func.func @transform_4(%arg0: i32) -> (i32, i32) {
    %c0_i32 = arith.constant 0 : i32
    %c0_i32_0 = arith.constant 0 : i32
    %c0_i32_1 = arith.constant 0 : i32
    return %c0_i32, %c0_i32_0 : i32, i32
  }
  func.func @transform_5(%arg0: i32) -> (i32, i32) {
    %c0_i32 = arith.constant 0 : i32
    %c0_i32_0 = arith.constant 0 : i32
    %c0_i32_1 = arith.constant 0 : i32
    return %c0_i32, %c0_i32_0 : i32, i32
  }
  func.func @transform_6(%arg0: i32) -> (i32, i32) {
    %c0_i32 = arith.constant 0 : i32
    %c0_i32_0 = arith.constant 0 : i32
    %c0_i32_1 = arith.constant 0 : i32
    return %c0_i32, %c0_i32_0 : i32, i32
  }
  func.func @transform_7(%arg0: i32) -> (i32, i32) {
    %c0_i32 = arith.constant 0 : i32
    %c0_i32_0 = arith.constant 0 : i32
    %c0_i32_1 = arith.constant 0 : i32
    return %c0_i32, %c0_i32_0 : i32, i32
  }
  func.func @transform_8(%arg0: i32) -> (i32, i32) {
    %c0_i32 = arith.constant 0 : i32
    %c0_i32_0 = arith.constant 0 : i32
    %c0_i32_1 = arith.constant 0 : i32
    return %c0_i32, %c0_i32_0 : i32, i32
  }
  func.func @transform_9(%arg0: i32) -> (i32, i32) {
    %c0_i32 = arith.constant 0 : i32
    %c0_i32_0 = arith.constant 0 : i32
    %c0_i32_1 = arith.constant 0 : i32
    return %c0_i32, %c0_i32_0 : i32, i32
  }
  func.func @transform_10(%arg0: i32) -> (i32, i32) {
    %c0_i32 = arith.constant 0 : i32
    %c0_i32_0 = arith.constant 0 : i32
    %c0_i32_1 = arith.constant 0 : i32
    return %c0_i32, %c0_i32_0 : i32, i32
  }
  func.func @transform_11(%arg0: i32) -> (i32, i32) {
    %c0_i32 = arith.constant 0 : i32
    %c0_i32_0 = arith.constant 0 : i32
    return %arg0, %c0_i32 : i32, i32
  }
}

</mosaic_0001>

<bundles_post_ra>
// kernel: tpu_custom_call.1
= control target key start
LH: loop header
LB: loop body
LE: loop exit
PB: predicated region body
PF: predicated region fallthrough
CT: control target
= control target key end

     0   :  { %vm3847_vm10 = vcmask 130048   ;;  %vm20614_vm15 = vmmov 0   ;;  %s27208_s0 = inlined_call_operand.vmem [shape: bf16[16,256], index: 0, kind: input, shape index: {}]   ;;  %s27209_s1 = inlined_call_operand.vmem [shape: bf16[256,784], index: 1, kind: input, shape index: {}]   ;;  %s27210_s2 = inlined_call_operand.vmem [shape: f32[1,784], index: 2, kind: input, shape index: {}]   ;;  %s27211_s3 = inlined_call_operand.vmem [shape: bf16[784,1152], index: 3, kind: input, shape index: {}]   ;;  %s27212_s4 = inlined_call_operand.vmem [shape: f32[1,1152], index: 4, kind: input, shape index: {}]   ;;  %s27213_s5 = inlined_call_operand.vmem [shape: bf16[1152,1600], index: 5, kind: input, shape index: {}]   ;;  %s27214_s6 = inlined_call_operand.vmem [shape: f32[1,1600], index: 6, kind: input, shape index: {}]   ;;  %s27215_s7 = inlined_call_operand.vmem [shape: bf16[1600,512], index: 7, kind: input, shape index: {}]   ;;  %s27216_s8 = inlined_call_operand.vmem [shape: f32[1,512], index: 8, kind: input, shape index: {}]   ;;  %s27217_s9 = inlined_call_operand.vmem [shape: bf16[512,128], index: 9, kind: input, shape index: {}]   ;;  %s27218_s10 = inlined_call_operand.vmem [shape: f32[1,128], index: 10, kind: input, shape index: {}]   ;;  %s27219_s11 = inlined_call_operand.hbm [shape: f32[16,256], index: 11, kind: output, shape index: {}]  }
   0x1   :  { %v17744_v0 = vld [vmem:[%s27209_s1 + $0x18c] ss:$28 sps:$4 sm:$0xff]   ;;  %v17746_v1 = vld [vmem:[%s27209_s1 + $0x194] ss:$28 sps:$4 sm:$0xff]   ;;  %v17752_v5 = vld [vmem:[%s27209_s1 + $0x15c] ss:$28 sps:$4 sm:$0xff]  }
   0x2   :  { %793 = vmatprep.subr.bf16.mxu0 %v17744_v0  ;;  %v17748_v2 = vld [vmem:[%s27209_s1 + $0x188] ss:$28 sps:$4 sm:$0xff]   ;;  %v17749_v3 = vld [vmem:[%s27209_s1 + $0x190] ss:$28 sps:$4 sm:$0xff]   ;;  %836 = vmatprep.subr.bf16.mxu1 %v17746_v1  ;;  %v17755_v7 = vld [vmem:[%s27209_s1 + $0x158] ss:$28 sps:$4 sm:$0xff]  }
   0x3   :  { %v17750_v4 = vld [vmem:[%s27209_s1 + $0x154] ss:$28 sps:$4 sm:$0xff]   ;;  %794 = vmatpush1.bf16.msra.mxu0 %v17748_v2  ;;  %837 = vmatpush1.bf16.msra.mxu1 %v17749_v3  ;;  %v17756_v8 = vld [vmem:[%s27209_s1 + $0x11c] ss:$28 sps:$4 sm:$0xff]   ;;  %v17758_v9 = vld [vmem:[%s27209_s1 + $0x124] ss:$28 sps:$4 sm:$0xff]  }
   0x4   :  { %v17754_v6 = vld [vmem:[%s27209_s1 + $0x150] ss:$28 sps:$4 sm:$0xff]   ;;  %795 = vmatprep.subr.bf16.mxu0 %v17750_v4  ;;  %838 = vmatprep.subr.bf16.mxu1 %v17752_v5  ;;  %v17760_v10 = vld [vmem:[%s27209_s1 + $0x118] ss:$28 sps:$4 sm:$0xff]   ;;  %v17761_v11 = vld [vmem:[%s27209_s1 + $0x120] ss:$28 sps:$4 sm:$0xff]  }
   0x5   :  { %v17762_v12 = vld [vmem:[%s27209_s1 + $0xe4] ss:$28 sps:$4 sm:$0xff]   ;;  %v17764_v13 = vld [vmem:[%s27209_s1 + $0xec] ss:$28 sps:$4 sm:$0xff]   ;;  %v17770_v17 = vld [vmem:[%s27209_s1 + $0xb4] ss:$28 sps:$4 sm:$0xff]  }
   0x6   :  { %v17766_v14 = vld [vmem:[%s27209_s1 + $0xe0] ss:$28 sps:$4 sm:$0xff]   ;;  %v17767_v15 = vld [vmem:[%s27209_s1 + $0xe8] ss:$28 sps:$4 sm:$0xff]   ;;  %v17773_v19 = vld [vmem:[%s27209_s1 + $0xb0] ss:$28 sps:$4 sm:$0xff]  }
   0x7   :  { %796 = vmatpush1.bf16.msra.mxu0 %v17754_v6  ;;  %839 = vmatpush1.bf16.msra.mxu1 %v17755_v7  ;;  %v17768_v16 = vld [vmem:[%s27209_s1 + $0xac] ss:$28 sps:$4 sm:$0xff]   ;;  %v17774_v20 = vld [vmem:[%s27209_s1 + $0x74] ss:$28 sps:$4 sm:$0xff]   ;;  %v17776_v21 = vld [vmem:[%s27209_s1 + $0x7c] ss:$28 sps:$4 sm:$0xff]  }
   0x8   :  { %797 = vmatprep.subr.bf16.mxu0 %v17756_v8  ;;  %840 = vmatprep.subr.bf16.mxu1 %v17758_v9  ;;  %v17772_v18 = vld [vmem:[%s27209_s1 + $0xa8] ss:$28 sps:$4 sm:$0xff]   ;;  %v17778_v22 = vld [vmem:[%s27209_s1 + $0x70] ss:$28 sps:$4 sm:$0xff]   ;;  %v17779_v23 = vld [vmem:[%s27209_s1 + $0x78] ss:$28 sps:$4 sm:$0xff]  }
   0x9   :  { %v17780_v24 = vld [vmem:[%s27209_s1 + $0x3c] ss:$28 sps:$4 sm:$0xff]   ;;  %v17782_v25 = vld [vmem:[%s27209_s1 + $0x44] ss:$28 sps:$4 sm:$0xff]   ;;  %v17788_v29 = vld [vmem:[%s27209_s1 + $0xc] ss:$28 sps:$4 sm:$0xff]  }
   0xa   :  { %v17784_v26 = vld [vmem:[%s27209_s1 + $0x38] ss:$28 sps:$4 sm:$0xff]   ;;  %v17785_v27 = vld [vmem:[%s27209_s1 + $0x40] ss:$28 sps:$4 sm:$0xff]   ;;  %v17791_v31 = vld [vmem:[%s27209_s1 + $0x8] ss:$28 sps:$4 sm:$0xff]  }
   0xb   :  { %798 = vmatpush1.bf16.msra.mxu0 %v17760_v10  ;;  %841 = vmatpush1.bf16.msra.mxu1 %v17761_v11  ;;  %v17786_v28 = vld [vmem:[%s27209_s1 + $0x4] ss:$28 sps:$4 sm:$0xff]   ;;  %v17792_v32 = vld [vmem:[%s27209_s1 + $0x34c] ss:$28 sps:$4 sm:$0xff]   ;;  %v17794_v33 = vld [vmem:[%s27209_s1 + $0x354] ss:$28 sps:$4 sm:$0xff]  }
   0xc   :  { %799 = vmatprep.subr.bf16.mxu0 %v17762_v12  ;;  %842 = vmatprep.subr.bf16.mxu1 %v17764_v13  ;;  %v17790_v30 = vld [vmem:[%s27209_s1] ss:$28 sps:$4 sm:$0xff]   ;;  %v17796_v34 = vld [vmem:[%s27209_s1 + $0x348] ss:$28 sps:$4 sm:$0xff]   ;;  %v17797_v35 = vld [vmem:[%s27209_s1 + $0x350] ss:$28 sps:$4 sm:$0xff]  }
   0xd   :  { %v17798_v36 = vld [vmem:[%s27209_s1 + $0x314] ss:$28 sps:$4 sm:$0xff]   ;;  %v17800_v37 = vld [vmem:[%s27209_s1 + $0x31c] ss:$28 sps:$4 sm:$0xff]   ;;  %v17806_v41 = vld [vmem:[%s27209_s1 + $0x2e4] ss:$28 sps:$4 sm:$0xff]  }
   0xe   :  { %v17802_v38 = vld [vmem:[%s27209_s1 + $0x310] ss:$28 sps:$4 sm:$0xff]   ;;  %v17803_v39 = vld [vmem:[%s27209_s1 + $0x318] ss:$28 sps:$4 sm:$0xff]   ;;  %v17809_v43 = vld [vmem:[%s27209_s1 + $0x2e0] ss:$28 sps:$4 sm:$0xff]  }
   0xf   :  { %800 = vmatpush1.bf16.msra.mxu0 %v17766_v14  ;;  %843 = vmatpush1.bf16.msra.mxu1 %v17767_v15  ;;  %v17804_v40 = vld [vmem:[%s27209_s1 + $0x2dc] ss:$28 sps:$4 sm:$0xff]   ;;  %v17810_v44 = vld [vmem:[%s27209_s1 + $0x2a4] ss:$28 sps:$4 sm:$0xff]   ;;  %v17812_v45 = vld [vmem:[%s27209_s1 + $0x2ac] ss:$28 sps:$4 sm:$0xff]  }
  0x10   :  { %801 = vmatprep.subr.bf16.mxu0 %v17768_v16  ;;  %844 = vmatprep.subr.bf16.mxu1 %v17770_v17  ;;  %v17808_v42 = vld [vmem:[%s27209_s1 + $0x2d8] ss:$28 sps:$4 sm:$0xff]   ;;  %v17814_v46 = vld [vmem:[%s27209_s1 + $0x2a0] ss:$28 sps:$4 sm:$0xff]   ;;  %v17815_v47 = vld [vmem:[%s27209_s1 + $0x2a8] ss:$28 sps:$4 sm:$0xff]  }
  0x11   :  { %v17840_v48 = vld [vmem:[%s27208_s0 + $0x4] ss:$8 sps:$4 sm:$0xff]   ;;  %v17818_v50 = vld [vmem:[%s27209_s1 + $0x274] ss:$28 sps:$4 sm:$0xff]   ;;  %v17824_v54 = vld [vmem:[%s27209_s1 + $0x23c] ss:$28 sps:$4 sm:$0xff]  }
  0x12   :  { %v17816_v49 = vld [vmem:[%s27209_s1 + $0x26c] ss:$28 sps:$4 sm:$0xff]   ;;  %825 = vmatprep.mubr.bf16.mxu0 %v17840_v48  ;;  %868 = vmatprep.mubr.bf16.mxu1 %v17840_v48  ;;  %v17822_v53 = vld [vmem:[%s27209_s1 + $0x234] ss:$28 sps:$4 sm:$0xff]   ;;  %v17828_v57 = vld [vmem:[%s27209_s1 + $0x1fc] ss:$28 sps:$4 sm:$0xff]  }
  0x13   :  { %802 = vmatpush1.bf16.msra.mxu0 %v17772_v18  ;;  %845 = vmatpush1.bf16.msra.mxu1 %v17773_v19  ;;  %v17820_v51 = vld [vmem:[%s27209_s1 + $0x268] ss:$28 sps:$4 sm:$0xff]   ;;  %v17821_v52 = vld [vmem:[%s27209_s1 + $0x270] ss:$28 sps:$4 sm:$0xff]   ;;  %v17827_v56 = vld [vmem:[%s27209_s1 + $0x238] ss:$28 sps:$4 sm:$0xff]  }
  0x14   :  { %803 = vmatprep.subr.bf16.mxu0 %v17774_v20  ;;  %846 = vmatprep.subr.bf16.mxu1 %v17776_v21  ;;  %v17826_v55 = vld [vmem:[%s27209_s1 + $0x230] ss:$28 sps:$4 sm:$0xff]   ;;  %v17830_v58 = vld [vmem:[%s27209_s1 + $0x204] ss:$28 sps:$4 sm:$0xff]   ;;  %v17832_v59 = vld [vmem:[%s27209_s1 + $0x1f8] ss:$28 sps:$4 sm:$0xff]  }
  0x15   :  { %v17833_v60 = vld [vmem:[%s27209_s1 + $0x200] ss:$28 sps:$4 sm:$0xff]   ;;  %v17836_v62 = vld [vmem:[%s27209_s1 + $0x1cc] ss:$28 sps:$4 sm:$0xff]   ;;  %v17843_v4 = vld [vmem:[%s27209_s1 + $0x198] ss:$28 sps:$4 sm:$0xff]  }
  0x16   :  { %v17834_v61 = vld [vmem:[%s27209_s1 + $0x1c4] ss:$28 sps:$4 sm:$0xff]   ;;  %v17845_v2 = vld [vmem:[%s27209_s1 + $0x19c] ss:$28 sps:$4 sm:$0xff]   ;;  %v17855_v10 = vld [vmem:[%s27209_s1 + $0x12c] ss:$28 sps:$4 sm:$0xff]  }
  0x17   :  { %804 = vmatpush1.bf16.msra.mxu0 %v17778_v22  ;;  %847 = vmatpush1.bf16.msra.mxu1 %v17779_v23  ;;  %v17838_v63 = vld [vmem:[%s27209_s1 + $0x1c0] ss:$28 sps:$4 sm:$0xff]   ;;  %v17839_v0 = vld [vmem:[%s27209_s1 + $0x1c8] ss:$28 sps:$4 sm:$0xff]   ;;  %v17856_v11 = vld [vmem:[%s27209_s1 + $0x2f0] ss:$28 sps:$4 sm:$0xff]  }
  0x18   :  { %805 = vmatprep.subr.bf16.mxu0 %v17780_v24  ;;  %848 = vmatprep.subr.bf16.mxu1 %v17782_v25  ;;  %v20876_v1 = vld [vmem:[%s27208_s0] ss:$8 sps:$4 sm:$0xff]   ;;  %v17857_v13 = vld [vmem:[%s27209_s1 + $0x130] ss:$28 sps:$4 sm:$0xff]   ;;  %v17861_v15 = vld [vmem:[%s27209_s1 + $0x2b8] ss:$28 sps:$4 sm:$0xff]  }
  0x19   :  { %v17846_v3 = vld [vmem:[%s27209_s1 + $0x360] ss:$28 sps:$4 sm:$0xff]   ;;  %v17851_v7 = vld [vmem:[%s27209_s1 + $0x328] ss:$28 sps:$4 sm:$0xff]   ;;  %v17860_v14 = vld [vmem:[%s27209_s1 + $0xf4] ss:$28 sps:$4 sm:$0xff]  }
  0x1a   :  { %v17847_v5 = vld [vmem:[%s27209_s1 + $0x1a0] ss:$28 sps:$4 sm:$0xff]   ;;  %v17852_v9 = vld [vmem:[%s27209_s1 + $0x168] ss:$28 sps:$4 sm:$0xff]   ;;  %v17858_v16 = vld [vmem:[%s27209_s1 + $0xf0] ss:$28 sps:$4 sm:$0xff]  }
  0x1b   :  { %806 = vmatpush1.bf16.msra.mxu0 %v17784_v26  ;;  %849 = vmatpush1.bf16.msra.mxu1 %v17785_v27  ;;  %v17850_v6 = vld [vmem:[%s27209_s1 + $0x164] ss:$28 sps:$4 sm:$0xff]   ;;  %v17862_v17 = vld [vmem:[%s27209_s1 + $0xf8] ss:$28 sps:$4 sm:$0xff]   ;;  %v17875_v26 = vld [vmem:[%s27209_s1 + $0x4c] ss:$28 sps:$4 sm:$0xff]  }
  0x1c   :  { %807 = vmatprep.subr.bf16.mxu0 %v17786_v28  ;;  %850 = vmatprep.subr.bf16.mxu1 %v17788_v29  ;;  %v17848_v8 = vld [vmem:[%s27209_s1 + $0x160] ss:$28 sps:$4 sm:$0xff]   ;;  %v17853_v12 = vld [vmem:[%s27209_s1 + $0x128] ss:$28 sps:$4 sm:$0xff]   ;;  %v17863_v20 = vld [vmem:[%s27209_s1 + $0xb8] ss:$28 sps:$4 sm:$0xff]  }
  0x1d   :  { %v17865_v18 = vld [vmem:[%s27209_s1 + $0xbc] ss:$28 sps:$4 sm:$0xff]   ;;  %v17870_v22 = vld [vmem:[%s27209_s1 + $0x84] ss:$28 sps:$4 sm:$0xff]   ;;  %v17876_v27 = vld [vmem:[%s27209_s1 + $0x210] ss:$28 sps:$4 sm:$0xff]  }
  0x1e   :  { %v17866_v19 = vld [vmem:[%s27209_s1 + $0x280] ss:$28 sps:$4 sm:$0xff]   ;;  %v17871_v23 = vld [vmem:[%s27209_s1 + $0x248] ss:$28 sps:$4 sm:$0xff]   ;;  %v17877_v29 = vld [vmem:[%s27209_s1 + $0x50] ss:$28 sps:$4 sm:$0xff]  }
  0x1f   :  { %808 = vmatpush1.bf16.msra.mxu0 %v17790_v30  ;;  %851 = vmatpush1.bf16.msra.mxu1 %v17791_v31  ;;  %v17867_v21 = vld [vmem:[%s27209_s1 + $0xc0] ss:$28 sps:$4 sm:$0xff]   ;;  %v17872_v25 = vld [vmem:[%s27209_s1 + $0x88] ss:$28 sps:$4 sm:$0xff]   ;;  %v17880_v30 = vld [vmem:[%s27209_s1 + $0x14] ss:$28 sps:$4 sm:$0xff]  }
  0x20   :  { %809 = vmatprep.subr.bf16.mxu0 %v17792_v32  ;;  %852 = vmatprep.subr.bf16.mxu1 %v17794_v33  ;;  %v17868_v24 = vld [vmem:[%s27209_s1 + $0x80] ss:$28 sps:$4 sm:$0xff]   ;;  %v17873_v28 = vld [vmem:[%s27209_s1 + $0x48] ss:$28 sps:$4 sm:$0xff]   ;;  %v17881_v31 = vld [vmem:[%s27209_s1 + $0x1d8] ss:$28 sps:$4 sm:$0xff]  }
  0x21   :  { %v17878_v32 = vld [vmem:[%s27209_s1 + $0x10] ss:$28 sps:$4 sm:$0xff]   ;;  %v17882_v33 = vld [vmem:[%s27209_s1 + $0x18] ss:$28 sps:$4 sm:$0xff]  }
  0x23   :  { %810 = vmatpush2.bf16.msra.mxu0 %v17796_v34  ;;  %853 = vmatpush2.bf16.msra.mxu1 %v17797_v35  ;;  %v17885_v34 = vld [vmem:[%s27209_s1 + $0x35c] ss:$28 sps:$4 sm:$0xff]  }
  0x24   :  { %811 = vmatprep.subr.bf16.mxu0 %v17798_v36  ;;  %854 = vmatprep.subr.bf16.mxu1 %v17800_v37  ;;  %v17909_v35 = vld [vmem:[%s27211_s3 + $0x1fc] ss:$36 sps:$4 sm:$0xff]   ;;  %v17883_v36 = vld [vmem:[%s27209_s1 + $0x358] ss:$28 sps:$4 sm:$0xff]  }
  0x25   :  { %v17888_v37 = vld [vmem:[%s27209_s1 + $0x324] ss:$28 sps:$4 sm:$0xff]  }
  0x27   :  { %812 = vmatpush2.bf16.msra.mxu0 %v17802_v38  ;;  %855 = vmatpush2.bf16.msra.mxu1 %v17803_v39  ;;  %v17907_v38 = vld [vmem:[%s27211_s3 + $0x1f8] ss:$36 sps:$4 sm:$0xff]  }
  0x28   :  { %813 = vmatprep.subr.bf16.mxu0 %v17804_v40  ;;  %856 = vmatprep.subr.bf16.mxu1 %v17806_v41  ;;  %v17915_v39 = vld [vmem:[%s27211_s3 + $0x1b4] ss:$36 sps:$4 sm:$0xff]   ;;  %v17886_v40 = vld [vmem:[%s27209_s1 + $0x320] ss:$28 sps:$4 sm:$0xff]   ;;  %v17891_v41 = vld [vmem:[%s27209_s1 + $0x2ec] ss:$28 sps:$4 sm:$0xff]  }
  0x2b   :  { %814 = vmatpush2.bf16.msra.mxu0 %v17808_v42  ;;  %857 = vmatpush2.bf16.msra.mxu1 %v17809_v43  ;;  %v17913_v42 = vld [vmem:[%s27211_s3 + $0x1b0] ss:$36 sps:$4 sm:$0xff]  }
  0x2c   :  { %815 = vmatprep.subr.bf16.mxu0 %v17810_v44  ;;  %858 = vmatprep.subr.bf16.mxu1 %v17812_v45  ;;  %v17921_v43 = vld [vmem:[%s27211_s3 + $0x16c] ss:$36 sps:$4 sm:$0xff]   ;;  %v17889_v44 = vld [vmem:[%s27209_s1 + $0x2e8] ss:$28 sps:$4 sm:$0xff]  }
  0x2d   :  { %v17919_v45 = vld [vmem:[%s27211_s3 + $0x168] ss:$36 sps:$4 sm:$0xff]  }
  0x2f   :  { %816 = vmatpush2.bf16.msra.mxu0 %v17814_v46  ;;  %859 = vmatpush2.bf16.msra.mxu1 %v17815_v47  ;;  %v17894_v46 = vld [vmem:[%s27209_s1 + $0x2b4] ss:$28 sps:$4 sm:$0xff]   ;;  %v17927_v47 = vld [vmem:[%s27211_s3 + $0x124] ss:$36 sps:$4 sm:$0xff]  }
  0x30   :  { %817 = vmatprep.subr.bf16.mxu0 %v17816_v49  ;;  %860 = vmatprep.subr.bf16.mxu1 %v17818_v50  ;;  %v17925_v49 = vld [vmem:[%s27211_s3 + $0x120] ss:$36 sps:$4 sm:$0xff]   ;;  %v17897_v50 = vld [vmem:[%s27209_s1 + $0x27c] ss:$28 sps:$4 sm:$0xff]  }
  0x33   :  { %818 = vmatpush2.bf16.msra.mxu0 %v17820_v51  ;;  %861 = vmatpush2.bf16.msra.mxu1 %v17821_v52  ;;  %v17933_v51 = vld [vmem:[%s27211_s3 + $0xdc] ss:$36 sps:$4 sm:$0xff]   ;;  %v17895_v52 = vld [vmem:[%s27209_s1 + $0x278] ss:$28 sps:$4 sm:$0xff]  }
  0x34   :  { %819 = vmatprep.subr.bf16.mxu0 %v17822_v53  ;;  %862 = vmatprep.subr.bf16.mxu1 %v17824_v54  ;;  %v17931_v53 = vld [vmem:[%s27211_s3 + $0xd8] ss:$36 sps:$4 sm:$0xff]   ;;  %v17900_v54 = vld [vmem:[%s27209_s1 + $0x244] ss:$28 sps:$4 sm:$0xff]  }
  0x37   :  { %820 = vmatpush2.bf16.msra.mxu0 %v17826_v55  ;;  %863 = vmatpush2.bf16.msra.mxu1 %v17827_v56  ;;  %v17939_v55 = vld [vmem:[%s27211_s3 + $0x94] ss:$36 sps:$4 sm:$0xff]   ;;  %v17898_v56 = vld [vmem:[%s27209_s1 + $0x240] ss:$28 sps:$4 sm:$0xff]  }
  0x38   :  { %821 = vmatprep.subr.bf16.mxu0 %v17828_v57  ;;  %864 = vmatprep.subr.bf16.mxu1 %v17830_v58  ;;  %v17937_v57 = vld [vmem:[%s27211_s3 + $0x90] ss:$36 sps:$4 sm:$0xff]   ;;  %v17903_v58 = vld [vmem:[%s27209_s1 + $0x20c] ss:$28 sps:$4 sm:$0xff]  }
  0x3b   :  { %822 = vmatpush2.bf16.msra.mxu0 %v17832_v59  ;;  %865 = vmatpush2.bf16.msra.mxu1 %v17833_v60  ;;  %v17945_v59 = vld [vmem:[%s27211_s3 + $0x4c] ss:$36 sps:$4 sm:$0xff]   ;;  %v17901_v60 = vld [vmem:[%s27209_s1 + $0x208] ss:$28 sps:$4 sm:$0xff]  }
  0x3c   :  { %823 = vmatprep.subr.bf16.mxu0 %v17834_v61  ;;  %866 = vmatprep.subr.bf16.mxu1 %v17836_v62  ;;  %v17943_v61 = vld [vmem:[%s27211_s3 + $0x48] ss:$36 sps:$4 sm:$0xff]   ;;  %v17906_v62 = vld [vmem:[%s27209_s1 + $0x1d4] ss:$28 sps:$4 sm:$0xff]  }
  0x3f   :  { %824 = vmatpush2.bf16.msra.mxu0 %v17838_v63  ;;  %867 = vmatpush2.bf16.msra.mxu1 %v17839_v0  ;;  %v17951_v63 = vld [vmem:[%s27211_s3 + $0x4] ss:$36 sps:$4 sm:$0xff]   ;;  %v17904_v0 = vld [vmem:[%s27209_s1 + $0x1d0] ss:$28 sps:$4 sm:$0xff]  }
  0x40   :  { %879 = vmatprep.subr.bf16.mxu0 %v17845_v2  ;;  %17481 = vmatprep.subr.bf16.mxu1 %v17846_v3  ;;  %v17949_v2 = vld [vmem:[%s27211_s3] ss:$36 sps:$4 sm:$0xff]  }
  0x41   :  { %v17912_v3 = vld [vmem:[%s27211_s3 + $0x67c] ss:$36 sps:$4 sm:$0xff]  }
  0x42   :  { %826 = vmatmul.mubr.bf16.vlgmr.msra.gmra.mxu0 %v20876_v1  ;;  %869 = vmatmul.mubr.bf16.vlgmr.msra.gmra.mxu1 %v20876_v1 }
  0x43   :  { %880 = vmatpush1.bf16.msra.mxu0 %v17843_v4  ;;  %17482 = vmatpush3.bf16.msra.mxu1 %v17847_v5  ;;  %v17910_v4 = vld [vmem:[%s27211_s3 + $0x678] ss:$36 sps:$4 sm:$0xff]  }
  0x44   :  { %881 = vmatprep.subr.bf16.mxu0 %v17850_v6  ;;  %17483 = vmatprep.subr.bf16.mxu1 %v17851_v7  ;;  %v17918_v5 = vld [vmem:[%s27211_s3 + $0x634] ss:$36 sps:$4 sm:$0xff]   ;;  %v17957_v6 = vld [vmem:[%s27211_s3 + $0x43c] ss:$36 sps:$4 sm:$0xff]  }
  0x45   :  { %954 = vmatprep.mubr.bf16.mxu1 %v17840_v48  ;;  %911 = vmatprep.mubr.bf16.mxu0 %v17840_v48  ;;  %v17892_v48 = vld [vmem:[%s27209_s1 + $0x2b0] ss:$28 sps:$4 sm:$0xff]  }
  0x46   :  { %v17916_v7 = vld [vmem:[%s27211_s3 + $0x630] ss:$36 sps:$4 sm:$0xff]  }
  0x47   :  { %882 = vmatpush1.bf16.msra.mxu0 %v17848_v8  ;;  %17484 = vmatpush3.bf16.msra.mxu1 %v17852_v9  ;;  %v17955_v8 = vld [vmem:[%s27211_s3 + $0x438] ss:$36 sps:$4 sm:$0xff]   ;;  %v17924_v9 = vld [vmem:[%s27211_s3 + $0x5ec] ss:$36 sps:$4 sm:$0xff]  }
  0x48   :  { %883 = vmatprep.subr.bf16.mxu0 %v17855_v10  ;;  %17485 = vmatprep.subr.bf16.mxu1 %v17856_v11  ;;  %v17922_v10 = vld [vmem:[%s27211_s3 + $0x5e8] ss:$36 sps:$4 sm:$0xff]   ;;  %v17961_v11 = vld [vmem:[%s27211_s3 + $0x3f0] ss:$36 sps:$4 sm:$0xff]  }
  0x4b   :  { %884 = vmatpush1.bf16.msra.mxu0 %v17853_v12  ;;  %17486 = vmatpush3.bf16.msra.mxu1 %v17857_v13  ;;  %v17930_v12 = vld [vmem:[%s27211_s3 + $0x5a4] ss:$36 sps:$4 sm:$0xff]  }
  0x4c   :  { %885 = vmatprep.subr.bf16.mxu0 %v17860_v14  ;;  %17487 = vmatprep.subr.bf16.mxu1 %v17861_v15  ;;  %v17928_v13 = vld [vmem:[%s27211_s3 + $0x5a0] ss:$36 sps:$4 sm:$0xff]   ;;  %v17969_v14 = vld [vmem:[%s27211_s3 + $0x3ac] ss:$36 sps:$4 sm:$0xff]  }
  0x4d   :  { %v17936_v15 = vld [vmem:[%s27211_s3 + $0x55c] ss:$36 sps:$4 sm:$0xff]  }
  0x4f   :  { %886 = vmatpush1.bf16.msra.mxu0 %v17858_v16  ;;  %17488 = vmatpush3.bf16.msra.mxu1 %v17862_v17  ;;  %v17967_v16 = vld [vmem:[%s27211_s3 + $0x3a8] ss:$36 sps:$4 sm:$0xff]   ;;  %v17934_v17 = vld [vmem:[%s27211_s3 + $0x558] ss:$36 sps:$4 sm:$0xff]  }
  0x50   :  { %887 = vmatprep.subr.bf16.mxu0 %v17865_v18  ;;  %17489 = vmatprep.subr.bf16.mxu1 %v17866_v19  ;;  %v17975_v18 = vld [vmem:[%s27211_s3 + $0x364] ss:$36 sps:$4 sm:$0xff]   ;;  %v17942_v19 = vld [vmem:[%s27211_s3 + $0x514] ss:$36 sps:$4 sm:$0xff]  }
  0x53   :  { %888 = vmatpush1.bf16.msra.mxu0 %v17863_v20  ;;  %17490 = vmatpush3.bf16.msra.mxu1 %v17867_v21  ;;  %v17973_v20 = vld [vmem:[%s27211_s3 + $0x360] ss:$36 sps:$4 sm:$0xff]   ;;  %v17940_v21 = vld [vmem:[%s27211_s3 + $0x510] ss:$36 sps:$4 sm:$0xff]  }
  0x54   :  { %889 = vmatprep.subr.bf16.mxu0 %v17870_v22  ;;  %17491 = vmatprep.subr.bf16.mxu1 %v17871_v23  ;;  %v17981_v22 = vld [vmem:[%s27211_s3 + $0x31c] ss:$36 sps:$4 sm:$0xff]   ;;  %v17948_v23 = vld [vmem:[%s27211_s3 + $0x4cc] ss:$36 sps:$4 sm:$0xff]  }
  0x57   :  { %890 = vmatpush1.bf16.msra.mxu0 %v17868_v24  ;;  %17492 = vmatpush3.bf16.msra.mxu1 %v17872_v25  ;;  %v17979_v24 = vld [vmem:[%s27211_s3 + $0x318] ss:$36 sps:$4 sm:$0xff]   ;;  %v17946_v25 = vld [vmem:[%s27211_s3 + $0x4c8] ss:$36 sps:$4 sm:$0xff]  }
  0x58   :  { %891 = vmatprep.subr.bf16.mxu0 %v17875_v26  ;;  %17493 = vmatprep.subr.bf16.mxu1 %v17876_v27  ;;  %v17987_v26 = vld [vmem:[%s27211_s3 + $0x2d4] ss:$36 sps:$4 sm:$0xff]   ;;  %v17954_v27 = vld [vmem:[%s27211_s3 + $0x484] ss:$36 sps:$4 sm:$0xff]  }
  0x5b   :  { %892 = vmatpush1.bf16.msra.mxu0 %v17873_v28  ;;  %17494 = vmatpush3.bf16.msra.mxu1 %v17877_v29  ;;  %v17985_v28 = vld [vmem:[%s27211_s3 + $0x2d0] ss:$36 sps:$4 sm:$0xff]   ;;  %v17952_v29 = vld [vmem:[%s27211_s3 + $0x480] ss:$36 sps:$4 sm:$0xff]  }
  0x5c   :  { %893 = vmatprep.subr.bf16.mxu0 %v17880_v30  ;;  %17495 = vmatprep.subr.bf16.mxu1 %v17881_v31  ;;  %v17993_v30 = vld [vmem:[%s27211_s3 + $0x28c] ss:$36 sps:$4 sm:$0xff]   ;;  %v17960_v31 = vld [vmem:[%s27211_s3 + $0x8bc] ss:$36 sps:$4 sm:$0xff]  }
  0x5f   :  { %894 = vmatpush1.bf16.msra.mxu0 %v17878_v32  ;;  %17496 = vmatpush3.bf16.msra.mxu1 %v17882_v33  ;;  %v17991_v32 = vld [vmem:[%s27211_s3 + $0x288] ss:$36 sps:$4 sm:$0xff]   ;;  %v17958_v33 = vld [vmem:[%s27211_s3 + $0x8b8] ss:$36 sps:$4 sm:$0xff]  }
  0x60   :  { %895 = vmatprep.subr.bf16.mxu0 %v17885_v34  ;;  %3851 = vmatprep.subr.bf16.mxu1 %v17909_v35  ;;  %v17999_v34 = vld [vmem:[%s27211_s3 + $0x244] ss:$36 sps:$4 sm:$0xff]   ;;  %v17966_v35 = vld [vmem:[%s27211_s3 + $0x874] ss:$36 sps:$4 sm:$0xff]  }
  0x62   :  { %955 = vmatmul.mubr.bf16.vlgmr.msra.gmra.mxu1 %v20876_v1 }
  0x63   :  { %896 = vmatpush2.bf16.msra.mxu0 %v17883_v36  ;;  %3852 = vmatpush1.bf16.msra.mxu1 %v17907_v38  ;;  %v17997_v36 = vld [vmem:[%s27211_s3 + $0x240] ss:$36 sps:$4 sm:$0xff]  }
  0x64   :  { %897 = vmatprep.subr.bf16.mxu0 %v17888_v37  ;;  %3853 = vmatprep.subr.bf16.mxu1 %v17915_v39  ;;  %v17964_v37 = vld [vmem:[%s27211_s3 + $0x870] ss:$36 sps:$4 sm:$0xff]   ;;  %v18005_v38 = vld [vmem:[%s27211_s3 + $0xafc] ss:$36 sps:$4 sm:$0xff]  }
  0x65   :  { %v17972_v39 = vld [vmem:[%s27211_s3 + $0x82c] ss:$36 sps:$4 sm:$0xff]  }
  0x67   :  { %898 = vmatpush2.bf16.msra.mxu0 %v17886_v40  ;;  %3854 = vmatpush1.bf16.msra.mxu1 %v17913_v42  ;;  %v17970_v40 = vld [vmem:[%s27211_s3 + $0x828] ss:$36 sps:$4 sm:$0xff]   ;;  %v17976_v42 = vld [vmem:[%s27211_s3 + $0x7e0] ss:$36 sps:$4 sm:$0xff]  }
  0x68   :  { %899 = vmatprep.subr.bf16.mxu0 %v17891_v41  ;;  %3855 = vmatprep.subr.bf16.mxu1 %v17921_v43  ;;  %v17978_v41 = vld [vmem:[%s27211_s3 + $0x7e4] ss:$36 sps:$4 sm:$0xff]   ;;  %v17984_v43 = vld [vmem:[%s27211_s3 + $0x79c] ss:$36 sps:$4 sm:$0xff]  }
  0x6b   :  { %900 = vmatpush2.bf16.msra.mxu0 %v17889_v44  ;;  %3856 = vmatpush1.bf16.msra.mxu1 %v17919_v45  ;;  %v17982_v44 = vld [vmem:[%s27211_s3 + $0x798] ss:$36 sps:$4 sm:$0xff]  }
  0x6c   :  { %901 = vmatprep.subr.bf16.mxu0 %v17894_v46  ;;  %3857 = vmatprep.subr.bf16.mxu1 %v17927_v47  ;;  %v17990_v45 = vld [vmem:[%s27211_s3 + $0x754] ss:$36 sps:$4 sm:$0xff]   ;;  %v17996_v47 = vld [vmem:[%s27211_s3 + $0x70c] ss:$36 sps:$4 sm:$0xff]  }
  0x6d   :  { %v17988_v46 = vld [vmem:[%s27211_s3 + $0x750] ss:$36 sps:$4 sm:$0xff]  }
  0x6f   :  { %902 = vmatpush2.bf16.msra.mxu0 %v17892_v48  ;;  %3858 = vmatpush1.bf16.msra.mxu1 %v17925_v49  ;;  %v17994_v48 = vld [vmem:[%s27211_s3 + $0x708] ss:$36 sps:$4 sm:$0xff]  }
  0x70   :  { %903 = vmatprep.subr.bf16.mxu0 %v17897_v50  ;;  %3859 = vmatprep.subr.bf16.mxu1 %v17933_v51  ;;  %v18002_v49 = vld [vmem:[%s27211_s3 + $0x6c4] ss:$36 sps:$4 sm:$0xff]  }
  0x71   :  { %v18000_v50 = vld [vmem:[%s27211_s3 + $0x6c0] ss:$36 sps:$4 sm:$0xff]  }
  0x72   :  { %v18029_v51 = vld [vmem:[%s27211_s3 + $0xd84] ss:$36 sps:$4 sm:$0xff]  }
  0x73   :  { %904 = vmatpush2.bf16.msra.mxu0 %v17895_v52  ;;  %3860 = vmatpush1.bf16.msra.mxu1 %v17931_v53  ;;  %v27220_v52 = vlaneseq }
  0x74   :  { %905 = vmatprep.subr.bf16.mxu0 %v17900_v54  ;;  %3861 = vmatprep.subr.bf16.mxu1 %v17939_v55  ;;  %v21230_v54 = vld [vmem:[%s27210_s2] sm:$0x7f] }
  0x75   :  { %v21225_v53 = vshrl.u32 %v27220_v52, 7 }
  0x77   :  { %906 = vmatpush2.bf16.msra.mxu0 %v17898_v56  ;;  %3862 = vmatpush1.bf16.msra.mxu1 %v17937_v57  ;;  %v21233_v55 = vsub.s32 0, %v21225_v53  ;;  %v21236_v56 = vsub.s32 2, %v21225_v53  ;;  %v21239_v57 = vsub.s32 1, %v21225_v53 }
  0x78   :  { %907 = vmatprep.subr.bf16.mxu0 %v17903_v58  ;;  %3863 = vmatprep.subr.bf16.mxu1 %v17945_v59  ;;  %v21242_v58 = vsub.s32 3, %v21225_v53 }
  0x79   :  { %27231 = vst [vmem:[#allocation5_spill] sm:$0xff] %v21233_v55  ;;  %v175_v59 = vrot.slane %v21230_v54, %v21233_v55 }
  0x7b   :  { %908 = vmatpush2.bf16.msra.mxu0 %v17901_v60  ;;  %3864 = vmatpush1.bf16.msra.mxu1 %v17943_v61  ;;  %v183_v60 = vrot.slane %v21230_v54, %v21236_v56 }
  0x7c   :  { %909 = vmatprep.subr.bf16.mxu0 %v17906_v62  ;;  %3865 = vmatprep.subr.bf16.mxu1 %v17951_v63  ;;  %v179_v63 = vrot.slane %v21230_v54, %v21239_v57 }
  0x7f   :  { %910 = vmatpush2.bf16.msra.mxu0 %v17904_v0  ;;  %3866 = vmatpush1.bf16.msra.mxu1 %v17949_v2  ;;  %v187_v0 = vrot.slane %v21230_v54, %v21242_v58 }
  0x80   :  { %3894 = vmatprep.subr.bf16.mxu0 %v17912_v3  ;;  %3867 = vmatprep.subr.bf16.mxu1 %v17957_v6 }
  0x82   :  { %912 = vmatmul.mubr.bf16.vlgmr.msra.gmra.mxu0 %v20876_v1  ;;  %v17963_v1 = vld [vmem:[%s27211_s3 + $0x3f4] ss:$36 sps:$4 sm:$0xff]  }
  0x83   :  { %3895 = vmatpush1.bf16.msra.mxu0 %v17910_v4  ;;  %3868 = vmatpush2.bf16.msra.mxu1 %v17955_v8 }
  0x84   :  { %3896 = vmatprep.subr.bf16.mxu0 %v17918_v5  ;;  %3869 = vmatprep.subr.bf16.mxu1 %v17963_v1 }
  0x87   :  { %3897 = vmatpush1.bf16.msra.mxu0 %v17916_v7  ;;  %3870 = vmatpush2.bf16.msra.mxu1 %v17961_v11 }
  0x88   :  { %3898 = vmatprep.subr.bf16.mxu0 %v17924_v9  ;;  %3871 = vmatprep.subr.bf16.mxu1 %v17969_v14 }
  0x8b   :  { %3899 = vmatpush1.bf16.msra.mxu0 %v17922_v10  ;;  %3872 = vmatpush2.bf16.msra.mxu1 %v17967_v16 }
  0x8c   :  { %3900 = vmatprep.subr.bf16.mxu0 %v17930_v12  ;;  %3873 = vmatprep.subr.bf16.mxu1 %v17975_v18 }
  0x8f   :  { %3901 = vmatpush1.bf16.msra.mxu0 %v17928_v13  ;;  %3874 = vmatpush2.bf16.msra.mxu1 %v17973_v20 }
  0x90   :  { %3902 = vmatprep.subr.bf16.mxu0 %v17936_v15  ;;  %3875 = vmatprep.subr.bf16.mxu1 %v17981_v22 }
  0x93   :  { %3903 = vmatpush1.bf16.msra.mxu0 %v17934_v17  ;;  %3876 = vmatpush2.bf16.msra.mxu1 %v17979_v24 }
  0x94   :  { %3904 = vmatprep.subr.bf16.mxu0 %v17942_v19  ;;  %3877 = vmatprep.subr.bf16.mxu1 %v17987_v26 }
  0x97   :  { %3905 = vmatpush1.bf16.msra.mxu0 %v17940_v21  ;;  %3878 = vmatpush2.bf16.msra.mxu1 %v17985_v28 }
  0x98   :  { %3906 = vmatprep.subr.bf16.mxu0 %v17948_v23  ;;  %3879 = vmatprep.subr.bf16.mxu1 %v17993_v30 }
  0x9b   :  { %3907 = vmatpush1.bf16.msra.mxu0 %v17946_v25  ;;  %3880 = vmatpush2.bf16.msra.mxu1 %v17991_v32 }
  0x9c   :  { %3908 = vmatprep.subr.bf16.mxu0 %v17954_v27  ;;  %3881 = vmatprep.subr.bf16.mxu1 %v17999_v34 }
  0x9f   :  { %3909 = vmatpush1.bf16.msra.mxu0 %v17952_v29  ;;  %3882 = vmatpush2.bf16.msra.mxu1 %v17997_v36 }
  0xa0   :  { %3910 = vmatprep.subr.bf16.mxu0 %v17960_v31  ;;  %3937 = vmatprep.subr.bf16.mxu1 %v18005_v38 }
  0xa3   :  { %3911 = vmatpush2.bf16.msra.mxu0 %v17958_v33 }
  0xa4   :  { %3912 = vmatprep.subr.bf16.mxu0 %v17966_v35  ;;  %v21262_v35 = vsub.s32 6, %v21225_v53 }
  0xa7   :  { %3913 = vmatpush2.bf16.msra.mxu0 %v17964_v37 }
  0xa8   :  { %3914 = vmatprep.subr.bf16.mxu0 %v17972_v39 }
  0xab   :  { %3915 = vmatpush2.bf16.msra.mxu0 %v17970_v40 }
  0xac   :  { %3916 = vmatprep.subr.bf16.mxu0 %v17978_v41 }
  0xaf   :  { %3917 = vmatpush2.bf16.msra.mxu0 %v17976_v42 }
  0xb0   :  { %3918 = vmatprep.subr.bf16.mxu0 %v17984_v43 }
  0xb3   :  { %3919 = vmatpush2.bf16.msra.mxu0 %v17982_v44 }
  0xb4   :  { %3920 = vmatprep.subr.bf16.mxu0 %v17990_v45 }
  0xb7   :  { %3921 = vmatpush2.bf16.msra.mxu0 %v17988_v46 }
  0xb8   :  { %3922 = vmatprep.subr.bf16.mxu0 %v17996_v47 }
  0xbb   :  { %3923 = vmatpush2.bf16.msra.mxu0 %v17994_v48 }
  0xbc   :  { %3924 = vmatprep.subr.bf16.mxu0 %v18002_v49  ;;  %v18003_v49 = vld [vmem:[%s27211_s3 + $0xaf8] ss:$36 sps:$4 sm:$0xff]  }
  0xbf   :  { %3925 = vmatpush2.bf16.msra.mxu0 %v18000_v50 }
  0xc0   :  { %3994 = vmatprep.subr.bf16.mxu0 %v18029_v51 }
 0x102   :  { %v827_v61 = vpop.f32.mrf.mxu0  ;;  %v870_v62 = vpop.f32.mrf.mxu1 }
 0x103   :  { %v21252_v2 = vadd.f32 %v827_v61, %v175_v59  ;;  %v21254_v3 = vadd.f32 %v870_v62, %v183_v60  ;;  %v18027_v61 = vld [vmem:[%s27211_s3 + $0xd80] ss:$36 sps:$4 sm:$0xff]  }
 0x104   :  { %v829_v4 = vpop.f32.mrf.mxu0  ;;  %v872_v5 = vpop.f32.mrf.mxu1 }
 0x105   :  { %v977_v6 = vmin.f32 %v21252_v2, 0.0  ;;  %v979_v7 = vmin.f32 %v21254_v3, 0.0  ;;  %v830_v8 = vadd.f32 %v829_v4, %v179_v63  ;;  %v21258_v9 = vadd.f32 %v872_v5, %v187_v0 }
 0x106   :  { %v831_v1 = vpop.f32.mrf.mxu0  ;;  %v874_v10 = vpop.f32.mrf.mxu1  ;;  %vm963_vm0 = vcmp.gt.f32.partialorder %v21252_v2, 0.0  ;;  %vm965_vm1 = vcmp.gt.f32.partialorder %v21254_v3, 0.0 }
 0x107   :  { %v991_v11 = vmul.f32 1.442695, %v977_v6  ;;  %v995_v12 = vmul.f32 1.442695, %v979_v7  ;;  %v832_v13 = vadd.f32 %v831_v1, %v175_v59  ;;  %v875_v14 = vadd.f32 %v874_v10, %v183_v60  ;;  %v18008_v60 = vld [vmem:[%s27211_s3 + $0xab4] ss:$36 sps:$4 sm:$0xff]  }
 0x108   :  { %v978_v15 = vmin.f32 %v830_v8, 0.0  ;;  %v980_v16 = vmin.f32 %v21258_v9, 0.0  ;;  %v833_v17 = vpop.f32.mrf.mxu0  ;;  %v876_v18 = vpop.f32.mrf.mxu1  ;;  %vm964_vm2 = vcmp.gt.f32.partialorder %v830_v8, 0.0  ;;  %vm966_vm3 = vcmp.gt.f32.partialorder %v21258_v9, 0.0  ;;  %v18035_v10 = vld [vmem:[%s27211_s3 + $0x204] ss:$36 sps:$4 sm:$0xff]  }
 0x109   :  { %v984_v19 = vmin.f32 %v832_v13, 0.0  ;;  %20544 = vpow2.f32 %v991_v11  ;;  %v986_v22 = vmin.f32 %v875_v14, 0.0  ;;  %v834_v24 = vadd.f32 %v833_v17, %v179_v63 }
 0x10a   :  { %v993_v20 = vmul.f32 1.442695, %v978_v15  ;;  %v997_v21 = vmul.f32 1.442695, %v980_v16  ;;  %20546 = vpow2.f32 %v995_v12  ;;  %v877_v25 = vadd.f32 %v876_v18, %v187_v0  ;;  %v18006_v12 = vld [vmem:[%s27211_s3 + $0xab0] ss:$36 sps:$4 sm:$0xff]  }
 0x10b   :  { %v1005_v23 = vmul.f32 1.442695, %v984_v19  ;;  %v1009_v26 = vmul.f32 1.442695, %v986_v22  ;;  %v985_v27 = vmin.f32 %v834_v24, 0.0  ;;  %vm970_vm4 = vcmp.gt.f32.partialorder %v832_v13, 0.0 }
 0x10c   :  { %20548 = vpow2.f32 %v993_v20  ;;  %v987_v28 = vmin.f32 %v877_v25, 0.0  ;;  %vm972_vm5 = vcmp.gt.f32.partialorder %v875_v14, 0.0  ;;  %vm971_vm6 = vcmp.gt.f32.partialorder %v834_v24, 0.0  ;;  %v18009_v19 = vld [vmem:[%s27211_s3 + $0xa68] ss:$36 sps:$4 sm:$0xff]  }
 0x10d   :  { %20550 = vpow2.f32 %v997_v21  ;;  %v1007_v29 = vmul.f32 1.442695, %v985_v27  ;;  %vm973_vm7 = vcmp.gt.f32.partialorder %v877_v25, 0.0  ;;  %v199_v1 = vrot.slane %v21230_v54, %v21262_v35  ;;  %v18014_v20 = vld [vmem:[%s27211_s3 + $0xa24] ss:$36 sps:$4 sm:$0xff]  }
 0x10e   :  { %20552 = vpow2.f32 %v1005_v23  ;;  %v1011_v30 = vmul.f32 1.442695, %v987_v28  ;;  %v27225_v16 = vmov 0   ;;  %v18015_v27 = vld [vmem:[%s27211_s3 + $0x9d8] ss:$36 sps:$4 sm:$0xff]  }
 0x10f   :  { %20554 = vpow2.f32 %v1009_v26  ;;  %v18020_v28 = vld [vmem:[%s27211_s3 + $0x994] ss:$36 sps:$4 sm:$0xff]  }
 0x110   :  { %20556 = vpow2.f32 %v1007_v29  ;;  %v18018_v29 = vld [vmem:[%s27211_s3 + $0x990] ss:$36 sps:$4 sm:$0xff]  }
 0x111   :  { %20558 = vpow2.f32 %v1011_v30  ;;  %v18023_v30 = vld [vmem:[%s27211_s3 + $0x94c] ss:$36 sps:$4 sm:$0xff]  }
 0x116   :  { %v20545_v31 = vpop.eup %20544 }
 0x117   :  { %v20547_v32 = vpop.eup %20546  ;;  %v15649_v42 = vadd.f32 -1.0, %v20545_v31 }
 0x118   :  { %v15651_v43 = vadd.f32 -1.0, %v20547_v32  ;;  %v18021_v32 = vld [vmem:[%s27211_s3 + $0x948] ss:$36 sps:$4 sm:$0xff]  }
 0x119   :  { %v20549_v33 = vpop.eup %20548  ;;  %v1033_v62 = vsel %vm963_vm0, %v21252_v2, %v15649_v42 }
 0x11a   :  { %v20551_v34 = vpop.eup %20550  ;;  %v15650_v39 = vadd.f32 -1.0, %v20549_v33  ;;  %v1035_v6 = vsel %vm965_vm1, %v21254_v3, %v15651_v43  ;;  %v18026_v33 = vld [vmem:[%s27211_s3 + $0x904] ss:$36 sps:$4 sm:$0xff]  }
 0x11b   :  { %v20553_v36 = vpop.eup %20552  ;;  %v15652_v44 = vadd.f32 -1.0, %v20551_v34  ;;  %v21341_v34 = vsub.s32 4, %v21225_v53  ;;  %v18033_v43 = vld [vmem:[%s27211_s3 + $0x200] ss:$36 sps:$4 sm:$0xff]  }
 0x11c   :  { %v20555_v37 = vpop.eup %20554  ;;  %v15656_v38 = vadd.f32 -1.0, %v20553_v36  ;;  %v1034_v50 = vsel %vm964_vm2, %v830_v8, %v15650_v39  ;;  %v18024_v39 = vld [vmem:[%s27211_s3 + $0x900] ss:$36 sps:$4 sm:$0xff]  }
 0x11d   :  { %v15658_v40 = vadd.f32 -1.0, %v20555_v37  ;;  %v20557_v41 = vpop.eup %20556  ;;  %v1036_v63 = vsel %vm966_vm3, %v21258_v9, %v15652_v44  ;;  %27232 = vst [vmem:[#allocation6_spill] sm:$0xff] %v21341_v34  ;;  %v21344_v37 = vsub.s32 5, %v21225_v53  ;;  %v191_v42 = vrot.slane %v21230_v54, %v21341_v34 }
 0x11e   :  { %v20559_v45 = vpop.eup %20558  ;;  %v15657_v46 = vadd.f32 -1.0, %v20557_v41  ;;  %v1040_v47 = vsel %vm970_vm4, %v832_v13, %v15656_v38  ;;  %v18011_v13 = vld [vmem:[%s27211_s3 + $0xa6c] ss:$36 sps:$4 sm:$0xff]  }
 0x11f   :  { %v15659_v48 = vadd.f32 -1.0, %v20559_v45  ;;  %v1042_v51 = vsel %vm972_vm5, %v875_v14, %v15658_v40  ;;  %v21288_v7 = vpack.c.bf16 %v1040_v47, %v1033_v62  ;;  %v18032_v40 = vld [vmem:[%s27211_s3 + $0xd3c] ss:$36 sps:$4 sm:$0xff]  }
 0x120   :  { %v1041_v59 = vsel %vm971_vm6, %v834_v24, %v15657_v46  ;;  %v21294_v2 = vpack.c.bf16 %v1042_v51, %v1035_v6  ;;  %v18012_v24 = vld [vmem:[%s27211_s3 + $0xa20] ss:$36 sps:$4 sm:$0xff]   ;;  %v195_v46 = vrot.slane %v21230_v54, %v21344_v37 }
 0x121   :  { %v21283_v0 = vpack.c.bf16 %v1041_v59, %v1034_v50  ;;  %v1043_v4 = vsel %vm973_vm7, %v877_v25, %v15659_v48  ;;  %v18017_v25 = vld [vmem:[%s27211_s3 + $0x9dc] ss:$36 sps:$4 sm:$0xff]   ;;  %v18038_v50 = vld [vmem:[%s27211_s3 + $0xcf4] ss:$36 sps:$4 sm:$0xff]  }
 0x122   :  { %v17497_v5 = vpop.f32.mrf.mxu1  ;;  %v21290_v8 = vpack.c.bf16 %v1043_v4, %v1036_v63  ;;  %v18041_v51 = vld [vmem:[%s27211_s3 + $0x1bc] ss:$36 sps:$4 sm:$0xff]   ;;  %v18036_v4 = vld [vmem:[%s27211_s3 + $0xcf0] ss:$36 sps:$4 sm:$0xff]  }
 0x123   :  { %3883 = vmatprep.mubr.bf16.mxu1 %v21283_v0 }
 0x124   :  { %v17498_v9 = vpop.f32.mrf.mxu1  ;;  %3926 = vmatprep.mubr.bf16.mxu0 %v21290_v8  ;;  %3884 = vmatmul.mubr.bf16.vlgmr.msra.gmra.mxu1 %v21288_v7 }
 0x125   :  { %v17499_v3 = vadd.f32 %v17498_v9, %v17497_v5  ;;  %3927 = vmatmul.mubr.bf16.vlgmr.msra.gmra.mxu0 %v21294_v2  ;;  %3938 = vmatpush1.bf16.msra.mxu1 %v18003_v49  ;;  %v18030_v49 = vld [vmem:[%s27211_s3 + $0xd38] ss:$36 sps:$4 sm:$0xff]   ;;  %v18044_v9 = vld [vmem:[%s27211_s3 + $0xcac] ss:$36 sps:$4 sm:$0xff]  }
 0x126   :  { %v17500_v11 = vpop.f32.mrf.mxu1  ;;  %3939 = vmatprep.subr.bf16.mxu1 %v18008_v60  ;;  %3995 = vmatpush1.bf16.msra.mxu0 %v18027_v61  ;;  %v18039_v61 = vld [vmem:[%s27211_s3 + $0x1b8] ss:$36 sps:$4 sm:$0xff]  }
 0x127   :  { %v957_v14 = vadd.f32 %v17499_v3, %v199_v1  ;;  %4012 = vmatprep.mubr.bf16.mxu0 %v27225_v16  ;;  %4023 = vmatprep.subr.bf16.mxu0 %v18035_v10  ;;  %v18047_v5 = vld [vmem:[%s27211_s3 + $0x174] ss:$36 sps:$4 sm:$0xff]   ;;  %v18042_v3 = vld [vmem:[%s27211_s3 + $0xca8] ss:$36 sps:$4 sm:$0xff]  }
 0x128   :  { %v17501_v15 = vpop.f32.mrf.mxu1 }
 0x129   :  { %v983_v17 = vmin.f32 %v957_v14, 0.0  ;;  %v17502_v18 = vadd.f32 %v17501_v15, %v17500_v11  ;;  %3940 = vmatpush1.bf16.msra.mxu1 %v18006_v12  ;;  %vm969_vm8 = vcmp.gt.f32.partialorder %v957_v14, 0.0 }
 0x12a   :  { %3941 = vmatprep.subr.bf16.mxu1 %v18011_v13  ;;  %v18045_v13 = vld [vmem:[%s27211_s3 + $0x170] ss:$36 sps:$4 sm:$0xff]  }
 0x12b   :  { %v1003_v21 = vmul.f32 1.442695, %v983_v17  ;;  %v960_v22 = vadd.f32 %v17502_v18, %v199_v1  ;;  %v18050_v17 = vld [vmem:[%s27211_s3 + $0xc64] ss:$36 sps:$4 sm:$0xff]   ;;  %v18053_v18 = vld [vmem:[%s27211_s3 + $0x12c] ss:$36 sps:$4 sm:$0xff]  }
 0x12d   :  { %20560 = vpow2.f32 %v1003_v21  ;;  %v990_v23 = vmin.f32 %v960_v22, 0.0  ;;  %3942 = vmatpush1.bf16.msra.mxu1 %v18009_v19  ;;  %vm976_vm9 = vcmp.gt.f32.partialorder %v960_v22, 0.0  ;;  %v18051_v21 = vld [vmem:[%s27211_s3 + $0x128] ss:$36 sps:$4 sm:$0xff]  }
 0x12e   :  { %3943 = vmatprep.subr.bf16.mxu1 %v18014_v20 }
 0x12f   :  { %v1017_v26 = vmul.f32 1.442695, %v990_v23  ;;  %v18048_v23 = vld [vmem:[%s27211_s3 + $0xc60] ss:$36 sps:$4 sm:$0xff]  }
 0x131   :  { %20562 = vpow2.f32 %v1017_v26  ;;  %3944 = vmatpush1.bf16.msra.mxu1 %v18012_v24  ;;  %v18059_v24 = vld [vmem:[%s27211_s3 + $0xe4] ss:$36 sps:$4 sm:$0xff]  }
 0x132   :  { %3945 = vmatprep.subr.bf16.mxu1 %v18017_v25  ;;  %v18056_v25 = vld [vmem:[%s27211_s3 + $0xc1c] ss:$36 sps:$4 sm:$0xff]  }
 0x133   :  { %v18057_v26 = vld [vmem:[%s27211_s3 + $0xe0] ss:$36 sps:$4 sm:$0xff]  }
 0x135   :  { %3946 = vmatpush1.bf16.msra.mxu1 %v18015_v27  ;;  %v18054_v27 = vld [vmem:[%s27211_s3 + $0xc18] ss:$36 sps:$4 sm:$0xff]  }
 0x136   :  { %3947 = vmatprep.subr.bf16.mxu1 %v18020_v28  ;;  %v18062_v28 = vld [vmem:[%s27211_s3 + $0xbd4] ss:$36 sps:$4 sm:$0xff]  }
 0x139   :  { %3948 = vmatpush1.bf16.msra.mxu1 %v18018_v29  ;;  %v18065_v29 = vld [vmem:[%s27211_s3 + $0x9c] ss:$36 sps:$4 sm:$0xff]  }
 0x13a   :  { %v20561_v31 = vpop.eup %20560  ;;  %3949 = vmatprep.subr.bf16.mxu1 %v18023_v30  ;;  %v18063_v30 = vld [vmem:[%s27211_s3 + $0x98] ss:$36 sps:$4 sm:$0xff]  }
 0x13b   :  { %v15655_v36 = vadd.f32 -1.0, %v20561_v31  ;;  %v18060_v31 = vld [vmem:[%s27211_s3 + $0xbd0] ss:$36 sps:$4 sm:$0xff]  }
 0x13d   :  { %3950 = vmatpush1.bf16.msra.mxu1 %v18021_v32  ;;  %v1039_v44 = vsel %vm969_vm8, %v957_v14, %v15655_v36  ;;  %v18068_v32 = vld [vmem:[%s27211_s3 + $0xb8c] ss:$36 sps:$4 sm:$0xff]  }
 0x13e   :  { %v20563_v38 = vpop.eup %20562  ;;  %3951 = vmatprep.subr.bf16.mxu1 %v18026_v33  ;;  %v18071_v33 = vld [vmem:[%s27211_s3 + $0x54] ss:$36 sps:$4 sm:$0xff]  }
 0x13f   :  { %v15662_v41 = vadd.f32 -1.0, %v20563_v38  ;;  %v18069_v38 = vld [vmem:[%s27211_s3 + $0x50] ss:$36 sps:$4 sm:$0xff]  }
 0x141   :  { %v1046_v45 = vsel %vm976_vm9, %v960_v22, %v15662_v41  ;;  %3952 = vmatpush1.bf16.msra.mxu1 %v18024_v39  ;;  %v18074_v41 = vld [vmem:[%s27211_s3 + $0xb44] ss:$36 sps:$4 sm:$0xff]  }
 0x142   :  { %v21359_v47 = vpack.c.bf16 %v1046_v45, %v1039_v44  ;;  %v913_v48 = vpop.f32.mrf.mxu0  ;;  %3953 = vmatprep.subr.bf16.mxu1 %v18032_v40  ;;  %v18066_v40 = vld [vmem:[%s27211_s3 + $0xb88] ss:$36 sps:$4 sm:$0xff]  }
 0x143   :  { %v21370_v59 = vadd.f32 %v913_v48, %v191_v42  ;;  %v18075_v44 = vld [vmem:[%s27211_s3 + $0x8] ss:$36 sps:$4 sm:$0xff]   ;;  %v18072_v48 = vld [vmem:[%s27211_s3 + $0xb40] ss:$36 sps:$4 sm:$0xff]  }
 0x144   :  { %v915_v54 = vpop.f32.mrf.mxu0  ;;  %16105 = vmatmul.mubr.msk.bf16.vlgmr.msra.gmra.mxu0 %vm3847_vm10, %v21359_v47 }
 0x145   :  { %v21374_v60 = vadd.f32 %v915_v54, %v195_v46  ;;  %4024 = vmatpush1.bf16.msra.mxu0 %v18033_v43  ;;  %4055 = vmatprep.mubr.bf16.mxu0 %v21283_v0  ;;  %v981_v62 = vmin.f32 %v21370_v59, 0.0  ;;  %vm967_vm14 = vcmp.gt.f32.partialorder %v21370_v59, 0.0 }
 0x146   :  { %3954 = vmatpush2.bf16.msra.mxu1 %v18030_v49  ;;  %v917_v63 = vpop.f32.mrf.mxu0  ;;  %4025 = vmatprep.subr.bf16.mxu0 %v18041_v51 }
 0x147   :  { %v982_v6 = vmin.f32 %v21374_v60, 0.0  ;;  %v21388_v1 = vadd.f32 %v917_v63, %v191_v42  ;;  %3955 = vmatprep.subr.bf16.mxu1 %v18038_v50  ;;  %v999_v14 = vmul.f32 1.442695, %v981_v62  ;;  %v18077_v42 = vld [vmem:[%s27211_s3 + $0xc] ss:$36 sps:$4 sm:$0xff]   ;;  %vm968_vm11 = vcmp.gt.f32.partialorder %v21374_v60, 0.0 }
 0x148   :  { %v919_v10 = vpop.f32.mrf.mxu0  ;;  %v18080_v50 = vld [vmem:[%s27211_s3 + $0x684] ss:$36 sps:$4 sm:$0xff]  }
 0x149   :  { %v1001_v11 = vmul.f32 1.442695, %v982_v6  ;;  %v988_v12 = vmin.f32 %v21388_v1, 0.0  ;;  %4026 = vmatpush1.bf16.msra.mxu0 %v18039_v61  ;;  %v21400_v15 = vadd.f32 %v919_v10, %v195_v46  ;;  %v18083_v61 = vld [vmem:[%s27211_s3 + $0x444] ss:$36 sps:$4 sm:$0xff]   ;;  %vm974_vm12 = vcmp.gt.f32.partialorder %v21388_v1, 0.0 }
 0x14a   :  { %3956 = vmatpush2.bf16.msra.mxu1 %v18036_v4  ;;  %4027 = vmatprep.subr.bf16.mxu0 %v18047_v5  ;;  %v18081_v6 = vld [vmem:[%s27211_s3 + $0x440] ss:$36 sps:$4 sm:$0xff]  }
 0x14b   :  { %v1013_v19 = vmul.f32 1.442695, %v988_v12  ;;  %3957 = vmatprep.subr.bf16.mxu1 %v18044_v9  ;;  %20564 = vpow2.f32 %v1001_v11  ;;  %v989_v20 = vmin.f32 %v21400_v15, 0.0  ;;  %vm975_vm13 = vcmp.gt.f32.partialorder %v21400_v15, 0.0  ;;  %v18089_v10 = vld [vmem:[%s27211_s3 + $0x3fc] ss:$36 sps:$4 sm:$0xff]  }
 0x14c   :  { %v18087_v11 = vld [vmem:[%s27211_s3 + $0x3f8] ss:$36 sps:$4 sm:$0xff]  }
 0x14d   :  { %20566 = vpow2.f32 %v1013_v19  ;;  %4028 = vmatpush1.bf16.msra.mxu0 %v18045_v13  ;;  %v1015_v22 = vmul.f32 1.442695, %v989_v20  ;;  %v18095_v12 = vld [vmem:[%s27211_s3 + $0x3b4] ss:$36 sps:$4 sm:$0xff]   ;;  %v18099_v19 = vld [vmem:[%s27211_s3 + $0x368] ss:$36 sps:$4 sm:$0xff]  }
 0x14e   :  { %20568 = vpow2.f32 %v999_v14  ;;  %3958 = vmatpush2.bf16.msra.mxu1 %v18042_v3  ;;  %4029 = vmatprep.subr.bf16.mxu0 %v18053_v18  ;;  %v18092_v13 = vld [vmem:[%s27211_s3 + $0x5f4] ss:$36 sps:$4 sm:$0xff]   ;;  %v18098_v18 = vld [vmem:[%s27211_s3 + $0x5ac] ss:$36 sps:$4 sm:$0xff]  }
 0x14f   :  { %3959 = vmatprep.subr.bf16.mxu1 %v18050_v17  ;;  %20570 = vpow2.f32 %v1015_v22  ;;  %v18090_v14 = vld [vmem:[%s27211_s3 + $0x5f0] ss:$36 sps:$4 sm:$0xff]   ;;  %v18096_v20 = vld [vmem:[%s27211_s3 + $0x5a8] ss:$36 sps:$4 sm:$0xff]  }
 0x150   :  { %v18101_v17 = vld [vmem:[%s27211_s3 + $0x36c] ss:$36 sps:$4 sm:$0xff]   ;;  %v18107_v22 = vld [vmem:[%s27211_s3 + $0x324] ss:$36 sps:$4 sm:$0xff]  }
 0x151   :  { %4030 = vmatpush1.bf16.msra.mxu0 %v18051_v21  ;;  %v18104_v21 = vld [vmem:[%s27211_s3 + $0x564] ss:$36 sps:$4 sm:$0xff]  }
 0x152   :  { %3960 = vmatpush2.bf16.msra.mxu1 %v18048_v23  ;;  %4031 = vmatprep.subr.bf16.mxu0 %v18059_v24  ;;  %v18105_v23 = vld [vmem:[%s27211_s3 + $0x320] ss:$36 sps:$4 sm:$0xff]  }
 0x153   :  { %3961 = vmatprep.subr.bf16.mxu1 %v18056_v25  ;;  %v18102_v24 = vld [vmem:[%s27211_s3 + $0x560] ss:$36 sps:$4 sm:$0xff]  }
 0x154   :  { %v18110_v25 = vld [vmem:[%s27211_s3 + $0x51c] ss:$36 sps:$4 sm:$0xff]  }
 0x155   :  { %4032 = vmatpush1.bf16.msra.mxu0 %v18057_v26  ;;  %v18113_v26 = vld [vmem:[%s27211_s3 + $0x2dc] ss:$36 sps:$4 sm:$0xff]  }
 0x156   :  { %3962 = vmatpush2.bf16.msra.mxu1 %v18054_v27  ;;  %4033 = vmatprep.subr.bf16.mxu0 %v18065_v29  ;;  %v18111_v27 = vld [vmem:[%s27211_s3 + $0x2d8] ss:$36 sps:$4 sm:$0xff]  }
 0x157   :  { %3963 = vmatprep.subr.bf16.mxu1 %v18062_v28  ;;  %v18108_v28 = vld [vmem:[%s27211_s3 + $0x518] ss:$36 sps:$4 sm:$0xff]  }
 0x158   :  { %v20565_v36 = vpop.eup %20564  ;;  %v18116_v29 = vld [vmem:[%s27211_s3 + $0x4d4] ss:$36 sps:$4 sm:$0xff]  }
 0x159   :  { %4034 = vmatpush1.bf16.msra.mxu0 %v18063_v30  ;;  %v15654_v45 = vadd.f32 -1.0, %v20565_v36  ;;  %v18119_v30 = vld [vmem:[%s27211_s3 + $0x294] ss:$36 sps:$4 sm:$0xff]   ;;  %v18125_v36 = vld [vmem:[%s27211_s3 + $0x24c] ss:$36 sps:$4 sm:$0xff]  }
 0x15a   :  { %v20567_v39 = vpop.eup %20566  ;;  %3964 = vmatpush2.bf16.msra.mxu1 %v18060_v31  ;;  %4035 = vmatprep.subr.bf16.mxu0 %v18071_v33  ;;  %v18117_v31 = vld [vmem:[%s27211_s3 + $0x290] ss:$36 sps:$4 sm:$0xff]  }
 0x15b   :  { %v20569_v43 = vpop.eup %20568  ;;  %3965 = vmatprep.subr.bf16.mxu1 %v18068_v32  ;;  %v15660_v46 = vadd.f32 -1.0, %v20567_v39  ;;  %v1038_v62 = vsel %vm968_vm11, %v21374_v60, %v15654_v45  ;;  %v18078_v60 = vld [vmem:[%s27211_s3 + $0x680] ss:$36 sps:$4 sm:$0xff]   ;;  %v18114_v32 = vld [vmem:[%s27211_s3 + $0x4d0] ss:$36 sps:$4 sm:$0xff]  }
 0x15c   :  { %v20571_v49 = vpop.eup %20570  ;;  %v15653_v51 = vadd.f32 -1.0, %v20569_v43  ;;  %v18122_v33 = vld [vmem:[%s27211_s3 + $0x48c] ss:$36 sps:$4 sm:$0xff]   ;;  %v18126_v43 = vld [vmem:[%s27211_s3 + $0x8c0] ss:$36 sps:$4 sm:$0xff]  }
 0x15d   :  { %4036 = vmatpush1.bf16.msra.mxu0 %v18069_v38  ;;  %v15661_v54 = vadd.f32 -1.0, %v20571_v49  ;;  %v1044_v63 = vsel %vm974_vm12, %v21388_v1, %v15660_v46  ;;  %v18086_v1 = vld [vmem:[%s27211_s3 + $0x63c] ss:$36 sps:$4 sm:$0xff]   ;;  %v18123_v38 = vld [vmem:[%s27211_s3 + $0x248] ss:$36 sps:$4 sm:$0xff]  }
 0x15e   :  { %3966 = vmatpush2.bf16.msra.mxu1 %v18066_v40  ;;  %4037 = vmatprep.subr.bf16.mxu0 %v18077_v42  ;;  %v1037_v9 = vsel %vm967_vm14, %v21370_v59, %v15653_v51  ;;  %v18084_v59 = vld [vmem:[%s27211_s3 + $0x638] ss:$36 sps:$4 sm:$0xff]   ;;  %v18120_v39 = vld [vmem:[%s27211_s3 + $0x488] ss:$36 sps:$4 sm:$0xff]   ;;  %v18129_v42 = vld [vmem:[%s27211_s3 + $0xb00] ss:$36 sps:$4 sm:$0xff]  }
 0x15f   :  { %3967 = vmatprep.subr.bf16.mxu1 %v18074_v41  ;;  %v1045_v4 = vsel %vm975_vm13, %v21400_v15, %v15661_v54  ;;  %v21491_v3 = vpack.c.bf16 %v1044_v63, %v1037_v9  ;;  %v18093_v15 = vld [vmem:[%s27211_s3 + $0x3b0] ss:$36 sps:$4 sm:$0xff]   ;;  %v18128_v40 = vld [vmem:[%s27211_s3 + $0x8c4] ss:$36 sps:$4 sm:$0xff]   ;;  %v18137_v45 = vld [vmem:[%s27211_s3 + $0xabc] ss:$36 sps:$4 sm:$0xff]  }
 0x160   :  { %v21476_v5 = vpack.c.bf16 %v1045_v4, %v1038_v62  ;;  %v18131_v41 = vld [vmem:[%s27211_s3 + $0xb04] ss:$36 sps:$4 sm:$0xff]   ;;  %v18135_v46 = vld [vmem:[%s27211_s3 + $0xab8] ss:$36 sps:$4 sm:$0xff]   ;;  %v18138_v51 = vld [vmem:[%s27211_s3 + $0x830] ss:$36 sps:$4 sm:$0xff]  }
 0x161   :  { %4038 = vmatpush1.bf16.msra.mxu0 %v18075_v44  ;;  %v18134_v44 = vld [vmem:[%s27211_s3 + $0x87c] ss:$36 sps:$4 sm:$0xff]   ;;  %v18140_v49 = vld [vmem:[%s27211_s3 + $0x834] ss:$36 sps:$4 sm:$0xff]   ;;  %v18149_v62 = vld [vmem:[%s27211_s3 + $0xa2c] ss:$36 sps:$4 sm:$0xff]  }
 0x162   :  { %3968 = vmatpush2.bf16.msra.mxu1 %v18072_v48  ;;  %4039 = vmatprep.subr.bf16.mxu0 %v18083_v61  ;;  %v18132_v48 = vld [vmem:[%s27211_s3 + $0x878] ss:$36 sps:$4 sm:$0xff]   ;;  %v18141_v54 = vld [vmem:[%s27211_s3 + $0xa70] ss:$36 sps:$4 sm:$0xff]   ;;  %v18144_v63 = vld [vmem:[%s27211_s3 + $0x7e8] ss:$36 sps:$4 sm:$0xff]  }
 0x163   :  { %3969 = vmatprep.mubr.bf16.mxu1 %v21476_v5  ;;  %4066 = vmatprep.subr.bf16.mxu1 %v18080_v50  ;;  %v18143_v50 = vld [vmem:[%s27211_s3 + $0xa74] ss:$36 sps:$4 sm:$0xff]   ;;  %v18146_v61 = vld [vmem:[%s27211_s3 + $0x7ec] ss:$36 sps:$4 sm:$0xff]   ;;  %v18155_v9 = vld [vmem:[%s27211_s3 + $0x9e4] ss:$36 sps:$4 sm:$0xff]  }
 0x164   :  { %v18147_v4 = vld [vmem:[%s27211_s3 + $0xa28] ss:$36 sps:$4 sm:$0xff]  }
 0x165   :  { %3970 = vmatmul.mubr.bf16.vlgmr.msra.gmra.mxu1 %v21491_v3  ;;  %4040 = vmatpush2.bf16.msra.mxu0 %v18081_v6  ;;  %v18152_v6 = vld [vmem:[%s27211_s3 + $0x7a4] ss:$36 sps:$4 sm:$0xff]  }
 0x166   :  { %4067 = vmatpush1.bf16.msra.mxu1 %v18078_v60  ;;  %4098 = vmatprep.mubr.bf16.mxu1 %v21290_v8  ;;  %v18150_v60 = vld [vmem:[%s27211_s3 + $0x7a0] ss:$36 sps:$4 sm:$0xff]  }
 0x167   :  { %4068 = vmatprep.subr.bf16.mxu1 %v18086_v1  ;;  %4041 = vmatprep.subr.bf16.mxu0 %v18089_v10  ;;  %v18153_v1 = vld [vmem:[%s27211_s3 + $0x9e0] ss:$36 sps:$4 sm:$0xff]  }
 0x168   :  { %v18158_v10 = vld [vmem:[%s27211_s3 + $0x75c] ss:$36 sps:$4 sm:$0xff]  }
 0x169   :  { %4042 = vmatpush2.bf16.msra.mxu0 %v18087_v11  ;;  %v18156_v11 = vld [vmem:[%s27211_s3 + $0x758] ss:$36 sps:$4 sm:$0xff]  }
 0x16a   :  { %4069 = vmatpush1.bf16.msra.mxu1 %v18084_v59  ;;  %4043 = vmatprep.subr.bf16.mxu0 %v18095_v12  ;;  %v18161_v59 = vld [vmem:[%s27211_s3 + $0x99c] ss:$36 sps:$4 sm:$0xff]  }
 0x16b   :  { %4070 = vmatprep.subr.bf16.mxu1 %v18092_v13  ;;  %v18159_v12 = vld [vmem:[%s27211_s3 + $0x998] ss:$36 sps:$4 sm:$0xff]  }
 0x16c   :  { %v18164_v13 = vld [vmem:[%s27211_s3 + $0x714] ss:$36 sps:$4 sm:$0xff]  }
 0x16d   :  { %4044 = vmatpush2.bf16.msra.mxu0 %v18093_v15  ;;  %v18162_v15 = vld [vmem:[%s27211_s3 + $0x710] ss:$36 sps:$4 sm:$0xff]  }
 0x16e   :  { %4071 = vmatpush1.bf16.msra.mxu1 %v18090_v14  ;;  %4045 = vmatprep.subr.bf16.mxu0 %v18101_v17  ;;  %v18167_v14 = vld [vmem:[%s27211_s3 + $0x954] ss:$36 sps:$4 sm:$0xff]  }
 0x16f   :  { %4072 = vmatprep.subr.bf16.mxu1 %v18098_v18  ;;  %v18165_v17 = vld [vmem:[%s27211_s3 + $0x950] ss:$36 sps:$4 sm:$0xff]  }
 0x170   :  { %v18170_v18 = vld [vmem:[%s27211_s3 + $0x6cc] ss:$36 sps:$4 sm:$0xff]  }
 0x171   :  { %4046 = vmatpush2.bf16.msra.mxu0 %v18099_v19  ;;  %v18173_v19 = vld [vmem:[%s27211_s3 + $0x90c] ss:$36 sps:$4 sm:$0xff]  }
 0x172   :  { %4073 = vmatpush1.bf16.msra.mxu1 %v18096_v20  ;;  %4047 = vmatprep.subr.bf16.mxu0 %v18107_v22  ;;  %v18168_v20 = vld [vmem:[%s27211_s3 + $0x6c8] ss:$36 sps:$4 sm:$0xff]  }
 0x173   :  { %4074 = vmatprep.subr.bf16.mxu1 %v18104_v21  ;;  %v18171_v21 = vld [vmem:[%s27211_s3 + $0x908] ss:$36 sps:$4 sm:$0xff]  }
 0x174   :  { %v18176_v22 = vld [vmem:[%s27211_s3 + $0xd8c] ss:$36 sps:$4 sm:$0xff]  }
 0x175   :  { %4048 = vmatpush2.bf16.msra.mxu0 %v18105_v23  ;;  %v18179_v23 = vld [vmem:[%s27211_s3 + $0xd44] ss:$36 sps:$4 sm:$0xff]  }
 0x176   :  { %4075 = vmatpush1.bf16.msra.mxu1 %v18102_v24  ;;  %4049 = vmatprep.subr.bf16.mxu0 %v18113_v26  ;;  %v18174_v24 = vld [vmem:[%s27211_s3 + $0xd88] ss:$36 sps:$4 sm:$0xff]   ;;  %v18182_v26 = vld [vmem:[%s27211_s3 + $0xcfc] ss:$36 sps:$4 sm:$0xff]  }
 0x177   :  { %4076 = vmatprep.subr.bf16.mxu1 %v18110_v25  ;;  %v18177_v25 = vld [vmem:[%s27211_s3 + $0xd40] ss:$36 sps:$4 sm:$0xff]  }
 0x179   :  { %4050 = vmatpush2.bf16.msra.mxu0 %v18111_v27  ;;  %v18185_v27 = vld [vmem:[%s27211_s3 + $0x20c] ss:$36 sps:$4 sm:$0xff]  }
 0x17a   :  { %4077 = vmatpush1.bf16.msra.mxu1 %v18108_v28  ;;  %4051 = vmatprep.subr.bf16.mxu0 %v18119_v30  ;;  %v18180_v28 = vld [vmem:[%s27211_s3 + $0xcf8] ss:$36 sps:$4 sm:$0xff]   ;;  %v18183_v30 = vld [vmem:[%s27211_s3 + $0x208] ss:$36 sps:$4 sm:$0xff]  }
 0x17b   :  { %4078 = vmatprep.subr.bf16.mxu1 %v18116_v29  ;;  %v18188_v29 = vld [vmem:[%s27211_s3 + $0xcb4] ss:$36 sps:$4 sm:$0xff]  }
 0x17d   :  { %4052 = vmatpush2.bf16.msra.mxu0 %v18117_v31  ;;  %v18186_v31 = vld [vmem:[%s27211_s3 + $0xcb0] ss:$36 sps:$4 sm:$0xff]  }
 0x17e   :  { %4079 = vmatpush1.bf16.msra.mxu1 %v18114_v32  ;;  %4053 = vmatprep.subr.bf16.mxu0 %v18125_v36  ;;  %v18191_v32 = vld [vmem:[%s27211_s3 + $0x1c4] ss:$36 sps:$4 sm:$0xff]  }
 0x17f   :  { %4080 = vmatprep.subr.bf16.mxu1 %v18122_v33  ;;  %v18194_v33 = vld [vmem:[%s27211_s3 + $0xc6c] ss:$36 sps:$4 sm:$0xff]   ;;  %v18189_v36 = vld [vmem:[%s27211_s3 + $0x1c0] ss:$36 sps:$4 sm:$0xff]  }
 0x181   :  { %4054 = vmatpush2.bf16.msra.mxu0 %v18123_v38  ;;  %v18192_v38 = vld [vmem:[%s27211_s3 + $0xc68] ss:$36 sps:$4 sm:$0xff]  }
 0x182   :  { %4081 = vmatpush1.bf16.msra.mxu1 %v18120_v39  ;;  %4109 = vmatprep.subr.bf16.mxu0 %v18131_v41  ;;  %v18200_v39 = vld [vmem:[%s27211_s3 + $0xc24] ss:$36 sps:$4 sm:$0xff]  }
 0x183   :  { %4082 = vmatprep.subr.bf16.mxu1 %v18128_v40  ;;  %v18197_v40 = vld [vmem:[%s27211_s3 + $0x17c] ss:$36 sps:$4 sm:$0xff]  }
 0x184   :  { %4056 = vmatmul.mubr.bf16.vlgmr.msra.gmra.mxu0 %v21288_v7  ;;  %v18198_v41 = vld [vmem:[%s27211_s3 + $0xc20] ss:$36 sps:$4 sm:$0xff]  }
 0x185   :  { %4110 = vmatpush1.bf16.msra.mxu0 %v18129_v42  ;;  %4141 = vmatprep.mubr.bf16.mxu0 %v21476_v5  ;;  %v18195_v42 = vld [vmem:[%s27211_s3 + $0x178] ss:$36 sps:$4 sm:$0xff]  }
 0x186   :  { %4083 = vmatpush2.bf16.msra.mxu1 %v18126_v43  ;;  %4111 = vmatprep.subr.bf16.mxu0 %v18137_v45  ;;  %v18206_v43 = vld [vmem:[%s27211_s3 + $0xbdc] ss:$36 sps:$4 sm:$0xff]  }
 0x187   :  { %4084 = vmatprep.subr.bf16.mxu1 %v18134_v44  ;;  %v18203_v44 = vld [vmem:[%s27211_s3 + $0x134] ss:$36 sps:$4 sm:$0xff]  }
 0x188   :  { %v18204_v45 = vld [vmem:[%s27211_s3 + $0xbd8] ss:$36 sps:$4 sm:$0xff]  }
 0x189   :  { %4112 = vmatpush1.bf16.msra.mxu0 %v18135_v46  ;;  %v18201_v46 = vld [vmem:[%s27211_s3 + $0x130] ss:$36 sps:$4 sm:$0xff]  }
 0x18a   :  { %4085 = vmatpush2.bf16.msra.mxu1 %v18132_v48  ;;  %4113 = vmatprep.subr.bf16.mxu0 %v18143_v50  ;;  %v18212_v48 = vld [vmem:[%s27211_s3 + $0xb94] ss:$36 sps:$4 sm:$0xff]  }
 0x18b   :  { %4086 = vmatprep.subr.bf16.mxu1 %v18140_v49  ;;  %v18209_v49 = vld [vmem:[%s27211_s3 + $0xec] ss:$36 sps:$4 sm:$0xff]  }
 0x18c   :  { %v18210_v50 = vld [vmem:[%s27211_s3 + $0xb90] ss:$36 sps:$4 sm:$0xff]  }
 0x18d   :  { %4114 = vmatpush1.bf16.msra.mxu0 %v18141_v54  ;;  %v18218_v54 = vld [vmem:[%s27211_s3 + $0xb4c] ss:$36 sps:$4 sm:$0xff]  }
 0x18e   :  { %4087 = vmatpush2.bf16.msra.mxu1 %v18138_v51  ;;  %4115 = vmatprep.subr.bf16.mxu0 %v18149_v62  ;;  %v18207_v51 = vld [vmem:[%s27211_s3 + $0xe8] ss:$36 sps:$4 sm:$0xff]  }
 0x18f   :  { %4088 = vmatprep.subr.bf16.mxu1 %v18146_v61  ;;  %v18215_v61 = vld [vmem:[%s27211_s3 + $0xa4] ss:$36 sps:$4 sm:$0xff]  }
 0x190   :  { %v18216_v62 = vld [vmem:[%s27211_s3 + $0xb48] ss:$36 sps:$4 sm:$0xff]  }
 0x191   :  { %4116 = vmatpush1.bf16.msra.mxu0 %v18147_v4  ;;  %v18224_v4 = vld [vmem:[%s27211_s3 + $0x68c] ss:$36 sps:$4 sm:$0xff]  }
 0x192   :  { %4089 = vmatpush2.bf16.msra.mxu1 %v18144_v63  ;;  %4117 = vmatprep.subr.bf16.mxu0 %v18155_v9  ;;  %v18213_v63 = vld [vmem:[%s27211_s3 + $0xa0] ss:$36 sps:$4 sm:$0xff]   ;;  %v18222_v9 = vld [vmem:[%s27211_s3 + $0x688] ss:$36 sps:$4 sm:$0xff]  }
 0x193   :  { %4090 = vmatprep.subr.bf16.mxu1 %v18152_v6  ;;  %v18221_v6 = vld [vmem:[%s27211_s3 + $0x5c] ss:$36 sps:$4 sm:$0xff]  }
 0x195   :  { %4118 = vmatpush1.bf16.msra.mxu0 %v18153_v1  ;;  %v18230_v1 = vld [vmem:[%s27211_s3 + $0x644] ss:$36 sps:$4 sm:$0xff]  }
 0x196   :  { %4091 = vmatpush2.bf16.msra.mxu1 %v18150_v60  ;;  %4119 = vmatprep.subr.bf16.mxu0 %v18161_v59  ;;  %v18219_v60 = vld [vmem:[%s27211_s3 + $0x58] ss:$36 sps:$4 sm:$0xff]   ;;  %v18228_v59 = vld [vmem:[%s27211_s3 + $0x640] ss:$36 sps:$4 sm:$0xff]  }
 0x197   :  { %4092 = vmatprep.subr.bf16.mxu1 %v18158_v10  ;;  %v18227_v10 = vld [vmem:[%s27211_s3 + $0x14] ss:$36 sps:$4 sm:$0xff]  }
 0x199   :  { %4120 = vmatpush1.bf16.msra.mxu0 %v18159_v12  ;;  %v18236_v12 = vld [vmem:[%s27211_s3 + $0x5fc] ss:$36 sps:$4 sm:$0xff]  }
 0x19a   :  { %4093 = vmatpush2.bf16.msra.mxu1 %v18156_v11  ;;  %4121 = vmatprep.subr.bf16.mxu0 %v18167_v14  ;;  %v18225_v11 = vld [vmem:[%s27211_s3 + $0x10] ss:$36 sps:$4 sm:$0xff]   ;;  %v18234_v14 = vld [vmem:[%s27211_s3 + $0x5f8] ss:$36 sps:$4 sm:$0xff]  }
 0x19b   :  { %4094 = vmatprep.subr.bf16.mxu1 %v18164_v13  ;;  %v18233_v13 = vld [vmem:[%s27211_s3 + $0x44c] ss:$36 sps:$4 sm:$0xff]  }
 0x19d   :  { %4122 = vmatpush1.bf16.msra.mxu0 %v18165_v17  ;;  %v18242_v17 = vld [vmem:[%s27211_s3 + $0x5b4] ss:$36 sps:$4 sm:$0xff]  }
 0x19e   :  { %4095 = vmatpush2.bf16.msra.mxu1 %v18162_v15  ;;  %4123 = vmatprep.subr.bf16.mxu0 %v18173_v19  ;;  %v18231_v15 = vld [vmem:[%s27211_s3 + $0x448] ss:$36 sps:$4 sm:$0xff]   ;;  %v18237_v19 = vld [vmem:[%s27211_s3 + $0x400] ss:$36 sps:$4 sm:$0xff]  }
 0x19f   :  { %4096 = vmatprep.subr.bf16.mxu1 %v18170_v18  ;;  %v18239_v18 = vld [vmem:[%s27211_s3 + $0x404] ss:$36 sps:$4 sm:$0xff]  }
 0x1a1   :  { %4124 = vmatpush1.bf16.msra.mxu0 %v18171_v21  ;;  %v18245_v21 = vld [vmem:[%s27211_s3 + $0x3bc] ss:$36 sps:$4 sm:$0xff]  }
 0x1a2   :  { %4097 = vmatpush2.bf16.msra.mxu1 %v18168_v20  ;;  %4125 = vmatprep.subr.bf16.mxu0 %v18179_v23  ;;  %v18240_v20 = vld [vmem:[%s27211_s3 + $0x5b0] ss:$36 sps:$4 sm:$0xff]   ;;  %v18243_v23 = vld [vmem:[%s27211_s3 + $0x3b8] ss:$36 sps:$4 sm:$0xff]  }
 0x1a3   :  { %4166 = vmatprep.subr.bf16.mxu1 %v18176_v22  ;;  %v18248_v22 = vld [vmem:[%s27211_s3 + $0x56c] ss:$36 sps:$4 sm:$0xff]  }
 0x1a5   :  { %4099 = vmatmul.mubr.bf16.vlgmr.msra.gmra.mxu1 %v21294_v2  ;;  %4126 = vmatpush2.bf16.msra.mxu0 %v18177_v25  ;;  %v18251_v25 = vld [vmem:[%s27211_s3 + $0x374] ss:$36 sps:$4 sm:$0xff]  }
 0x1a6   :  { %4167 = vmatpush1.bf16.msra.mxu1 %v18174_v24  ;;  %4127 = vmatprep.subr.bf16.mxu0 %v18182_v26  ;;  %v18246_v24 = vld [vmem:[%s27211_s3 + $0x568] ss:$36 sps:$4 sm:$0xff]  }
 0x1a7   :  { %4184 = vmatprep.mubr.bf16.mxu1 %v27225_v16  ;;  %4195 = vmatprep.subr.bf16.mxu1 %v18185_v27  ;;  %v18254_v26 = vld [vmem:[%s27211_s3 + $0x524] ss:$36 sps:$4 sm:$0xff]   ;;  %v18249_v27 = vld [vmem:[%s27211_s3 + $0x370] ss:$36 sps:$4 sm:$0xff]  }
 0x1a9   :  { %4128 = vmatpush2.bf16.msra.mxu0 %v18180_v28  ;;  %v18252_v28 = vld [vmem:[%s27211_s3 + $0x520] ss:$36 sps:$4 sm:$0xff]  }
 0x1aa   :  { %4129 = vmatprep.subr.bf16.mxu0 %v18188_v29  ;;  %v18257_v29 = vld [vmem:[%s27211_s3 + $0x32c] ss:$36 sps:$4 sm:$0xff]  }
 0x1ad   :  { %16106 = vmatmul.mubr.msk.bf16.vlgmr.msra.gmra.mxu1 %vm3847_vm10, %v21359_v47  ;;  %4130 = vmatpush2.bf16.msra.mxu0 %v18186_v31  ;;  %v18255_v31 = vld [vmem:[%s27211_s3 + $0x328] ss:$36 sps:$4 sm:$0xff]  }
 0x1ae   :  { %4196 = vmatpush1.bf16.msra.mxu1 %v18183_v30  ;;  %4227 = vmatprep.mubr.bf16.mxu1 %v21283_v0  ;;  %v18260_v30 = vld [vmem:[%s27211_s3 + $0x4dc] ss:$36 sps:$4 sm:$0xff]  }
 0x1af   :  { %4197 = vmatprep.subr.bf16.mxu1 %v18191_v32  ;;  %4131 = vmatprep.subr.bf16.mxu0 %v18194_v33  ;;  %v18258_v32 = vld [vmem:[%s27211_s3 + $0x4d8] ss:$36 sps:$4 sm:$0xff]   ;;  %v18263_v33 = vld [vmem:[%s27211_s3 + $0x2e4] ss:$36 sps:$4 sm:$0xff]  }
 0x1b1   :  { %4132 = vmatpush2.bf16.msra.mxu0 %v18192_v38  ;;  %v18261_v38 = vld [vmem:[%s27211_s3 + $0x2e0] ss:$36 sps:$4 sm:$0xff]  }
 0x1b2   :  { %4198 = vmatpush1.bf16.msra.mxu1 %v18189_v36  ;;  %4133 = vmatprep.subr.bf16.mxu0 %v18200_v39  ;;  %v18266_v36 = vld [vmem:[%s27211_s3 + $0x494] ss:$36 sps:$4 sm:$0xff]  }
 0x1b3   :  { %4199 = vmatprep.subr.bf16.mxu1 %v18197_v40  ;;  %v18264_v39 = vld [vmem:[%s27211_s3 + $0x490] ss:$36 sps:$4 sm:$0xff]   ;;  %v18269_v40 = vld [vmem:[%s27211_s3 + $0x29c] ss:$36 sps:$4 sm:$0xff]  }
 0x1b5   :  { %4134 = vmatpush2.bf16.msra.mxu0 %v18198_v41  ;;  %v1544_v41 = vld [vmem:[%s27212_s4] sm:$0xff] }
 0x1b6   :  { %4200 = vmatpush1.bf16.msra.mxu1 %v18195_v42  ;;  %4135 = vmatprep.subr.bf16.mxu0 %v18206_v43  ;;  %v18272_v42 = vld [vmem:[%s27211_s3 + $0x8cc] ss:$36 sps:$4 sm:$0xff]   ;;  %v18267_v43 = vld [vmem:[%s27211_s3 + $0x298] ss:$36 sps:$4 sm:$0xff]  }
 0x1b7   :  { %4201 = vmatprep.subr.bf16.mxu1 %v18203_v44  ;;  %v18270_v44 = vld [vmem:[%s27211_s3 + $0x8c8] ss:$36 sps:$4 sm:$0xff]  }
 0x1b9   :  { %4136 = vmatpush2.bf16.msra.mxu0 %v18204_v45  ;;  %v1551_v45 = vrot.slane %v1544_v41, %v21233_v55  ;;  %v18329_v41 = vld [vmem:[%s27211_s3 + $0x214] ss:$36 sps:$4 sm:$0xff]  }
 0x1ba   :  { %4202 = vmatpush1.bf16.msra.mxu1 %v18201_v46  ;;  %4137 = vmatprep.subr.bf16.mxu0 %v18212_v48  ;;  %v18275_v46 = vld [vmem:[%s27211_s3 + $0x254] ss:$36 sps:$4 sm:$0xff]   ;;  %v18278_v48 = vld [vmem:[%s27211_s3 + $0x884] ss:$36 sps:$4 sm:$0xff]  }
 0x1bb   :  { %4203 = vmatprep.subr.bf16.mxu1 %v18209_v49  ;;  %v18273_v49 = vld [vmem:[%s27211_s3 + $0x250] ss:$36 sps:$4 sm:$0xff]  }
 0x1bd   :  { %4138 = vmatpush2.bf16.msra.mxu0 %v18210_v50  ;;  %v18276_v50 = vld [vmem:[%s27211_s3 + $0x880] ss:$36 sps:$4 sm:$0xff]  }
 0x1be   :  { %4204 = vmatpush1.bf16.msra.mxu1 %v18207_v51  ;;  %4139 = vmatprep.subr.bf16.mxu0 %v18218_v54  ;;  %v18284_v54 = vld [vmem:[%s27211_s3 + $0x83c] ss:$36 sps:$4 sm:$0xff]  }
 0x1bf   :  { %4205 = vmatprep.subr.bf16.mxu1 %v18215_v61 }
 0x1c1   :  { %4140 = vmatpush2.bf16.msra.mxu0 %v18216_v62 }
 0x1c2   :  { %4206 = vmatpush1.bf16.msra.mxu1 %v18213_v63  ;;  %4238 = vmatprep.subr.bf16.mxu0 %v18224_v4  ;;  %v18281_v4 = vld [vmem:[%s27211_s3 + $0xb0c] ss:$36 sps:$4 sm:$0xff]  }
 0x1c3   :  { %4207 = vmatprep.subr.bf16.mxu1 %v18221_v6 }
 0x1c4   :  { %4142 = vmatmul.mubr.bf16.vlgmr.msra.gmra.mxu0 %v21491_v3 }
 0x1c5   :  { %4239 = vmatpush1.bf16.msra.mxu0 %v18222_v9  ;;  %4270 = vmatprep.mubr.bf16.mxu0 %v21290_v8 }
 0x1c6   :  { %4208 = vmatpush1.bf16.msra.mxu1 %v18219_v60  ;;  %4240 = vmatprep.subr.bf16.mxu0 %v18230_v1  ;;  %v18279_v60 = vld [vmem:[%s27211_s3 + $0xb08] ss:$36 sps:$4 sm:$0xff]   ;;  %v18282_v1 = vld [vmem:[%s27211_s3 + $0x838] ss:$36 sps:$4 sm:$0xff]  }
 0x1c7   :  { %4209 = vmatprep.subr.bf16.mxu1 %v18227_v10 }
 0x1c9   :  { %4241 = vmatpush1.bf16.msra.mxu0 %v18228_v59  ;;  %v18287_v59 = vld [vmem:[%s27211_s3 + $0xac4] ss:$36 sps:$4 sm:$0xff]  }
 0x1ca   :  { %4210 = vmatpush1.bf16.msra.mxu1 %v18225_v11  ;;  %4242 = vmatprep.subr.bf16.mxu0 %v18236_v12  ;;  %v18290_v11 = vld [vmem:[%s27211_s3 + $0x7f4] ss:$36 sps:$4 sm:$0xff]  }
 0x1cb   :  { %4211 = vmatprep.subr.bf16.mxu1 %v18233_v13 }
 0x1cd   :  { %4243 = vmatpush1.bf16.msra.mxu0 %v18234_v14 }
 0x1ce   :  { %4212 = vmatpush2.bf16.msra.mxu1 %v18231_v15  ;;  %4244 = vmatprep.subr.bf16.mxu0 %v18242_v17  ;;  %v18285_v15 = vld [vmem:[%s27211_s3 + $0xac0] ss:$36 sps:$4 sm:$0xff]   ;;  %v18288_v17 = vld [vmem:[%s27211_s3 + $0x7f0] ss:$36 sps:$4 sm:$0xff]  }
 0x1cf   :  { %4213 = vmatprep.subr.bf16.mxu1 %v18239_v18  ;;  %v18293_v18 = vld [vmem:[%s27211_s3 + $0xa7c] ss:$36 sps:$4 sm:$0xff]  }
 0x1d1   :  { %4245 = vmatpush1.bf16.msra.mxu0 %v18240_v20  ;;  %v18291_v20 = vld [vmem:[%s27211_s3 + $0xa78] ss:$36 sps:$4 sm:$0xff]  }
 0x1d2   :  { %4214 = vmatpush2.bf16.msra.mxu1 %v18237_v19  ;;  %4246 = vmatprep.subr.bf16.mxu0 %v18248_v22  ;;  %v18296_v19 = vld [vmem:[%s27211_s3 + $0x7ac] ss:$36 sps:$4 sm:$0xff]   ;;  %v18302_v22 = vld [vmem:[%s27211_s3 + $0x764] ss:$36 sps:$4 sm:$0xff]  }
 0x1d3   :  { %4215 = vmatprep.subr.bf16.mxu1 %v18245_v21  ;;  %v18294_v21 = vld [vmem:[%s27211_s3 + $0x7a8] ss:$36 sps:$4 sm:$0xff]  }
 0x1d5   :  { %4247 = vmatpush1.bf16.msra.mxu0 %v18246_v24  ;;  %v18300_v24 = vld [vmem:[%s27211_s3 + $0x760] ss:$36 sps:$4 sm:$0xff]  }
 0x1d6   :  { %4216 = vmatpush2.bf16.msra.mxu1 %v18243_v23  ;;  %4248 = vmatprep.subr.bf16.mxu0 %v18254_v26  ;;  %v18299_v23 = vld [vmem:[%s27211_s3 + $0xa34] ss:$36 sps:$4 sm:$0xff]   ;;  %v18308_v26 = vld [vmem:[%s27211_s3 + $0x71c] ss:$36 sps:$4 sm:$0xff]  }
 0x1d7   :  { %4217 = vmatprep.subr.bf16.mxu1 %v18251_v25  ;;  %v18297_v25 = vld [vmem:[%s27211_s3 + $0xa30] ss:$36 sps:$4 sm:$0xff]  }
 0x1d9   :  { %4249 = vmatpush1.bf16.msra.mxu0 %v18252_v28  ;;  %v18306_v28 = vld [vmem:[%s27211_s3 + $0x718] ss:$36 sps:$4 sm:$0xff]  }
 0x1da   :  { %4218 = vmatpush2.bf16.msra.mxu1 %v18249_v27  ;;  %4250 = vmatprep.subr.bf16.mxu0 %v18260_v30  ;;  %v18305_v27 = vld [vmem:[%s27211_s3 + $0x9ec] ss:$36 sps:$4 sm:$0xff]   ;;  %v18314_v30 = vld [vmem:[%s27211_s3 + $0x6d4] ss:$36 sps:$4 sm:$0xff]  }
 0x1db   :  { %4219 = vmatprep.subr.bf16.mxu1 %v18257_v29  ;;  %v18303_v29 = vld [vmem:[%s27211_s3 + $0x9e8] ss:$36 sps:$4 sm:$0xff]  }
 0x1dd   :  { %4251 = vmatpush1.bf16.msra.mxu0 %v18258_v32  ;;  %v18312_v32 = vld [vmem:[%s27211_s3 + $0x6d0] ss:$36 sps:$4 sm:$0xff]  }
 0x1de   :  { %4220 = vmatpush2.bf16.msra.mxu1 %v18255_v31  ;;  %4252 = vmatprep.subr.bf16.mxu0 %v18266_v36  ;;  %v18311_v31 = vld [vmem:[%s27211_s3 + $0x9a4] ss:$36 sps:$4 sm:$0xff]   ;;  %v18323_v36 = vld [vmem:[%s27211_s3 + $0xd94] ss:$36 sps:$4 sm:$0xff]  }
 0x1df   :  { %4221 = vmatprep.subr.bf16.mxu1 %v18263_v33  ;;  %v18309_v33 = vld [vmem:[%s27211_s3 + $0x9a0] ss:$36 sps:$4 sm:$0xff]  }
 0x1e1   :  { %4253 = vmatpush1.bf16.msra.mxu0 %v18264_v39  ;;  %v18321_v39 = vld [vmem:[%s27211_s3 + $0xd90] ss:$36 sps:$4 sm:$0xff]  }
 0x1e2   :  { %4222 = vmatpush2.bf16.msra.mxu1 %v18261_v38  ;;  %4254 = vmatprep.subr.bf16.mxu0 %v18272_v42  ;;  %v18317_v38 = vld [vmem:[%s27211_s3 + $0x95c] ss:$36 sps:$4 sm:$0xff]   ;;  %v18320_v42 = vld [vmem:[%s27211_s3 + $0x914] ss:$36 sps:$4 sm:$0xff]  }
 0x1e3   :  { %4223 = vmatprep.subr.bf16.mxu1 %v18269_v40  ;;  %v18315_v40 = vld [vmem:[%s27211_s3 + $0x958] ss:$36 sps:$4 sm:$0xff]  }
 0x1e4   :  { %v3885_v51 = vpop.f32.mrf.mxu1 }
 0x1e5   :  { %4255 = vmatpush2.bf16.msra.mxu0 %v18270_v44  ;;  %v3886_v61 = vadd.f32 %v3885_v51, %v1551_v45  ;;  %v3928_v62 = vpop.f32.mrf.mxu0  ;;  %v18326_v44 = vld [vmem:[%s27211_s3 + $0xd4c] ss:$36 sps:$4 sm:$0xff]  }
 0x1e6   :  { %4224 = vmatpush2.bf16.msra.mxu1 %v18267_v43  ;;  %4256 = vmatprep.subr.bf16.mxu0 %v18278_v48  ;;  %v21896_v63 = vpop.f32.mrf.mxu1  ;;  %v18318_v43 = vld [vmem:[%s27211_s3 + $0x910] ss:$36 sps:$4 sm:$0xff]   ;;  %v18333_v51 = vld [vmem:[%s27211_s3 + $0x1c8] ss:$36 sps:$4 sm:$0xff]  }
 0x1e7   :  { %4225 = vmatprep.subr.bf16.mxu1 %v18275_v46  ;;  %v21901_v6 = vadd.f32 %v3928_v62, %v3886_v61  ;;  %v21903_v9 = vpop.f32.mrf.mxu0  ;;  %v18327_v46 = vld [vmem:[%s27211_s3 + $0x210] ss:$36 sps:$4 sm:$0xff]   ;;  %v18338_v61 = vld [vmem:[%s27211_s3 + $0xcbc] ss:$36 sps:$4 sm:$0xff]  }
 0x1e8   :  { %v3889_v10 = vpop.f32.mrf.mxu1  ;;  %v18335_v48 = vld [vmem:[%s27211_s3 + $0x1cc] ss:$36 sps:$4 sm:$0xff]   ;;  %v18336_v62 = vld [vmem:[%s27211_s3 + $0xcb8] ss:$36 sps:$4 sm:$0xff]  }
 0x1e9   :  { %4257 = vmatpush2.bf16.msra.mxu0 %v18276_v50  ;;  %v3890_v12 = vadd.f32 %v3889_v10, %v1551_v45  ;;  %v3932_v13 = vpop.f32.mrf.mxu0  ;;  %v18324_v45 = vld [vmem:[%s27211_s3 + $0xd48] ss:$36 sps:$4 sm:$0xff]   ;;  %v18330_v50 = vld [vmem:[%s27211_s3 + $0xd00] ss:$36 sps:$4 sm:$0xff]   ;;  %v18345_v10 = vld [vmem:[%s27211_s3 + $0x138] ss:$36 sps:$4 sm:$0xff]  }
 0x1ea   :  { %4226 = vmatpush2.bf16.msra.mxu1 %v18273_v49  ;;  %4258 = vmatprep.subr.bf16.mxu0 %v18284_v54  ;;  %v18332_v49 = vld [vmem:[%s27211_s3 + $0xd04] ss:$36 sps:$4 sm:$0xff]  }
 0x1eb   :  { %4281 = vmatprep.subr.bf16.mxu1 %v18281_v4  ;;  %v21917_v14 = vadd.f32 %v3932_v13, %v3890_v12  ;;  %v18341_v54 = vld [vmem:[%s27211_s3 + $0x184] ss:$36 sps:$4 sm:$0xff]   ;;  %v18350_v12 = vld [vmem:[%s27211_s3 + $0xc2c] ss:$36 sps:$4 sm:$0xff]  }
 0x1ec   :  { %v18339_v4 = vld [vmem:[%s27211_s3 + $0x180] ss:$36 sps:$4 sm:$0xff]   ;;  %v18351_v13 = vld [vmem:[%s27211_s3 + $0xf0] ss:$36 sps:$4 sm:$0xff]  }
 0x1ed   :  { %4228 = vmatmul.mubr.bf16.vlgmr.msra.gmra.mxu1 %v21288_v7  ;;  %4259 = vmatpush2.bf16.msra.mxu0 %v18282_v1  ;;  %v18344_v1 = vld [vmem:[%s27211_s3 + $0xc74] ss:$36 sps:$4 sm:$0xff]  }
 0x1ee   :  { %4282 = vmatpush1.bf16.msra.mxu1 %v18279_v60  ;;  %4313 = vmatprep.mubr.bf16.mxu1 %v21476_v5  ;;  %v18347_v60 = vld [vmem:[%s27211_s3 + $0x13c] ss:$36 sps:$4 sm:$0xff]  }
 0x1ef   :  { %4283 = vmatprep.subr.bf16.mxu1 %v18287_v59  ;;  %4260 = vmatprep.subr.bf16.mxu0 %v18290_v11  ;;  %v18342_v59 = vld [vmem:[%s27211_s3 + $0xc70] ss:$36 sps:$4 sm:$0xff]  }
 0x1f0   :  { %v18353_v11 = vld [vmem:[%s27211_s3 + $0xf4] ss:$36 sps:$4 sm:$0xff]  }
 0x1f1   :  { %4261 = vmatpush2.bf16.msra.mxu0 %v18288_v17  ;;  %v18359_v17 = vld [vmem:[%s27211_s3 + $0xac] ss:$36 sps:$4 sm:$0xff]  }
 0x1f2   :  { %4284 = vmatpush1.bf16.msra.mxu1 %v18285_v15  ;;  %4262 = vmatprep.subr.bf16.mxu0 %v18296_v19  ;;  %v18348_v15 = vld [vmem:[%s27211_s3 + $0xc28] ss:$36 sps:$4 sm:$0xff]  }
 0x1f3   :  { %4285 = vmatprep.subr.bf16.mxu1 %v18293_v18  ;;  %v18356_v18 = vld [vmem:[%s27211_s3 + $0xbe4] ss:$36 sps:$4 sm:$0xff]  }
 0x1f4   :  { %v18357_v19 = vld [vmem:[%s27211_s3 + $0xa8] ss:$36 sps:$4 sm:$0xff]  }
 0x1f5   :  { %4263 = vmatpush2.bf16.msra.mxu0 %v18294_v21  ;;  %v18365_v21 = vld [vmem:[%s27211_s3 + $0x64] ss:$36 sps:$4 sm:$0xff]  }
 0x1f6   :  { %4286 = vmatpush1.bf16.msra.mxu1 %v18291_v20  ;;  %4264 = vmatprep.subr.bf16.mxu0 %v18302_v22  ;;  %v18354_v20 = vld [vmem:[%s27211_s3 + $0xbe0] ss:$36 sps:$4 sm:$0xff]  }
 0x1f7   :  { %4287 = vmatprep.subr.bf16.mxu1 %v18299_v23  ;;  %v18362_v22 = vld [vmem:[%s27211_s3 + $0xb9c] ss:$36 sps:$4 sm:$0xff]   ;;  %v22076_v23 = vpop.f32.mrf.mxu0 }
 0x1f9   :  { %4265 = vmatpush2.bf16.msra.mxu0 %v18300_v24  ;;  %v18363_v24 = vld [vmem:[%s27211_s3 + $0x60] ss:$36 sps:$4 sm:$0xff]  }
 0x1fa   :  { %4288 = vmatpush1.bf16.msra.mxu1 %v18297_v25  ;;  %4266 = vmatprep.subr.bf16.mxu0 %v18308_v26  ;;  %v18360_v25 = vld [vmem:[%s27211_s3 + $0xb98] ss:$36 sps:$4 sm:$0xff]  }
 0x1fb   :  { %4289 = vmatprep.subr.bf16.mxu1 %v18305_v27  ;;  %v18371_v26 = vld [vmem:[%s27211_s3 + $0x1c] ss:$36 sps:$4 sm:$0xff]   ;;  %v22087_v27 = vpop.f32.mrf.mxu1 }
 0x1fd   :  { %4267 = vmatpush2.bf16.msra.mxu0 %v18306_v28 }
 0x1fe   :  { %4290 = vmatpush1.bf16.msra.mxu1 %v18303_v29  ;;  %4268 = vmatprep.subr.bf16.mxu0 %v18314_v30  ;;  %v18368_v29 = vld [vmem:[%s27211_s3 + $0xb54] ss:$36 sps:$4 sm:$0xff]  }
 0x1ff   :  { %4291 = vmatprep.subr.bf16.mxu1 %v18311_v31  ;;  %v18369_v31 = vld [vmem:[%s27211_s3 + $0x18] ss:$36 sps:$4 sm:$0xff]  }
 0x201   :  { %4269 = vmatpush2.bf16.msra.mxu0 %v18312_v32 }
 0x202   :  { %4292 = vmatpush1.bf16.msra.mxu1 %v18309_v33  ;;  %4338 = vmatprep.subr.bf16.mxu0 %v18323_v36  ;;  %v18366_v33 = vld [vmem:[%s27211_s3 + $0xb50] ss:$36 sps:$4 sm:$0xff]  }
 0x203   :  { %4293 = vmatprep.subr.bf16.mxu1 %v18317_v38  ;;  %v18377_v36 = vld [vmem:[%s27211_s3 + $0x454] ss:$36 sps:$4 sm:$0xff]  }
 0x204   :  { %4271 = vmatmul.mubr.bf16.vlgmr.msra.gmra.mxu0 %v21294_v2  ;;  %v4014_v28 = vpop.f32.mrf.mxu0 }
 0x205   :  { %4339 = vmatpush1.bf16.msra.mxu0 %v18321_v39  ;;  %4356 = vmatprep.mubr.bf16.mxu0 %v27225_v16 }
 0x206   :  { %4294 = vmatpush1.bf16.msra.mxu1 %v18315_v40  ;;  %4367 = vmatprep.subr.bf16.mxu0 %v18329_v41  ;;  %v22102_v38 = vpop.f32.mrf.mxu0  ;;  %v18374_v40 = vld [vmem:[%s27211_s3 + $0x694] ss:$36 sps:$4 sm:$0xff]  }
 0x207   :  { %4295 = vmatprep.subr.bf16.mxu1 %v18320_v42 }
 0x20a   :  { %4296 = vmatpush1.bf16.msra.mxu1 %v18318_v43  ;;  %v18375_v43 = vld [vmem:[%s27211_s3 + $0x450] ss:$36 sps:$4 sm:$0xff]  }
 0x20b   :  { %4297 = vmatprep.subr.bf16.mxu1 %v18326_v44 }
 0x20c   :  { %16107 = vmatmul.mubr.msk.bf16.vlgmr.msra.gmra.mxu0 %vm3847_vm10, %v21359_v47 }
 0x20d   :  { %4368 = vmatpush1.bf16.msra.mxu0 %v18327_v46  ;;  %4399 = vmatprep.mubr.bf16.mxu0 %v21283_v0  ;;  %v18383_v46 = vld [vmem:[%s27211_s3 + $0x40c] ss:$36 sps:$4 sm:$0xff]  }
 0x20e   :  { %4298 = vmatpush2.bf16.msra.mxu1 %v18324_v45  ;;  %4369 = vmatprep.subr.bf16.mxu0 %v18335_v48  ;;  %v18380_v45 = vld [vmem:[%s27211_s3 + $0x64c] ss:$36 sps:$4 sm:$0xff]   ;;  %v4018_v48 = vpop.f32.mrf.mxu0 }
 0x20f   :  { %4299 = vmatprep.subr.bf16.mxu1 %v18332_v49  ;;  %v18381_v49 = vld [vmem:[%s27211_s3 + $0x408] ss:$36 sps:$4 sm:$0xff]  }
 0x211   :  { %4370 = vmatpush1.bf16.msra.mxu0 %v18333_v51  ;;  %v18389_v51 = vld [vmem:[%s27211_s3 + $0x3c4] ss:$36 sps:$4 sm:$0xff]  }
 0x212   :  { %4300 = vmatpush2.bf16.msra.mxu1 %v18330_v50  ;;  %4371 = vmatprep.subr.bf16.mxu0 %v18341_v54 }
 0x213   :  { %4301 = vmatprep.subr.bf16.mxu1 %v18338_v61 }
 0x215   :  { %4372 = vmatpush1.bf16.msra.mxu0 %v18339_v4 }
 0x216   :  { %4302 = vmatpush2.bf16.msra.mxu1 %v18336_v62  ;;  %4373 = vmatprep.subr.bf16.mxu0 %v18347_v60  ;;  %v18386_v62 = vld [vmem:[%s27211_s3 + $0x604] ss:$36 sps:$4 sm:$0xff]  }
 0x217   :  { %4303 = vmatprep.subr.bf16.mxu1 %v18344_v1  ;;  %v18384_v60 = vld [vmem:[%s27211_s3 + $0x600] ss:$36 sps:$4 sm:$0xff]  }
 0x218   :  { %v18387_v1 = vld [vmem:[%s27211_s3 + $0x3c0] ss:$36 sps:$4 sm:$0xff]  }
 0x219   :  { %4374 = vmatpush1.bf16.msra.mxu0 %v18345_v10  ;;  %v18395_v10 = vld [vmem:[%s27211_s3 + $0x37c] ss:$36 sps:$4 sm:$0xff]  }
 0x21a   :  { %4304 = vmatpush2.bf16.msra.mxu1 %v18342_v59  ;;  %4375 = vmatprep.subr.bf16.mxu0 %v18353_v11  ;;  %v18392_v59 = vld [vmem:[%s27211_s3 + $0x5bc] ss:$36 sps:$4 sm:$0xff]  }
 0x21b   :  { %4305 = vmatprep.subr.bf16.mxu1 %v18350_v12  ;;  %v18390_v11 = vld [vmem:[%s27211_s3 + $0x5b8] ss:$36 sps:$4 sm:$0xff]  }
 0x21c   :  { %v18393_v12 = vld [vmem:[%s27211_s3 + $0x378] ss:$36 sps:$4 sm:$0xff]  }
 0x21d   :  { %4376 = vmatpush1.bf16.msra.mxu0 %v18351_v13  ;;  %v18401_v13 = vld [vmem:[%s27211_s3 + $0x334] ss:$36 sps:$4 sm:$0xff]  }
 0x21e   :  { %4306 = vmatpush2.bf16.msra.mxu1 %v18348_v15  ;;  %4377 = vmatprep.subr.bf16.mxu0 %v18359_v17  ;;  %v18398_v15 = vld [vmem:[%s27211_s3 + $0x574] ss:$36 sps:$4 sm:$0xff]  }
 0x21f   :  { %4307 = vmatprep.subr.bf16.mxu1 %v18356_v18  ;;  %v18396_v17 = vld [vmem:[%s27211_s3 + $0x570] ss:$36 sps:$4 sm:$0xff]  }
 0x220   :  { %v18399_v18 = vld [vmem:[%s27211_s3 + $0x330] ss:$36 sps:$4 sm:$0xff]  }
 0x221   :  { %4378 = vmatpush1.bf16.msra.mxu0 %v18357_v19  ;;  %v18404_v19 = vld [vmem:[%s27211_s3 + $0x52c] ss:$36 sps:$4 sm:$0xff]  }
 0x222   :  { %4308 = vmatpush2.bf16.msra.mxu1 %v18354_v20  ;;  %4379 = vmatprep.subr.bf16.mxu0 %v18365_v21  ;;  %v18407_v20 = vld [vmem:[%s27211_s3 + $0x2ec] ss:$36 sps:$4 sm:$0xff]  }
 0x223   :  { %4309 = vmatprep.subr.bf16.mxu1 %v18362_v22  ;;  %v18402_v21 = vld [vmem:[%s27211_s3 + $0x528] ss:$36 sps:$4 sm:$0xff]  }
 0x224   :  { %v18405_v22 = vld [vmem:[%s27211_s3 + $0x2e8] ss:$36 sps:$4 sm:$0xff]  }
 0x225   :  { %v3971_v30 = vpop.f32.mrf.mxu1  ;;  %4380 = vmatpush1.bf16.msra.mxu0 %v18363_v24  ;;  %v18410_v24 = vld [vmem:[%s27211_s3 + $0x4e4] ss:$36 sps:$4 sm:$0xff]  }
 0x226   :  { %4310 = vmatpush2.bf16.msra.mxu1 %v18360_v25  ;;  %v3972_v32 = vadd.f32 %v3971_v30, %v21901_v6  ;;  %4381 = vmatprep.subr.bf16.mxu0 %v18371_v26  ;;  %v18372_v6 = vld [vmem:[%s27211_s3 + $0x690] ss:$36 sps:$4 sm:$0xff]   ;;  %v18413_v25 = vld [vmem:[%s27211_s3 + $0x2a4] ss:$36 sps:$4 sm:$0xff]   ;;  %v18419_v30 = vld [vmem:[%s27211_s3 + $0x25c] ss:$36 sps:$4 sm:$0xff]  }
 0x227   :  { %v22104_v39 = vpop.f32.mrf.mxu1  ;;  %4311 = vmatprep.subr.bf16.mxu1 %v18368_v29  ;;  %v18408_v26 = vld [vmem:[%s27211_s3 + $0x4e0] ss:$36 sps:$4 sm:$0xff]  }
 0x228   :  { %v4015_v41 = vadd.f32 %v4014_v28, %v3972_v32  ;;  %v18411_v28 = vld [vmem:[%s27211_s3 + $0x2a0] ss:$36 sps:$4 sm:$0xff]   ;;  %v18417_v32 = vld [vmem:[%s27211_s3 + $0x258] ss:$36 sps:$4 sm:$0xff]  }
 0x229   :  { %v3975_v42 = vpop.f32.mrf.mxu1  ;;  %4382 = vmatpush1.bf16.msra.mxu0 %v18369_v31  ;;  %v18416_v29 = vld [vmem:[%s27211_s3 + $0x49c] ss:$36 sps:$4 sm:$0xff]  }
 0x22a   :  { %4312 = vmatpush2.bf16.msra.mxu1 %v18366_v33  ;;  %v3976_v44 = vadd.f32 %v3975_v42, %v21917_v14  ;;  %4383 = vmatprep.subr.bf16.mxu0 %v18377_v36  ;;  %v18378_v14 = vld [vmem:[%s27211_s3 + $0x648] ss:$36 sps:$4 sm:$0xff]   ;;  %v4703_v54 = vmax.f32 %v4015_v41, 0.0  ;;  %v18414_v31 = vld [vmem:[%s27211_s3 + $0x498] ss:$36 sps:$4 sm:$0xff]  }
 0x22b   :  { %4410 = vmatprep.subr.bf16.mxu1 %v18374_v40  ;;  %v18422_v33 = vld [vmem:[%s27211_s3 + $0x8d4] ss:$36 sps:$4 sm:$0xff]   ;;  %v18431_v42 = vld [vmem:[%s27211_s3 + $0xacc] ss:$36 sps:$4 sm:$0xff]  }
 0x22c   :  { %v4019_v50 = vadd.f32 %v4018_v48, %v3976_v44  ;;  %v18425_v36 = vld [vmem:[%s27211_s3 + $0xb14] ss:$36 sps:$4 sm:$0xff]   ;;  %v18429_v44 = vld [vmem:[%s27211_s3 + $0xac8] ss:$36 sps:$4 sm:$0xff]   ;;  %v18432_v48 = vld [vmem:[%s27211_s3 + $0x840] ss:$36 sps:$4 sm:$0xff]  }
 0x22d   :  { %4314 = vmatmul.mubr.bf16.vlgmr.msra.gmra.mxu1 %v21491_v3  ;;  %4384 = vmatpush2.bf16.msra.mxu0 %v18375_v43  ;;  %v18420_v40 = vld [vmem:[%s27211_s3 + $0x8d0] ss:$36 sps:$4 sm:$0xff]   ;;  %v18426_v43 = vld [vmem:[%s27211_s3 + $0x888] ss:$36 sps:$4 sm:$0xff]  }
 0x22e   :  { %v4712_v61 = vmax.f32 %v4019_v50, 0.0  ;;  %4411 = vmatpush1.bf16.msra.mxu1 %v18372_v6  ;;  %4442 = vmatprep.mubr.bf16.mxu1 %v21290_v8  ;;  %v18423_v41 = vld [vmem:[%s27211_s3 + $0xb10] ss:$36 sps:$4 sm:$0xff]   ;;  %v18440_v50 = vld [vmem:[%s27211_s3 + $0x7fc] ss:$36 sps:$4 sm:$0xff]  }
 0x22f   :  { %4412 = vmatprep.subr.bf16.mxu1 %v18380_v45  ;;  %4385 = vmatprep.subr.bf16.mxu0 %v18383_v46  ;;  %v18428_v6 = vld [vmem:[%s27211_s3 + $0x88c] ss:$36 sps:$4 sm:$0xff]   ;;  %v18434_v45 = vld [vmem:[%s27211_s3 + $0x844] ss:$36 sps:$4 sm:$0xff]  }
 0x230   :  { %v22136_v4 = vpack.c.bf16 %v4712_v61, %v4703_v54  ;;  %v18437_v46 = vld [vmem:[%s27211_s3 + $0xa84] ss:$36 sps:$4 sm:$0xff]   ;;  %v18441_v54 = vld [vmem:[%s27211_s3 + $0xa38] ss:$36 sps:$4 sm:$0xff]  }
 0x231   :  { %4386 = vmatpush2.bf16.msra.mxu0 %v18381_v49  ;;  %v18435_v49 = vld [vmem:[%s27211_s3 + $0xa80] ss:$36 sps:$4 sm:$0xff]   ;;  %v18446_v61 = vld [vmem:[%s27211_s3 + $0x7b4] ss:$36 sps:$4 sm:$0xff]  }
 0x232   :  { %4413 = vmatpush1.bf16.msra.mxu1 %v18378_v14  ;;  %4387 = vmatprep.subr.bf16.mxu0 %v18389_v51  ;;  %v18443_v14 = vld [vmem:[%s27211_s3 + $0xa3c] ss:$36 sps:$4 sm:$0xff]  }
 0x233   :  { %4414 = vmatprep.subr.bf16.mxu1 %v18386_v62  ;;  %v18438_v51 = vld [vmem:[%s27211_s3 + $0x7f8] ss:$36 sps:$4 sm:$0xff]  }
 0x234   :  { %v18449_v62 = vld [vmem:[%s27211_s3 + $0x9f4] ss:$36 sps:$4 sm:$0xff]  }
 0x235   :  { %4388 = vmatpush2.bf16.msra.mxu0 %v18387_v1  ;;  %v18447_v1 = vld [vmem:[%s27211_s3 + $0x9f0] ss:$36 sps:$4 sm:$0xff]  }
 0x236   :  { %4415 = vmatpush1.bf16.msra.mxu1 %v18384_v60  ;;  %4389 = vmatprep.subr.bf16.mxu0 %v18395_v10  ;;  %v18444_v60 = vld [vmem:[%s27211_s3 + $0x7b0] ss:$36 sps:$4 sm:$0xff]  }
 0x237   :  { %4416 = vmatprep.subr.bf16.mxu1 %v18392_v59  ;;  %v18452_v10 = vld [vmem:[%s27211_s3 + $0x76c] ss:$36 sps:$4 sm:$0xff]  }
 0x238   :  { %v18455_v59 = vld [vmem:[%s27211_s3 + $0x9ac] ss:$36 sps:$4 sm:$0xff]  }
 0x239   :  { %4390 = vmatpush2.bf16.msra.mxu0 %v18393_v12  ;;  %v18450_v12 = vld [vmem:[%s27211_s3 + $0x768] ss:$36 sps:$4 sm:$0xff]  }
 0x23a   :  { %4417 = vmatpush1.bf16.msra.mxu1 %v18390_v11  ;;  %4391 = vmatprep.subr.bf16.mxu0 %v18401_v13  ;;  %v22272_v11 = vpop.f32.mrf.mxu0 }
 0x23b   :  { %4418 = vmatprep.subr.bf16.mxu1 %v18398_v15  ;;  %v18453_v15 = vld [vmem:[%s27211_s3 + $0x9a8] ss:$36 sps:$4 sm:$0xff]  }
 0x23d   :  { %4392 = vmatpush2.bf16.msra.mxu0 %v18399_v18  ;;  %v18461_v18 = vld [vmem:[%s27211_s3 + $0x964] ss:$36 sps:$4 sm:$0xff]  }
 0x23e   :  { %4419 = vmatpush1.bf16.msra.mxu1 %v18396_v17  ;;  %4393 = vmatprep.subr.bf16.mxu0 %v18407_v20  ;;  %v18458_v17 = vld [vmem:[%s27211_s3 + $0x724] ss:$36 sps:$4 sm:$0xff]  }
 0x23f   :  { %4420 = vmatprep.subr.bf16.mxu1 %v18404_v19  ;;  %v22289_v19 = vld [vmem:[%s27212_s4] sm:$0xff] }
 0x240   :  { %v1559_v20 = vrot.slane %v22289_v19, %v21236_v56 }
 0x241   :  { %4394 = vmatpush2.bf16.msra.mxu0 %v18405_v22 }
 0x242   :  { %4421 = vmatpush1.bf16.msra.mxu1 %v18402_v21  ;;  %4395 = vmatprep.subr.bf16.mxu0 %v18413_v25  ;;  %v18456_v21 = vld [vmem:[%s27211_s3 + $0x720] ss:$36 sps:$4 sm:$0xff]  }
 0x243   :  { %4422 = vmatprep.subr.bf16.mxu1 %v18410_v24  ;;  %v18459_v24 = vld [vmem:[%s27211_s3 + $0x960] ss:$36 sps:$4 sm:$0xff]  }
 0x244   :  { %v4057_v13 = vpop.f32.mrf.mxu0  ;;  %v18464_v25 = vld [vmem:[%s27211_s3 + $0x6dc] ss:$36 sps:$4 sm:$0xff]  }
 0x245   :  { %4396 = vmatpush2.bf16.msra.mxu0 %v18411_v28  ;;  %v22307_v28 = vpop.f32.mrf.mxu1 }
 0x246   :  { %4423 = vmatpush1.bf16.msra.mxu1 %v18408_v26  ;;  %4397 = vmatprep.subr.bf16.mxu0 %v18419_v30  ;;  %v22296_v22 = vpop.f32.mrf.mxu0  ;;  %v18467_v26 = vld [vmem:[%s27211_s3 + $0x91c] ss:$36 sps:$4 sm:$0xff]  }
 0x247   :  { %4424 = vmatprep.subr.bf16.mxu1 %v18416_v29  ;;  %v4058_v29 = vadd.f32 %v4057_v13, %v1559_v20  ;;  %v18462_v30 = vld [vmem:[%s27211_s3 + $0x6d8] ss:$36 sps:$4 sm:$0xff]   ;;  %v18489_v13 = vld [vmem:[%s27211_s3 + $0xc30] ss:$36 sps:$4 sm:$0xff]  }
 0x249   :  { %4398 = vmatpush2.bf16.msra.mxu0 %v18417_v32 }
 0x24a   :  { %4425 = vmatpush1.bf16.msra.mxu1 %v18414_v31  ;;  %4453 = vmatprep.subr.bf16.mxu0 %v18425_v36  ;;  %v4061_v31 = vpop.f32.mrf.mxu0 }
 0x24b   :  { %4426 = vmatprep.subr.bf16.mxu1 %v18422_v33  ;;  %v18465_v33 = vld [vmem:[%s27211_s3 + $0x918] ss:$36 sps:$4 sm:$0xff]  }
 0x24c   :  { %4400 = vmatmul.mubr.bf16.vlgmr.msra.gmra.mxu0 %v21288_v7 }
 0x24d   :  { %4454 = vmatpush1.bf16.msra.mxu0 %v18423_v41  ;;  %4485 = vmatprep.mubr.bf16.mxu0 %v21476_v5  ;;  %v18473_v41 = vld [vmem:[%s27211_s3 + $0xd54] ss:$36 sps:$4 sm:$0xff]  }
 0x24e   :  { %4427 = vmatpush2.bf16.msra.mxu1 %v18420_v40  ;;  %4455 = vmatprep.subr.bf16.mxu0 %v18431_v42  ;;  %v18470_v40 = vld [vmem:[%s27211_s3 + $0xd9c] ss:$36 sps:$4 sm:$0xff]   ;;  %v4062_v42 = vadd.f32 %v4061_v31, %v1559_v20  ;;  %v18502_v31 = vld [vmem:[%s27211_s3 + $0x2f0] ss:$36 sps:$4 sm:$0xff]  }
 0x24f   :  { %4428 = vmatprep.subr.bf16.mxu1 %v18428_v6 }
 0x251   :  { %4456 = vmatpush1.bf16.msra.mxu0 %v18429_v44 }
 0x252   :  { %4429 = vmatpush2.bf16.msra.mxu1 %v18426_v43  ;;  %4457 = vmatprep.subr.bf16.mxu0 %v18437_v46  ;;  %v18468_v43 = vld [vmem:[%s27211_s3 + $0xd98] ss:$36 sps:$4 sm:$0xff]  }
 0x253   :  { %4430 = vmatprep.subr.bf16.mxu1 %v18434_v45  ;;  %v18471_v45 = vld [vmem:[%s27211_s3 + $0xd50] ss:$36 sps:$4 sm:$0xff]  }
 0x255   :  { %4458 = vmatpush1.bf16.msra.mxu0 %v18435_v49  ;;  %v18477_v49 = vld [vmem:[%s27211_s3 + $0x458] ss:$36 sps:$4 sm:$0xff]  }
 0x256   :  { %4431 = vmatpush2.bf16.msra.mxu1 %v18432_v48  ;;  %4459 = vmatprep.subr.bf16.mxu0 %v18443_v14  ;;  %v18476_v48 = vld [vmem:[%s27211_s3 + $0xd0c] ss:$36 sps:$4 sm:$0xff]   ;;  %v18481_v14 = vld [vmem:[%s27211_s3 + $0xcc4] ss:$36 sps:$4 sm:$0xff]  }
 0x257   :  { %4432 = vmatprep.subr.bf16.mxu1 %v18440_v50  ;;  %v18474_v50 = vld [vmem:[%s27211_s3 + $0xd08] ss:$36 sps:$4 sm:$0xff]  }
 0x259   :  { %4460 = vmatpush1.bf16.msra.mxu0 %v18441_v54  ;;  %v18479_v54 = vld [vmem:[%s27211_s3 + $0xcc0] ss:$36 sps:$4 sm:$0xff]  }
 0x25a   :  { %4433 = vmatpush2.bf16.msra.mxu1 %v18438_v51  ;;  %4461 = vmatprep.subr.bf16.mxu0 %v18449_v62  ;;  %v18478_v51 = vld [vmem:[%s27211_s3 + $0x218] ss:$36 sps:$4 sm:$0xff]  }
 0x25b   :  { %4434 = vmatprep.subr.bf16.mxu1 %v18446_v61  ;;  %v18482_v61 = vld [vmem:[%s27211_s3 + $0x410] ss:$36 sps:$4 sm:$0xff]   ;;  %v18486_v62 = vld [vmem:[%s27211_s3 + $0xc7c] ss:$36 sps:$4 sm:$0xff]  }
 0x25d   :  { %4462 = vmatpush1.bf16.msra.mxu0 %v18447_v1  ;;  %v18483_v1 = vld [vmem:[%s27211_s3 + $0x1d0] ss:$36 sps:$4 sm:$0xff]  }
 0x25e   :  { %4435 = vmatpush2.bf16.msra.mxu1 %v18444_v60  ;;  %4463 = vmatprep.subr.bf16.mxu0 %v18455_v59  ;;  %v18484_v60 = vld [vmem:[%s27211_s3 + $0xc78] ss:$36 sps:$4 sm:$0xff]   ;;  %v18487_v59 = vld [vmem:[%s27211_s3 + $0x3c8] ss:$36 sps:$4 sm:$0xff]  }
 0x25f   :  { %4436 = vmatprep.subr.bf16.mxu1 %v18452_v10  ;;  %v18491_v10 = vld [vmem:[%s27211_s3 + $0xc34] ss:$36 sps:$4 sm:$0xff]  }
 0x261   :  { %4464 = vmatpush1.bf16.msra.mxu0 %v18453_v15  ;;  %v18496_v15 = vld [vmem:[%s27211_s3 + $0xbec] ss:$36 sps:$4 sm:$0xff]  }
 0x262   :  { %4437 = vmatpush2.bf16.msra.mxu1 %v18450_v12  ;;  %4465 = vmatprep.subr.bf16.mxu0 %v18461_v18  ;;  %v18488_v12 = vld [vmem:[%s27211_s3 + $0x188] ss:$36 sps:$4 sm:$0xff]   ;;  %v18493_v18 = vld [vmem:[%s27211_s3 + $0x140] ss:$36 sps:$4 sm:$0xff]  }
 0x263   :  { %4438 = vmatprep.subr.bf16.mxu1 %v18458_v17  ;;  %v18494_v17 = vld [vmem:[%s27211_s3 + $0xbe8] ss:$36 sps:$4 sm:$0xff]  }
 0x265   :  { %v4100_v32 = vpop.f32.mrf.mxu1  ;;  %4466 = vmatpush1.bf16.msra.mxu0 %v18459_v24  ;;  %v18501_v24 = vld [vmem:[%s27211_s3 + $0xba4] ss:$36 sps:$4 sm:$0xff]  }
 0x266   :  { %v22315_v36 = vadd.f32 %v4100_v32, %v4058_v29  ;;  %4439 = vmatpush2.bf16.msra.mxu1 %v18456_v21  ;;  %4467 = vmatprep.subr.bf16.mxu0 %v18467_v26  ;;  %v18497_v21 = vld [vmem:[%s27211_s3 + $0x338] ss:$36 sps:$4 sm:$0xff]   ;;  %v22406_v29 = vpop.f32.mrf.mxu0 }
 0x267   :  { %v22323_v6 = vpop.f32.mrf.mxu1  ;;  %4440 = vmatprep.subr.bf16.mxu1 %v18464_v25  ;;  %v18499_v25 = vld [vmem:[%s27211_s3 + $0xba0] ss:$36 sps:$4 sm:$0xff]   ;;  %v18498_v26 = vld [vmem:[%s27211_s3 + $0xf8] ss:$36 sps:$4 sm:$0xff]  }
 0x268   :  { %v18506_v32 = vld [vmem:[%s27211_s3 + $0xb5c] ss:$36 sps:$4 sm:$0xff]  }
 0x269   :  { %v4104_v44 = vpop.f32.mrf.mxu1  ;;  %4468 = vmatpush1.bf16.msra.mxu0 %v18465_v33  ;;  %v18504_v33 = vld [vmem:[%s27211_s3 + $0xb58] ss:$36 sps:$4 sm:$0xff]  }
 0x26a   :  { %v22331_v46 = vadd.f32 %v4104_v44, %v4062_v42  ;;  %4441 = vmatpush2.bf16.msra.mxu1 %v18462_v30  ;;  %4469 = vmatprep.subr.bf16.mxu0 %v18473_v41  ;;  %v18503_v41 = vld [vmem:[%s27211_s3 + $0xb0] ss:$36 sps:$4 sm:$0xff]  }
 0x26b   :  { %4510 = vmatprep.subr.bf16.mxu1 %v18470_v40  ;;  %v22392_v20 = vpop.f32.mrf.mxu1 }
 0x26d   :  { %4443 = vmatmul.mubr.bf16.vlgmr.msra.gmra.mxu1 %v21294_v2  ;;  %4470 = vmatpush2.bf16.msra.mxu0 %v18471_v45  ;;  %v4186_v30 = vpop.f32.mrf.mxu1  ;;  %v18507_v45 = vld [vmem:[%s27211_s3 + $0x2a8] ss:$36 sps:$4 sm:$0xff]  }
 0x26e   :  { %4511 = vmatpush1.bf16.msra.mxu1 %v18468_v43  ;;  %4471 = vmatprep.subr.bf16.mxu0 %v18476_v48  ;;  %v18509_v48 = vld [vmem:[%s27211_s3 + $0x8d8] ss:$36 sps:$4 sm:$0xff]  }
 0x26f   :  { %4528 = vmatprep.mubr.bf16.mxu1 %v27225_v16  ;;  %17503 = vmatprep.subr.bf16.mxu1 %v18477_v49  ;;  %v22421_v43 = vpop.f32.mrf.mxu1 }
 0x271   :  { %4472 = vmatpush2.bf16.msra.mxu0 %v18474_v50 }
 0x272   :  { %4473 = vmatprep.subr.bf16.mxu0 %v18481_v14  ;;  %v18508_v14 = vld [vmem:[%s27211_s3 + $0x68] ss:$36 sps:$4 sm:$0xff]  }
 0x275   :  { %16108 = vmatmul.mubr.msk.bf16.vlgmr.msra.gmra.mxu1 %vm3847_vm10, %v21359_v47  ;;  %4474 = vmatpush2.bf16.msra.mxu0 %v18479_v54  ;;  %v4190_v54 = vpop.f32.mrf.mxu1 }
 0x276   :  { %17504 = vmatpush3.bf16.msra.mxu1 %v18478_v51  ;;  %4571 = vmatprep.mubr.bf16.mxu1 %v21283_v0  ;;  %v18492_v0 = vld [vmem:[%s27211_s3 + $0x380] ss:$36 sps:$4 sm:$0xff]  }
 0x277   :  { %17505 = vmatprep.subr.bf16.mxu1 %v18482_v61  ;;  %4475 = vmatprep.subr.bf16.mxu0 %v18486_v62  ;;  %v18511_v61 = vld [vmem:[%s27211_s3 + $0x260] ss:$36 sps:$4 sm:$0xff]   ;;  %v18513_v62 = vld [vmem:[%s27211_s3 + $0x890] ss:$36 sps:$4 sm:$0xff]  }
 0x279   :  { %4476 = vmatpush2.bf16.msra.mxu0 %v18484_v60 }
 0x27a   :  { %17506 = vmatpush3.bf16.msra.mxu1 %v18483_v1  ;;  %4477 = vmatprep.subr.bf16.mxu0 %v18491_v10  ;;  %v18514_v1 = vld [vmem:[%s27211_s3 + $0x650] ss:$36 sps:$4 sm:$0xff]   ;;  %v18517_v10 = vld [vmem:[%s27211_s3 + $0x848] ss:$36 sps:$4 sm:$0xff]  }
 0x27b   :  { %17507 = vmatprep.subr.bf16.mxu1 %v18487_v59 }
 0x27d   :  { %4478 = vmatpush2.bf16.msra.mxu0 %v18489_v13 }
 0x27e   :  { %17508 = vmatpush3.bf16.msra.mxu1 %v18488_v12  ;;  %4479 = vmatprep.subr.bf16.mxu0 %v18496_v15  ;;  %v18518_v15 = vld [vmem:[%s27211_s3 + $0x608] ss:$36 sps:$4 sm:$0xff]  }
 0x27f   :  { %17509 = vmatprep.subr.bf16.mxu1 %v18492_v0  ;;  %v18515_v0 = vld [vmem:[%s27211_s3 + $0xd58] ss:$36 sps:$4 sm:$0xff]  }
 0x281   :  { %4480 = vmatpush2.bf16.msra.mxu0 %v18494_v17  ;;  %v18516_v17 = vld [vmem:[%s27211_s3 + $0xb18] ss:$36 sps:$4 sm:$0xff]  }
 0x282   :  { %17510 = vmatpush3.bf16.msra.mxu1 %v18493_v18  ;;  %4481 = vmatprep.subr.bf16.mxu0 %v18501_v24  ;;  %v18521_v18 = vld [vmem:[%s27211_s3 + $0x800] ss:$36 sps:$4 sm:$0xff]   ;;  %v18520_v24 = vld [vmem:[%s27211_s3 + $0xad0] ss:$36 sps:$4 sm:$0xff]  }
 0x283   :  { %17511 = vmatprep.subr.bf16.mxu1 %v18497_v21  ;;  %v18522_v21 = vld [vmem:[%s27211_s3 + $0x5c0] ss:$36 sps:$4 sm:$0xff]  }
 0x284   :  { %v4143_v40 = vpop.f32.mrf.mxu0 }
 0x285   :  { %v4144_v42 = vadd.f32 %v4143_v40, %v22315_v36  ;;  %4482 = vmatpush2.bf16.msra.mxu0 %v18499_v25  ;;  %v18510_v36 = vld [vmem:[%s27211_s3 + $0x698] ss:$36 sps:$4 sm:$0xff]   ;;  %v18523_v25 = vld [vmem:[%s27211_s3 + $0xcc8] ss:$36 sps:$4 sm:$0xff]  }
 0x286   :  { %17512 = vmatpush3.bf16.msra.mxu1 %v18498_v26  ;;  %v22423_v44 = vpop.f32.mrf.mxu0  ;;  %4483 = vmatprep.subr.bf16.mxu0 %v18506_v32  ;;  %v18525_v26 = vld [vmem:[%s27211_s3 + $0x7b8] ss:$36 sps:$4 sm:$0xff]   ;;  %v18528_v32 = vld [vmem:[%s27211_s3 + $0xa40] ss:$36 sps:$4 sm:$0xff]  }
 0x287   :  { %v4187_v49 = vadd.f32 %v4186_v30, %v4144_v42  ;;  %17513 = vmatprep.subr.bf16.mxu1 %v18502_v31  ;;  %v18526_v30 = vld [vmem:[%s27211_s3 + $0x578] ss:$36 sps:$4 sm:$0xff]   ;;  %v18529_v31 = vld [vmem:[%s27211_s3 + $0x770] ss:$36 sps:$4 sm:$0xff]   ;;  %v1555_v42 = vrot.slane %v22289_v19, %v21239_v57 }
 0x288   :  { %v4147_v50 = vpop.f32.mrf.mxu0  ;;  %v18531_v40 = vld [vmem:[%s27211_s3 + $0xc38] ss:$36 sps:$4 sm:$0xff]  }
 0x289   :  { %v4148_v51 = vadd.f32 %v4147_v50, %v22331_v46  ;;  %4484 = vmatpush2.bf16.msra.mxu0 %v18504_v33  ;;  %v18512_v46 = vld [vmem:[%s27211_s3 + $0x20] ss:$36 sps:$4 sm:$0xff]   ;;  %v4705_v59 = vmax.f32 %v4187_v49, 0.0  ;;  %v18530_v33 = vld [vmem:[%s27211_s3 + $0x530] ss:$36 sps:$4 sm:$0xff]   ;;  %v3892_v49 = vadd.f32 %v22087_v27, %v1555_v42 }
 0x28a   :  { %17514 = vmatpush3.bf16.msra.mxu1 %v18503_v41  ;;  %17525 = vmatprep.subr.bf16.mxu0 %v18509_v48  ;;  %v18533_v41 = vld [vmem:[%s27211_s3 + $0x728] ss:$36 sps:$4 sm:$0xff]   ;;  %v18537_v50 = vld [vmem:[%s27211_s3 + $0x6e0] ss:$36 sps:$4 sm:$0xff]  }
 0x28b   :  { %v4191_v60 = vadd.f32 %v4190_v54, %v4148_v51  ;;  %17515 = vmatprep.subr.bf16.mxu1 %v18507_v45  ;;  %v18532_v45 = vld [vmem:[%s27211_s3 + $0x9f8] ss:$36 sps:$4 sm:$0xff]   ;;  %v18534_v48 = vld [vmem:[%s27211_s3 + $0x4e8] ss:$36 sps:$4 sm:$0xff]   ;;  %v3888_v51 = vadd.f32 %v21896_v63, %v1555_v42  ;;  %v18538_v27 = vld [vmem:[%s27211_s3 + $0x4a0] ss:$36 sps:$4 sm:$0xff]  }
 0x28c   :  { %4486 = vmatmul.mubr.bf16.vlgmr.msra.gmra.mxu0 %v21491_v3  ;;  %v18539_v63 = vld [vmem:[%s27211_s3 + $0xba8] ss:$36 sps:$4 sm:$0xff]   ;;  %v18564_v42 = vld [vmem:[%s27213_s5 + $0x1a4] ss:$52 sps:$4 sm:$0xff]  }
 0x28d   :  { %v4714_v12 = vmax.f32 %v4191_v60, 0.0  ;;  %17526 = vmatpush3.bf16.msra.mxu0 %v18510_v36  ;;  %4612 = vmatprep.mubr.bf16.mxu0 %v21290_v8  ;;  %v18519_v8 = vld [vmem:[%s27211_s3 + $0xd10] ss:$36 sps:$4 sm:$0xff]  }
 0x28e   :  { %17516 = vmatpush3.bf16.msra.mxu1 %v18508_v14  ;;  %17527 = vmatprep.subr.bf16.mxu0 %v18513_v62  ;;  %v18535_v36 = vld [vmem:[%s27211_s3 + $0xbf0] ss:$36 sps:$4 sm:$0xff]   ;;  %v1563_v14 = vrot.slane %v22289_v19, %v21242_v58  ;;  %v4149_v62 = vpop.f32.mrf.mxu0 }
 0x28f   :  { %v22455_v13 = vpack.c.bf16 %v4714_v12, %v4705_v59  ;;  %17517 = vmatprep.subr.bf16.mxu1 %v18511_v61  ;;  %v3935_v61 = vadd.f32 %v22076_v23, %v3892_v49  ;;  %v18536_v60 = vld [vmem:[%s27211_s3 + $0x9b0] ss:$36 sps:$4 sm:$0xff]  }
 0x290   :  { %v4064_v54 = vadd.f32 %v22406_v29, %v1563_v14  ;;  %v4060_v29 = vadd.f32 %v22296_v22, %v1563_v14  ;;  %v18570_v49 = vld [vmem:[%s27213_s5 + $0x13c] ss:$52 sps:$4 sm:$0xff]   ;;  %v18571_v14 = vld [vmem:[%s27213_s5 + $0x7b8] ss:$52 sps:$4 sm:$0xff]  }
 0x291   :  { %17528 = vmatpush3.bf16.msra.mxu0 %v18514_v1  ;;  %v3978_v23 = vadd.f32 %v22307_v28, %v3935_v61  ;;  %v27222_v28 = vmov 0.0  }
 0x292   :  { %17518 = vmatpush3.bf16.msra.mxu1 %v18512_v46  ;;  %17529 = vmatprep.subr.bf16.mxu0 %v18517_v10  ;;  %v4107_v1 = vadd.f32 %v22392_v20, %v4064_v54  ;;  %v3931_v46 = vadd.f32 %v21903_v9, %v3888_v51  ;;  %v18540_v10 = vld [vmem:[%s27211_s3 + $0x968] ss:$36 sps:$4 sm:$0xff]   ;;  %v4103_v59 = vadd.f32 %v22323_v6, %v4060_v29  ;;  %v18541_v9 = vld [vmem:[%s27211_s3 + $0xb60] ss:$36 sps:$4 sm:$0xff]   ;;  %v18549_v6 = vld [vmem:[%s27213_s5 + $0x95c] ss:$52 sps:$4 sm:$0xff]  }
 0x293   :  { %17547 = vmatprep.subr.bf16.mxu1 %v18515_v0  ;;  %v18543_v0 = vld [vmem:[%s27211_s3 + $0xda0] ss:$36 sps:$4 sm:$0xff]   ;;  %v18568_v54 = vld [vmem:[%s27213_s5 + $0x138] ss:$52 sps:$4 sm:$0xff]  }
 0x294   :  { %v4150_v12 = vadd.f32 %v4149_v62, %v4107_v1  ;;  %v3974_v22 = vadd.f32 %v22104_v39, %v3931_v46  ;;  %v4146_v20 = vadd.f32 %v22423_v44, %v4103_v59  ;;  %v18577_v62 = vld [vmem:[%s27213_s5 + $0x750] ss:$52 sps:$4 sm:$0xff]   ;;  %v18585_v29 = vld [vmem:[%s27213_s5 + $0x6ec] ss:$52 sps:$4 sm:$0xff]  }
 0x295   :  { %4572 = vmatmul.mubr.bf16.vlgmr.msra.gmra.mxu1 %v21288_v7  ;;  %17530 = vmatpush3.bf16.msra.mxu0 %v18518_v15  ;;  %v18524_v7 = vld [vmem:[%s27211_s3 + $0xa88] ss:$36 sps:$4 sm:$0xff]   ;;  %v4021_v15 = vadd.f32 %v22272_v11, %v3978_v23  ;;  %v18591_v59 = vld [vmem:[%s27213_s5 + $0x684] ss:$52 sps:$4 sm:$0xff]  }
 0x296   :  { %17548 = vmatpush3.bf16.msra.mxu1 %v18516_v17  ;;  %4653 = vmatprep.mubr.bf16.mxu1 %v21476_v5  ;;  %v18527_v5 = vld [vmem:[%s27211_s3 + $0xc80] ss:$36 sps:$4 sm:$0xff]   ;;  %v4192_v17 = vpop.f32.mrf.mxu1  ;;  %v4189_v44 = vadd.f32 %v22421_v43, %v4146_v20  ;;  %v18583_v23 = vld [vmem:[%s27213_s5 + $0x6e8] ss:$52 sps:$4 sm:$0xff]   ;;  %v18592_v20 = vld [vmem:[%s27213_s5 + $0x618] ss:$52 sps:$4 sm:$0xff]  }
 0x297   :  { %17549 = vmatprep.subr.bf16.mxu1 %v18519_v8  ;;  %17531 = vmatprep.subr.bf16.mxu0 %v18521_v18  ;;  %v4193_v39 = vadd.f32 %v4192_v17, %v4150_v12  ;;  %v18542_v8 = vld [vmem:[%s27211_s3 + $0x920] ss:$36 sps:$4 sm:$0xff]   ;;  %v4017_v18 = vadd.f32 %v22102_v38, %v3974_v22  ;;  %v4713_v11 = vmax.f32 %v4021_v15, 0.0  ;;  %v18552_v38 = vld [vmem:[%s27213_s5 + $0x274] ss:$52 sps:$4 sm:$0xff]  }
 0x298   :  { %v18582_v46 = vld [vmem:[%s27213_s5 + $0x6c] ss:$52 sps:$4 sm:$0xff]   ;;  %v18588_v12 = vld [vmem:[%s27213_s5 + $0x4] ss:$52 sps:$4 sm:$0xff]   ;;  %v18600_v17 = vld [vmem:[%s27213_s5 + $0x5b4] ss:$52 sps:$4 sm:$0xff]  }
 0x299   :  { %17532 = vmatpush3.bf16.msra.mxu0 %v18522_v21  ;;  %v18544_v21 = vld [vmem:[%s27213_s5 + $0x2d8] ss:$52 sps:$4 sm:$0xff]   ;;  %v4704_v43 = vmax.f32 %v4017_v18, 0.0  ;;  %v18586_v22 = vld [vmem:[%s27213_s5] ss:$52 sps:$4 sm:$0xff]  }
 0x29a   :  { %17550 = vmatpush3.bf16.msra.mxu1 %v18520_v24  ;;  %17533 = vmatprep.subr.bf16.mxu0 %v18525_v26  ;;  %v18547_v24 = vld [vmem:[%s27213_s5 + $0x958] ss:$52 sps:$4 sm:$0xff]   ;;  %v18555_v26 = vld [vmem:[%s27213_s5 + $0x8f4] ss:$52 sps:$4 sm:$0xff]   ;;  %v18601_v18 = vld [vmem:[%s27213_s5 + $0xc30] ss:$52 sps:$4 sm:$0xff]  }
 0x29b   :  { %17551 = vmatprep.subr.bf16.mxu1 %v18523_v25  ;;  %v4715_v25 = vmax.f32 %v4193_v39, 0.0  ;;  %v18595_v15 = vld [vmem:[%s27213_s5 + $0xc98] ss:$52 sps:$4 sm:$0xff]   ;;  %v18603_v39 = vld [vmem:[%s27213_s5 + $0xc34] ss:$52 sps:$4 sm:$0xff]  }
 0x29d   :  { %17534 = vmatpush3.bf16.msra.mxu0 %v18526_v30  ;;  %v4706_v30 = vmax.f32 %v4189_v44, 0.0  ;;  %v18606_v44 = vld [vmem:[%s27213_s5 + $0x54c] ss:$52 sps:$4 sm:$0xff]  }
 0x29e   :  { %17552 = vmatpush3.bf16.msra.mxu1 %v18524_v7  ;;  %17535 = vmatprep.subr.bf16.mxu0 %v18529_v31  ;;  %v22583_v7 = vpack.c.bf16 %v4713_v11, %v4704_v43  ;;  %v18553_v31 = vld [vmem:[%s27213_s5 + $0x8f0] ss:$52 sps:$4 sm:$0xff]   ;;  %v18604_v11 = vld [vmem:[%s27213_s5 + $0x548] ss:$52 sps:$4 sm:$0xff]  }
 0x29f   :  { %17553 = vmatprep.subr.bf16.mxu1 %v18527_v5  ;;  %v18550_v5 = vld [vmem:[%s27213_s5 + $0x270] ss:$52 sps:$4 sm:$0xff]  }
 0x2a1   :  { %17536 = vmatpush3.bf16.msra.mxu0 %v18530_v33  ;;  %v18558_v33 = vld [vmem:[%s27213_s5 + $0x20c] ss:$52 sps:$4 sm:$0xff]  }
 0x2a2   :  { %17554 = vmatpush3.bf16.msra.mxu1 %v18528_v32  ;;  %17537 = vmatprep.subr.bf16.mxu0 %v18533_v41  ;;  %v22593_v32 = vpack.c.bf16 %v4715_v25, %v4706_v30  ;;  %v18567_v41 = vld [vmem:[%s27213_s5 + $0x824] ss:$52 sps:$4 sm:$0xff]   ;;  %v18618_v30 = vld [vmem:[%s27213_s5 + $0x47c] ss:$52 sps:$4 sm:$0xff]  }
 0x2a3   :  { %17555 = vmatprep.subr.bf16.mxu1 %v18531_v40  ;;  %v18559_v40 = vld [vmem:[%s27213_s5 + $0x888] ss:$52 sps:$4 sm:$0xff]   ;;  %v18615_v25 = vld [vmem:[%s27213_s5 + $0xb64] ss:$52 sps:$4 sm:$0xff]  }
 0x2a5   :  { %17538 = vmatpush3.bf16.msra.mxu0 %v18534_v48  ;;  %v18565_v48 = vld [vmem:[%s27213_s5 + $0x820] ss:$52 sps:$4 sm:$0xff]  }
 0x2a6   :  { %17556 = vmatpush3.bf16.msra.mxu1 %v18532_v45  ;;  %17539 = vmatprep.subr.bf16.mxu0 %v18537_v50  ;;  %v18562_v45 = vld [vmem:[%s27213_s5 + $0x1a0] ss:$52 sps:$4 sm:$0xff]   ;;  %v22630_v50 = vrot.slane %v22289_v19, %v21341_v34 }
 0x2a7   :  { %17557 = vmatprep.subr.bf16.mxu1 %v18535_v36  ;;  %v18573_v36 = vld [vmem:[%s27213_s5 + $0x7bc] ss:$52 sps:$4 sm:$0xff]   ;;  %v18576_v19 = vld [vmem:[%s27213_s5 + $0xd4] ss:$52 sps:$4 sm:$0xff]  }
 0x2a9   :  { %17540 = vmatpush3.bf16.msra.mxu0 %v18538_v27  ;;  %v18579_v27 = vld [vmem:[%s27213_s5 + $0x754] ss:$52 sps:$4 sm:$0xff]  }
 0x2aa   :  { %17558 = vmatpush3.bf16.msra.mxu1 %v18536_v60  ;;  %17712 = vmatprep.subr.bf16.mxu0 %v27222_v28 }
 0x2ab   :  { %17559 = vmatprep.subr.bf16.mxu1 %v18539_v63  ;;  %v18574_v63 = vld [vmem:[%s27213_s5 + $0xd0] ss:$52 sps:$4 sm:$0xff]  }
 0x2ac   :  { %4613 = vmatmul.mubr.bf16.vlgmr.msra.gmra.mxu0 %v21294_v2  ;;  %v18546_v2 = vld [vmem:[%s27213_s5 + $0x2dc] ss:$52 sps:$4 sm:$0xff]  }
 0x2ad   :  { %17713 = vmatpush3.bf16.msra.mxu0 %v18543_v0  ;;  %17714 = vmatprep.mubr.msk.bf16.mxu0 %vm20614_vm15, %v27222_v28  ;;  %v4229_v51 = vpop.f32.mrf.mxu1  ;;  %v18589_v0 = vld [vmem:[%s27213_s5 + $0x680] ss:$52 sps:$4 sm:$0xff]  }
 0x2ae   :  { %17560 = vmatpush3.bf16.msra.mxu1 %v18540_v10  ;;  %10602 = vmatprep.subr.bf16.mxu0 %v18549_v6  ;;  %v4230_v61 = vadd.f32 %v4229_v51, %v22630_v50  ;;  %v18580_v10 = vld [vmem:[%s27213_s5 + $0x68] ss:$52 sps:$4 sm:$0xff]   ;;  %v22762_v51 = vld [vmem:[%s27212_s4] sm:$0xff] }
 0x2af   :  { %17561 = vmatprep.subr.bf16.mxu1 %v18541_v9  ;;  %v18597_v9 = vld [vmem:[%s27213_s5 + $0xc9c] ss:$52 sps:$4 sm:$0xff]  }
 0x2b0   :  { %v18594_v6 = vld [vmem:[%s27213_s5 + $0x61c] ss:$52 sps:$4 sm:$0xff]  }
 0x2b2   :  { %17562 = vmatpush3.bf16.msra.mxu1 %v18542_v8  ;;  %v18598_v8 = vld [vmem:[%s27213_s5 + $0x5b0] ss:$52 sps:$4 sm:$0xff]  }
 0x2b3   :  { %10559 = vmatprep.subr.bf16.mxu1 %v18546_v2  ;;  %v18609_v2 = vld [vmem:[%s27213_s5 + $0xbcc] ss:$52 sps:$4 sm:$0xff]  }
 0x2b4   :  { %17715 = vmatmul.mubr.msk.bf16.vlgmr.msra.gmra.mxu0 %vm3847_vm10, %v21359_v47  ;;  %v18561_v47 = vld [vmem:[%s27213_s5 + $0x88c] ss:$52 sps:$4 sm:$0xff]  }
 0x2b5   :  { %4654 = vmatmul.mubr.bf16.vlgmr.msra.gmra.mxu1 %v21491_v3  ;;  %10603 = vmatpush1.bf16.msra.mxu0 %v18547_v24  ;;  %v18556_v3 = vld [vmem:[%s27213_s5 + $0x208] ss:$52 sps:$4 sm:$0xff]   ;;  %v18612_v24 = vld [vmem:[%s27213_s5 + $0x4e4] ss:$52 sps:$4 sm:$0xff]  }
 0x2b6   :  { %10560 = vmatpush1.bf16.msra.mxu1 %v18544_v21  ;;  %10591 = vmatprep.mubr.bf16.mxu1 %v22583_v7  ;;  %v18607_v21 = vld [vmem:[%s27213_s5 + $0xbc8] ss:$52 sps:$4 sm:$0xff]  }
 0x2b7   :  { %10634 = vmatprep.mubr.bf16.mxu0 %v22593_v32  ;;  %10561 = vmatprep.subr.bf16.mxu1 %v18552_v38  ;;  %v18610_v38 = vld [vmem:[%s27213_s5 + $0x4e0] ss:$52 sps:$4 sm:$0xff]  }
 0x2b8   :  { %10604 = vmatprep.subr.bf16.mxu0 %v18555_v26  ;;  %v18613_v26 = vld [vmem:[%s27213_s5 + $0xb60] ss:$52 sps:$4 sm:$0xff]  }
 0x2b9   :  { %10605 = vmatpush1.bf16.msra.mxu0 %v18553_v31 }
 0x2ba   :  { %10562 = vmatpush1.bf16.msra.mxu1 %v18550_v5  ;;  %10606 = vmatprep.subr.bf16.mxu0 %v18561_v47  ;;  %v18621_v5 = vld [vmem:[%s27213_s5 + $0xafc] ss:$52 sps:$4 sm:$0xff]   ;;  %v18619_v47 = vld [vmem:[%s27213_s5 + $0xaf8] ss:$52 sps:$4 sm:$0xff]  }
 0x2bb   :  { %10563 = vmatprep.subr.bf16.mxu1 %v18558_v33  ;;  %v18616_v33 = vld [vmem:[%s27213_s5 + $0x478] ss:$52 sps:$4 sm:$0xff]  }
 0x2bd   :  { %10607 = vmatpush1.bf16.msra.mxu0 %v18559_v40  ;;  %v18627_v40 = vld [vmem:[%s27213_s5 + $0xa94] ss:$52 sps:$4 sm:$0xff]  }
 0x2be   :  { %10564 = vmatpush1.bf16.msra.mxu1 %v18556_v3  ;;  %10608 = vmatprep.subr.bf16.mxu0 %v18567_v41  ;;  %v18624_v3 = vld [vmem:[%s27213_s5 + $0x414] ss:$52 sps:$4 sm:$0xff]   ;;  %v4231_v41 = vpop.f32.mrf.mxu1 }
 0x2bf   :  { %10565 = vmatprep.subr.bf16.mxu1 %v18564_v42 }
 0x2c1   :  { %10609 = vmatpush1.bf16.msra.mxu0 %v18565_v48  ;;  %v18625_v48 = vld [vmem:[%s27213_s5 + $0xa90] ss:$52 sps:$4 sm:$0xff]  }
 0x2c2   :  { %10566 = vmatpush1.bf16.msra.mxu1 %v18562_v45  ;;  %10610 = vmatprep.subr.bf16.mxu0 %v18573_v36  ;;  %v18622_v45 = vld [vmem:[%s27213_s5 + $0x410] ss:$52 sps:$4 sm:$0xff]   ;;  %v18633_v36 = vld [vmem:[%s27213_s5 + $0xa2c] ss:$52 sps:$4 sm:$0xff]  }
 0x2c3   :  { %10567 = vmatprep.subr.bf16.mxu1 %v18570_v49  ;;  %v18630_v49 = vld [vmem:[%s27213_s5 + $0x3ac] ss:$52 sps:$4 sm:$0xff]  }
 0x2c4   :  { %v4272_v60 = vpop.f32.mrf.mxu0 }
 0x2c5   :  { %10611 = vmatpush1.bf16.msra.mxu0 %v18571_v14  ;;  %v22654_v1 = vadd.f32 %v4272_v60, %v4230_v61  ;;  %v22757_v14 = vpop.f32.mrf.mxu1  ;;  %v18631_v61 = vld [vmem:[%s27213_s5 + $0xa28] ss:$52 sps:$4 sm:$0xff]   ;;  %v18639_v60 = vld [vmem:[%s27213_s5 + $0x9c4] ss:$52 sps:$4 sm:$0xff]  }
 0x2c6   :  { %10568 = vmatpush1.bf16.msra.mxu1 %v18568_v54  ;;  %10612 = vmatprep.subr.bf16.mxu0 %v18579_v27  ;;  %v4274_v43 = vpop.f32.mrf.mxu0  ;;  %v1571_v54 = vrot.slane %v22762_v51, %v21344_v37 }
 0x2c7   :  { %10569 = vmatprep.subr.bf16.mxu1 %v18576_v19  ;;  %v18628_v19 = vld [vmem:[%s27213_s5 + $0x3a8] ss:$52 sps:$4 sm:$0xff]  }
 0x2c8   :  { %v22731_v31 = vpop.f32.mrf.mxu0 }
 0x2c9   :  { %10613 = vmatpush1.bf16.msra.mxu0 %v18577_v62  ;;  %v18636_v62 = vld [vmem:[%s27213_s5 + $0x344] ss:$52 sps:$4 sm:$0xff]  }
 0x2ca   :  { %10570 = vmatpush1.bf16.msra.mxu1 %v18574_v63  ;;  %10614 = vmatprep.subr.bf16.mxu0 %v18585_v29  ;;  %v4278_v42 = vpop.f32.mrf.mxu0  ;;  %v4235_v63 = vpop.f32.mrf.mxu1  ;;  %v18637_v29 = vld [vmem:[%s27213_s5 + $0x9c0] ss:$52 sps:$4 sm:$0xff]  }
 0x2cb   :  { %10571 = vmatprep.subr.bf16.mxu1 %v18582_v46  ;;  %v4232_v46 = vadd.f32 %v4231_v41, %v1571_v54  ;;  %v18693_v41 = vld [vmem:[%s27213_s5 + $0x1524] ss:$52 sps:$4 sm:$0xff]  }
 0x2cc   :  { %v22766_v27 = vpop.f32.mrf.mxu0 }
 0x2cd   :  { %10615 = vmatpush1.bf16.msra.mxu0 %v18583_v23  ;;  %v18634_v23 = vld [vmem:[%s27213_s5 + $0x340] ss:$52 sps:$4 sm:$0xff]  }
 0x2ce   :  { %10572 = vmatpush1.bf16.msra.mxu1 %v18580_v10  ;;  %10616 = vmatprep.subr.bf16.mxu0 %v18591_v59  ;;  %v18675_v10 = vld [vmem:[%s27213_s5 + $0x165c] ss:$52 sps:$4 sm:$0xff]   ;;  %v4360_v59 = vpop.f32.mrf.mxu0 }
 0x2cf   :  { %10573 = vmatprep.subr.bf16.mxu1 %v18588_v12 }
 0x2d1   :  { %10617 = vmatpush1.bf16.msra.mxu0 %v18589_v0  ;;  %v4275_v0 = vadd.f32 %v4274_v43, %v4232_v46  ;;  %v18708_v46 = vld [vmem:[%s27213_s5 + $0x13ec] ss:$52 sps:$4 sm:$0xff]  }
 0x2d2   :  { %10574 = vmatpush1.bf16.msra.mxu1 %v18586_v22  ;;  %10618 = vmatprep.subr.bf16.mxu0 %v18597_v9  ;;  %v18642_v9 = vld [vmem:[%s27213_s5 + $0xfdc] ss:$52 sps:$4 sm:$0xff]  }
 0x2d3   :  { %10575 = vmatprep.subr.bf16.mxu1 %v18594_v6  ;;  %v4236_v6 = vadd.f32 %v4235_v63, %v1571_v54  ;;  %v18654_v54 = vld [vmem:[%s27213_s5 + $0xe3c] ss:$52 sps:$4 sm:$0xff]  }
 0x2d4   :  { %v18655_v63 = vld [vmem:[%s27213_s5 + $0xdd0] ss:$52 sps:$4 sm:$0xff]  }
 0x2d5   :  { %10619 = vmatpush2.bf16.msra.mxu0 %v18595_v15  ;;  %v18640_v15 = vld [vmem:[%s27213_s5 + $0xfd8] ss:$52 sps:$4 sm:$0xff]  }
 0x2d6   :  { %10576 = vmatpush2.bf16.msra.mxu1 %v18592_v20  ;;  %10620 = vmatprep.subr.bf16.mxu0 %v18603_v39  ;;  %v22800_v39 = vpop.f32.mrf.mxu0 }
 0x2d7   :  { %10577 = vmatprep.subr.bf16.mxu1 %v18600_v17  ;;  %v18673_v17 = vld [vmem:[%s27213_s5 + $0x1658] ss:$52 sps:$4 sm:$0xff]  }
 0x2d8   :  { %v4364_v43 = vpop.f32.mrf.mxu0 }
 0x2d9   :  { %10621 = vmatpush2.bf16.msra.mxu0 %v18601_v18  ;;  %v18681_v18 = vld [vmem:[%s27213_s5 + $0x15f4] ss:$52 sps:$4 sm:$0xff]  }
 0x2da   :  { %10578 = vmatpush2.bf16.msra.mxu1 %v18598_v8  ;;  %10622 = vmatprep.subr.bf16.mxu0 %v18609_v2 }
 0x2db   :  { %10579 = vmatprep.subr.bf16.mxu1 %v18606_v44  ;;  %v4279_v44 = vadd.f32 %v4278_v42, %v4236_v6  ;;  %v18709_v6 = vld [vmem:[%s27213_s5 + $0x1380] ss:$52 sps:$4 sm:$0xff]  }
 0x2dd   :  { %10623 = vmatpush2.bf16.msra.mxu0 %v18607_v21 }
 0x2de   :  { %10580 = vmatpush2.bf16.msra.mxu1 %v18604_v11  ;;  %10624 = vmatprep.subr.bf16.mxu0 %v18615_v25  ;;  %v18645_v11 = vld [vmem:[%s27213_s5 + $0xf74] ss:$52 sps:$4 sm:$0xff]   ;;  %v18643_v25 = vld [vmem:[%s27213_s5 + $0xf70] ss:$52 sps:$4 sm:$0xff]  }
 0x2df   :  { %10581 = vmatprep.subr.bf16.mxu1 %v18612_v24 }
 0x2e1   :  { %10625 = vmatpush2.bf16.msra.mxu0 %v18613_v26  ;;  %v18687_v26 = vld [vmem:[%s27213_s5 + $0x158c] ss:$52 sps:$4 sm:$0xff]  }
 0x2e2   :  { %10582 = vmatpush2.bf16.msra.mxu1 %v18610_v38  ;;  %10626 = vmatprep.subr.bf16.mxu0 %v18621_v5  ;;  %v18679_v38 = vld [vmem:[%s27213_s5 + $0x15f0] ss:$52 sps:$4 sm:$0xff]   ;;  %v18648_v5 = vld [vmem:[%s27213_s5 + $0xf0c] ss:$52 sps:$4 sm:$0xff]  }
 0x2e3   :  { %10583 = vmatprep.subr.bf16.mxu1 %v18618_v30 }
 0x2e5   :  { %10627 = vmatpush2.bf16.msra.mxu0 %v18619_v47 }
 0x2e6   :  { %10584 = vmatpush2.bf16.msra.mxu1 %v18616_v33  ;;  %10628 = vmatprep.subr.bf16.mxu0 %v18627_v40  ;;  %v18685_v40 = vld [vmem:[%s27213_s5 + $0x1588] ss:$52 sps:$4 sm:$0xff]  }
 0x2e7   :  { %10585 = vmatprep.subr.bf16.mxu1 %v18624_v3  ;;  %v18646_v3 = vld [vmem:[%s27213_s5 + $0xf08] ss:$52 sps:$4 sm:$0xff]  }
 0x2e9   :  { %10629 = vmatpush2.bf16.msra.mxu0 %v18625_v48  ;;  %v18649_v48 = vld [vmem:[%s27213_s5 + $0xea0] ss:$52 sps:$4 sm:$0xff]  }
 0x2ea   :  { %10586 = vmatpush2.bf16.msra.mxu1 %v18622_v45  ;;  %10630 = vmatprep.subr.bf16.mxu0 %v18633_v36  ;;  %v18651_v45 = vld [vmem:[%s27213_s5 + $0xea4] ss:$52 sps:$4 sm:$0xff]   ;;  %v18699_v36 = vld [vmem:[%s27213_s5 + $0x14bc] ss:$52 sps:$4 sm:$0xff]  }
 0x2eb   :  { %10587 = vmatprep.subr.bf16.mxu1 %v18630_v49  ;;  %v18691_v49 = vld [vmem:[%s27213_s5 + $0x1520] ss:$52 sps:$4 sm:$0xff]  }
 0x2ed   :  { %v22789_v12 = vpop.f32.mrf.mxu1  ;;  %10631 = vmatpush2.bf16.msra.mxu0 %v18631_v61  ;;  %v18697_v61 = vld [vmem:[%s27213_s5 + $0x14b8] ss:$52 sps:$4 sm:$0xff]  }
 0x2ee   :  { %10588 = vmatpush2.bf16.msra.mxu1 %v18628_v19  ;;  %10632 = vmatprep.subr.bf16.mxu0 %v18639_v60  ;;  %v18652_v19 = vld [vmem:[%s27213_s5 + $0xe38] ss:$52 sps:$4 sm:$0xff]   ;;  %v18657_v60 = vld [vmem:[%s27213_s5 + $0xdd4] ss:$52 sps:$4 sm:$0xff]  }
 0x2ef   :  { %v4317_v22 = vpop.f32.mrf.mxu1  ;;  %10589 = vmatprep.subr.bf16.mxu1 %v18636_v62  ;;  %v18705_v62 = vld [vmem:[%s27213_s5 + $0x1454] ss:$52 sps:$4 sm:$0xff]  }
 0x2f0   :  { %v4318_v20 = vadd.f32 %v4317_v22, %v4275_v0  ;;  %v18711_v0 = vld [vmem:[%s27213_s5 + $0x1384] ss:$52 sps:$4 sm:$0xff]  }
 0x2f1   :  { %v22802_v8 = vpop.f32.mrf.mxu1  ;;  %10633 = vmatpush2.bf16.msra.mxu0 %v18637_v29  ;;  %v18703_v29 = vld [vmem:[%s27213_s5 + $0x1450] ss:$52 sps:$4 sm:$0xff]  }
 0x2f2   :  { %10590 = vmatpush2.bf16.msra.mxu1 %v18634_v23  ;;  %10688 = vmatprep.subr.bf16.mxu0 %v18675_v10  ;;  %v4361_v21 = vadd.f32 %v4360_v59, %v4318_v20  ;;  %v18660_v23 = vld [vmem:[%s27213_s5 + $0xd6c] ss:$52 sps:$4 sm:$0xff]   ;;  %v18658_v10 = vld [vmem:[%s27213_s5 + $0xd68] ss:$52 sps:$4 sm:$0xff]   ;;  %v18663_v22 = vld [vmem:[%s27213_s5 + $0xd04] ss:$52 sps:$4 sm:$0xff]  }
 0x2f3   :  { %v4321_v2 = vpop.f32.mrf.mxu1  ;;  %10645 = vmatprep.subr.bf16.mxu1 %v18642_v9  ;;  %v18706_v59 = vld [vmem:[%s27213_s5 + $0x13e8] ss:$52 sps:$4 sm:$0xff]   ;;  %v18661_v9 = vld [vmem:[%s27213_s5 + $0xd00] ss:$52 sps:$4 sm:$0xff]  }
 0x2f4   :  { %v4322_v24 = vadd.f32 %v4321_v2, %v4279_v44  ;;  %10635 = vmatmul.mubr.bf16.vlgmr.msra.gmra.mxu0 %v22455_v13  ;;  %v4708_v33 = vmax.f32 %v4361_v21, 0.0  ;;  %v18714_v20 = vld [vmem:[%s27213_s5 + $0x199c] ss:$52 sps:$4 sm:$0xff]   ;;  %v18717_v44 = vld [vmem:[%s27213_s5 + $0x1934] ss:$52 sps:$4 sm:$0xff]  }
 0x2f5   :  { %10592 = vmatmul.mubr.bf16.vlgmr.msra.gmra.mxu1 %v22136_v4  ;;  %10689 = vmatpush1.bf16.msra.mxu0 %v18673_v17  ;;  %v18664_v17 = vld [vmem:[%s27213_s5 + $0x1318] ss:$52 sps:$4 sm:$0xff]   ;;  %v18669_v2 = vld [vmem:[%s27213_s5 + $0x12b4] ss:$52 sps:$4 sm:$0xff]   ;;  %v18715_v21 = vld [vmem:[%s27213_s5 + $0x1930] ss:$52 sps:$4 sm:$0xff]  }
 0x2f6   :  { %v4365_v30 = vadd.f32 %v4364_v43, %v4322_v24  ;;  %10646 = vmatpush1.bf16.msra.mxu1 %v18640_v15  ;;  %10690 = vmatprep.subr.bf16.mxu0 %v18681_v18  ;;  %v18666_v15 = vld [vmem:[%s27213_s5 + $0x131c] ss:$52 sps:$4 sm:$0xff]   ;;  %v18712_v18 = vld [vmem:[%s27213_s5 + $0x1998] ss:$52 sps:$4 sm:$0xff]  }
 0x2f7   :  { %10647 = vmatprep.subr.bf16.mxu1 %v18645_v11  ;;  %v18667_v11 = vld [vmem:[%s27213_s5 + $0x12b0] ss:$52 sps:$4 sm:$0xff]   ;;  %v18720_v24 = vld [vmem:[%s27213_s5 + $0x18cc] ss:$52 sps:$4 sm:$0xff]   ;;  %v18718_v43 = vld [vmem:[%s27213_s5 + $0x18c8] ss:$52 sps:$4 sm:$0xff]  }
 0x2f8   :  { %v4717_v47 = vmax.f32 %v4365_v30, 0.0  ;;  %v18678_v30 = vld [vmem:[%s27213_s5 + $0x11e4] ss:$52 sps:$4 sm:$0xff]  }
 0x2f9   :  { %10691 = vmatpush1.bf16.msra.mxu0 %v18679_v38  ;;  %v18670_v38 = vld [vmem:[%s27213_s5 + $0x1248] ss:$52 sps:$4 sm:$0xff]  }
 0x2fa   :  { %v22833_v42 = vpack.c.bf16 %v4717_v47, %v4708_v33  ;;  %10648 = vmatpush1.bf16.msra.mxu1 %v18643_v25  ;;  %10692 = vmatprep.subr.bf16.mxu0 %v18687_v26  ;;  %v18672_v25 = vld [vmem:[%s27213_s5 + $0x124c] ss:$52 sps:$4 sm:$0xff]   ;;  %v18723_v26 = vld [vmem:[%s27213_s5 + $0x1864] ss:$52 sps:$4 sm:$0xff]   ;;  %v18726_v47 = vld [vmem:[%s27213_s5 + $0x17fc] ss:$52 sps:$4 sm:$0xff]  }
 0x2fb   :  { %10649 = vmatprep.subr.bf16.mxu1 %v18648_v5  ;;  %v18676_v5 = vld [vmem:[%s27213_s5 + $0x11e0] ss:$52 sps:$4 sm:$0xff]  }
 0x2fc   :  { %10677 = vmatprep.mubr.bf16.mxu1 %v22833_v42  ;;  %v18721_v33 = vld [vmem:[%s27213_s5 + $0x1860] ss:$52 sps:$4 sm:$0xff]  }
 0x2fd   :  { %10693 = vmatpush1.bf16.msra.mxu0 %v18685_v40  ;;  %v18682_v40 = vld [vmem:[%s27213_s5 + $0x1178] ss:$52 sps:$4 sm:$0xff]  }
 0x2fe   :  { %10650 = vmatpush1.bf16.msra.mxu1 %v18646_v3  ;;  %10694 = vmatprep.subr.bf16.mxu0 %v18693_v41  ;;  %v18684_v3 = vld [vmem:[%s27213_s5 + $0x117c] ss:$52 sps:$4 sm:$0xff]   ;;  %v18724_v41 = vld [vmem:[%s27213_s5 + $0x17f8] ss:$52 sps:$4 sm:$0xff]  }
 0x2ff   :  { %10651 = vmatprep.subr.bf16.mxu1 %v18651_v45  ;;  %v18729_v45 = vld [vmem:[%s27213_s5 + $0x1794] ss:$52 sps:$4 sm:$0xff]  }
 0x301   :  { %10695 = vmatpush1.bf16.msra.mxu0 %v18691_v49  ;;  %v18690_v49 = vld [vmem:[%s27213_s5 + $0x1114] ss:$52 sps:$4 sm:$0xff]  }
 0x302   :  { %10652 = vmatpush1.bf16.msra.mxu1 %v18649_v48  ;;  %10696 = vmatprep.subr.bf16.mxu0 %v18699_v36  ;;  %v4234_v48 = vadd.f32 %v22757_v14, %v22630_v50  ;;  %v18688_v36 = vld [vmem:[%s27213_s5 + $0x1110] ss:$52 sps:$4 sm:$0xff]   ;;  %v18732_v50 = vld [vmem:[%s27213_s5 + $0x172c] ss:$52 sps:$4 sm:$0xff]  }
 0x303   :  { %10653 = vmatprep.subr.bf16.mxu1 %v18654_v54 }
 0x304   :  { %v4277_v54 = vadd.f32 %v22731_v31, %v4234_v48  ;;  %v18694_v31 = vld [vmem:[%s27213_s5 + $0x10a8] ss:$52 sps:$4 sm:$0xff]  }
 0x305   :  { %10697 = vmatpush1.bf16.msra.mxu0 %v18697_v61  ;;  %v18696_v61 = vld [vmem:[%s27213_s5 + $0x10ac] ss:$52 sps:$4 sm:$0xff]  }
 0x306   :  { %10654 = vmatpush1.bf16.msra.mxu1 %v18652_v19  ;;  %10698 = vmatprep.subr.bf16.mxu0 %v18705_v62  ;;  %v18727_v19 = vld [vmem:[%s27213_s5 + $0x1790] ss:$52 sps:$4 sm:$0xff]   ;;  %v4320_v14 = vadd.f32 %v22802_v8, %v4277_v54  ;;  %v4316_v62 = vadd.f32 %v22789_v12, %v22654_v1  ;;  %v18700_v1 = vld [vmem:[%s27213_s5 + $0x1040] ss:$52 sps:$4 sm:$0xff]  }
 0x307   :  { %10655 = vmatprep.subr.bf16.mxu1 %v18657_v60  ;;  %v18730_v60 = vld [vmem:[%s27213_s5 + $0x1728] ss:$52 sps:$4 sm:$0xff]   ;;  %v18735_v8 = vld [vmem:[%s27213_s5 + $0x16c4] ss:$52 sps:$4 sm:$0xff]  }
 0x308   :  { %v4359_v12 = vadd.f32 %v22766_v27, %v4316_v62  ;;  %v18742_v27 = vld [vmem:[%s27213_s5 + $0x1cd8] ss:$52 sps:$4 sm:$0xff]  }
 0x309   :  { %10699 = vmatpush1.bf16.msra.mxu0 %v18703_v29  ;;  %v18702_v29 = vld [vmem:[%s27213_s5 + $0x1044] ss:$52 sps:$4 sm:$0xff]  }
 0x30a   :  { %10656 = vmatpush1.bf16.msra.mxu1 %v18655_v63  ;;  %10700 = vmatprep.subr.bf16.mxu0 %v18708_v46  ;;  %v4363_v63 = vadd.f32 %v22800_v39, %v4320_v14  ;;  %v18733_v46 = vld [vmem:[%s27213_s5 + $0x16c0] ss:$52 sps:$4 sm:$0xff]   ;;  %v18738_v39 = vld [vmem:[%s27213_s5 + $0x2e4] ss:$52 sps:$4 sm:$0xff]  }
 0x30b   :  { %10657 = vmatprep.subr.bf16.mxu1 %v18660_v23 }
 0x30c   :  { %v4716_v23 = vmax.f32 %v4363_v63, 0.0  ;;  %v18792_v63 = vld [vmem:[%s27213_s5 + $0x964] ss:$52 sps:$4 sm:$0xff]  }
 0x30d   :  { %10701 = vmatpush1.bf16.msra.mxu0 %v18706_v59  ;;  %v4707_v59 = vmax.f32 %v4359_v12, 0.0 }
 0x30e   :  { %10658 = vmatpush1.bf16.msra.mxu1 %v18658_v10  ;;  %10702 = vmatprep.subr.bf16.mxu0 %v18711_v0  ;;  %v18744_v10 = vld [vmem:[%s27213_s5 + $0x1cdc] ss:$52 sps:$4 sm:$0xff]  }
 0x30f   :  { %10659 = vmatprep.subr.bf16.mxu1 %v18663_v22  ;;  %v23006_v0 = vpack.c.bf16 %v4716_v23, %v4707_v59  ;;  %v18750_v22 = vld [vmem:[%s27213_s5 + $0x1c74] ss:$52 sps:$4 sm:$0xff]  }
 0x311   :  { %10703 = vmatpush1.bf16.msra.mxu0 %v18709_v6  ;;  %v18756_v6 = vld [vmem:[%s27213_s5 + $0x1c0c] ss:$52 sps:$4 sm:$0xff]  }
 0x312   :  { %10660 = vmatpush1.bf16.msra.mxu1 %v18661_v9  ;;  %10704 = vmatprep.subr.bf16.mxu0 %v18714_v20  ;;  %v18748_v9 = vld [vmem:[%s27213_s5 + $0x1c70] ss:$52 sps:$4 sm:$0xff]  }
 0x313   :  { %10661 = vmatprep.subr.bf16.mxu1 %v18666_v15  ;;  %v18754_v15 = vld [vmem:[%s27213_s5 + $0x1c08] ss:$52 sps:$4 sm:$0xff]  }
 0x315   :  { %10705 = vmatpush2.bf16.msra.mxu0 %v18712_v18 }
 0x316   :  { %10662 = vmatpush2.bf16.msra.mxu1 %v18664_v17  ;;  %10706 = vmatprep.subr.bf16.mxu0 %v18717_v44  ;;  %v18762_v17 = vld [vmem:[%s27213_s5 + $0x1ba4] ss:$52 sps:$4 sm:$0xff]   ;;  %v4401_v44 = vpop.f32.mrf.mxu0 }
 0x317   :  { %10663 = vmatprep.subr.bf16.mxu1 %v18669_v2  ;;  %v18760_v2 = vld [vmem:[%s27213_s5 + $0x1ba0] ss:$52 sps:$4 sm:$0xff]  }
 0x319   :  { %10707 = vmatpush2.bf16.msra.mxu0 %v18715_v21 }
 0x31a   :  { %10664 = vmatpush2.bf16.msra.mxu1 %v18667_v11  ;;  %10708 = vmatprep.subr.bf16.mxu0 %v18720_v24  ;;  %v18768_v11 = vld [vmem:[%s27213_s5 + $0x1b3c] ss:$52 sps:$4 sm:$0xff]   ;;  %v18766_v24 = vld [vmem:[%s27213_s5 + $0x1b38] ss:$52 sps:$4 sm:$0xff]  }
 0x31b   :  { %10665 = vmatprep.subr.bf16.mxu1 %v18672_v25  ;;  %v4403_v25 = vpop.f32.mrf.mxu0 }
 0x31d   :  { %10709 = vmatpush2.bf16.msra.mxu0 %v18718_v43  ;;  %v27221_v43 = vsub.s32 7, %v21225_v53 }
 0x31e   :  { %10666 = vmatpush2.bf16.msra.mxu1 %v18670_v38  ;;  %10710 = vmatprep.subr.bf16.mxu0 %v18723_v26  ;;  %v18774_v38 = vld [vmem:[%s27213_s5 + $0x1ad4] ss:$52 sps:$4 sm:$0xff]  }
 0x31f   :  { %10667 = vmatprep.subr.bf16.mxu1 %v18678_v30  ;;  %v4405_v30 = vpop.f32.mrf.mxu0 }
 0x321   :  { %10711 = vmatpush2.bf16.msra.mxu0 %v18721_v33  ;;  %v1579_v33 = vrot.slane %v22762_v51, %v27221_v43 }
 0x322   :  { %10668 = vmatpush2.bf16.msra.mxu1 %v18676_v5  ;;  %10712 = vmatprep.subr.bf16.mxu0 %v18726_v47  ;;  %v18772_v5 = vld [vmem:[%s27213_s5 + $0x1ad0] ss:$52 sps:$4 sm:$0xff]   ;;  %v18780_v47 = vld [vmem:[%s27213_s5 + $0x1a6c] ss:$52 sps:$4 sm:$0xff]  }
 0x323   :  { %10669 = vmatprep.subr.bf16.mxu1 %v18684_v3  ;;  %v1575_v3 = vrot.slane %v22762_v51, %v21262_v35  ;;  %v4404_v48 = vadd.f32 %v4403_v25, %v1579_v33  ;;  %v18784_v51 = vld [vmem:[%s27213_s5 + $0x1a00] ss:$52 sps:$4 sm:$0xff]  }
 0x324   :  { %v18747_v25 = vld [vmem:[%s27213_s5 + $0x214] ss:$52 sps:$4 sm:$0xff]  }
 0x325   :  { %10713 = vmatpush2.bf16.msra.mxu0 %v18724_v41  ;;  %v18778_v41 = vld [vmem:[%s27213_s5 + $0x1a68] ss:$52 sps:$4 sm:$0xff]  }
 0x326   :  { %10670 = vmatpush2.bf16.msra.mxu1 %v18682_v40  ;;  %10714 = vmatprep.subr.bf16.mxu0 %v18729_v45  ;;  %v4407_v45 = vpop.f32.mrf.mxu0 }
 0x327   :  { %10671 = vmatprep.subr.bf16.mxu1 %v18690_v49  ;;  %v18786_v49 = vld [vmem:[%s27213_s5 + $0x1a04] ss:$52 sps:$4 sm:$0xff]   ;;  %v4408_v62 = vadd.f32 %v4407_v45, %v1579_v33 }
 0x328   :  { %v18763_v45 = vld [vmem:[%s27213_s5 + $0xd8] ss:$52 sps:$4 sm:$0xff]  }
 0x329   :  { %10715 = vmatpush2.bf16.msra.mxu0 %v18727_v19 }
 0x32a   :  { %10672 = vmatpush2.bf16.msra.mxu1 %v18688_v36  ;;  %10716 = vmatprep.subr.bf16.mxu0 %v18732_v50  ;;  %v4402_v36 = vadd.f32 %v4401_v44, %v1575_v3  ;;  %v4406_v50 = vadd.f32 %v4405_v30, %v1575_v3  ;;  %v18736_v44 = vld [vmem:[%s27213_s5 + $0x2e0] ss:$52 sps:$4 sm:$0xff]   ;;  %v18751_v30 = vld [vmem:[%s27213_s5 + $0x1a8] ss:$52 sps:$4 sm:$0xff]  }
 0x32b   :  { %10673 = vmatprep.subr.bf16.mxu1 %v18696_v61  ;;  %v18765_v3 = vld [vmem:[%s27213_s5 + $0xdc] ss:$52 sps:$4 sm:$0xff]  }
 0x32d   :  { %10717 = vmatpush2.bf16.msra.mxu0 %v18730_v60  ;;  %v4444_v20 = vpop.f32.mrf.mxu1 }
 0x32e   :  { %10674 = vmatpush2.bf16.msra.mxu1 %v18694_v31  ;;  %10718 = vmatprep.subr.bf16.mxu0 %v18735_v8  ;;  %v4445_v61 = vadd.f32 %v4444_v20, %v4402_v36 }
 0x32f   :  { %10675 = vmatprep.subr.bf16.mxu1 %v18702_v29  ;;  %v4446_v18 = vpop.f32.mrf.mxu1 }
 0x330   :  { %v4447_v14 = vadd.f32 %v4446_v18, %v4404_v48 }
 0x331   :  { %10719 = vmatpush2.bf16.msra.mxu0 %v18733_v46  ;;  %v4448_v21 = vpop.f32.mrf.mxu1 }
 0x332   :  { %10676 = vmatpush2.bf16.msra.mxu1 %v18700_v1  ;;  %10774 = vmatprep.subr.bf16.mxu0 %v18738_v39  ;;  %v4449_v60 = vadd.f32 %v4448_v21, %v4406_v50 }
 0x333   :  { %10731 = vmatprep.subr.bf16.mxu1 %v18744_v10  ;;  %v4450_v26 = vpop.f32.mrf.mxu1 }
 0x334   :  { %v4451_v46 = vadd.f32 %v4450_v26, %v4408_v62  ;;  %v18753_v26 = vld [vmem:[%s27213_s5 + $0x1ac] ss:$52 sps:$4 sm:$0xff]  }
 0x335   :  { %10678 = vmatmul.mubr.bf16.vlgmr.msra.gmra.mxu1 %v23006_v0  ;;  %v4530_v40 = vpop.f32.mrf.mxu1 }
 0x336   :  { %10732 = vmatpush1.bf16.msra.mxu1 %v18742_v27  ;;  %10763 = vmatprep.mubr.bf16.mxu1 %v27225_v16 }
 0x337   :  { %10733 = vmatprep.subr.bf16.mxu1 %v18750_v22  ;;  %v4532_v54 = vpop.f32.mrf.mxu1 }
 0x339   :  { %v4534_v29 = vpop.f32.mrf.mxu1 }
 0x33a   :  { %10734 = vmatpush1.bf16.msra.mxu1 %v18748_v9 }
 0x33b   :  { %10735 = vmatprep.subr.bf16.mxu1 %v18756_v6  ;;  %v4536_v22 = vpop.f32.mrf.mxu1 }
 0x33e   :  { %10736 = vmatpush1.bf16.msra.mxu1 %v18754_v15 }
 0x33f   :  { %10737 = vmatprep.subr.bf16.mxu1 %v18762_v17 }
 0x342   :  { %10738 = vmatpush1.bf16.msra.mxu1 %v18760_v2  ;;  %v18741_v2 = vld [vmem:[%s27213_s5 + $0x27c] ss:$52 sps:$4 sm:$0xff]  }
 0x343   :  { %10739 = vmatprep.subr.bf16.mxu1 %v18768_v11 }
 0x346   :  { %10740 = vmatpush1.bf16.msra.mxu1 %v18766_v24  ;;  %v18739_v24 = vld [vmem:[%s27213_s5 + $0x278] ss:$52 sps:$4 sm:$0xff]  }
 0x347   :  { %10741 = vmatprep.subr.bf16.mxu1 %v18774_v38  ;;  %v18745_v38 = vld [vmem:[%s27213_s5 + $0x210] ss:$52 sps:$4 sm:$0xff]  }
 0x34a   :  { %10742 = vmatpush1.bf16.msra.mxu1 %v18772_v5  ;;  %v18759_v5 = vld [vmem:[%s27213_s5 + $0x144] ss:$52 sps:$4 sm:$0xff]  }
 0x34b   :  { %10743 = vmatprep.subr.bf16.mxu1 %v18780_v47  ;;  %v18757_v47 = vld [vmem:[%s27213_s5 + $0x140] ss:$52 sps:$4 sm:$0xff]  }
 0x34c   :  { %v4487_v19 = vpop.f32.mrf.mxu0 }
 0x34d   :  { %v4488_v1 = vadd.f32 %v4487_v19, %v4445_v61  ;;  %v15663_v19 = vld [vmem:[%s27212_s4 + $0x8] ss:$0 sm:$0xff]  ;;  %v18777_v61 = vld [vmem:[%s27213_s5 + $0xc] ss:$52 sps:$4 sm:$0xff]  }
 0x34e   :  { %v4489_v31 = vpop.f32.mrf.mxu0  ;;  %10744 = vmatpush1.bf16.msra.mxu1 %v18778_v41 }
 0x34f   :  { %v4490_v8 = vadd.f32 %v4489_v31, %v4447_v14  ;;  %10745 = vmatprep.subr.bf16.mxu1 %v18786_v49  ;;  %v4531_v9 = vadd.f32 %v4530_v40, %v4488_v1  ;;  %v18771_v49 = vld [vmem:[%s27213_s5 + $0x74] ss:$52 sps:$4 sm:$0xff]  }
 0x350   :  { %v4491_v12 = vpop.f32.mrf.mxu0 }
 0x351   :  { %v4492_v39 = vadd.f32 %v4491_v12, %v4449_v60  ;;  %v4533_v10 = vadd.f32 %v4532_v54, %v4490_v8  ;;  %v4709_v18 = vmax.f32 %v4531_v9, 0.0  ;;  %v18781_v9 = vld [vmem:[%s27213_s5 + $0x620] ss:$52 sps:$4 sm:$0xff]  }
 0x352   :  { %v4493_v23 = vpop.f32.mrf.mxu0  ;;  %10746 = vmatpush1.bf16.msra.mxu1 %v18784_v51  ;;  %v18769_v51 = vld [vmem:[%s27213_s5 + $0x70] ss:$52 sps:$4 sm:$0xff]  }
 0x353   :  { %v4535_v59 = vadd.f32 %v4534_v29, %v4492_v39  ;;  %v4494_v27 = vadd.f32 %v4493_v23, %v4451_v46  ;;  %10817 = vmatprep.subr.bf16.mxu1 %v18792_v63  ;;  %v4710_v15 = vmax.f32 %v4533_v10, 0.0  ;;  %v18775_v63 = vld [vmem:[%s27213_s5 + $0x8] ss:$52 sps:$4 sm:$0xff]   ;;  %v18783_v46 = vld [vmem:[%s27213_s5 + $0x624] ss:$52 sps:$4 sm:$0xff]  }
 0x355   :  { %v4537_v6 = vadd.f32 %v4536_v22, %v4494_v27  ;;  %v4718_v20 = vmax.f32 %v4535_v59, 0.0  ;;  %v17519_v33 = vpop.f32.mrf.mxu1 }
 0x357   :  { %v4719_v17 = vmax.f32 %v4537_v6, 0.0  ;;  %v23069_v21 = vpack.c.bf16 %v4718_v20, %v4709_v18  ;;  %v17520_v40 = vpop.f32.mrf.mxu1 }
 0x358   :  { %v17521_v50 = vadd.f32 %v17520_v40, %v17519_v33  ;;  %v18793_v33 = vld [vmem:[%s27213_s5 + $0x550] ss:$52 sps:$4 sm:$0xff]   ;;  %v18801_v40 = vld [vmem:[%s27213_s5 + $0x4ec] ss:$52 sps:$4 sm:$0xff]  }
 0x359   :  { %v23067_v11 = vpack.c.bf16 %v4719_v17, %v4710_v15  ;;  %v17522_v36 = vpop.f32.mrf.mxu1  ;;  %v18789_v17 = vld [vmem:[%s27213_s5 + $0x5bc] ss:$52 sps:$4 sm:$0xff]  }
 0x35a   :  { %v4574_v29 = vadd.f32 %v17521_v50, %v15663_v19  ;;  %v18802_v50 = vld [vmem:[%s27213_s5 + $0x890] ss:$52 sps:$4 sm:$0xff]  }
 0x35b   :  { %10720 = vmatprep.mubr.bf16.mxu0 %v23067_v11  ;;  %v17523_v31 = vpop.f32.mrf.mxu1 }
 0x35c   :  { %10721 = vmatmul.mubr.bf16.vlgmr.msra.gmra.mxu0 %v23069_v21  ;;  %v17524_v1 = vadd.f32 %v17523_v31, %v17522_v36  ;;  %v18796_v36 = vld [vmem:[%s27213_s5 + $0x8f8] ss:$52 sps:$4 sm:$0xff]   ;;  %v18819_v31 = vld [vmem:[%s27213_s5 + $0x3b4] ss:$52 sps:$4 sm:$0xff]  }
 0x35d   :  { %10775 = vmatpush1.bf16.msra.mxu0 %v18736_v44  ;;  %10806 = vmatprep.mubr.bf16.mxu0 %v22583_v7 }
 0x35e   :  { %10776 = vmatprep.subr.bf16.mxu0 %v18741_v2  ;;  %v4577_v6 = vadd.f32 %v17524_v1, %v15663_v19  ;;  %v18805_v19 = vld [vmem:[%s27213_s5 + $0x480] ss:$52 sps:$4 sm:$0xff]   ;;  %v18822_v1 = vld [vmem:[%s27213_s5 + $0x75c] ss:$52 sps:$4 sm:$0xff]  }
 0x361   :  { %10777 = vmatpush1.bf16.msra.mxu0 %v18739_v24  ;;  %v18787_v24 = vld [vmem:[%s27213_s5 + $0x5b8] ss:$52 sps:$4 sm:$0xff]  }
 0x362   :  { %10778 = vmatprep.subr.bf16.mxu0 %v18747_v25 }
 0x365   :  { %10779 = vmatpush1.bf16.msra.mxu0 %v18745_v38 }
 0x366   :  { %10780 = vmatprep.subr.bf16.mxu0 %v18753_v26  ;;  %v18795_v26 = vld [vmem:[%s27213_s5 + $0x554] ss:$52 sps:$4 sm:$0xff]  }
 0x369   :  { %10781 = vmatpush1.bf16.msra.mxu0 %v18751_v30 }
 0x36a   :  { %10782 = vmatprep.subr.bf16.mxu0 %v18759_v5  ;;  %v18790_v5 = vld [vmem:[%s27213_s5 + $0x960] ss:$52 sps:$4 sm:$0xff]  }
 0x36c   :  { %v17541_v41 = vpop.f32.mrf.mxu0 }
 0x36d   :  { %10783 = vmatpush1.bf16.msra.mxu0 %v18757_v47 }
 0x36e   :  { %v17542_v48 = vpop.f32.mrf.mxu0  ;;  %10784 = vmatprep.subr.bf16.mxu0 %v18765_v3 }
 0x36f   :  { %v17543_v62 = vadd.f32 %v17542_v48, %v17541_v41  ;;  %v18799_v48 = vld [vmem:[%s27213_s5 + $0x4e8] ss:$52 sps:$4 sm:$0xff]  }
 0x370   :  { %v17544_v54 = vpop.f32.mrf.mxu0 }
 0x371   :  { %10785 = vmatpush1.bf16.msra.mxu0 %v18763_v45  ;;  %v4615_v23 = vadd.f32 %v17543_v62, %v4574_v29  ;;  %v18798_v45 = vld [vmem:[%s27213_s5 + $0x8fc] ss:$52 sps:$4 sm:$0xff]   ;;  %v18814_v29 = vld [vmem:[%s27213_s5 + $0x7c0] ss:$52 sps:$4 sm:$0xff]  }
 0x372   :  { %v17545_v14 = vpop.f32.mrf.mxu0  ;;  %10786 = vmatprep.subr.bf16.mxu0 %v18771_v49  ;;  %v18807_v49 = vld [vmem:[%s27213_s5 + $0x484] ss:$52 sps:$4 sm:$0xff]   ;;  %v18808_v62 = vld [vmem:[%s27213_s5 + $0x828] ss:$52 sps:$4 sm:$0xff]  }
 0x373   :  { %v17546_v10 = vadd.f32 %v17545_v14, %v17544_v54  ;;  %v18804_v54 = vld [vmem:[%s27213_s5 + $0x894] ss:$52 sps:$4 sm:$0xff]   ;;  %v18810_v14 = vld [vmem:[%s27213_s5 + $0x82c] ss:$52 sps:$4 sm:$0xff]  }
 0x374   :  { %v4696_v60 = vpop.f32.mrf.mxu0 }
 0x375   :  { %v17563_v8 = vpop.f32.mrf.mxu1  ;;  %10787 = vmatpush1.bf16.msra.mxu0 %v18769_v51  ;;  %v4618_v44 = vadd.f32 %v17546_v10, %v4577_v6  ;;  %v18813_v51 = vld [vmem:[%s27213_s5 + $0x41c] ss:$52 sps:$4 sm:$0xff]   ;;  %v18829_v10 = vld [vmem:[%s27213_s5 + $0xfe0] ss:$52 sps:$4 sm:$0xff]  }
 0x376   :  { %v17716_v12 = vpop.f32.mrf.mxu0  ;;  %10788 = vmatprep.subr.bf16.mxu0 %v18777_v61  ;;  %v18811_v61 = vld [vmem:[%s27213_s5 + $0x418] ss:$52 sps:$4 sm:$0xff]   ;;  %v18843_v6 = vld [vmem:[%s27213_s5 + $0xf14] ss:$52 sps:$4 sm:$0xff]  }
 0x377   :  { %v17564_v39 = vpop.f32.mrf.mxu1  ;;  %v18823_v12 = vld [vmem:[%s27213_s5 + $0x348] ss:$52 sps:$4 sm:$0xff]  }
 0x378   :  { %v17565_v59 = vadd.f32 %v17564_v39, %v17563_v8  ;;  %v4699_v27 = vpop.f32.mrf.mxu0  ;;  %v18817_v8 = vld [vmem:[%s27213_s5 + $0x3b0] ss:$52 sps:$4 sm:$0xff]   ;;  %v18820_v39 = vld [vmem:[%s27213_s5 + $0x758] ss:$52 sps:$4 sm:$0xff]  }
 0x379   :  { %v17566_v22 = vpop.f32.mrf.mxu1  ;;  %10789 = vmatpush1.bf16.msra.mxu0 %v18775_v63  ;;  %v18825_v63 = vld [vmem:[%s27213_s5 + $0x34c] ss:$52 sps:$4 sm:$0xff]  }
 0x37a   :  { %v4656_v20 = vadd.f32 %v17565_v59, %v4615_v23  ;;  %v17717_v15 = vpop.f32.mrf.mxu0  ;;  %10790 = vmatprep.subr.bf16.mxu0 %v18783_v46  ;;  %v18831_v46 = vld [vmem:[%s27213_s5 + $0xfe4] ss:$52 sps:$4 sm:$0xff]   ;;  %v18828_v23 = vld [vmem:[%s27213_s5 + $0x6f4] ss:$52 sps:$4 sm:$0xff]   ;;  %v18837_v59 = vld [vmem:[%s27213_s5 + $0xf7c] ss:$52 sps:$4 sm:$0xff]  }
 0x37b   :  { %v17567_v18 = vpop.f32.mrf.mxu1  ;;  %v18840_v15 = vld [vmem:[%s27213_s5 + $0xca4] ss:$52 sps:$4 sm:$0xff]  }
 0x37c   :  { %v17568_v2 = vadd.f32 %v17567_v18, %v17566_v22  ;;  %v4697_v25 = vadd.f32 %v4696_v60, %v4656_v20  ;;  %v18816_v60 = vld [vmem:[%s27213_s5 + $0x7c4] ss:$52 sps:$4 sm:$0xff]   ;;  %v18834_v22 = vld [vmem:[%s27213_s5 + $0x68c] ss:$52 sps:$4 sm:$0xff]   ;;  %v18832_v20 = vld [vmem:[%s27213_s5 + $0x688] ss:$52 sps:$4 sm:$0xff]  }
 0x37d   :  { %10791 = vmatpush2.bf16.msra.mxu0 %v18781_v9  ;;  %v18835_v9 = vld [vmem:[%s27213_s5 + $0xf78] ss:$52 sps:$4 sm:$0xff]  }
 0x37e   :  { %v4659_v38 = vadd.f32 %v17568_v2, %v4618_v44  ;;  %10792 = vmatprep.subr.bf16.mxu0 %v18789_v17  ;;  %v4711_v47 = vmax.f32 %v4697_v25, 0.0  ;;  %v18841_v17 = vld [vmem:[%s27213_s5 + $0xf10] ss:$52 sps:$4 sm:$0xff]   ;;  %v18849_v18 = vld [vmem:[%s27213_s5 + $0xeac] ss:$52 sps:$4 sm:$0xff]  }
 0x37f   :  { %v18838_v44 = vld [vmem:[%s27213_s5 + $0xca0] ss:$52 sps:$4 sm:$0xff]   ;;  %v18846_v2 = vld [vmem:[%s27213_s5 + $0xc3c] ss:$52 sps:$4 sm:$0xff]   ;;  %v18855_v25 = vld [vmem:[%s27213_s5 + $0xe44] ss:$52 sps:$4 sm:$0xff]  }
 0x380   :  { %v4700_v30 = vadd.f32 %v4699_v27, %v4659_v38  ;;  %v18826_v27 = vld [vmem:[%s27213_s5 + $0x6f0] ss:$52 sps:$4 sm:$0xff]   ;;  %v18844_v38 = vld [vmem:[%s27213_s5 + $0xc38] ss:$52 sps:$4 sm:$0xff]  }
 0x381   :  { %10793 = vmatpush2.bf16.msra.mxu0 %v18787_v24  ;;  %v18847_v24 = vld [vmem:[%s27213_s5 + $0xea8] ss:$52 sps:$4 sm:$0xff]  }
 0x382   :  { %v4720_v3 = vmax.f32 %v4700_v30, 0.0  ;;  %10794 = vmatprep.subr.bf16.mxu0 %v18795_v26  ;;  %v18852_v26 = vld [vmem:[%s27213_s5 + $0xbd4] ss:$52 sps:$4 sm:$0xff]  }
 0x383   :  { %v18853_v30 = vld [vmem:[%s27213_s5 + $0xe40] ss:$52 sps:$4 sm:$0xff]  }
 0x384   :  { %v23140_v41 = vpack.c.bf16 %v4720_v3, %v4711_v47  ;;  %v18858_v47 = vld [vmem:[%s27213_s5 + $0xb6c] ss:$52 sps:$4 sm:$0xff]   ;;  %v18856_v3 = vld [vmem:[%s27213_s5 + $0xb68] ss:$52 sps:$4 sm:$0xff]  }
 0x385   :  { %10795 = vmatpush2.bf16.msra.mxu0 %v18793_v33  ;;  %v18850_v33 = vld [vmem:[%s27213_s5 + $0xbd0] ss:$52 sps:$4 sm:$0xff]  }
 0x386   :  { %10764 = vmatmul.mubr.bf16.vlgmr.msra.gmra.mxu1 %v23140_v41  ;;  %10796 = vmatprep.subr.bf16.mxu0 %v18801_v40  ;;  %v18859_v40 = vld [vmem:[%s27213_s5 + $0xdd8] ss:$52 sps:$4 sm:$0xff]  }
 0x387   :  { %10818 = vmatpush1.bf16.msra.mxu1 %v18790_v5  ;;  %10849 = vmatprep.mubr.bf16.mxu1 %v22593_v32  ;;  %v18861_v5 = vld [vmem:[%s27213_s5 + $0xddc] ss:$52 sps:$4 sm:$0xff]  }
 0x388   :  { %10819 = vmatprep.subr.bf16.mxu1 %v18798_v45  ;;  %v18867_v45 = vld [vmem:[%s27213_s5 + $0xd74] ss:$52 sps:$4 sm:$0xff]  }
 0x389   :  { %10797 = vmatpush2.bf16.msra.mxu0 %v18799_v48  ;;  %v5738_v48 = vld [vmem:[%s27214_s6] sm:$0xff] }
 0x38a   :  { %10798 = vmatprep.subr.bf16.mxu0 %v18807_v49  ;;  %v18864_v49 = vld [vmem:[%s27213_s5 + $0xb04] ss:$52 sps:$4 sm:$0xff]  }
 0x38b   :  { %10820 = vmatpush1.bf16.msra.mxu1 %v18796_v36  ;;  %v18865_v36 = vld [vmem:[%s27213_s5 + $0xd70] ss:$52 sps:$4 sm:$0xff]  }
 0x38c   :  { %10821 = vmatprep.subr.bf16.mxu1 %v18804_v54  ;;  %v5745_v54 = vrot.slane %v5738_v48, %v21233_v55  ;;  %v18915_v48 = vld [vmem:[%s27213_s5 + $0x10b4] ss:$52 sps:$4 sm:$0xff]  }
 0x38d   :  { %10799 = vmatpush2.bf16.msra.mxu0 %v18805_v19  ;;  %v18873_v19 = vld [vmem:[%s27213_s5 + $0xd0c] ss:$52 sps:$4 sm:$0xff]  }
 0x38e   :  { %10800 = vmatprep.subr.bf16.mxu0 %v18813_v51  ;;  %v18862_v51 = vld [vmem:[%s27213_s5 + $0xb00] ss:$52 sps:$4 sm:$0xff]  }
 0x38f   :  { %10822 = vmatpush1.bf16.msra.mxu1 %v18802_v50  ;;  %v18870_v50 = vld [vmem:[%s27213_s5 + $0xa9c] ss:$52 sps:$4 sm:$0xff]  }
 0x390   :  { %10823 = vmatprep.subr.bf16.mxu1 %v18810_v14 }
 0x391   :  { %10801 = vmatpush2.bf16.msra.mxu0 %v18811_v61 }
 0x392   :  { %10802 = vmatprep.subr.bf16.mxu0 %v18819_v31  ;;  %v18871_v31 = vld [vmem:[%s27213_s5 + $0xd08] ss:$52 sps:$4 sm:$0xff]  }
 0x393   :  { %10824 = vmatpush1.bf16.msra.mxu1 %v18808_v62 }
 0x394   :  { %10825 = vmatprep.subr.bf16.mxu1 %v18816_v60 }
 0x395   :  { %10803 = vmatpush2.bf16.msra.mxu0 %v18817_v8  ;;  %v18879_v8 = vld [vmem:[%s27213_s5 + $0x1324] ss:$52 sps:$4 sm:$0xff]  }
 0x396   :  { %10804 = vmatprep.subr.bf16.mxu0 %v18825_v63 }
 0x397   :  { %10826 = vmatpush1.bf16.msra.mxu1 %v18814_v29  ;;  %v18868_v29 = vld [vmem:[%s27213_s5 + $0xa98] ss:$52 sps:$4 sm:$0xff]  }
 0x398   :  { %10827 = vmatprep.subr.bf16.mxu1 %v18822_v1  ;;  %v18876_v1 = vld [vmem:[%s27213_s5 + $0xa34] ss:$52 sps:$4 sm:$0xff]  }
 0x399   :  { %10805 = vmatpush2.bf16.msra.mxu0 %v18823_v12 }
 0x39a   :  { %10860 = vmatprep.subr.bf16.mxu0 %v18831_v46 }
 0x39b   :  { %10828 = vmatpush1.bf16.msra.mxu1 %v18820_v39 }
 0x39c   :  { %10829 = vmatprep.subr.bf16.mxu1 %v18828_v23  ;;  %10807 = vmatmul.mubr.bf16.vlgmr.msra.gmra.mxu0 %v22136_v4  ;;  %v18877_v23 = vld [vmem:[%s27213_s5 + $0x1320] ss:$52 sps:$4 sm:$0xff]  }
 0x39d   :  { %10861 = vmatpush1.bf16.msra.mxu0 %v18829_v10  ;;  %10892 = vmatprep.mubr.bf16.mxu0 %v22833_v42 }
 0x39e   :  { %10862 = vmatprep.subr.bf16.mxu0 %v18837_v59  ;;  %v18885_v59 = vld [vmem:[%s27213_s5 + $0x12bc] ss:$52 sps:$4 sm:$0xff]  }
 0x39f   :  { %10830 = vmatpush1.bf16.msra.mxu1 %v18826_v27  ;;  %v18874_v27 = vld [vmem:[%s27213_s5 + $0xa30] ss:$52 sps:$4 sm:$0xff]  }
 0x3a0   :  { %10831 = vmatprep.subr.bf16.mxu1 %v18834_v22  ;;  %v18882_v22 = vld [vmem:[%s27213_s5 + $0x9cc] ss:$52 sps:$4 sm:$0xff]  }
 0x3a1   :  { %10863 = vmatpush1.bf16.msra.mxu0 %v18835_v9 }
 0x3a2   :  { %10864 = vmatprep.subr.bf16.mxu0 %v18843_v6  ;;  %v18883_v6 = vld [vmem:[%s27213_s5 + $0x12b8] ss:$52 sps:$4 sm:$0xff]  }
 0x3a3   :  { %10832 = vmatpush1.bf16.msra.mxu1 %v18832_v20  ;;  %v18891_v20 = vld [vmem:[%s27213_s5 + $0x1254] ss:$52 sps:$4 sm:$0xff]  }
 0x3a4   :  { %10833 = vmatprep.subr.bf16.mxu1 %v18840_v15  ;;  %v18880_v15 = vld [vmem:[%s27213_s5 + $0x9c8] ss:$52 sps:$4 sm:$0xff]  }
 0x3a5   :  { %10865 = vmatpush1.bf16.msra.mxu0 %v18841_v17  ;;  %v18888_v17 = vld [vmem:[%s27213_s5 + $0x1664] ss:$52 sps:$4 sm:$0xff]  }
 0x3a6   :  { %10866 = vmatprep.subr.bf16.mxu0 %v18849_v18  ;;  %v18886_v18 = vld [vmem:[%s27213_s5 + $0x1660] ss:$52 sps:$4 sm:$0xff]  }
 0x3a7   :  { %10834 = vmatpush2.bf16.msra.mxu1 %v18838_v44  ;;  %v18889_v44 = vld [vmem:[%s27213_s5 + $0x1250] ss:$52 sps:$4 sm:$0xff]  }
 0x3a8   :  { %10835 = vmatprep.subr.bf16.mxu1 %v18846_v2  ;;  %v18897_v2 = vld [vmem:[%s27213_s5 + $0x11ec] ss:$52 sps:$4 sm:$0xff]  }
 0x3a9   :  { %10867 = vmatpush1.bf16.msra.mxu0 %v18847_v24  ;;  %v18894_v24 = vld [vmem:[%s27213_s5 + $0x15fc] ss:$52 sps:$4 sm:$0xff]  }
 0x3aa   :  { %10868 = vmatprep.subr.bf16.mxu0 %v18855_v25  ;;  %v18892_v25 = vld [vmem:[%s27213_s5 + $0x15f8] ss:$52 sps:$4 sm:$0xff]  }
 0x3ab   :  { %10836 = vmatpush2.bf16.msra.mxu1 %v18844_v38  ;;  %v18895_v38 = vld [vmem:[%s27213_s5 + $0x11e8] ss:$52 sps:$4 sm:$0xff]  }
 0x3ac   :  { %10837 = vmatprep.subr.bf16.mxu1 %v18852_v26  ;;  %v18903_v26 = vld [vmem:[%s27213_s5 + $0x1184] ss:$52 sps:$4 sm:$0xff]  }
 0x3ad   :  { %10869 = vmatpush1.bf16.msra.mxu0 %v18853_v30  ;;  %v18900_v30 = vld [vmem:[%s27213_s5 + $0x1594] ss:$52 sps:$4 sm:$0xff]  }
 0x3ae   :  { %10870 = vmatprep.subr.bf16.mxu0 %v18861_v5  ;;  %v18898_v5 = vld [vmem:[%s27213_s5 + $0x1590] ss:$52 sps:$4 sm:$0xff]  }
 0x3af   :  { %10838 = vmatpush2.bf16.msra.mxu1 %v18850_v33  ;;  %v18901_v33 = vld [vmem:[%s27213_s5 + $0x1180] ss:$52 sps:$4 sm:$0xff]  }
 0x3b0   :  { %10839 = vmatprep.subr.bf16.mxu1 %v18858_v47  ;;  %v18909_v47 = vld [vmem:[%s27213_s5 + $0x111c] ss:$52 sps:$4 sm:$0xff]  }
 0x3b1   :  { %10871 = vmatpush1.bf16.msra.mxu0 %v18859_v40  ;;  %v18904_v40 = vld [vmem:[%s27213_s5 + $0x1528] ss:$52 sps:$4 sm:$0xff]  }
 0x3b2   :  { %10872 = vmatprep.subr.bf16.mxu0 %v18867_v45  ;;  %v18907_v45 = vld [vmem:[%s27213_s5 + $0x1118] ss:$52 sps:$4 sm:$0xff]  }
 0x3b3   :  { %10840 = vmatpush2.bf16.msra.mxu1 %v18856_v3  ;;  %v18906_v3 = vld [vmem:[%s27213_s5 + $0x152c] ss:$52 sps:$4 sm:$0xff]  }
 0x3b4   :  { %10841 = vmatprep.subr.bf16.mxu1 %v18864_v49  ;;  %v10636_v14 = vpop.f32.mrf.mxu0  ;;  %v18912_v49 = vld [vmem:[%s27213_s5 + $0x14c4] ss:$52 sps:$4 sm:$0xff]  }
 0x3b5   :  { %v10593_v61 = vpop.f32.mrf.mxu1  ;;  %10873 = vmatpush1.bf16.msra.mxu0 %v18865_v36  ;;  %v18913_v36 = vld [vmem:[%s27213_s5 + $0x10b0] ss:$52 sps:$4 sm:$0xff]  }
 0x3b6   :  { %v10594_v62 = vadd.f32 %v10593_v61, %v5745_v54  ;;  %v23300_v60 = vpop.f32.mrf.mxu0  ;;  %10874 = vmatprep.subr.bf16.mxu0 %v18873_v19  ;;  %v18910_v19 = vld [vmem:[%s27213_s5 + $0x14c0] ss:$52 sps:$4 sm:$0xff]   ;;  %v18916_v61 = vld [vmem:[%s27213_s5 + $0x1458] ss:$52 sps:$4 sm:$0xff]  }
 0x3b7   :  { %10842 = vmatpush2.bf16.msra.mxu1 %v18862_v51  ;;  %v23305_v63 = vpop.f32.mrf.mxu1  ;;  %v18918_v51 = vld [vmem:[%s27213_s5 + $0x145c] ss:$52 sps:$4 sm:$0xff]  }
 0x3b8   :  { %v23313_v12 = vadd.f32 %v10636_v14, %v10594_v62  ;;  %10843 = vmatprep.subr.bf16.mxu1 %v18870_v50  ;;  %v10640_v39 = vpop.f32.mrf.mxu0  ;;  %v18919_v50 = vld [vmem:[%s27213_s5 + $0x1048] ss:$52 sps:$4 sm:$0xff]   ;;  %v18927_v14 = vld [vmem:[%s27213_s5 + $0x1ce4] ss:$52 sps:$4 sm:$0xff]   ;;  %v18925_v62 = vld [vmem:[%s27213_s5 + $0x1ce0] ss:$52 sps:$4 sm:$0xff]  }
 0x3b9   :  { %v10597_v46 = vpop.f32.mrf.mxu1  ;;  %10875 = vmatpush1.bf16.msra.mxu0 %v18871_v31  ;;  %v18924_v31 = vld [vmem:[%s27213_s5 + $0x13f4] ss:$52 sps:$4 sm:$0xff]  }
 0x3ba   :  { %v10598_v10 = vadd.f32 %v10597_v46, %v5745_v54  ;;  %10876 = vmatprep.subr.bf16.mxu0 %v18879_v8  ;;  %v18921_v54 = vld [vmem:[%s27213_s5 + $0x104c] ss:$52 sps:$4 sm:$0xff]   ;;  %v18933_v8 = vld [vmem:[%s27213_s5 + $0x1c7c] ss:$52 sps:$4 sm:$0xff]  }
 0x3bb   :  { %10844 = vmatpush2.bf16.msra.mxu1 %v18868_v29  ;;  %v18922_v29 = vld [vmem:[%s27213_s5 + $0x13f0] ss:$52 sps:$4 sm:$0xff]   ;;  %v18931_v46 = vld [vmem:[%s27213_s5 + $0x1c78] ss:$52 sps:$4 sm:$0xff]  }
 0x3bc   :  { %v23327_v9 = vadd.f32 %v10640_v39, %v10598_v10  ;;  %10845 = vmatprep.subr.bf16.mxu1 %v18876_v1  ;;  %v18930_v1 = vld [vmem:[%s27213_s5 + $0x138c] ss:$52 sps:$4 sm:$0xff]   ;;  %v18939_v39 = vld [vmem:[%s27213_s5 + $0x1c14] ss:$52 sps:$4 sm:$0xff]   ;;  %v18936_v10 = vld [vmem:[%s27213_s5 + $0x19a4] ss:$52 sps:$4 sm:$0xff]  }
 0x3bd   :  { %10877 = vmatpush2.bf16.msra.mxu0 %v18877_v23  ;;  %v18928_v23 = vld [vmem:[%s27213_s5 + $0x1388] ss:$52 sps:$4 sm:$0xff]  }
 0x3be   :  { %10878 = vmatprep.subr.bf16.mxu0 %v18885_v59  ;;  %v18937_v59 = vld [vmem:[%s27213_s5 + $0x1c10] ss:$52 sps:$4 sm:$0xff]  }
 0x3bf   :  { %10846 = vmatpush2.bf16.msra.mxu1 %v18874_v27  ;;  %v18945_v27 = vld [vmem:[%s27213_s5 + $0x1bac] ss:$52 sps:$4 sm:$0xff]  }
 0x3c0   :  { %10847 = vmatprep.subr.bf16.mxu1 %v18882_v22  ;;  %v18934_v22 = vld [vmem:[%s27213_s5 + $0x19a0] ss:$52 sps:$4 sm:$0xff]  }
 0x3c1   :  { %10879 = vmatpush2.bf16.msra.mxu0 %v18883_v6  ;;  %v18942_v6 = vld [vmem:[%s27213_s5 + $0x193c] ss:$52 sps:$4 sm:$0xff]  }
 0x3c2   :  { %10880 = vmatprep.subr.bf16.mxu0 %v18891_v20  ;;  %v18943_v20 = vld [vmem:[%s27213_s5 + $0x1ba8] ss:$52 sps:$4 sm:$0xff]  }
 0x3c3   :  { %10848 = vmatpush2.bf16.msra.mxu1 %v18880_v15  ;;  %v18951_v15 = vld [vmem:[%s27213_s5 + $0x1b44] ss:$52 sps:$4 sm:$0xff]  }
 0x3c4   :  { %10903 = vmatprep.subr.bf16.mxu1 %v18888_v17  ;;  %v18940_v17 = vld [vmem:[%s27213_s5 + $0x1938] ss:$52 sps:$4 sm:$0xff]  }
 0x3c5   :  { %10881 = vmatpush2.bf16.msra.mxu0 %v18889_v44  ;;  %v18949_v44 = vld [vmem:[%s27213_s5 + $0x1b40] ss:$52 sps:$4 sm:$0xff]  }
 0x3c6   :  { %10850 = vmatmul.mubr.bf16.vlgmr.msra.gmra.mxu1 %v22455_v13  ;;  %10882 = vmatprep.subr.bf16.mxu0 %v18897_v2  ;;  %v18957_v2 = vld [vmem:[%s27213_s5 + $0x1adc] ss:$52 sps:$4 sm:$0xff]  }
 0x3c7   :  { %10904 = vmatpush1.bf16.msra.mxu1 %v18886_v18  ;;  %10935 = vmatprep.mubr.bf16.mxu1 %v23067_v11  ;;  %v18948_v18 = vld [vmem:[%s27213_s5 + $0x18d4] ss:$52 sps:$4 sm:$0xff]  }
 0x3c8   :  { %10905 = vmatprep.subr.bf16.mxu1 %v18894_v24  ;;  %v18946_v24 = vld [vmem:[%s27213_s5 + $0x18d0] ss:$52 sps:$4 sm:$0xff]  }
 0x3c9   :  { %10883 = vmatpush2.bf16.msra.mxu0 %v18895_v38  ;;  %v18955_v38 = vld [vmem:[%s27213_s5 + $0x1ad8] ss:$52 sps:$4 sm:$0xff]  }
 0x3ca   :  { %10884 = vmatprep.subr.bf16.mxu0 %v18903_v26  ;;  %v18963_v26 = vld [vmem:[%s27213_s5 + $0x1a74] ss:$52 sps:$4 sm:$0xff]  }
 0x3cb   :  { %10906 = vmatpush1.bf16.msra.mxu1 %v18892_v25  ;;  %v18954_v25 = vld [vmem:[%s27213_s5 + $0x186c] ss:$52 sps:$4 sm:$0xff]  }
 0x3cc   :  { %10907 = vmatprep.subr.bf16.mxu1 %v18900_v30  ;;  %v18952_v30 = vld [vmem:[%s27213_s5 + $0x1868] ss:$52 sps:$4 sm:$0xff]  }
 0x3cd   :  { %10885 = vmatpush2.bf16.msra.mxu0 %v18901_v33  ;;  %v18961_v33 = vld [vmem:[%s27213_s5 + $0x1a70] ss:$52 sps:$4 sm:$0xff]  }
 0x3ce   :  { %10886 = vmatprep.subr.bf16.mxu0 %v18909_v47  ;;  %v18969_v47 = vld [vmem:[%s27213_s5 + $0x1a0c] ss:$52 sps:$4 sm:$0xff]  }
 0x3cf   :  { %10908 = vmatpush1.bf16.msra.mxu1 %v18898_v5  ;;  %v18960_v5 = vld [vmem:[%s27213_s5 + $0x1804] ss:$52 sps:$4 sm:$0xff]  }
 0x3d0   :  { %10909 = vmatprep.subr.bf16.mxu1 %v18906_v3  ;;  %v23495_v3 = vpop.f32.mrf.mxu1 }
 0x3d1   :  { %10887 = vmatpush2.bf16.msra.mxu0 %v18907_v45  ;;  %v18966_v45 = vld [vmem:[%s27213_s5 + $0x179c] ss:$52 sps:$4 sm:$0xff]  }
 0x3d2   :  { %10888 = vmatprep.subr.bf16.mxu0 %v18915_v48 }
 0x3d3   :  { %10910 = vmatpush1.bf16.msra.mxu1 %v18904_v40  ;;  %v18958_v40 = vld [vmem:[%s27213_s5 + $0x1800] ss:$52 sps:$4 sm:$0xff]  }
 0x3d4   :  { %10911 = vmatprep.subr.bf16.mxu1 %v18912_v49  ;;  %v18967_v49 = vld [vmem:[%s27213_s5 + $0x1a08] ss:$52 sps:$4 sm:$0xff]  }
 0x3d5   :  { %10889 = vmatpush2.bf16.msra.mxu0 %v18913_v36 }
 0x3d6   :  { %10890 = vmatprep.subr.bf16.mxu0 %v18921_v54  ;;  %v18975_v54 = vld [vmem:[%s27213_s5 + $0x96c] ss:$52 sps:$4 sm:$0xff]  }
 0x3d7   :  { %10912 = vmatpush1.bf16.msra.mxu1 %v18910_v19 }
 0x3d8   :  { %10913 = vmatprep.subr.bf16.mxu1 %v18918_v51  ;;  %v18964_v51 = vld [vmem:[%s27213_s5 + $0x1798] ss:$52 sps:$4 sm:$0xff]  }
 0x3d9   :  { %10891 = vmatpush2.bf16.msra.mxu0 %v18919_v50  ;;  %v18972_v50 = vld [vmem:[%s27213_s5 + $0x1734] ss:$52 sps:$4 sm:$0xff]  }
 0x3da   :  { %10946 = vmatprep.subr.bf16.mxu0 %v18927_v14 }
 0x3db   :  { %10914 = vmatpush1.bf16.msra.mxu1 %v18916_v61 }
 0x3dc   :  { %10915 = vmatprep.subr.bf16.mxu1 %v18924_v31  ;;  %10893 = vmatmul.mubr.bf16.vlgmr.msra.gmra.mxu0 %v23006_v0  ;;  %v18981_v31 = vld [vmem:[%s27213_s5 + $0x904] ss:$52 sps:$4 sm:$0xff]  }
 0x3dd   :  { %10947 = vmatpush1.bf16.msra.mxu0 %v18925_v62  ;;  %10978 = vmatprep.mubr.bf16.mxu0 %v27225_v16  ;;  %v18970_v62 = vld [vmem:[%s27213_s5 + $0x1730] ss:$52 sps:$4 sm:$0xff]  }
 0x3de   :  { %10948 = vmatprep.subr.bf16.mxu0 %v18933_v8  ;;  %v18978_v8 = vld [vmem:[%s27213_s5 + $0x16cc] ss:$52 sps:$4 sm:$0xff]  }
 0x3df   :  { %10916 = vmatpush1.bf16.msra.mxu1 %v18922_v29  ;;  %v18987_v29 = vld [vmem:[%s27213_s5 + $0x89c] ss:$52 sps:$4 sm:$0xff]  }
 0x3e0   :  { %10917 = vmatprep.subr.bf16.mxu1 %v18930_v1  ;;  %v18976_v1 = vld [vmem:[%s27213_s5 + $0x16c8] ss:$52 sps:$4 sm:$0xff]  }
 0x3e1   :  { %10949 = vmatpush1.bf16.msra.mxu0 %v18931_v46  ;;  %v18984_v46 = vld [vmem:[%s27213_s5 + $0x2ec] ss:$52 sps:$4 sm:$0xff]  }
 0x3e2   :  { %10950 = vmatprep.subr.bf16.mxu0 %v18939_v39  ;;  %v18982_v39 = vld [vmem:[%s27213_s5 + $0x2e8] ss:$52 sps:$4 sm:$0xff]  }
 0x3e3   :  { %10918 = vmatpush1.bf16.msra.mxu1 %v18928_v23  ;;  %v18985_v23 = vld [vmem:[%s27213_s5 + $0x898] ss:$52 sps:$4 sm:$0xff]  }
 0x3e4   :  { %10919 = vmatprep.subr.bf16.mxu1 %v18936_v10  ;;  %v18993_v10 = vld [vmem:[%s27213_s5 + $0x834] ss:$52 sps:$4 sm:$0xff]  }
 0x3e5   :  { %10951 = vmatpush1.bf16.msra.mxu0 %v18937_v59  ;;  %v18990_v59 = vld [vmem:[%s27213_s5 + $0x284] ss:$52 sps:$4 sm:$0xff]  }
 0x3e6   :  { %10952 = vmatprep.subr.bf16.mxu0 %v18945_v27  ;;  %v18988_v27 = vld [vmem:[%s27213_s5 + $0x280] ss:$52 sps:$4 sm:$0xff]  }
 0x3e7   :  { %10920 = vmatpush2.bf16.msra.mxu1 %v18934_v22  ;;  %v18991_v22 = vld [vmem:[%s27213_s5 + $0x830] ss:$52 sps:$4 sm:$0xff]  }
 0x3e8   :  { %10921 = vmatprep.subr.bf16.mxu1 %v18942_v6  ;;  %v18999_v6 = vld [vmem:[%s27213_s5 + $0x7cc] ss:$52 sps:$4 sm:$0xff]  }
 0x3e9   :  { %10953 = vmatpush1.bf16.msra.mxu0 %v18943_v20 }
 0x3ea   :  { %10954 = vmatprep.subr.bf16.mxu0 %v18951_v15 }
 0x3eb   :  { %10922 = vmatpush2.bf16.msra.mxu1 %v18940_v17 }
 0x3ec   :  { %10923 = vmatprep.subr.bf16.mxu1 %v18948_v18 }
 0x3ed   :  { %10955 = vmatpush1.bf16.msra.mxu0 %v18949_v44 }
 0x3ee   :  { %10956 = vmatprep.subr.bf16.mxu0 %v18957_v2 }
 0x3ef   :  { %10924 = vmatpush2.bf16.msra.mxu1 %v18946_v24 }
 0x3f0   :  { %10925 = vmatprep.subr.bf16.mxu1 %v18954_v25 }
 0x3f1   :  { %10957 = vmatpush1.bf16.msra.mxu0 %v18955_v38 }
 0x3f2   :  { %10958 = vmatprep.subr.bf16.mxu0 %v18963_v26 }
 0x3f3   :  { %10926 = vmatpush2.bf16.msra.mxu1 %v18952_v30 }
 0x3f4   :  { %10927 = vmatprep.subr.bf16.mxu1 %v18960_v5 }
 0x3f5   :  { %v10679_v48 = vpop.f32.mrf.mxu1  ;;  %10959 = vmatpush1.bf16.msra.mxu0 %v18961_v33 }
 0x3f6   :  { %v23507_v36 = vadd.f32 %v10679_v48, %v23313_v12  ;;  %10960 = vmatprep.subr.bf16.mxu0 %v18969_v47  ;;  %v18973_v12 = vld [vmem:[%s27213_s5 + $0x968] ss:$52 sps:$4 sm:$0xff]  }
 0x3f7   :  { %10928 = vmatpush2.bf16.msra.mxu1 %v18958_v40  ;;  %v23512_v19 = vpop.f32.mrf.mxu1 }
 0x3f8   :  { %10929 = vmatprep.subr.bf16.mxu1 %v18966_v45 }
 0x3f9   :  { %v10683_v14 = vpop.f32.mrf.mxu1  ;;  %10961 = vmatpush1.bf16.msra.mxu0 %v18967_v49 }
 0x3fa   :  { %v23524_v61 = vadd.f32 %v10683_v14, %v23327_v9  ;;  %11032 = vmatprep.subr.bf16.mxu0 %v18975_v54  ;;  %v18979_v9 = vld [vmem:[%s27213_s5 + $0x900] ss:$52 sps:$4 sm:$0xff]  }
 0x3fb   :  { %10930 = vmatpush2.bf16.msra.mxu1 %v18964_v51 }
 0x3fc   :  { %10931 = vmatprep.subr.bf16.mxu1 %v18972_v50  ;;  %10979 = vmatmul.mubr.bf16.vlgmr.msra.gmra.mxu0 %v23140_v41 }
 0x3fd   :  { %11033 = vmatpush1.bf16.msra.mxu0 %v18973_v12  ;;  %11064 = vmatprep.mubr.bf16.mxu0 %v22593_v32 }
 0x3fe   :  { %11034 = vmatprep.subr.bf16.mxu0 %v18981_v31 }
 0x3ff   :  { %10932 = vmatpush2.bf16.msra.mxu1 %v18970_v62 }
 0x400   :  { %10933 = vmatprep.subr.bf16.mxu1 %v18978_v8 }
 0x401   :  { %11035 = vmatpush1.bf16.msra.mxu0 %v18979_v9 }
 0x402   :  { %11036 = vmatprep.subr.bf16.mxu0 %v18987_v29 }
 0x403   :  { %10934 = vmatpush2.bf16.msra.mxu1 %v18976_v1 }
 0x404   :  { %10989 = vmatprep.subr.bf16.mxu1 %v18984_v46 }
 0x405   :  { %11037 = vmatpush1.bf16.msra.mxu0 %v18985_v23 }
 0x406   :  { %10936 = vmatmul.mubr.bf16.vlgmr.msra.gmra.mxu1 %v23069_v21  ;;  %11038 = vmatprep.subr.bf16.mxu0 %v18993_v10 }
 0x407   :  { %10990 = vmatpush1.bf16.msra.mxu1 %v18982_v39  ;;  %11021 = vmatprep.mubr.bf16.mxu1 %v22583_v7 }
 0x408   :  { %16 = vsyncpa [#allocation3], 0  ;;  %10991 = vmatprep.subr.bf16.mxu1 %v18990_v59  ;;  %v18996_v20 = vld [vmem:[%s27213_s5 + $0x21c] ss:$52 sps:$4 sm:$0xff]   ;;  %v19005_v17 = vld [vmem:[%s27213_s5 + $0x764] ss:$52 sps:$4 sm:$0xff]   ;;  %v23626_v54 = vpop.f32.mrf.mxu0 }
 0x409   :  { %11039 = vmatpush1.bf16.msra.mxu0 %v18991_v22  ;;  %v18997_v15 = vld [vmem:[%s27213_s5 + $0x7c8] ss:$52 sps:$4 sm:$0xff]   ;;  %v18994_v18 = vld [vmem:[%s27213_s5 + $0x218] ss:$52 sps:$4 sm:$0xff]   ;;  %v19003_v2 = vld [vmem:[%s27213_s5 + $0x760] ss:$52 sps:$4 sm:$0xff]  }
 0x40a   :  { %11040 = vmatprep.subr.bf16.mxu0 %v18999_v6  ;;  %v19002_v44 = vld [vmem:[%s27213_s5 + $0x1b4] ss:$52 sps:$4 sm:$0xff]   ;;  %v19011_v24 = vld [vmem:[%s27213_s5 + $0x6fc] ss:$52 sps:$4 sm:$0xff]   ;;  %v19008_v38 = vld [vmem:[%s27213_s5 + $0x14c] ss:$52 sps:$4 sm:$0xff]  }
 0x40b   :  { %10992 = vmatpush1.bf16.msra.mxu1 %v18988_v27  ;;  %v19000_v25 = vld [vmem:[%s27213_s5 + $0x1b0] ss:$52 sps:$4 sm:$0xff]   ;;  %v19009_v26 = vld [vmem:[%s27213_s5 + $0x6f8] ss:$52 sps:$4 sm:$0xff]   ;;  %v19017_v30 = vld [vmem:[%s27213_s5 + $0x694] ss:$52 sps:$4 sm:$0xff]  }
 0x40c   :  { %10993 = vmatprep.subr.bf16.mxu1 %v18996_v20  ;;  %v19006_v5 = vld [vmem:[%s27213_s5 + $0x148] ss:$52 sps:$4 sm:$0xff]   ;;  %v19014_v33 = vld [vmem:[%s27213_s5 + $0xe4] ss:$52 sps:$4 sm:$0xff]   ;;  %v19023_v40 = vld [vmem:[%s27213_s5 + $0xcac] ss:$52 sps:$4 sm:$0xff]  }
 0x40d   :  { %11041 = vmatpush1.bf16.msra.mxu0 %v18997_v15  ;;  %v19015_v47 = vld [vmem:[%s27213_s5 + $0x690] ss:$52 sps:$4 sm:$0xff]   ;;  %v19012_v45 = vld [vmem:[%s27213_s5 + $0xe0] ss:$52 sps:$4 sm:$0xff]   ;;  %v19021_v49 = vld [vmem:[%s27213_s5 + $0xca8] ss:$52 sps:$4 sm:$0xff]  }
 0x40e   :  { %11042 = vmatprep.subr.bf16.mxu0 %v19005_v17  ;;  %v19020_v48 = vld [vmem:[%s27213_s5 + $0x7c] ss:$52 sps:$4 sm:$0xff]   ;;  %v19029_v51 = vld [vmem:[%s27213_s5 + $0xc44] ss:$52 sps:$4 sm:$0xff]   ;;  %v19026_v12 = vld [vmem:[%s27213_s5 + $0x14] ss:$52 sps:$4 sm:$0xff]  }
 0x40f   :  { %10994 = vmatpush1.bf16.msra.mxu1 %v18994_v18  ;;  %v19018_v50 = vld [vmem:[%s27213_s5 + $0x78] ss:$52 sps:$4 sm:$0xff]   ;;  %v19027_v62 = vld [vmem:[%s27213_s5 + $0xc40] ss:$52 sps:$4 sm:$0xff]   ;;  %v19035_v9 = vld [vmem:[%s27213_s5 + $0xbdc] ss:$52 sps:$4 sm:$0xff]  }
 0x410   :  { %10995 = vmatprep.subr.bf16.mxu1 %v19002_v44  ;;  %v19024_v29 = vld [vmem:[%s27213_s5 + $0x10] ss:$52 sps:$4 sm:$0xff]   ;;  %v19032_v1 = vld [vmem:[%s27213_s5 + $0x62c] ss:$52 sps:$4 sm:$0xff]   ;;  %v19041_v23 = vld [vmem:[%s27213_s5 + $0xb74] ss:$52 sps:$4 sm:$0xff]  }
 0x411   :  { %11043 = vmatpush1.bf16.msra.mxu0 %v19003_v2  ;;  %v19033_v39 = vld [vmem:[%s27213_s5 + $0xbd8] ss:$52 sps:$4 sm:$0xff]   ;;  %v19030_v10 = vld [vmem:[%s27213_s5 + $0x628] ss:$52 sps:$4 sm:$0xff]   ;;  %v19039_v59 = vld [vmem:[%s27213_s5 + $0xb70] ss:$52 sps:$4 sm:$0xff]  }
 0x412   :  { %11044 = vmatprep.subr.bf16.mxu0 %v19011_v24  ;;  %v19047_v27 = vld [vmem:[%s27213_s5 + $0xb0c] ss:$52 sps:$4 sm:$0xff]   ;;  %v19044_v6 = vld [vmem:[%s27213_s5 + $0x55c] ss:$52 sps:$4 sm:$0xff]   ;;  %v19053_v15 = vld [vmem:[%s27213_s5 + $0xaa4] ss:$52 sps:$4 sm:$0xff]  }
 0x413   :  { %10996 = vmatpush1.bf16.msra.mxu1 %v19000_v25  ;;  %v19036_v22 = vld [vmem:[%s27213_s5 + $0x5c0] ss:$52 sps:$4 sm:$0xff]   ;;  %v19045_v20 = vld [vmem:[%s27213_s5 + $0xb08] ss:$52 sps:$4 sm:$0xff]   ;;  %v19042_v17 = vld [vmem:[%s27213_s5 + $0x558] ss:$52 sps:$4 sm:$0xff]  }
 0x414   :  { %10997 = vmatprep.subr.bf16.mxu1 %v19008_v38  ;;  %v19050_v18 = vld [vmem:[%s27213_s5 + $0x4f4] ss:$52 sps:$4 sm:$0xff]   ;;  %v19059_v2 = vld [vmem:[%s27213_s5 + $0xa3c] ss:$52 sps:$4 sm:$0xff]   ;;  %v19056_v25 = vld [vmem:[%s27213_s5 + $0x48c] ss:$52 sps:$4 sm:$0xff]  }
 0x415   :  { %11045 = vmatpush1.bf16.msra.mxu0 %v19009_v26  ;;  %v19051_v44 = vld [vmem:[%s27213_s5 + $0xaa0] ss:$52 sps:$4 sm:$0xff]   ;;  %v19048_v24 = vld [vmem:[%s27213_s5 + $0x4f0] ss:$52 sps:$4 sm:$0xff]   ;;  %v19057_v38 = vld [vmem:[%s27213_s5 + $0xa38] ss:$52 sps:$4 sm:$0xff]  }
 0x416   :  { %11046 = vmatprep.subr.bf16.mxu0 %v19017_v30  ;;  %v19065_v26 = vld [vmem:[%s27213_s5 + $0x9d4] ss:$52 sps:$4 sm:$0xff]   ;;  %vm14515_vm0 = vcmask 523264  }
 0x417   :  { %10998 = vmatpush1.bf16.msra.mxu1 %v19006_v5  ;;  %v19054_v30 = vld [vmem:[%s27213_s5 + $0x488] ss:$52 sps:$4 sm:$0xff]   ;;  %v19062_v5 = vld [vmem:[%s27213_s5 + $0x424] ss:$52 sps:$4 sm:$0xff]  }
 0x418   :  { %10999 = vmatprep.subr.bf16.mxu1 %v19014_v33  ;;  %v19063_v33 = vld [vmem:[%s27213_s5 + $0x9d0] ss:$52 sps:$4 sm:$0xff]  }
 0x419   :  { %11047 = vmatpush1.bf16.msra.mxu0 %v19015_v47  ;;  %v19071_v47 = vld [vmem:[%s27213_s5 + $0x166c] ss:$52 sps:$4 sm:$0xff]  }
 0x41a   :  { %11048 = vmatprep.subr.bf16.mxu0 %v19023_v40  ;;  %v19060_v40 = vld [vmem:[%s27213_s5 + $0x420] ss:$52 sps:$4 sm:$0xff]  }
 0x41b   :  { %11000 = vmatpush1.bf16.msra.mxu1 %v19012_v45  ;;  %v19068_v45 = vld [vmem:[%s27213_s5 + $0x3bc] ss:$52 sps:$4 sm:$0xff]  }
 0x41c   :  { %11001 = vmatprep.subr.bf16.mxu1 %v19020_v48  ;;  %v10722_v14 = vpop.f32.mrf.mxu0  ;;  %v19069_v48 = vld [vmem:[%s27213_s5 + $0x1668] ss:$52 sps:$4 sm:$0xff]  }
 0x41d   :  { %v23638_v31 = vadd.f32 %v10722_v14, %v23507_v36  ;;  %11049 = vmatpush2.bf16.msra.mxu0 %v19021_v49  ;;  %v19077_v49 = vld [vmem:[%s27213_s5 + $0x1604] ss:$52 sps:$4 sm:$0xff]   ;;  %v19075_v14 = vld [vmem:[%s27213_s5 + $0x1600] ss:$52 sps:$4 sm:$0xff]  }
 0x41e   :  { %v23643_v8 = vpop.f32.mrf.mxu0  ;;  %11050 = vmatprep.subr.bf16.mxu0 %v19029_v51  ;;  %v19066_v51 = vld [vmem:[%s27213_s5 + $0x3b8] ss:$52 sps:$4 sm:$0xff]  }
 0x41f   :  { %11002 = vmatpush1.bf16.msra.mxu1 %v19018_v50  ;;  %v19074_v50 = vld [vmem:[%s27213_s5 + $0x354] ss:$52 sps:$4 sm:$0xff]  }
 0x420   :  { %11003 = vmatprep.subr.bf16.mxu1 %v19026_v12  ;;  %v10726_v36 = vpop.f32.mrf.mxu0  ;;  %v19083_v12 = vld [vmem:[%s27213_s5 + $0x159c] ss:$52 sps:$4 sm:$0xff]  }
 0x421   :  { %v23655_v46 = vadd.f32 %v10726_v36, %v23524_v61  ;;  %11051 = vmatpush2.bf16.msra.mxu0 %v19027_v62  ;;  %v19038_v61 = vld [vmem:[%s27213_s5 + $0x5c4] ss:$52 sps:$4 sm:$0xff]   ;;  %v19089_v36 = vld [vmem:[%s27213_s5 + $0x1534] ss:$52 sps:$4 sm:$0xff]  }
 0x422   :  { %11052 = vmatprep.subr.bf16.mxu0 %v19035_v9  ;;  %v19072_v62 = vld [vmem:[%s27213_s5 + $0x350] ss:$52 sps:$4 sm:$0xff]   ;;  %v19080_v9 = vld [vmem:[%s27213_s5 + $0xfec] ss:$52 sps:$4 sm:$0xff]  }
 0x423   :  { %11004 = vmatpush1.bf16.msra.mxu1 %v19024_v29  ;;  %v19081_v29 = vld [vmem:[%s27213_s5 + $0x1598] ss:$52 sps:$4 sm:$0xff]  }
 0x424   :  { %11005 = vmatprep.subr.bf16.mxu1 %v19032_v1  ;;  %v19078_v1 = vld [vmem:[%s27213_s5 + $0xfe8] ss:$52 sps:$4 sm:$0xff]  }
 0x425   :  { %11053 = vmatpush2.bf16.msra.mxu0 %v19033_v39  ;;  %v23764_v39 = vpop.f32.mrf.mxu1 }
 0x426   :  { %11054 = vmatprep.subr.bf16.mxu0 %v19041_v23  ;;  %v19086_v23 = vld [vmem:[%s27213_s5 + $0xf84] ss:$52 sps:$4 sm:$0xff]  }
 0x427   :  { %11006 = vmatpush2.bf16.msra.mxu1 %v19030_v10  ;;  %v19087_v10 = vld [vmem:[%s27213_s5 + $0x1530] ss:$52 sps:$4 sm:$0xff]  }
 0x428   :  { %11007 = vmatprep.subr.bf16.mxu1 %v19038_v61 }
 0x429   :  { %11055 = vmatpush2.bf16.msra.mxu0 %v19039_v59  ;;  %v19095_v59 = vld [vmem:[%s27213_s5 + $0x14cc] ss:$52 sps:$4 sm:$0xff]  }
 0x42a   :  { %11056 = vmatprep.subr.bf16.mxu0 %v19047_v27 }
 0x42b   :  { %11008 = vmatpush2.bf16.msra.mxu1 %v19036_v22  ;;  %v19084_v22 = vld [vmem:[%s27213_s5 + $0xf80] ss:$52 sps:$4 sm:$0xff]  }
 0x42c   :  { %11009 = vmatprep.subr.bf16.mxu1 %v19044_v6 }
 0x42d   :  { %11057 = vmatpush2.bf16.msra.mxu0 %v19045_v20  ;;  %v19092_v20 = vld [vmem:[%s27213_s5 + $0xf1c] ss:$52 sps:$4 sm:$0xff]  }
 0x42e   :  { %11058 = vmatprep.subr.bf16.mxu0 %v19053_v15  ;;  %v19093_v15 = vld [vmem:[%s27213_s5 + $0x14c8] ss:$52 sps:$4 sm:$0xff]  }
 0x42f   :  { %11010 = vmatpush2.bf16.msra.mxu1 %v19042_v17  ;;  %v19101_v17 = vld [vmem:[%s27213_s5 + $0x1464] ss:$52 sps:$4 sm:$0xff]  }
 0x430   :  { %11011 = vmatprep.subr.bf16.mxu1 %v19050_v18 }
 0x431   :  { %11059 = vmatpush2.bf16.msra.mxu0 %v19051_v44  ;;  %v19090_v44 = vld [vmem:[%s27213_s5 + $0xf18] ss:$52 sps:$4 sm:$0xff]  }
 0x432   :  { %11060 = vmatprep.subr.bf16.mxu0 %v19059_v2  ;;  %v19098_v2 = vld [vmem:[%s27213_s5 + $0xeb4] ss:$52 sps:$4 sm:$0xff]  }
 0x433   :  { %11012 = vmatpush2.bf16.msra.mxu1 %v19048_v24 }
 0x434   :  { %11013 = vmatprep.subr.bf16.mxu1 %v19056_v25 }
 0x435   :  { %11061 = vmatpush2.bf16.msra.mxu0 %v19057_v38  ;;  %v19099_v38 = vld [vmem:[%s27213_s5 + $0x1460] ss:$52 sps:$4 sm:$0xff]  }
 0x436   :  { %11062 = vmatprep.subr.bf16.mxu0 %v19065_v26 }
 0x437   :  { %11014 = vmatpush2.bf16.msra.mxu1 %v19054_v30  ;;  %v19096_v30 = vld [vmem:[%s27213_s5 + $0xeb0] ss:$52 sps:$4 sm:$0xff]  }
 0x438   :  { %11015 = vmatprep.subr.bf16.mxu1 %v19062_v5  ;;  %v19104_v5 = vld [vmem:[%s27213_s5 + $0xe4c] ss:$52 sps:$4 sm:$0xff]  }
 0x439   :  { %11063 = vmatpush2.bf16.msra.mxu0 %v19063_v33  ;;  %v19105_v33 = vld [vmem:[%s27213_s5 + $0x13f8] ss:$52 sps:$4 sm:$0xff]  }
 0x43a   :  { %11118 = vmatprep.subr.bf16.mxu0 %v19071_v47  ;;  %v19113_v47 = vld [vmem:[%s27213_s5 + $0x1394] ss:$52 sps:$4 sm:$0xff]  }
 0x43b   :  { %11016 = vmatpush2.bf16.msra.mxu1 %v19060_v40  ;;  %v19102_v40 = vld [vmem:[%s27213_s5 + $0xe48] ss:$52 sps:$4 sm:$0xff]  }
 0x43c   :  { %11017 = vmatprep.subr.bf16.mxu1 %v19068_v45  ;;  %11065 = vmatmul.mubr.bf16.vlgmr.msra.gmra.mxu0 %v22455_v13  ;;  %v19110_v45 = vld [vmem:[%s27213_s5 + $0xde4] ss:$52 sps:$4 sm:$0xff]  }
 0x43d   :  { %11119 = vmatpush1.bf16.msra.mxu0 %v19069_v48  ;;  %11150 = vmatprep.mubr.bf16.mxu0 %v23067_v11  ;;  %v19111_v48 = vld [vmem:[%s27213_s5 + $0x1390] ss:$52 sps:$4 sm:$0xff]  }
 0x43e   :  { %11120 = vmatprep.subr.bf16.mxu0 %v19077_v49  ;;  %v19119_v49 = vld [vmem:[%s27213_s5 + $0x19ac] ss:$52 sps:$4 sm:$0xff]  }
 0x43f   :  { %11018 = vmatpush2.bf16.msra.mxu1 %v19066_v51  ;;  %v19108_v51 = vld [vmem:[%s27213_s5 + $0xde0] ss:$52 sps:$4 sm:$0xff]  }
 0x440   :  { %11019 = vmatprep.subr.bf16.mxu1 %v19074_v50  ;;  %v19116_v50 = vld [vmem:[%s27213_s5 + $0xd7c] ss:$52 sps:$4 sm:$0xff]  }
 0x441   :  { %11121 = vmatpush1.bf16.msra.mxu0 %v19075_v14  ;;  %v19117_v14 = vld [vmem:[%s27213_s5 + $0x19a8] ss:$52 sps:$4 sm:$0xff]  }
 0x442   :  { %11122 = vmatprep.subr.bf16.mxu0 %v19083_v12  ;;  %v19125_v12 = vld [vmem:[%s27213_s5 + $0x1944] ss:$52 sps:$4 sm:$0xff]  }
 0x443   :  { %11020 = vmatpush2.bf16.msra.mxu1 %v19072_v62  ;;  %v19114_v62 = vld [vmem:[%s27213_s5 + $0xd78] ss:$52 sps:$4 sm:$0xff]  }
 0x444   :  { %11075 = vmatprep.subr.bf16.mxu1 %v19080_v9  ;;  %v19122_v9 = vld [vmem:[%s27213_s5 + $0xd14] ss:$52 sps:$4 sm:$0xff]  }
 0x445   :  { %11123 = vmatpush1.bf16.msra.mxu0 %v19081_v29  ;;  %v19123_v29 = vld [vmem:[%s27213_s5 + $0x1940] ss:$52 sps:$4 sm:$0xff]  }
 0x446   :  { %11022 = vmatmul.mubr.bf16.vlgmr.msra.gmra.mxu1 %v22136_v4  ;;  %v10765_v61 = vpop.f32.mrf.mxu1  ;;  %11124 = vmatprep.subr.bf16.mxu0 %v19089_v36  ;;  %v19131_v36 = vld [vmem:[%s27213_s5 + $0x18dc] ss:$52 sps:$4 sm:$0xff]  }
 0x447   :  { %v10766_v27 = vadd.f32 %v10765_v61, %v23638_v31  ;;  %11076 = vmatpush1.bf16.msra.mxu1 %v19078_v1  ;;  %11107 = vmatprep.mubr.bf16.mxu1 %v22833_v42  ;;  %v19120_v1 = vld [vmem:[%s27213_s5 + $0xd10] ss:$52 sps:$4 sm:$0xff]   ;;  %v19137_v61 = vld [vmem:[%s27213_s5 + $0x1874] ss:$52 sps:$4 sm:$0xff]  }
 0x448   :  { %v23781_v6 = vpop.f32.mrf.mxu1  ;;  %11077 = vmatprep.subr.bf16.mxu1 %v19086_v23  ;;  %v19128_v23 = vld [vmem:[%s27213_s5 + $0x132c] ss:$52 sps:$4 sm:$0xff]  }
 0x449   :  { %11125 = vmatpush1.bf16.msra.mxu0 %v19087_v10  ;;  %v12054_v24 = vmax.f32 %v10766_v27, 0.0  ;;  %v19129_v10 = vld [vmem:[%s27213_s5 + $0x18d8] ss:$52 sps:$4 sm:$0xff]  }
 0x44a   :  { %v10769_v31 = vpop.f32.mrf.mxu1  ;;  %11126 = vmatprep.subr.bf16.mxu0 %v19095_v59  ;;  %v19126_v59 = vld [vmem:[%s27213_s5 + $0x1328] ss:$52 sps:$4 sm:$0xff]   ;;  %v19134_v27 = vld [vmem:[%s27213_s5 + $0x12c4] ss:$52 sps:$4 sm:$0xff]  }
 0x44b   :  { %v10770_v18 = vadd.f32 %v10769_v31, %v23655_v46  ;;  %11078 = vmatpush1.bf16.msra.mxu1 %v19084_v22  ;;  %v19107_v46 = vld [vmem:[%s27213_s5 + $0x13fc] ss:$52 sps:$4 sm:$0xff]  }
 0x44c   :  { %11079 = vmatprep.subr.bf16.mxu1 %v19092_v20  ;;  %v19135_v22 = vld [vmem:[%s27213_s5 + $0x1870] ss:$52 sps:$4 sm:$0xff]   ;;  %v19143_v20 = vld [vmem:[%s27213_s5 + $0x180c] ss:$52 sps:$4 sm:$0xff]  }
 0x44d   :  { %v12067_v25 = vmax.f32 %v10770_v18, 0.0  ;;  %11127 = vmatpush1.bf16.msra.mxu0 %v19093_v15  ;;  %v19132_v15 = vld [vmem:[%s27213_s5 + $0x12c0] ss:$52 sps:$4 sm:$0xff]   ;;  %v19140_v31 = vld [vmem:[%s27213_s5 + $0x125c] ss:$52 sps:$4 sm:$0xff]  }
 0x44e   :  { %11128 = vmatprep.subr.bf16.mxu0 %v19101_v17  ;;  %v19141_v17 = vld [vmem:[%s27213_s5 + $0x1808] ss:$52 sps:$4 sm:$0xff]   ;;  %v19149_v18 = vld [vmem:[%s27213_s5 + $0x17a4] ss:$52 sps:$4 sm:$0xff]  }
 0x44f   :  { %v23805_v26 = vpack.c.bf16 %v12067_v25, %v12054_v24  ;;  %11080 = vmatpush1.bf16.msra.mxu1 %v19090_v44  ;;  %v19138_v44 = vld [vmem:[%s27213_s5 + $0x1258] ss:$52 sps:$4 sm:$0xff]   ;;  %v19147_v24 = vld [vmem:[%s27213_s5 + $0x17a0] ss:$52 sps:$4 sm:$0xff]   ;;  %v19155_v25 = vld [vmem:[%s27213_s5 + $0x173c] ss:$52 sps:$4 sm:$0xff]  }
 0x450   :  { %11081 = vmatprep.subr.bf16.mxu1 %v19098_v2  ;;  %v19146_v2 = vld [vmem:[%s27213_s5 + $0x11f4] ss:$52 sps:$4 sm:$0xff]  }
 0x451   :  { %11129 = vmatpush1.bf16.msra.mxu0 %v19099_v38  ;;  %v19144_v38 = vld [vmem:[%s27213_s5 + $0x11f0] ss:$52 sps:$4 sm:$0xff]  }
 0x452   :  { %11130 = vmatprep.subr.bf16.mxu0 %v19107_v46  ;;  %v19152_v46 = vld [vmem:[%s27213_s5 + $0x118c] ss:$52 sps:$4 sm:$0xff]  }
 0x453   :  { %11082 = vmatpush1.bf16.msra.mxu1 %v19096_v30  ;;  %v19153_v30 = vld [vmem:[%s27213_s5 + $0x1738] ss:$52 sps:$4 sm:$0xff]  }
 0x454   :  { %11083 = vmatprep.subr.bf16.mxu1 %v19104_v5  ;;  %v19161_v5 = vld [vmem:[%s27213_s5 + $0x16d4] ss:$52 sps:$4 sm:$0xff]  }
 0x455   :  { %11131 = vmatpush1.bf16.msra.mxu0 %v19105_v33  ;;  %v19150_v33 = vld [vmem:[%s27213_s5 + $0x1188] ss:$52 sps:$4 sm:$0xff]  }
 0x456   :  { %11132 = vmatprep.subr.bf16.mxu0 %v19113_v47  ;;  %v19158_v47 = vld [vmem:[%s27213_s5 + $0x1124] ss:$52 sps:$4 sm:$0xff]  }
 0x457   :  { %11084 = vmatpush1.bf16.msra.mxu1 %v19102_v40  ;;  %v19159_v40 = vld [vmem:[%s27213_s5 + $0x16d0] ss:$52 sps:$4 sm:$0xff]  }
 0x458   :  { %11085 = vmatprep.subr.bf16.mxu1 %v19110_v45  ;;  %v19167_v45 = vld [vmem:[%s27213_s5 + $0x2f4] ss:$52 sps:$4 sm:$0xff]  }
 0x459   :  { %11133 = vmatpush1.bf16.msra.mxu0 %v19111_v48  ;;  %v19156_v48 = vld [vmem:[%s27213_s5 + $0x1120] ss:$52 sps:$4 sm:$0xff]  }
 0x45a   :  { %11134 = vmatprep.subr.bf16.mxu0 %v19119_v49  ;;  %v19164_v49 = vld [vmem:[%s27213_s5 + $0x10bc] ss:$52 sps:$4 sm:$0xff]  }
 0x45b   :  { %11086 = vmatpush1.bf16.msra.mxu1 %v19108_v51  ;;  %v19165_v51 = vld [vmem:[%s27213_s5 + $0x2f0] ss:$52 sps:$4 sm:$0xff]  }
 0x45c   :  { %11087 = vmatprep.subr.bf16.mxu1 %v19116_v50  ;;  %v19173_v50 = vld [vmem:[%s27213_s5 + $0x28c] ss:$52 sps:$4 sm:$0xff]  }
 0x45d   :  { %11135 = vmatpush2.bf16.msra.mxu0 %v19117_v14  ;;  %v19162_v14 = vld [vmem:[%s27213_s5 + $0x10b8] ss:$52 sps:$4 sm:$0xff]  }
 0x45e   :  { %11136 = vmatprep.subr.bf16.mxu0 %v19125_v12  ;;  %v23942_v12 = vpop.f32.mrf.mxu0 }
 0x45f   :  { %11088 = vmatpush1.bf16.msra.mxu1 %v19114_v62  ;;  %v19170_v62 = vld [vmem:[%s27213_s5 + $0x1054] ss:$52 sps:$4 sm:$0xff]  }
 0x460   :  { %11089 = vmatprep.subr.bf16.mxu1 %v19122_v9  ;;  %v19171_v9 = vld [vmem:[%s27213_s5 + $0x288] ss:$52 sps:$4 sm:$0xff]  }
 0x461   :  { %11137 = vmatpush2.bf16.msra.mxu0 %v19123_v29  ;;  %v10808_v29 = vpop.f32.mrf.mxu0 }
 0x462   :  { %11138 = vmatprep.subr.bf16.mxu0 %v19131_v36  ;;  %v19179_v36 = vld [vmem:[%s27213_s5 + $0x224] ss:$52 sps:$4 sm:$0xff]  }
 0x463   :  { %11090 = vmatpush1.bf16.msra.mxu1 %v19120_v1  ;;  %v19168_v1 = vld [vmem:[%s27213_s5 + $0x1050] ss:$52 sps:$4 sm:$0xff]  }
 0x464   :  { %11091 = vmatprep.subr.bf16.mxu1 %v19128_v23  ;;  %v19176_v23 = vld [vmem:[%s27213_s5 + $0x1cec] ss:$52 sps:$4 sm:$0xff]  }
 0x465   :  { %11139 = vmatpush2.bf16.msra.mxu0 %v19129_v10  ;;  %v23964_v10 = vld [vmem:[%s27214_s6] sm:$0xff] }
 0x466   :  { %11140 = vmatprep.subr.bf16.mxu0 %v19137_v61  ;;  %v5753_v61 = vrot.slane %v23964_v10, %v21236_v56 }
 0x467   :  { %11092 = vmatpush2.bf16.msra.mxu1 %v19126_v59  ;;  %v19177_v59 = vld [vmem:[%s27213_s5 + $0x220] ss:$52 sps:$4 sm:$0xff]  }
 0x468   :  { %11093 = vmatprep.subr.bf16.mxu1 %v19134_v27  ;;  %v23971_v27 = vpop.f32.mrf.mxu0 }
 0x469   :  { %11141 = vmatpush2.bf16.msra.mxu0 %v19135_v22  ;;  %v19185_v22 = vld [vmem:[%s27213_s5 + $0x1bc] ss:$52 sps:$4 sm:$0xff]  }
 0x46a   :  { %11142 = vmatprep.subr.bf16.mxu0 %v19143_v20  ;;  %v19174_v20 = vld [vmem:[%s27213_s5 + $0x1ce8] ss:$52 sps:$4 sm:$0xff]  }
 0x46b   :  { %11094 = vmatpush2.bf16.msra.mxu1 %v19132_v15  ;;  %v23979_v15 = vpop.f32.mrf.mxu1 }
 0x46c   :  { %11095 = vmatprep.subr.bf16.mxu1 %v19140_v31  ;;  %v19182_v31 = vld [vmem:[%s27213_s5 + $0x1c84] ss:$52 sps:$4 sm:$0xff]  }
 0x46d   :  { %11143 = vmatpush2.bf16.msra.mxu0 %v19141_v17  ;;  %v10809_v17 = vadd.f32 %v10808_v29, %v5753_v61  ;;  %v19209_v29 = vld [vmem:[%s27213_s5 + $0x1c] ss:$52 sps:$4 sm:$0xff]  }
 0x46e   :  { %11144 = vmatprep.subr.bf16.mxu0 %v19149_v18  ;;  %v19183_v18 = vld [vmem:[%s27213_s5 + $0x1b8] ss:$52 sps:$4 sm:$0xff]  }
 0x46f   :  { %11096 = vmatpush2.bf16.msra.mxu1 %v19138_v44  ;;  %v10812_v44 = vpop.f32.mrf.mxu0 }
 0x470   :  { %11097 = vmatprep.subr.bf16.mxu1 %v19146_v2 }
 0x471   :  { %11145 = vmatpush2.bf16.msra.mxu0 %v19147_v24  ;;  %v19191_v24 = vld [vmem:[%s27213_s5 + $0x154] ss:$52 sps:$4 sm:$0xff]  }
 0x472   :  { %11146 = vmatprep.subr.bf16.mxu0 %v19155_v25 }
 0x473   :  { %11098 = vmatpush2.bf16.msra.mxu1 %v19144_v38  ;;  %v19180_v38 = vld [vmem:[%s27213_s5 + $0x1c80] ss:$52 sps:$4 sm:$0xff]  }
 0x474   :  { %11099 = vmatprep.subr.bf16.mxu1 %v19152_v46 }
 0x475   :  { %11147 = vmatpush2.bf16.msra.mxu0 %v19153_v30  ;;  %v19188_v30 = vld [vmem:[%s27213_s5 + $0x1c1c] ss:$52 sps:$4 sm:$0xff]  }
 0x476   :  { %11148 = vmatprep.subr.bf16.mxu0 %v19161_v5  ;;  %v10813_v5 = vadd.f32 %v10812_v44, %v5753_v61  ;;  %v19215_v61 = vld [vmem:[%s27213_s5 + $0x634] ss:$52 sps:$4 sm:$0xff]  }
 0x477   :  { %11100 = vmatpush2.bf16.msra.mxu1 %v19150_v33  ;;  %v19189_v33 = vld [vmem:[%s27213_s5 + $0x150] ss:$52 sps:$4 sm:$0xff]  }
 0x478   :  { %11101 = vmatprep.subr.bf16.mxu1 %v19158_v47 }
 0x479   :  { %11149 = vmatpush2.bf16.msra.mxu0 %v19159_v40  ;;  %v19197_v40 = vld [vmem:[%s27213_s5 + $0xec] ss:$52 sps:$4 sm:$0xff]  }
 0x47a   :  { %11204 = vmatprep.subr.bf16.mxu0 %v19167_v45 }
 0x47b   :  { %11102 = vmatpush2.bf16.msra.mxu1 %v19156_v48  ;;  %v19186_v48 = vld [vmem:[%s27213_s5 + $0x1c18] ss:$52 sps:$4 sm:$0xff]  }
 0x47c   :  { %11103 = vmatprep.subr.bf16.mxu1 %v19164_v49  ;;  %11151 = vmatmul.mubr.bf16.vlgmr.msra.gmra.mxu0 %v23069_v21  ;;  %v19194_v49 = vld [vmem:[%s27213_s5 + $0x1bb4] ss:$52 sps:$4 sm:$0xff]  }
 0x47d   :  { %11205 = vmatpush1.bf16.msra.mxu0 %v19165_v51  ;;  %11236 = vmatprep.mubr.bf16.mxu0 %v22583_v7  ;;  %v19195_v51 = vld [vmem:[%s27213_s5 + $0xe8] ss:$52 sps:$4 sm:$0xff]  }
 0x47e   :  { %11206 = vmatprep.subr.bf16.mxu0 %v19173_v50  ;;  %v19203_v50 = vld [vmem:[%s27213_s5 + $0x84] ss:$52 sps:$4 sm:$0xff]  }
 0x47f   :  { %11104 = vmatpush2.bf16.msra.mxu1 %v19162_v14  ;;  %v19192_v14 = vld [vmem:[%s27213_s5 + $0x1bb0] ss:$52 sps:$4 sm:$0xff]  }
 0x480   :  { %11105 = vmatprep.subr.bf16.mxu1 %v19170_v62  ;;  %v19200_v62 = vld [vmem:[%s27213_s5 + $0x1b4c] ss:$52 sps:$4 sm:$0xff]  }
 0x481   :  { %11207 = vmatpush1.bf16.msra.mxu0 %v19171_v9  ;;  %v19201_v9 = vld [vmem:[%s27213_s5 + $0x80] ss:$52 sps:$4 sm:$0xff]  }
 0x482   :  { %11208 = vmatprep.subr.bf16.mxu0 %v19179_v36  ;;  %v19198_v36 = vld [vmem:[%s27213_s5 + $0x1b48] ss:$52 sps:$4 sm:$0xff]  }
 0x483   :  { %11106 = vmatpush2.bf16.msra.mxu1 %v19168_v1  ;;  %v19206_v1 = vld [vmem:[%s27213_s5 + $0x1ae4] ss:$52 sps:$4 sm:$0xff]  }
 0x484   :  { %11161 = vmatprep.subr.bf16.mxu1 %v19176_v23  ;;  %v19207_v23 = vld [vmem:[%s27213_s5 + $0x18] ss:$52 sps:$4 sm:$0xff]  }
 0x485   :  { %11209 = vmatpush1.bf16.msra.mxu0 %v19177_v59  ;;  %v19204_v59 = vld [vmem:[%s27213_s5 + $0x1ae0] ss:$52 sps:$4 sm:$0xff]  }
 0x486   :  { %v10851_v2 = vpop.f32.mrf.mxu1  ;;  %11108 = vmatmul.mubr.bf16.vlgmr.msra.gmra.mxu1 %v23006_v0  ;;  %11210 = vmatprep.subr.bf16.mxu0 %v19185_v22  ;;  %v19212_v22 = vld [vmem:[%s27213_s5 + $0x1a7c] ss:$52 sps:$4 sm:$0xff]  }
 0x487   :  { %v10852_v25 = vadd.f32 %v10851_v2, %v10809_v17  ;;  %11162 = vmatpush1.bf16.msra.mxu1 %v19174_v20  ;;  %11193 = vmatprep.mubr.bf16.mxu1 %v27225_v16  ;;  %v19213_v20 = vld [vmem:[%s27213_s5 + $0x630] ss:$52 sps:$4 sm:$0xff]   ;;  %v19221_v17 = vld [vmem:[%s27213_s5 + $0x5cc] ss:$52 sps:$4 sm:$0xff]   ;;  %v19218_v2 = vld [vmem:[%s27213_s5 + $0x1a14] ss:$52 sps:$4 sm:$0xff]  }
 0x488   :  { %v23995_v46 = vpop.f32.mrf.mxu1  ;;  %11163 = vmatprep.subr.bf16.mxu1 %v19182_v31  ;;  %v24051_v31 = vpop.f32.mrf.mxu0 }
 0x489   :  { %11211 = vmatpush1.bf16.msra.mxu0 %v19183_v18  ;;  %v19210_v18 = vld [vmem:[%s27213_s5 + $0x1a78] ss:$52 sps:$4 sm:$0xff]  }
 0x48a   :  { %v10855_v47 = vpop.f32.mrf.mxu1  ;;  %11212 = vmatprep.subr.bf16.mxu0 %v19191_v24 }
 0x48b   :  { %v10856_v45 = vadd.f32 %v10855_v47, %v10813_v5  ;;  %11164 = vmatpush1.bf16.msra.mxu1 %v19180_v38  ;;  %v19219_v38 = vld [vmem:[%s27213_s5 + $0x5c8] ss:$52 sps:$4 sm:$0xff]   ;;  %v19227_v5 = vld [vmem:[%s27213_s5 + $0x564] ss:$52 sps:$4 sm:$0xff]  }
 0x48c   :  { %11165 = vmatprep.subr.bf16.mxu1 %v19188_v30  ;;  %v19224_v47 = vld [vmem:[%s27213_s5 + $0x974] ss:$52 sps:$4 sm:$0xff]  }
 0x48d   :  { %11213 = vmatpush1.bf16.msra.mxu0 %v19189_v33  ;;  %v19216_v33 = vld [vmem:[%s27213_s5 + $0x1a10] ss:$52 sps:$4 sm:$0xff]  }
 0x48e   :  { %11214 = vmatprep.subr.bf16.mxu0 %v19197_v40 }
 0x48f   :  { %11166 = vmatpush1.bf16.msra.mxu1 %v19186_v48  ;;  %v19225_v48 = vld [vmem:[%s27213_s5 + $0x560] ss:$52 sps:$4 sm:$0xff]  }
 0x490   :  { %11167 = vmatprep.subr.bf16.mxu1 %v19194_v49  ;;  %v19233_v49 = vld [vmem:[%s27213_s5 + $0x4fc] ss:$52 sps:$4 sm:$0xff]  }
 0x491   :  { %11215 = vmatpush1.bf16.msra.mxu0 %v19195_v51  ;;  %v19222_v51 = vld [vmem:[%s27213_s5 + $0x970] ss:$52 sps:$4 sm:$0xff]  }
 0x492   :  { %11216 = vmatprep.subr.bf16.mxu0 %v19203_v50  ;;  %v19231_v50 = vld [vmem:[%s27213_s5 + $0x4f8] ss:$52 sps:$4 sm:$0xff]  }
 0x493   :  { %11168 = vmatpush1.bf16.msra.mxu1 %v19192_v14  ;;  %v19239_v14 = vld [vmem:[%s27213_s5 + $0x494] ss:$52 sps:$4 sm:$0xff]  }
 0x494   :  { %11169 = vmatprep.subr.bf16.mxu1 %v19200_v62  ;;  %v19228_v62 = vld [vmem:[%s27213_s5 + $0x908] ss:$52 sps:$4 sm:$0xff]  }
 0x495   :  { %11217 = vmatpush1.bf16.msra.mxu0 %v19201_v9  ;;  %v19236_v9 = vld [vmem:[%s27213_s5 + $0x8a4] ss:$52 sps:$4 sm:$0xff]  }
 0x496   :  { %11218 = vmatprep.subr.bf16.mxu0 %v19209_v29  ;;  %v19237_v29 = vld [vmem:[%s27213_s5 + $0x490] ss:$52 sps:$4 sm:$0xff]  }
 0x497   :  { %11170 = vmatpush1.bf16.msra.mxu1 %v19198_v36  ;;  %v19245_v36 = vld [vmem:[%s27213_s5 + $0x42c] ss:$52 sps:$4 sm:$0xff]  }
 0x498   :  { %11171 = vmatprep.subr.bf16.mxu1 %v19206_v1  ;;  %v19234_v1 = vld [vmem:[%s27213_s5 + $0x8a0] ss:$52 sps:$4 sm:$0xff]  }
 0x499   :  { %11219 = vmatpush1.bf16.msra.mxu0 %v19207_v23  ;;  %v19242_v23 = vld [vmem:[%s27213_s5 + $0x83c] ss:$52 sps:$4 sm:$0xff]  }
 0x49a   :  { %11220 = vmatprep.subr.bf16.mxu0 %v19215_v61  ;;  %v19243_v61 = vld [vmem:[%s27213_s5 + $0x428] ss:$52 sps:$4 sm:$0xff]  }
 0x49b   :  { %11172 = vmatpush1.bf16.msra.mxu1 %v19204_v59  ;;  %v19251_v59 = vld [vmem:[%s27213_s5 + $0x3c4] ss:$52 sps:$4 sm:$0xff]  }
 0x49c   :  { %11173 = vmatprep.subr.bf16.mxu1 %v19212_v22  ;;  %v10894_v44 = vpop.f32.mrf.mxu0  ;;  %v19240_v22 = vld [vmem:[%s27213_s5 + $0x838] ss:$52 sps:$4 sm:$0xff]  }
 0x49d   :  { %v24062_v24 = vadd.f32 %v10894_v44, %v10852_v25  ;;  %11221 = vmatpush2.bf16.msra.mxu0 %v19213_v20  ;;  %v19248_v20 = vld [vmem:[%s27213_s5 + $0x7d4] ss:$52 sps:$4 sm:$0xff]   ;;  %v19246_v44 = vld [vmem:[%s27213_s5 + $0x7d0] ss:$52 sps:$4 sm:$0xff]  }
 0x49e   :  { %v24067_v30 = vpop.f32.mrf.mxu0  ;;  %11222 = vmatprep.subr.bf16.mxu0 %v19221_v17  ;;  %v19249_v17 = vld [vmem:[%s27213_s5 + $0x3c0] ss:$52 sps:$4 sm:$0xff]  }
 0x49f   :  { %11174 = vmatpush1.bf16.msra.mxu1 %v19210_v18  ;;  %v19257_v18 = vld [vmem:[%s27213_s5 + $0x35c] ss:$52 sps:$4 sm:$0xff]  }
 0x4a0   :  { %11175 = vmatprep.subr.bf16.mxu1 %v19218_v2  ;;  %v10898_v25 = vpop.f32.mrf.mxu0  ;;  %v19254_v2 = vld [vmem:[%s27213_s5 + $0x76c] ss:$52 sps:$4 sm:$0xff]  }
 0x4a1   :  { %v24078_v40 = vadd.f32 %v10898_v25, %v10856_v45  ;;  %11223 = vmatpush2.bf16.msra.mxu0 %v19219_v38  ;;  %v19230_v45 = vld [vmem:[%s27213_s5 + $0x90c] ss:$52 sps:$4 sm:$0xff]   ;;  %v19260_v25 = vld [vmem:[%s27213_s5 + $0x704] ss:$52 sps:$4 sm:$0xff]  }
 0x4a2   :  { %11224 = vmatprep.subr.bf16.mxu0 %v19227_v5  ;;  %v19255_v38 = vld [vmem:[%s27213_s5 + $0x358] ss:$52 sps:$4 sm:$0xff]   ;;  %v19263_v5 = vld [vmem:[%s27213_s5 + $0xff4] ss:$52 sps:$4 sm:$0xff]  }
 0x4a3   :  { %11176 = vmatpush1.bf16.msra.mxu1 %v19216_v33  ;;  %v19252_v33 = vld [vmem:[%s27213_s5 + $0x768] ss:$52 sps:$4 sm:$0xff]  }
 0x4a4   :  { %11247 = vmatprep.subr.bf16.mxu1 %v19224_v47  ;;  %v19261_v47 = vld [vmem:[%s27213_s5 + $0xff0] ss:$52 sps:$4 sm:$0xff]  }
 0x4a5   :  { %11225 = vmatpush2.bf16.msra.mxu0 %v19225_v48  ;;  %v19269_v48 = vld [vmem:[%s27213_s5 + $0xf8c] ss:$52 sps:$4 sm:$0xff]  }
 0x4a6   :  { %11194 = vmatmul.mubr.bf16.vlgmr.msra.gmra.mxu1 %v23140_v41  ;;  %11226 = vmatprep.subr.bf16.mxu0 %v19233_v49  ;;  %v19258_v49 = vld [vmem:[%s27213_s5 + $0x700] ss:$52 sps:$4 sm:$0xff]  }
 0x4a7   :  { %11248 = vmatpush1.bf16.msra.mxu1 %v19222_v51  ;;  %11279 = vmatprep.mubr.bf16.mxu1 %v22593_v32  ;;  %v19266_v51 = vld [vmem:[%s27213_s5 + $0x69c] ss:$52 sps:$4 sm:$0xff]  }
 0x4a8   :  { %11249 = vmatprep.subr.bf16.mxu1 %v19230_v45  ;;  %v19267_v45 = vld [vmem:[%s27213_s5 + $0xf88] ss:$52 sps:$4 sm:$0xff]  }
 0x4a9   :  { %11227 = vmatpush2.bf16.msra.mxu0 %v19231_v50  ;;  %v19275_v50 = vld [vmem:[%s27213_s5 + $0xf24] ss:$52 sps:$4 sm:$0xff]  }
 0x4aa   :  { %11228 = vmatprep.subr.bf16.mxu0 %v19239_v14  ;;  %v19264_v14 = vld [vmem:[%s27213_s5 + $0x698] ss:$52 sps:$4 sm:$0xff]  }
 0x4ab   :  { %11250 = vmatpush1.bf16.msra.mxu1 %v19228_v62  ;;  %v19272_v62 = vld [vmem:[%s27213_s5 + $0xcb4] ss:$52 sps:$4 sm:$0xff]  }
 0x4ac   :  { %11251 = vmatprep.subr.bf16.mxu1 %v19236_v9  ;;  %v19273_v9 = vld [vmem:[%s27213_s5 + $0xf20] ss:$52 sps:$4 sm:$0xff]  }
 0x4ad   :  { %11229 = vmatpush2.bf16.msra.mxu0 %v19237_v29  ;;  %v24183_v29 = vpop.f32.mrf.mxu0 }
 0x4ae   :  { %11230 = vmatprep.subr.bf16.mxu0 %v19245_v36  ;;  %v19281_v36 = vld [vmem:[%s27213_s5 + $0xebc] ss:$52 sps:$4 sm:$0xff]  }
 0x4af   :  { %11252 = vmatpush1.bf16.msra.mxu1 %v19234_v1  ;;  %v19270_v1 = vld [vmem:[%s27213_s5 + $0xcb0] ss:$52 sps:$4 sm:$0xff]  }
 0x4b0   :  { %11253 = vmatprep.subr.bf16.mxu1 %v19242_v23  ;;  %v24191_v23 = vpop.f32.mrf.mxu1 }
 0x4b1   :  { %11231 = vmatpush2.bf16.msra.mxu0 %v19243_v61 }
 0x4b2   :  { %11232 = vmatprep.subr.bf16.mxu0 %v19251_v59  ;;  %v19278_v59 = vld [vmem:[%s27213_s5 + $0xc4c] ss:$52 sps:$4 sm:$0xff]  }
 0x4b3   :  { %11254 = vmatpush1.bf16.msra.mxu1 %v19240_v22  ;;  %v19279_v22 = vld [vmem:[%s27213_s5 + $0xeb8] ss:$52 sps:$4 sm:$0xff]  }
 0x4b4   :  { %11255 = vmatprep.subr.bf16.mxu1 %v19248_v20 }
 0x4b5   :  { %11233 = vmatpush2.bf16.msra.mxu0 %v19249_v17  ;;  %v19287_v17 = vld [vmem:[%s27213_s5 + $0xe54] ss:$52 sps:$4 sm:$0xff]  }
 0x4b6   :  { %11234 = vmatprep.subr.bf16.mxu0 %v19257_v18 }
 0x4b7   :  { %11256 = vmatpush1.bf16.msra.mxu1 %v19246_v44  ;;  %v19276_v44 = vld [vmem:[%s27213_s5 + $0xc48] ss:$52 sps:$4 sm:$0xff]  }
 0x4b8   :  { %11257 = vmatprep.subr.bf16.mxu1 %v19254_v2 }
 0x4b9   :  { %11235 = vmatpush2.bf16.msra.mxu0 %v19255_v38 }
 0x4ba   :  { %11290 = vmatprep.subr.bf16.mxu0 %v19263_v5  ;;  %v19284_v5 = vld [vmem:[%s27213_s5 + $0xbe4] ss:$52 sps:$4 sm:$0xff]  }
 0x4bb   :  { %11258 = vmatpush1.bf16.msra.mxu1 %v19252_v33 }
 0x4bc   :  { %11259 = vmatprep.subr.bf16.mxu1 %v19260_v25  ;;  %11237 = vmatmul.mubr.bf16.vlgmr.msra.gmra.mxu0 %v22136_v4  ;;  %v10980_v61 = vpop.f32.mrf.mxu0 }
 0x4bd   :  { %11291 = vmatpush1.bf16.msra.mxu0 %v19261_v47  ;;  %11322 = vmatprep.mubr.bf16.mxu0 %v22833_v42  ;;  %v19293_v47 = vld [vmem:[%s27213_s5 + $0xdec] ss:$52 sps:$4 sm:$0xff]  }
 0x4be   :  { %11292 = vmatprep.subr.bf16.mxu0 %v19269_v48  ;;  %v24206_v2 = vpop.f32.mrf.mxu0 }
 0x4bf   :  { %11260 = vmatpush1.bf16.msra.mxu1 %v19258_v49  ;;  %v19282_v49 = vld [vmem:[%s27213_s5 + $0xbe0] ss:$52 sps:$4 sm:$0xff]  }
 0x4c0   :  { %11261 = vmatprep.subr.bf16.mxu1 %v19266_v51  ;;  %v10984_v51 = vpop.f32.mrf.mxu0 }
 0x4c1   :  { %11293 = vmatpush1.bf16.msra.mxu0 %v19267_v45  ;;  %v19290_v45 = vld [vmem:[%s27213_s5 + $0xb7c] ss:$52 sps:$4 sm:$0xff]  }
 0x4c2   :  { %11294 = vmatprep.subr.bf16.mxu0 %v19275_v50 }
 0x4c3   :  { %11262 = vmatpush1.bf16.msra.mxu1 %v19264_v14  ;;  %v19291_v14 = vld [vmem:[%s27213_s5 + $0xde8] ss:$52 sps:$4 sm:$0xff]  }
 0x4c4   :  { %11263 = vmatprep.subr.bf16.mxu1 %v19272_v62 }
 0x4c5   :  { %11295 = vmatpush1.bf16.msra.mxu0 %v19273_v9 }
 0x4c6   :  { %v10937_v20 = vpop.f32.mrf.mxu1  ;;  %11296 = vmatprep.subr.bf16.mxu0 %v19281_v36  ;;  %v19288_v36 = vld [vmem:[%s27213_s5 + $0xb78] ss:$52 sps:$4 sm:$0xff]  }
 0x4c7   :  { %v10938_v18 = vadd.f32 %v10937_v20, %v24062_v24  ;;  %11264 = vmatpush2.bf16.msra.mxu1 %v19270_v1  ;;  %v19285_v24 = vld [vmem:[%s27213_s5 + $0xe50] ss:$52 sps:$4 sm:$0xff]   ;;  %v19296_v1 = vld [vmem:[%s27213_s5 + $0xb14] ss:$52 sps:$4 sm:$0xff]  }
 0x4c8   :  { %v24208_v38 = vpop.f32.mrf.mxu1  ;;  %11265 = vmatprep.subr.bf16.mxu1 %v19278_v59  ;;  %v19297_v59 = vld [vmem:[%s27213_s5 + $0xd80] ss:$52 sps:$4 sm:$0xff]   ;;  %v19294_v20 = vld [vmem:[%s27213_s5 + $0xb10] ss:$52 sps:$4 sm:$0xff]  }
 0x4c9   :  { %v10981_v33 = vadd.f32 %v10980_v61, %v10938_v18  ;;  %11297 = vmatpush1.bf16.msra.mxu0 %v19279_v22  ;;  %v19305_v22 = vld [vmem:[%s27213_s5 + $0xd1c] ss:$52 sps:$4 sm:$0xff]   ;;  %v19303_v18 = vld [vmem:[%s27213_s5 + $0xd18] ss:$52 sps:$4 sm:$0xff]  }
 0x4ca   :  { %v10941_v25 = vpop.f32.mrf.mxu1  ;;  %11298 = vmatprep.subr.bf16.mxu0 %v19287_v17  ;;  %v19302_v17 = vld [vmem:[%s27213_s5 + $0xaac] ss:$52 sps:$4 sm:$0xff]  }
 0x4cb   :  { %v10942_v48 = vadd.f32 %v10941_v25, %v24078_v40  ;;  %11266 = vmatpush2.bf16.msra.mxu1 %v19276_v44  ;;  %v19299_v40 = vld [vmem:[%s27213_s5 + $0xd84] ss:$52 sps:$4 sm:$0xff]   ;;  %v12056_v62 = vmax.f32 %v10981_v33, 0.0  ;;  %v19311_v44 = vld [vmem:[%s27213_s5 + $0x1334] ss:$52 sps:$4 sm:$0xff]  }
 0x4cc   :  { %11267 = vmatprep.subr.bf16.mxu1 %v19284_v5  ;;  %v19300_v5 = vld [vmem:[%s27213_s5 + $0xaa8] ss:$52 sps:$4 sm:$0xff]   ;;  %v19308_v33 = vld [vmem:[%s27213_s5 + $0xa44] ss:$52 sps:$4 sm:$0xff]   ;;  %v19317_v25 = vld [vmem:[%s27213_s5 + $0x12cc] ss:$52 sps:$4 sm:$0xff]  }
 0x4cd   :  { %v10985_v50 = vadd.f32 %v10984_v51, %v10942_v48  ;;  %11299 = vmatpush1.bf16.msra.mxu0 %v19285_v24  ;;  %v19309_v24 = vld [vmem:[%s27213_s5 + $0x1330] ss:$52 sps:$4 sm:$0xff]  }
 0x4ce   :  { %11300 = vmatprep.subr.bf16.mxu0 %v19293_v47  ;;  %v19306_v47 = vld [vmem:[%s27213_s5 + $0xa40] ss:$52 sps:$4 sm:$0xff]   ;;  %v19314_v48 = vld [vmem:[%s27213_s5 + $0x9dc] ss:$52 sps:$4 sm:$0xff]   ;;  %v19323_v51 = vld [vmem:[%s27213_s5 + $0x1264] ss:$52 sps:$4 sm:$0xff]  }
 0x4cf   :  { %v12069_v9 = vmax.f32 %v10985_v50, 0.0  ;;  %11268 = vmatpush2.bf16.msra.mxu1 %v19282_v49  ;;  %v19315_v49 = vld [vmem:[%s27213_s5 + $0x12c8] ss:$52 sps:$4 sm:$0xff]  }
 0x4d0   :  { %11269 = vmatprep.subr.bf16.mxu1 %v19290_v45  ;;  %v19312_v45 = vld [vmem:[%s27213_s5 + $0x9d8] ss:$52 sps:$4 sm:$0xff]   ;;  %v19320_v50 = vld [vmem:[%s27213_s5 + $0x1674] ss:$52 sps:$4 sm:$0xff]  }
 0x4d1   :  { %v24238_v61 = vpack.c.bf16 %v12069_v9, %v12056_v62  ;;  %11301 = vmatpush1.bf16.msra.mxu0 %v19291_v14  ;;  %v19321_v14 = vld [vmem:[%s27213_s5 + $0x1260] ss:$52 sps:$4 sm:$0xff]   ;;  %v19318_v62 = vld [vmem:[%s27213_s5 + $0x1670] ss:$52 sps:$4 sm:$0xff]  }
 0x4d2   :  { %11302 = vmatprep.subr.bf16.mxu0 %v19299_v40  ;;  %v19329_v40 = vld [vmem:[%s27213_s5 + $0x11fc] ss:$52 sps:$4 sm:$0xff]   ;;  %v19326_v9 = vld [vmem:[%s27213_s5 + $0x160c] ss:$52 sps:$4 sm:$0xff]  }
 0x4d3   :  { %27233 = vst [vmem:[#allocation7_spill] sm:$0xff] %v24238_v61  ;;  %11270 = vmatpush2.bf16.msra.mxu1 %v19288_v36  ;;  %v19327_v36 = vld [vmem:[%s27213_s5 + $0x11f8] ss:$52 sps:$4 sm:$0xff]  }
 0x4d4   :  { %11271 = vmatprep.subr.bf16.mxu1 %v19296_v1  ;;  %v19335_v1 = vld [vmem:[%s27213_s5 + $0x1194] ss:$52 sps:$4 sm:$0xff]  }
 0x4d5   :  { %11303 = vmatpush1.bf16.msra.mxu0 %v19297_v59  ;;  %v19324_v59 = vld [vmem:[%s27213_s5 + $0x1608] ss:$52 sps:$4 sm:$0xff]  }
 0x4d6   :  { %11304 = vmatprep.subr.bf16.mxu0 %v19305_v22  ;;  %v19332_v22 = vld [vmem:[%s27213_s5 + $0x15a4] ss:$52 sps:$4 sm:$0xff]  }
 0x4d7   :  { %11272 = vmatpush2.bf16.msra.mxu1 %v19294_v20  ;;  %v19333_v20 = vld [vmem:[%s27213_s5 + $0x1190] ss:$52 sps:$4 sm:$0xff]  }
 0x4d8   :  { %11273 = vmatprep.subr.bf16.mxu1 %v19302_v17  ;;  %v19341_v17 = vld [vmem:[%s27213_s5 + $0x112c] ss:$52 sps:$4 sm:$0xff]  }
 0x4d9   :  { %11305 = vmatpush1.bf16.msra.mxu0 %v19303_v18  ;;  %v19330_v18 = vld [vmem:[%s27213_s5 + $0x15a0] ss:$52 sps:$4 sm:$0xff]  }
 0x4da   :  { %11306 = vmatprep.subr.bf16.mxu0 %v19311_v44  ;;  %v19338_v44 = vld [vmem:[%s27213_s5 + $0x153c] ss:$52 sps:$4 sm:$0xff]  }
 0x4db   :  { %11274 = vmatpush2.bf16.msra.mxu1 %v19300_v5  ;;  %v19339_v5 = vld [vmem:[%s27213_s5 + $0x1128] ss:$52 sps:$4 sm:$0xff]  }
 0x4dc   :  { %11275 = vmatprep.subr.bf16.mxu1 %v19308_v33  ;;  %v19347_v33 = vld [vmem:[%s27213_s5 + $0x10c4] ss:$52 sps:$4 sm:$0xff]  }
 0x4dd   :  { %11307 = vmatpush2.bf16.msra.mxu0 %v19309_v24  ;;  %v19336_v24 = vld [vmem:[%s27213_s5 + $0x1538] ss:$52 sps:$4 sm:$0xff]  }
 0x4de   :  { %11308 = vmatprep.subr.bf16.mxu0 %v19317_v25  ;;  %v19344_v25 = vld [vmem:[%s27213_s5 + $0x14d4] ss:$52 sps:$4 sm:$0xff]  }
 0x4df   :  { %11276 = vmatpush2.bf16.msra.mxu1 %v19306_v47  ;;  %v19345_v47 = vld [vmem:[%s27213_s5 + $0x10c0] ss:$52 sps:$4 sm:$0xff]  }
 0x4e0   :  { %11277 = vmatprep.subr.bf16.mxu1 %v19314_v48  ;;  %v19353_v48 = vld [vmem:[%s27213_s5 + $0x105c] ss:$52 sps:$4 sm:$0xff]  }
 0x4e1   :  { %11309 = vmatpush2.bf16.msra.mxu0 %v19315_v49  ;;  %v19342_v49 = vld [vmem:[%s27213_s5 + $0x14d0] ss:$52 sps:$4 sm:$0xff]  }
 0x4e2   :  { %11310 = vmatprep.subr.bf16.mxu0 %v19323_v51  ;;  %v19350_v51 = vld [vmem:[%s27213_s5 + $0x146c] ss:$52 sps:$4 sm:$0xff]  }
 0x4e3   :  { %11278 = vmatpush2.bf16.msra.mxu1 %v19312_v45  ;;  %v19351_v45 = vld [vmem:[%s27213_s5 + $0x1058] ss:$52 sps:$4 sm:$0xff]  }
 0x4e4   :  { %11333 = vmatprep.subr.bf16.mxu1 %v19320_v50  ;;  %v19359_v50 = vld [vmem:[%s27213_s5 + $0x1cf4] ss:$52 sps:$4 sm:$0xff]  }
 0x4e5   :  { %11311 = vmatpush2.bf16.msra.mxu0 %v19321_v14  ;;  %v19348_v14 = vld [vmem:[%s27213_s5 + $0x1468] ss:$52 sps:$4 sm:$0xff]  }
 0x4e6   :  { %11280 = vmatmul.mubr.bf16.vlgmr.msra.gmra.mxu1 %v22455_v13  ;;  %11312 = vmatprep.subr.bf16.mxu0 %v19329_v40  ;;  %v19356_v40 = vld [vmem:[%s27213_s5 + $0x1404] ss:$52 sps:$4 sm:$0xff]  }
 0x4e7   :  { %11334 = vmatpush1.bf16.msra.mxu1 %v19318_v62  ;;  %11365 = vmatprep.mubr.bf16.mxu1 %v23067_v11  ;;  %v19357_v62 = vld [vmem:[%s27213_s5 + $0x1cf0] ss:$52 sps:$4 sm:$0xff]  }
 0x4e8   :  { %11335 = vmatprep.subr.bf16.mxu1 %v19326_v9  ;;  %v19365_v9 = vld [vmem:[%s27213_s5 + $0x1c8c] ss:$52 sps:$4 sm:$0xff]  }
 0x4e9   :  { %11313 = vmatpush2.bf16.msra.mxu0 %v19327_v36  ;;  %v19354_v36 = vld [vmem:[%s27213_s5 + $0x1400] ss:$52 sps:$4 sm:$0xff]  }
 0x4ea   :  { %11314 = vmatprep.subr.bf16.mxu0 %v19335_v1  ;;  %v19362_v1 = vld [vmem:[%s27213_s5 + $0x139c] ss:$52 sps:$4 sm:$0xff]  }
 0x4eb   :  { %11336 = vmatpush1.bf16.msra.mxu1 %v19324_v59  ;;  %v19363_v59 = vld [vmem:[%s27213_s5 + $0x1c88] ss:$52 sps:$4 sm:$0xff]  }
 0x4ec   :  { %11337 = vmatprep.subr.bf16.mxu1 %v19332_v22  ;;  %v19371_v22 = vld [vmem:[%s27213_s5 + $0x1c24] ss:$52 sps:$4 sm:$0xff]  }
 0x4ed   :  { %11315 = vmatpush2.bf16.msra.mxu0 %v19333_v20  ;;  %v19360_v20 = vld [vmem:[%s27213_s5 + $0x1398] ss:$52 sps:$4 sm:$0xff]  }
 0x4ee   :  { %11316 = vmatprep.subr.bf16.mxu0 %v19341_v17  ;;  %v19368_v17 = vld [vmem:[%s27213_s5 + $0x19b4] ss:$52 sps:$4 sm:$0xff]  }
 0x4ef   :  { %11338 = vmatpush1.bf16.msra.mxu1 %v19330_v18  ;;  %v19369_v18 = vld [vmem:[%s27213_s5 + $0x1c20] ss:$52 sps:$4 sm:$0xff]  }
 0x4f0   :  { %11339 = vmatprep.subr.bf16.mxu1 %v19338_v44  ;;  %v24391_v44 = vpop.f32.mrf.mxu0 }
 0x4f1   :  { %11317 = vmatpush2.bf16.msra.mxu0 %v19339_v5  ;;  %v19377_v5 = vld [vmem:[%s27213_s5 + $0x1bbc] ss:$52 sps:$4 sm:$0xff]  }
 0x4f2   :  { %11318 = vmatprep.subr.bf16.mxu0 %v19347_v33  ;;  %v5761_v33 = vrot.slane %v23964_v10, %v21341_v34  ;;  %v19383_v10 = vld [vmem:[%s27213_s5 + $0x1b54] ss:$52 sps:$4 sm:$0xff]   ;;  %v19620_v34 = vld [vmem:[%s27213_s5 + $0x1c2c] ss:$52 sps:$4 sm:$0xff]  }
 0x4f3   :  { %11340 = vmatpush1.bf16.msra.mxu1 %v19336_v24  ;;  %v19366_v24 = vld [vmem:[%s27213_s5 + $0x19b0] ss:$52 sps:$4 sm:$0xff]  }
 0x4f4   :  { %11341 = vmatprep.subr.bf16.mxu1 %v19344_v25  ;;  %v24401_v25 = vpop.f32.mrf.mxu1 }
 0x4f5   :  { %11319 = vmatpush2.bf16.msra.mxu0 %v19345_v47 }
 0x4f6   :  { %11320 = vmatprep.subr.bf16.mxu0 %v19353_v48  ;;  %v19374_v48 = vld [vmem:[%s27213_s5 + $0x194c] ss:$52 sps:$4 sm:$0xff]  }
 0x4f7   :  { %11342 = vmatpush1.bf16.msra.mxu1 %v19342_v49  ;;  %v19375_v49 = vld [vmem:[%s27213_s5 + $0x1bb8] ss:$52 sps:$4 sm:$0xff]  }
 0x4f8   :  { %11343 = vmatprep.subr.bf16.mxu1 %v19350_v51 }
 0x4f9   :  { %11321 = vmatpush2.bf16.msra.mxu0 %v19351_v45 }
 0x4fa   :  { %11376 = vmatprep.subr.bf16.mxu0 %v19359_v50  ;;  %v19372_v50 = vld [vmem:[%s27213_s5 + $0x1948] ss:$52 sps:$4 sm:$0xff]  }
 0x4fb   :  { %11344 = vmatpush1.bf16.msra.mxu1 %v19348_v14 }
 0x4fc   :  { %11345 = vmatprep.subr.bf16.mxu1 %v19356_v40  ;;  %11323 = vmatmul.mubr.bf16.vlgmr.msra.gmra.mxu0 %v23006_v0  ;;  %v11066_v47 = vpop.f32.mrf.mxu0 }
 0x4fd   :  { %11377 = vmatpush1.bf16.msra.mxu0 %v19357_v62  ;;  %11408 = vmatprep.mubr.bf16.mxu0 %v27225_v16  ;;  %v19380_v62 = vld [vmem:[%s27213_s5 + $0x18e4] ss:$52 sps:$4 sm:$0xff]  }
 0x4fe   :  { %11378 = vmatprep.subr.bf16.mxu0 %v19365_v9  ;;  %v24415_v14 = vpop.f32.mrf.mxu0  ;;  %v19381_v9 = vld [vmem:[%s27213_s5 + $0x1b50] ss:$52 sps:$4 sm:$0xff]  }
 0x4ff   :  { %11346 = vmatpush1.bf16.msra.mxu1 %v19354_v36 }
 0x500   :  { %11347 = vmatprep.subr.bf16.mxu1 %v19362_v1 }
 0x501   :  { %11379 = vmatpush1.bf16.msra.mxu0 %v19363_v59  ;;  %v19389_v59 = vld [vmem:[%s27213_s5 + $0x1aec] ss:$52 sps:$4 sm:$0xff]  }
 0x502   :  { %11380 = vmatprep.subr.bf16.mxu0 %v19371_v22 }
 0x503   :  { %11348 = vmatpush1.bf16.msra.mxu1 %v19360_v20  ;;  %v19378_v20 = vld [vmem:[%s27213_s5 + $0x18e0] ss:$52 sps:$4 sm:$0xff]  }
 0x504   :  { %11349 = vmatprep.subr.bf16.mxu1 %v19368_v17  ;;  %v11070_v17 = vpop.f32.mrf.mxu0 }
 0x505   :  { %11381 = vmatpush1.bf16.msra.mxu0 %v19369_v18  ;;  %v19386_v18 = vld [vmem:[%s27213_s5 + $0x187c] ss:$52 sps:$4 sm:$0xff]  }
 0x506   :  { %v11023_v51 = vpop.f32.mrf.mxu1  ;;  %11382 = vmatprep.subr.bf16.mxu0 %v19377_v5  ;;  %v19387_v5 = vld [vmem:[%s27213_s5 + $0x1ae8] ss:$52 sps:$4 sm:$0xff]  }
 0x507   :  { %v11024_v45 = vadd.f32 %v11023_v51, %v5761_v33  ;;  %11350 = vmatpush2.bf16.msra.mxu1 %v19366_v24  ;;  %v19401_v51 = vld [vmem:[%s27213_s5 + $0x1a1c] ss:$52 sps:$4 sm:$0xff]  }
 0x508   :  { %v24417_v40 = vpop.f32.mrf.mxu1  ;;  %11351 = vmatprep.subr.bf16.mxu1 %v19374_v48  ;;  %v19392_v48 = vld [vmem:[%s27213_s5 + $0x1814] ss:$52 sps:$4 sm:$0xff]  }
 0x509   :  { %11383 = vmatpush1.bf16.msra.mxu0 %v19375_v49  ;;  %v24425_v36 = vadd.f32 %v11066_v47, %v11024_v45  ;;  %v19384_v47 = vld [vmem:[%s27213_s5 + $0x1878] ss:$52 sps:$4 sm:$0xff]   ;;  %v19393_v49 = vld [vmem:[%s27213_s5 + $0x1a80] ss:$52 sps:$4 sm:$0xff]  }
 0x50a   :  { %v11027_v1 = vpop.f32.mrf.mxu1  ;;  %11384 = vmatprep.subr.bf16.mxu0 %v19383_v10  ;;  %v19390_v10 = vld [vmem:[%s27213_s5 + $0x1810] ss:$52 sps:$4 sm:$0xff]   ;;  %v19398_v45 = vld [vmem:[%s27213_s5 + $0x17ac] ss:$52 sps:$4 sm:$0xff]  }
 0x50b   :  { %v11028_v22 = vadd.f32 %v11027_v1, %v5761_v33  ;;  %11352 = vmatpush2.bf16.msra.mxu1 %v19372_v50  ;;  %v19395_v33 = vld [vmem:[%s27213_s5 + $0x1a84] ss:$52 sps:$4 sm:$0xff]  }
 0x50c   :  { %11353 = vmatprep.subr.bf16.mxu1 %v19380_v62  ;;  %v19399_v50 = vld [vmem:[%s27213_s5 + $0x1a18] ss:$52 sps:$4 sm:$0xff]   ;;  %v19407_v62 = vld [vmem:[%s27213_s5 + $0x97c] ss:$52 sps:$4 sm:$0xff]  }
 0x50d   :  { %11385 = vmatpush1.bf16.msra.mxu0 %v19381_v9  ;;  %v24439_v24 = vadd.f32 %v11070_v17, %v11028_v22  ;;  %v19396_v9 = vld [vmem:[%s27213_s5 + $0x17a8] ss:$52 sps:$4 sm:$0xff]   ;;  %v19404_v1 = vld [vmem:[%s27213_s5 + $0x1744] ss:$52 sps:$4 sm:$0xff]  }
 0x50e   :  { %11386 = vmatprep.subr.bf16.mxu0 %v19389_v59  ;;  %v19405_v59 = vld [vmem:[%s27213_s5 + $0x978] ss:$52 sps:$4 sm:$0xff]   ;;  %v19413_v22 = vld [vmem:[%s27213_s5 + $0x914] ss:$52 sps:$4 sm:$0xff]   ;;  %v19410_v17 = vld [vmem:[%s27213_s5 + $0x16dc] ss:$52 sps:$4 sm:$0xff]  }
 0x50f   :  { %11354 = vmatpush2.bf16.msra.mxu1 %v19378_v20  ;;  %v19402_v20 = vld [vmem:[%s27213_s5 + $0x1740] ss:$52 sps:$4 sm:$0xff]  }
 0x510   :  { %11355 = vmatprep.subr.bf16.mxu1 %v19386_v18  ;;  %v19411_v18 = vld [vmem:[%s27213_s5 + $0x910] ss:$52 sps:$4 sm:$0xff]  }
 0x511   :  { %11387 = vmatpush1.bf16.msra.mxu0 %v19387_v5  ;;  %v19419_v5 = vld [vmem:[%s27213_s5 + $0x8ac] ss:$52 sps:$4 sm:$0xff]  }
 0x512   :  { %11388 = vmatprep.subr.bf16.mxu0 %v19395_v33  ;;  %v19408_v33 = vld [vmem:[%s27213_s5 + $0x16d8] ss:$52 sps:$4 sm:$0xff]  }
 0x513   :  { %11356 = vmatpush2.bf16.msra.mxu1 %v19384_v47  ;;  %v19416_v47 = vld [vmem:[%s27213_s5 + $0x2fc] ss:$52 sps:$4 sm:$0xff]  }
 0x514   :  { %11357 = vmatprep.subr.bf16.mxu1 %v19392_v48  ;;  %v19417_v48 = vld [vmem:[%s27213_s5 + $0x8a8] ss:$52 sps:$4 sm:$0xff]  }
 0x515   :  { %11389 = vmatpush1.bf16.msra.mxu0 %v19393_v49  ;;  %v19425_v49 = vld [vmem:[%s27213_s5 + $0x844] ss:$52 sps:$4 sm:$0xff]  }
 0x516   :  { %11390 = vmatprep.subr.bf16.mxu0 %v19401_v51  ;;  %v19414_v51 = vld [vmem:[%s27213_s5 + $0x2f8] ss:$52 sps:$4 sm:$0xff]  }
 0x517   :  { %11358 = vmatpush2.bf16.msra.mxu1 %v19390_v10  ;;  %v19422_v10 = vld [vmem:[%s27213_s5 + $0x294] ss:$52 sps:$4 sm:$0xff]  }
 0x518   :  { %11359 = vmatprep.subr.bf16.mxu1 %v19398_v45  ;;  %v19423_v45 = vld [vmem:[%s27213_s5 + $0x840] ss:$52 sps:$4 sm:$0xff]  }
 0x519   :  { %11391 = vmatpush1.bf16.msra.mxu0 %v19399_v50  ;;  %v19431_v50 = vld [vmem:[%s27213_s5 + $0x7dc] ss:$52 sps:$4 sm:$0xff]  }
 0x51a   :  { %11462 = vmatprep.subr.bf16.mxu0 %v19407_v62  ;;  %v19420_v62 = vld [vmem:[%s27213_s5 + $0x290] ss:$52 sps:$4 sm:$0xff]  }
 0x51b   :  { %11360 = vmatpush2.bf16.msra.mxu1 %v19396_v9  ;;  %v19428_v9 = vld [vmem:[%s27213_s5 + $0x22c] ss:$52 sps:$4 sm:$0xff]  }
 0x51c   :  { %11361 = vmatprep.subr.bf16.mxu1 %v19404_v1  ;;  %11409 = vmatmul.mubr.bf16.vlgmr.msra.gmra.mxu0 %v23140_v41  ;;  %v19429_v1 = vld [vmem:[%s27213_s5 + $0x7d8] ss:$52 sps:$4 sm:$0xff]  }
 0x51d   :  { %11463 = vmatpush1.bf16.msra.mxu0 %v19405_v59  ;;  %11494 = vmatprep.mubr.bf16.mxu0 %v22593_v32  ;;  %v19437_v59 = vld [vmem:[%s27213_s5 + $0x774] ss:$52 sps:$4 sm:$0xff]  }
 0x51e   :  { %11464 = vmatprep.subr.bf16.mxu0 %v19413_v22  ;;  %v19426_v22 = vld [vmem:[%s27213_s5 + $0x228] ss:$52 sps:$4 sm:$0xff]  }
 0x51f   :  { %11362 = vmatpush2.bf16.msra.mxu1 %v19402_v20  ;;  %v19434_v20 = vld [vmem:[%s27213_s5 + $0x1c4] ss:$52 sps:$4 sm:$0xff]  }
 0x520   :  { %11363 = vmatprep.subr.bf16.mxu1 %v19410_v17  ;;  %v19435_v17 = vld [vmem:[%s27213_s5 + $0x770] ss:$52 sps:$4 sm:$0xff]  }
 0x521   :  { %11465 = vmatpush1.bf16.msra.mxu0 %v19411_v18  ;;  %v19443_v18 = vld [vmem:[%s27213_s5 + $0x70c] ss:$52 sps:$4 sm:$0xff]  }
 0x522   :  { %11466 = vmatprep.subr.bf16.mxu0 %v19419_v5  ;;  %v19432_v5 = vld [vmem:[%s27213_s5 + $0x1c0] ss:$52 sps:$4 sm:$0xff]  }
 0x523   :  { %11364 = vmatpush2.bf16.msra.mxu1 %v19408_v33  ;;  %v19440_v33 = vld [vmem:[%s27213_s5 + $0x15c] ss:$52 sps:$4 sm:$0xff]  }
 0x524   :  { %11419 = vmatprep.subr.bf16.mxu1 %v19416_v47  ;;  %v19441_v47 = vld [vmem:[%s27213_s5 + $0x708] ss:$52 sps:$4 sm:$0xff]  }
 0x525   :  { %11467 = vmatpush1.bf16.msra.mxu0 %v19417_v48  ;;  %v19449_v48 = vld [vmem:[%s27213_s5 + $0x6a4] ss:$52 sps:$4 sm:$0xff]  }
 0x526   :  { %11366 = vmatmul.mubr.bf16.vlgmr.msra.gmra.mxu1 %v23069_v21  ;;  %11468 = vmatprep.subr.bf16.mxu0 %v19425_v49  ;;  %v19438_v49 = vld [vmem:[%s27213_s5 + $0x158] ss:$52 sps:$4 sm:$0xff]  }
 0x527   :  { %11420 = vmatpush1.bf16.msra.mxu1 %v19414_v51  ;;  %11451 = vmatprep.mubr.bf16.mxu1 %v22583_v7  ;;  %v19446_v51 = vld [vmem:[%s27213_s5 + $0xf4] ss:$52 sps:$4 sm:$0xff]  }
 0x528   :  { %11421 = vmatprep.subr.bf16.mxu1 %v19422_v10  ;;  %v19447_v10 = vld [vmem:[%s27213_s5 + $0x6a0] ss:$52 sps:$4 sm:$0xff]  }
 0x529   :  { %11469 = vmatpush1.bf16.msra.mxu0 %v19423_v45  ;;  %v19455_v45 = vld [vmem:[%s27213_s5 + $0xcbc] ss:$52 sps:$4 sm:$0xff]  }
 0x52a   :  { %11470 = vmatprep.subr.bf16.mxu0 %v19431_v50  ;;  %v19444_v50 = vld [vmem:[%s27213_s5 + $0xf0] ss:$52 sps:$4 sm:$0xff]  }
 0x52b   :  { %11422 = vmatpush1.bf16.msra.mxu1 %v19420_v62  ;;  %v19452_v62 = vld [vmem:[%s27213_s5 + $0x8c] ss:$52 sps:$4 sm:$0xff]  }
 0x52c   :  { %11423 = vmatprep.subr.bf16.mxu1 %v19428_v9  ;;  %v19453_v9 = vld [vmem:[%s27213_s5 + $0xcb8] ss:$52 sps:$4 sm:$0xff]  }
 0x52d   :  { %11471 = vmatpush1.bf16.msra.mxu0 %v19429_v1  ;;  %v19461_v1 = vld [vmem:[%s27213_s5 + $0xc54] ss:$52 sps:$4 sm:$0xff]  }
 0x52e   :  { %11472 = vmatprep.subr.bf16.mxu0 %v19437_v59  ;;  %v19450_v59 = vld [vmem:[%s27213_s5 + $0x88] ss:$52 sps:$4 sm:$0xff]  }
 0x52f   :  { %11424 = vmatpush1.bf16.msra.mxu1 %v19426_v22  ;;  %v19458_v22 = vld [vmem:[%s27213_s5 + $0x24] ss:$52 sps:$4 sm:$0xff]  }
 0x530   :  { %11425 = vmatprep.subr.bf16.mxu1 %v19434_v20  ;;  %v19459_v20 = vld [vmem:[%s27213_s5 + $0xc50] ss:$52 sps:$4 sm:$0xff]  }
 0x531   :  { %11473 = vmatpush1.bf16.msra.mxu0 %v19435_v17  ;;  %v19467_v17 = vld [vmem:[%s27213_s5 + $0xbec] ss:$52 sps:$4 sm:$0xff]  }
 0x532   :  { %11474 = vmatprep.subr.bf16.mxu0 %v19443_v18  ;;  %v19456_v18 = vld [vmem:[%s27213_s5 + $0x20] ss:$52 sps:$4 sm:$0xff]  }
 0x533   :  { %11426 = vmatpush1.bf16.msra.mxu1 %v19432_v5  ;;  %v19464_v5 = vld [vmem:[%s27213_s5 + $0x63c] ss:$52 sps:$4 sm:$0xff]  }
 0x534   :  { %11427 = vmatprep.subr.bf16.mxu1 %v19440_v33  ;;  %v19465_v33 = vld [vmem:[%s27213_s5 + $0xbe8] ss:$52 sps:$4 sm:$0xff]  }
 0x535   :  { %11475 = vmatpush1.bf16.msra.mxu0 %v19441_v47  ;;  %v24601_v47 = vpop.f32.mrf.mxu0 }
 0x536   :  { %11476 = vmatprep.subr.bf16.mxu0 %v19449_v48  ;;  %v19473_v48 = vld [vmem:[%s27213_s5 + $0xb84] ss:$52 sps:$4 sm:$0xff]  }
 0x537   :  { %11428 = vmatpush1.bf16.msra.mxu1 %v19438_v49  ;;  %v19462_v49 = vld [vmem:[%s27213_s5 + $0x638] ss:$52 sps:$4 sm:$0xff]  }
 0x538   :  { %11429 = vmatprep.subr.bf16.mxu1 %v19446_v51  ;;  %v24609_v51 = vpop.f32.mrf.mxu1 }
 0x539   :  { %11477 = vmatpush1.bf16.msra.mxu0 %v19447_v10 }
 0x53a   :  { %11478 = vmatprep.subr.bf16.mxu0 %v19455_v45  ;;  %v19470_v45 = vld [vmem:[%s27213_s5 + $0x5d4] ss:$52 sps:$4 sm:$0xff]  }
 0x53b   :  { %11430 = vmatpush1.bf16.msra.mxu1 %v19444_v50  ;;  %v19471_v50 = vld [vmem:[%s27213_s5 + $0xb80] ss:$52 sps:$4 sm:$0xff]  }
 0x53c   :  { %11431 = vmatprep.subr.bf16.mxu1 %v19452_v62  ;;  %v11152_v10 = vpop.f32.mrf.mxu0 }
 0x53d   :  { %11479 = vmatpush2.bf16.msra.mxu0 %v19453_v9  ;;  %v19479_v9 = vld [vmem:[%s27213_s5 + $0xb1c] ss:$52 sps:$4 sm:$0xff]  }
 0x53e   :  { %11480 = vmatprep.subr.bf16.mxu0 %v19461_v1 }
 0x53f   :  { %11432 = vmatpush1.bf16.msra.mxu1 %v19450_v59  ;;  %v19468_v59 = vld [vmem:[%s27213_s5 + $0x5d0] ss:$52 sps:$4 sm:$0xff]  }
 0x540   :  { %11433 = vmatprep.subr.bf16.mxu1 %v19458_v22  ;;  %v24624_v22 = vpop.f32.mrf.mxu0 }
 0x541   :  { %11481 = vmatpush2.bf16.msra.mxu0 %v19459_v20 }
 0x542   :  { %11482 = vmatprep.subr.bf16.mxu0 %v19467_v17  ;;  %v19476_v17 = vld [vmem:[%s27213_s5 + $0x56c] ss:$52 sps:$4 sm:$0xff]  }
 0x543   :  { %11434 = vmatpush1.bf16.msra.mxu1 %v19456_v18  ;;  %v19477_v18 = vld [vmem:[%s27213_s5 + $0xb18] ss:$52 sps:$4 sm:$0xff]  }
 0x544   :  { %11435 = vmatprep.subr.bf16.mxu1 %v19464_v5 }
 0x545   :  { %11483 = vmatpush2.bf16.msra.mxu0 %v19465_v33  ;;  %v19485_v33 = vld [vmem:[%s27213_s5 + $0xab4] ss:$52 sps:$4 sm:$0xff]  }
 0x546   :  { %v11109_v62 = vpop.f32.mrf.mxu1  ;;  %11484 = vmatprep.subr.bf16.mxu0 %v19473_v48 }
 0x547   :  { %v11110_v1 = vadd.f32 %v11109_v62, %v24425_v36  ;;  %11436 = vmatpush2.bf16.msra.mxu1 %v19462_v49  ;;  %v19474_v49 = vld [vmem:[%s27213_s5 + $0x568] ss:$52 sps:$4 sm:$0xff]  }
 0x548   :  { %v24626_v20 = vpop.f32.mrf.mxu1  ;;  %11437 = vmatprep.subr.bf16.mxu1 %v19470_v45  ;;  %v11156_v45 = vpop.f32.mrf.mxu0 }
 0x549   :  { %11485 = vmatpush2.bf16.msra.mxu0 %v19471_v50  ;;  %v24634_v36 = vadd.f32 %v11152_v10, %v11110_v1  ;;  %v19482_v10 = vld [vmem:[%s27213_s5 + $0x504] ss:$52 sps:$4 sm:$0xff]   ;;  %v19488_v1 = vld [vmem:[%s27213_s5 + $0x49c] ss:$52 sps:$4 sm:$0xff]  }
 0x54a   :  { %v11113_v5 = vpop.f32.mrf.mxu1  ;;  %11486 = vmatprep.subr.bf16.mxu0 %v19479_v9  ;;  %v19483_v50 = vld [vmem:[%s27213_s5 + $0xab0] ss:$52 sps:$4 sm:$0xff]   ;;  %v19480_v9 = vld [vmem:[%s27213_s5 + $0x500] ss:$52 sps:$4 sm:$0xff]  }
 0x54b   :  { %v11114_v48 = vadd.f32 %v11113_v5, %v24439_v24  ;;  %11438 = vmatpush2.bf16.msra.mxu1 %v19468_v59  ;;  %v19491_v24 = vld [vmem:[%s27213_s5 + $0xa4c] ss:$52 sps:$4 sm:$0xff]   ;;  %v19489_v59 = vld [vmem:[%s27213_s5 + $0xa48] ss:$52 sps:$4 sm:$0xff]  }
 0x54c   :  { %11439 = vmatprep.subr.bf16.mxu1 %v19476_v17  ;;  %v19497_v17 = vld [vmem:[%s27213_s5 + $0x9e4] ss:$52 sps:$4 sm:$0xff]   ;;  %v19494_v5 = vld [vmem:[%s27213_s5 + $0x434] ss:$52 sps:$4 sm:$0xff]  }
 0x54d   :  { %11487 = vmatpush2.bf16.msra.mxu0 %v19477_v18  ;;  %v24649_v62 = vadd.f32 %v11156_v45, %v11114_v48  ;;  %v19486_v18 = vld [vmem:[%s27213_s5 + $0x498] ss:$52 sps:$4 sm:$0xff]   ;;  %v19503_v48 = vld [vmem:[%s27213_s5 + $0x167c] ss:$52 sps:$4 sm:$0xff]  }
 0x54e   :  { %11488 = vmatprep.subr.bf16.mxu0 %v19485_v33  ;;  %v19495_v33 = vld [vmem:[%s27213_s5 + $0x9e0] ss:$52 sps:$4 sm:$0xff]  }
 0x54f   :  { %11440 = vmatpush2.bf16.msra.mxu1 %v19474_v49  ;;  %v19492_v49 = vld [vmem:[%s27213_s5 + $0x430] ss:$52 sps:$4 sm:$0xff]   ;;  %v19500_v45 = vld [vmem:[%s27213_s5 + $0x3cc] ss:$52 sps:$4 sm:$0xff]  }
 0x550   :  { %11441 = vmatprep.subr.bf16.mxu1 %v19482_v10  ;;  %v19501_v10 = vld [vmem:[%s27213_s5 + $0x1678] ss:$52 sps:$4 sm:$0xff]  }
 0x551   :  { %11489 = vmatpush2.bf16.msra.mxu0 %v19483_v50  ;;  %v19509_v50 = vld [vmem:[%s27213_s5 + $0x1614] ss:$52 sps:$4 sm:$0xff]  }
 0x552   :  { %11490 = vmatprep.subr.bf16.mxu0 %v19491_v24  ;;  %v19498_v24 = vld [vmem:[%s27213_s5 + $0x3c8] ss:$52 sps:$4 sm:$0xff]  }
 0x553   :  { %11442 = vmatpush2.bf16.msra.mxu1 %v19480_v9  ;;  %v19506_v9 = vld [vmem:[%s27213_s5 + $0x364] ss:$52 sps:$4 sm:$0xff]  }
 0x554   :  { %11443 = vmatprep.subr.bf16.mxu1 %v19488_v1  ;;  %v19507_v1 = vld [vmem:[%s27213_s5 + $0x1610] ss:$52 sps:$4 sm:$0xff]  }
 0x555   :  { %11491 = vmatpush2.bf16.msra.mxu0 %v19489_v59  ;;  %v19515_v59 = vld [vmem:[%s27213_s5 + $0x15ac] ss:$52 sps:$4 sm:$0xff]  }
 0x556   :  { %11492 = vmatprep.subr.bf16.mxu0 %v19497_v17  ;;  %v19504_v17 = vld [vmem:[%s27213_s5 + $0x360] ss:$52 sps:$4 sm:$0xff]  }
 0x557   :  { %11444 = vmatpush2.bf16.msra.mxu1 %v19486_v18  ;;  %v19512_v18 = vld [vmem:[%s27213_s5 + $0xffc] ss:$52 sps:$4 sm:$0xff]  }
 0x558   :  { %11445 = vmatprep.subr.bf16.mxu1 %v19494_v5  ;;  %v19513_v5 = vld [vmem:[%s27213_s5 + $0x15a8] ss:$52 sps:$4 sm:$0xff]  }
 0x559   :  { %11493 = vmatpush2.bf16.msra.mxu0 %v19495_v33  ;;  %v19521_v33 = vld [vmem:[%s27213_s5 + $0x1544] ss:$52 sps:$4 sm:$0xff]  }
 0x55a   :  { %11548 = vmatprep.subr.bf16.mxu0 %v19503_v48  ;;  %v19510_v48 = vld [vmem:[%s27213_s5 + $0xff8] ss:$52 sps:$4 sm:$0xff]  }
 0x55b   :  { %11446 = vmatpush2.bf16.msra.mxu1 %v19492_v49  ;;  %v24719_v49 = vpop.f32.mrf.mxu1 }
 0x55c   :  { %11447 = vmatprep.subr.bf16.mxu1 %v19500_v45  ;;  %11495 = vmatmul.mubr.bf16.vlgmr.msra.gmra.mxu0 %v22455_v13  ;;  %v19518_v45 = vld [vmem:[%s27213_s5 + $0xf94] ss:$52 sps:$4 sm:$0xff]  }
 0x55d   :  { %11549 = vmatpush1.bf16.msra.mxu0 %v19501_v10  ;;  %11580 = vmatprep.mubr.bf16.mxu0 %v23067_v11  ;;  %v19519_v10 = vld [vmem:[%s27213_s5 + $0x1540] ss:$52 sps:$4 sm:$0xff]  }
 0x55e   :  { %11550 = vmatprep.subr.bf16.mxu0 %v19509_v50 }
 0x55f   :  { %11448 = vmatpush2.bf16.msra.mxu1 %v19498_v24  ;;  %v19527_v24 = vld [vmem:[%s27213_s5 + $0x14dc] ss:$52 sps:$4 sm:$0xff]  }
 0x560   :  { %11449 = vmatprep.subr.bf16.mxu1 %v19506_v9 }
 0x561   :  { %11551 = vmatpush1.bf16.msra.mxu0 %v19507_v1  ;;  %v19516_v1 = vld [vmem:[%s27213_s5 + $0xf90] ss:$52 sps:$4 sm:$0xff]  }
 0x562   :  { %11552 = vmatprep.subr.bf16.mxu0 %v19515_v59 }
 0x563   :  { %11450 = vmatpush2.bf16.msra.mxu1 %v19504_v17  ;;  %v19524_v17 = vld [vmem:[%s27213_s5 + $0xf2c] ss:$52 sps:$4 sm:$0xff]  }
 0x564   :  { %11505 = vmatprep.subr.bf16.mxu1 %v19512_v18  ;;  %v19525_v18 = vld [vmem:[%s27213_s5 + $0x14d8] ss:$52 sps:$4 sm:$0xff]  }
 0x565   :  { %11553 = vmatpush1.bf16.msra.mxu0 %v19513_v5  ;;  %v19533_v5 = vld [vmem:[%s27213_s5 + $0x1474] ss:$52 sps:$4 sm:$0xff]  }
 0x566   :  { %v11195_v50 = vpop.f32.mrf.mxu1  ;;  %11452 = vmatmul.mubr.bf16.vlgmr.msra.gmra.mxu1 %v22136_v4  ;;  %11554 = vmatprep.subr.bf16.mxu0 %v19521_v33 }
 0x567   :  { %v11196_v9 = vadd.f32 %v11195_v50, %v24634_v36  ;;  %11506 = vmatpush1.bf16.msra.mxu1 %v19510_v48  ;;  %11537 = vmatprep.mubr.bf16.mxu1 %v22833_v42  ;;  %v19522_v48 = vld [vmem:[%s27213_s5 + $0xf28] ss:$52 sps:$4 sm:$0xff]  }
 0x568   :  { %v24736_v59 = vpop.f32.mrf.mxu1  ;;  %11507 = vmatprep.subr.bf16.mxu1 %v19518_v45  ;;  %v19530_v45 = vld [vmem:[%s27213_s5 + $0xec4] ss:$52 sps:$4 sm:$0xff]  }
 0x569   :  { %11555 = vmatpush1.bf16.msra.mxu0 %v19519_v10  ;;  %v12058_v10 = vmax.f32 %v11196_v9, 0.0  ;;  %v19536_v9 = vld [vmem:[%s27213_s5 + $0xe5c] ss:$52 sps:$4 sm:$0xff]  }
 0x56a   :  { %v11199_v36 = vpop.f32.mrf.mxu1  ;;  %11556 = vmatprep.subr.bf16.mxu0 %v19527_v24  ;;  %v19531_v24 = vld [vmem:[%s27213_s5 + $0x1470] ss:$52 sps:$4 sm:$0xff]  }
 0x56b   :  { %v11200_v33 = vadd.f32 %v11199_v36, %v24649_v62  ;;  %11508 = vmatpush1.bf16.msra.mxu1 %v19516_v1  ;;  %v19539_v62 = vld [vmem:[%s27213_s5 + $0x140c] ss:$52 sps:$4 sm:$0xff]   ;;  %v19545_v36 = vld [vmem:[%s27213_s5 + $0x13a4] ss:$52 sps:$4 sm:$0xff]  }
 0x56c   :  { %11509 = vmatprep.subr.bf16.mxu1 %v19524_v17  ;;  %v19528_v17 = vld [vmem:[%s27213_s5 + $0xec0] ss:$52 sps:$4 sm:$0xff]   ;;  %v24934_v52 = vpop.f32.mrf.mxu1 }
 0x56d   :  { %v12071_v50 = vmax.f32 %v11200_v33, 0.0  ;;  %11557 = vmatpush1.bf16.msra.mxu0 %v19525_v18  ;;  %v19537_v18 = vld [vmem:[%s27213_s5 + $0x1408] ss:$52 sps:$4 sm:$0xff]  }
 0x56e   :  { %11558 = vmatprep.subr.bf16.mxu0 %v19533_v5  ;;  %v19534_v5 = vld [vmem:[%s27213_s5 + $0xe58] ss:$52 sps:$4 sm:$0xff]   ;;  %v19542_v33 = vld [vmem:[%s27213_s5 + $0xdf4] ss:$52 sps:$4 sm:$0xff]  }
 0x56f   :  { %v24760_v1 = vpack.c.bf16 %v12071_v50, %v12058_v10  ;;  %11510 = vmatpush1.bf16.msra.mxu1 %v19522_v48  ;;  %v19543_v48 = vld [vmem:[%s27213_s5 + $0x13a0] ss:$52 sps:$4 sm:$0xff]   ;;  %v19540_v10 = vld [vmem:[%s27213_s5 + $0xdf0] ss:$52 sps:$4 sm:$0xff]  }
 0x570   :  { %11511 = vmatprep.subr.bf16.mxu1 %v19530_v45  ;;  %v19551_v45 = vld [vmem:[%s27213_s5 + $0x19bc] ss:$52 sps:$4 sm:$0xff]   ;;  %v19548_v50 = vld [vmem:[%s27213_s5 + $0xd8c] ss:$52 sps:$4 sm:$0xff]  }
 0x571   :  { %27234 = vst [vmem:[#allocation8_spill] sm:$0xff] %v24760_v1  ;;  %11559 = vmatpush1.bf16.msra.mxu0 %v19531_v24  ;;  %v19549_v24 = vld [vmem:[%s27213_s5 + $0x19b8] ss:$52 sps:$4 sm:$0xff]  }
 0x572   :  { %11560 = vmatprep.subr.bf16.mxu0 %v19539_v62  ;;  %v19557_v62 = vld [vmem:[%s27213_s5 + $0x1954] ss:$52 sps:$4 sm:$0xff]  }
 0x573   :  { %11512 = vmatpush1.bf16.msra.mxu1 %v19528_v17  ;;  %v19546_v17 = vld [vmem:[%s27213_s5 + $0xd88] ss:$52 sps:$4 sm:$0xff]  }
 0x574   :  { %11513 = vmatprep.subr.bf16.mxu1 %v19536_v9  ;;  %v19554_v9 = vld [vmem:[%s27213_s5 + $0xd24] ss:$52 sps:$4 sm:$0xff]  }
 0x575   :  { %11561 = vmatpush1.bf16.msra.mxu0 %v19537_v18  ;;  %v19555_v18 = vld [vmem:[%s27213_s5 + $0x1950] ss:$52 sps:$4 sm:$0xff]  }
 0x576   :  { %11562 = vmatprep.subr.bf16.mxu0 %v19545_v36  ;;  %v19563_v36 = vld [vmem:[%s27213_s5 + $0x18ec] ss:$52 sps:$4 sm:$0xff]  }
 0x577   :  { %11514 = vmatpush1.bf16.msra.mxu1 %v19534_v5  ;;  %v19552_v5 = vld [vmem:[%s27213_s5 + $0xd20] ss:$52 sps:$4 sm:$0xff]  }
 0x578   :  { %11515 = vmatprep.subr.bf16.mxu1 %v19542_v33  ;;  %v19560_v33 = vld [vmem:[%s27213_s5 + $0x133c] ss:$52 sps:$4 sm:$0xff]  }
 0x579   :  { %11563 = vmatpush1.bf16.msra.mxu0 %v19543_v48  ;;  %v19561_v48 = vld [vmem:[%s27213_s5 + $0x18e8] ss:$52 sps:$4 sm:$0xff]  }
 0x57a   :  { %11564 = vmatprep.subr.bf16.mxu0 %v19551_v45  ;;  %v19569_v45 = vld [vmem:[%s27213_s5 + $0x1884] ss:$52 sps:$4 sm:$0xff]  }
 0x57b   :  { %11516 = vmatpush1.bf16.msra.mxu1 %v19540_v10  ;;  %v19558_v10 = vld [vmem:[%s27213_s5 + $0x1338] ss:$52 sps:$4 sm:$0xff]  }
 0x57c   :  { %11517 = vmatprep.subr.bf16.mxu1 %v19548_v50  ;;  %v19566_v50 = vld [vmem:[%s27213_s5 + $0x12d4] ss:$52 sps:$4 sm:$0xff]  }
 0x57d   :  { %11565 = vmatpush2.bf16.msra.mxu0 %v19549_v24  ;;  %v19567_v24 = vld [vmem:[%s27213_s5 + $0x1880] ss:$52 sps:$4 sm:$0xff]  }
 0x57e   :  { %11566 = vmatprep.subr.bf16.mxu0 %v19557_v62  ;;  %v19575_v62 = vld [vmem:[%s27213_s5 + $0x181c] ss:$52 sps:$4 sm:$0xff]  }
 0x57f   :  { %11518 = vmatpush1.bf16.msra.mxu1 %v19546_v17  ;;  %v19564_v17 = vld [vmem:[%s27213_s5 + $0x12d0] ss:$52 sps:$4 sm:$0xff]  }
 0x580   :  { %11519 = vmatprep.subr.bf16.mxu1 %v19554_v9  ;;  %v19572_v9 = vld [vmem:[%s27213_s5 + $0x126c] ss:$52 sps:$4 sm:$0xff]  }
 0x581   :  { %11567 = vmatpush2.bf16.msra.mxu0 %v19555_v18  ;;  %v19573_v18 = vld [vmem:[%s27213_s5 + $0x1818] ss:$52 sps:$4 sm:$0xff]  }
 0x582   :  { %11568 = vmatprep.subr.bf16.mxu0 %v19563_v36  ;;  %v19581_v36 = vld [vmem:[%s27213_s5 + $0x17b4] ss:$52 sps:$4 sm:$0xff]  }
 0x583   :  { %11520 = vmatpush1.bf16.msra.mxu1 %v19552_v5  ;;  %v19570_v5 = vld [vmem:[%s27213_s5 + $0x1268] ss:$52 sps:$4 sm:$0xff]  }
 0x584   :  { %11521 = vmatprep.subr.bf16.mxu1 %v19560_v33  ;;  %v19578_v33 = vld [vmem:[%s27213_s5 + $0x1204] ss:$52 sps:$4 sm:$0xff]  }
 0x585   :  { %11569 = vmatpush2.bf16.msra.mxu0 %v19561_v48  ;;  %v19579_v48 = vld [vmem:[%s27213_s5 + $0x17b0] ss:$52 sps:$4 sm:$0xff]  }
 0x586   :  { %11570 = vmatprep.subr.bf16.mxu0 %v19569_v45  ;;  %v19587_v45 = vld [vmem:[%s27213_s5 + $0x174c] ss:$52 sps:$4 sm:$0xff]  }
 0x587   :  { %11522 = vmatpush2.bf16.msra.mxu1 %v19558_v10  ;;  %v19576_v10 = vld [vmem:[%s27213_s5 + $0x1200] ss:$52 sps:$4 sm:$0xff]  }
 0x588   :  { %11523 = vmatprep.subr.bf16.mxu1 %v19566_v50  ;;  %v19584_v50 = vld [vmem:[%s27213_s5 + $0x119c] ss:$52 sps:$4 sm:$0xff]  }
 0x589   :  { %11571 = vmatpush2.bf16.msra.mxu0 %v19567_v24  ;;  %v19585_v24 = vld [vmem:[%s27213_s5 + $0x1748] ss:$52 sps:$4 sm:$0xff]  }
 0x58a   :  { %11572 = vmatprep.subr.bf16.mxu0 %v19575_v62  ;;  %v19593_v62 = vld [vmem:[%s27213_s5 + $0x16e4] ss:$52 sps:$4 sm:$0xff]  }
 0x58b   :  { %11524 = vmatpush2.bf16.msra.mxu1 %v19564_v17  ;;  %v19582_v17 = vld [vmem:[%s27213_s5 + $0x1198] ss:$52 sps:$4 sm:$0xff]  }
 0x58c   :  { %11525 = vmatprep.subr.bf16.mxu1 %v19572_v9  ;;  %v19590_v9 = vld [vmem:[%s27213_s5 + $0x1134] ss:$52 sps:$4 sm:$0xff]  }
 0x58d   :  { %11573 = vmatpush2.bf16.msra.mxu0 %v19573_v18  ;;  %v19591_v18 = vld [vmem:[%s27213_s5 + $0x16e0] ss:$52 sps:$4 sm:$0xff]  }
 0x58e   :  { %11574 = vmatprep.subr.bf16.mxu0 %v19581_v36  ;;  %v19599_v36 = vld [vmem:[%s27213_s5 + $0x304] ss:$52 sps:$4 sm:$0xff]  }
 0x58f   :  { %11526 = vmatpush2.bf16.msra.mxu1 %v19570_v5  ;;  %v19588_v5 = vld [vmem:[%s27213_s5 + $0x1130] ss:$52 sps:$4 sm:$0xff]  }
 0x590   :  { %11527 = vmatprep.subr.bf16.mxu1 %v19578_v33  ;;  %v19596_v33 = vld [vmem:[%s27213_s5 + $0x10cc] ss:$52 sps:$4 sm:$0xff]  }
 0x591   :  { %11575 = vmatpush2.bf16.msra.mxu0 %v19579_v48  ;;  %v19597_v48 = vld [vmem:[%s27213_s5 + $0x300] ss:$52 sps:$4 sm:$0xff]  }
 0x592   :  { %11576 = vmatprep.subr.bf16.mxu0 %v19587_v45  ;;  %v19605_v45 = vld [vmem:[%s27213_s5 + $0x29c] ss:$52 sps:$4 sm:$0xff]  }
 0x593   :  { %11528 = vmatpush2.bf16.msra.mxu1 %v19576_v10  ;;  %v19594_v10 = vld [vmem:[%s27213_s5 + $0x10c8] ss:$52 sps:$4 sm:$0xff]  }
 0x594   :  { %11529 = vmatprep.subr.bf16.mxu1 %v19584_v50  ;;  %v24897_v50 = vpop.f32.mrf.mxu0 }
 0x595   :  { %11577 = vmatpush2.bf16.msra.mxu0 %v19585_v24  ;;  %v19602_v24 = vld [vmem:[%s27213_s5 + $0x1064] ss:$52 sps:$4 sm:$0xff]  }
 0x596   :  { %11578 = vmatprep.subr.bf16.mxu0 %v19593_v62  ;;  %v19603_v62 = vld [vmem:[%s27213_s5 + $0x298] ss:$52 sps:$4 sm:$0xff]  }
 0x597   :  { %11530 = vmatpush2.bf16.msra.mxu1 %v19582_v17  ;;  %v11238_v17 = vpop.f32.mrf.mxu0 }
 0x598   :  { %11531 = vmatprep.subr.bf16.mxu1 %v19590_v9  ;;  %v19611_v9 = vld [vmem:[%s27213_s5 + $0x234] ss:$52 sps:$4 sm:$0xff]  }
 0x599   :  { %11579 = vmatpush2.bf16.msra.mxu0 %v19591_v18  ;;  %v19600_v18 = vld [vmem:[%s27213_s5 + $0x1060] ss:$52 sps:$4 sm:$0xff]  }
 0x59a   :  { %11634 = vmatprep.subr.bf16.mxu0 %v19599_v36  ;;  %v19608_v36 = vld [vmem:[%s27213_s5 + $0x1cfc] ss:$52 sps:$4 sm:$0xff]  }
 0x59b   :  { %11532 = vmatpush2.bf16.msra.mxu1 %v19588_v5  ;;  %v24919_v5 = vld [vmem:[%s27214_s6] sm:$0xff] }
 0x59c   :  { %11533 = vmatprep.subr.bf16.mxu1 %v19596_v33  ;;  %11581 = vmatmul.mubr.bf16.vlgmr.msra.gmra.mxu0 %v23069_v21  ;;  %v5769_v33 = vrot.slane %v24919_v5, %v21262_v35  ;;  %v19614_v35 = vld [vmem:[%s27213_s5 + $0x1c94] ss:$52 sps:$4 sm:$0xff]  }
 0x59d   :  { %11635 = vmatpush1.bf16.msra.mxu0 %v19597_v48  ;;  %11666 = vmatprep.mubr.bf16.mxu0 %v22583_v7  ;;  %v19609_v48 = vld [vmem:[%s27213_s5 + $0x230] ss:$52 sps:$4 sm:$0xff]  }
 0x59e   :  { %11636 = vmatprep.subr.bf16.mxu0 %v19605_v45  ;;  %v24926_v45 = vpop.f32.mrf.mxu0 }
 0x59f   :  { %11534 = vmatpush2.bf16.msra.mxu1 %v19594_v10  ;;  %v19617_v10 = vld [vmem:[%s27213_s5 + $0x1cc] ss:$52 sps:$4 sm:$0xff]  }
 0x5a0   :  { %11535 = vmatprep.subr.bf16.mxu1 %v19602_v24  ;;  %v19606_v24 = vld [vmem:[%s27213_s5 + $0x1cf8] ss:$52 sps:$4 sm:$0xff]   ;;  %v11242_v43 = vpop.f32.mrf.mxu0 }
 0x5a1   :  { %11637 = vmatpush1.bf16.msra.mxu0 %v19603_v62  ;;  %v11239_v62 = vadd.f32 %v11238_v17, %v5769_v33  ;;  %v19612_v17 = vld [vmem:[%s27213_s5 + $0x1c90] ss:$52 sps:$4 sm:$0xff]  }
 0x5a2   :  { %11638 = vmatprep.subr.bf16.mxu0 %v19611_v9  ;;  %v19615_v9 = vld [vmem:[%s27213_s5 + $0x1c8] ss:$52 sps:$4 sm:$0xff]  }
 0x5a3   :  { %11536 = vmatpush2.bf16.msra.mxu1 %v19600_v18  ;;  %v19623_v18 = vld [vmem:[%s27213_s5 + $0x164] ss:$52 sps:$4 sm:$0xff]  }
 0x5a4   :  { %11591 = vmatprep.subr.bf16.mxu1 %v19608_v36 }
 0x5a5   :  { %11639 = vmatpush1.bf16.msra.mxu0 %v19609_v48 }
 0x5a6   :  { %v11281_v28 = vpop.f32.mrf.mxu1  ;;  %11538 = vmatmul.mubr.bf16.vlgmr.msra.gmra.mxu1 %v23006_v0  ;;  %11640 = vmatprep.subr.bf16.mxu0 %v19617_v10  ;;  %v11243_v10 = vadd.f32 %v11242_v43, %v5769_v33  ;;  %v19626_v43 = vld [vmem:[%s27213_s5 + $0x1bc4] ss:$52 sps:$4 sm:$0xff]  }
 0x5a7   :  { %v11282_v36 = vadd.f32 %v11281_v28, %v11239_v62  ;;  %11592 = vmatpush1.bf16.msra.mxu1 %v19606_v24  ;;  %11623 = vmatprep.mubr.bf16.mxu1 %v27225_v16  ;;  %v19621_v28 = vld [vmem:[%s27213_s5 + $0x160] ss:$52 sps:$4 sm:$0xff]   ;;  %v19629_v62 = vld [vmem:[%s27213_s5 + $0xfc] ss:$52 sps:$4 sm:$0xff]   ;;  %v19627_v33 = vld [vmem:[%s27213_s5 + $0xf8] ss:$52 sps:$4 sm:$0xff]  }
 0x5a8   :  { %v24950_v48 = vpop.f32.mrf.mxu1  ;;  %11593 = vmatprep.subr.bf16.mxu1 %v19614_v35  ;;  %v19618_v35 = vld [vmem:[%s27213_s5 + $0x1c28] ss:$52 sps:$4 sm:$0xff]  }
 0x5a9   :  { %27235 = vst [vmem:[#allocation9_spill] sm:$0xff] %v24950_v48  ;;  %11641 = vmatpush1.bf16.msra.mxu0 %v19615_v9  ;;  %v19635_v9 = vld [vmem:[%s27213_s5 + $0x94] ss:$52 sps:$4 sm:$0xff]  }
 0x5aa   :  { %v11285_v24 = vpop.f32.mrf.mxu1  ;;  %11642 = vmatprep.subr.bf16.mxu0 %v19623_v18  ;;  %v19624_v18 = vld [vmem:[%s27213_s5 + $0x1bc0] ss:$52 sps:$4 sm:$0xff]  }
 0x5ab   :  { %v11286_v16 = vadd.f32 %v11285_v24, %v11243_v10  ;;  %11594 = vmatpush1.bf16.msra.mxu1 %v19612_v17  ;;  %v19633_v17 = vld [vmem:[%s27213_s5 + $0x90] ss:$52 sps:$4 sm:$0xff]   ;;  %v19641_v10 = vld [vmem:[%s27213_s5 + $0x2c] ss:$52 sps:$4 sm:$0xff]   ;;  %v19638_v24 = vld [vmem:[%s27213_s5 + $0x1af4] ss:$52 sps:$4 sm:$0xff]  }
 0x5ac   :  { %11595 = vmatprep.subr.bf16.mxu1 %v19620_v34  ;;  %v19632_v34 = vld [vmem:[%s27213_s5 + $0x1b5c] ss:$52 sps:$4 sm:$0xff]  }
 0x5ad   :  { %11643 = vmatpush1.bf16.msra.mxu0 %v19621_v28  ;;  %v19630_v28 = vld [vmem:[%s27213_s5 + $0x1b58] ss:$52 sps:$4 sm:$0xff]  }
 0x5ae   :  { %11644 = vmatprep.subr.bf16.mxu0 %v19629_v62  ;;  %v19639_v62 = vld [vmem:[%s27213_s5 + $0x28] ss:$52 sps:$4 sm:$0xff]  }
 0x5af   :  { %11596 = vmatpush1.bf16.msra.mxu1 %v19618_v35  ;;  %v19647_v35 = vld [vmem:[%s27213_s5 + $0x644] ss:$52 sps:$4 sm:$0xff]  }
 0x5b0   :  { %11597 = vmatprep.subr.bf16.mxu1 %v19626_v43  ;;  %v19636_v43 = vld [vmem:[%s27213_s5 + $0x1af0] ss:$52 sps:$4 sm:$0xff]  }
 0x5b1   :  { %11645 = vmatpush1.bf16.msra.mxu0 %v19627_v33  ;;  %v19644_v33 = vld [vmem:[%s27213_s5 + $0x1a8c] ss:$52 sps:$4 sm:$0xff]  }
 0x5b2   :  { %11646 = vmatprep.subr.bf16.mxu0 %v19635_v9  ;;  %v19645_v9 = vld [vmem:[%s27213_s5 + $0x640] ss:$52 sps:$4 sm:$0xff]  }
 0x5b3   :  { %11598 = vmatpush1.bf16.msra.mxu1 %v19624_v18  ;;  %v25006_v18 = vpop.f32.mrf.mxu0 }
 0x5b4   :  { %11599 = vmatprep.subr.bf16.mxu1 %v19632_v34  ;;  %v19653_v34 = vld [vmem:[%s27213_s5 + $0x5dc] ss:$52 sps:$4 sm:$0xff]  }
 0x5b5   :  { %11647 = vmatpush1.bf16.msra.mxu0 %v19633_v17  ;;  %v19642_v17 = vld [vmem:[%s27213_s5 + $0x1a88] ss:$52 sps:$4 sm:$0xff]  }
 0x5b6   :  { %11648 = vmatprep.subr.bf16.mxu0 %v19641_v10 }
 0x5b7   :  { %11600 = vmatpush1.bf16.msra.mxu1 %v19630_v28  ;;  %v19650_v28 = vld [vmem:[%s27213_s5 + $0x1a24] ss:$52 sps:$4 sm:$0xff]  }
 0x5b8   :  { %11601 = vmatprep.subr.bf16.mxu1 %v19638_v24 }
 0x5b9   :  { %11649 = vmatpush1.bf16.msra.mxu0 %v19639_v62  ;;  %v19651_v62 = vld [vmem:[%s27213_s5 + $0x5d8] ss:$52 sps:$4 sm:$0xff]  }
 0x5ba   :  { %11650 = vmatprep.subr.bf16.mxu0 %v19647_v35 }
 0x5bb   :  { %11602 = vmatpush1.bf16.msra.mxu1 %v19636_v43  ;;  %v19659_v43 = vld [vmem:[%s27213_s5 + $0x574] ss:$52 sps:$4 sm:$0xff]  }
 0x5bc   :  { %11603 = vmatprep.subr.bf16.mxu1 %v19644_v33  ;;  %v11324_v10 = vpop.f32.mrf.mxu0  ;;  %v19648_v33 = vld [vmem:[%s27213_s5 + $0x1a20] ss:$52 sps:$4 sm:$0xff]  }
 0x5bd   :  { %v25017_v24 = vadd.f32 %v11324_v10, %v11282_v36  ;;  %11651 = vmatpush2.bf16.msra.mxu0 %v19645_v9  ;;  %v19656_v9 = vld [vmem:[%s27213_s5 + $0x984] ss:$52 sps:$4 sm:$0xff]  }
 0x5be   :  { %v25022_v35 = vpop.f32.mrf.mxu0  ;;  %11652 = vmatprep.subr.bf16.mxu0 %v19653_v34  ;;  %v19657_v34 = vld [vmem:[%s27213_s5 + $0x570] ss:$52 sps:$4 sm:$0xff]  }
 0x5bf   :  { %27236 = vst [vmem:[#allocation10_spill] sm:$0xff] %v25022_v35  ;;  %11604 = vmatpush1.bf16.msra.mxu1 %v19642_v17  ;;  %v19665_v17 = vld [vmem:[%s27213_s5 + $0x50c] ss:$52 sps:$4 sm:$0xff]  }
 0x5c0   :  { %11605 = vmatprep.subr.bf16.mxu1 %v19650_v28  ;;  %v11328_v36 = vpop.f32.mrf.mxu0  ;;  %v19654_v28 = vld [vmem:[%s27213_s5 + $0x980] ss:$52 sps:$4 sm:$0xff]  }
 0x5c1   :  { %v25033_v10 = vadd.f32 %v11328_v36, %v11286_v16  ;;  %11653 = vmatpush2.bf16.msra.mxu0 %v19651_v62  ;;  %v19662_v16 = vld [vmem:[%s27213_s5 + $0x91c] ss:$52 sps:$4 sm:$0xff]   ;;  %v19668_v36 = vld [vmem:[%s27213_s5 + $0x8b4] ss:$52 sps:$4 sm:$0xff]  }
 0x5c2   :  { %11654 = vmatprep.subr.bf16.mxu0 %v19659_v43  ;;  %v19663_v62 = vld [vmem:[%s27213_s5 + $0x508] ss:$52 sps:$4 sm:$0xff]   ;;  %v19671_v43 = vld [vmem:[%s27213_s5 + $0x4a4] ss:$52 sps:$4 sm:$0xff]  }
 0x5c3   :  { %11606 = vmatpush1.bf16.msra.mxu1 %v19648_v33  ;;  %v19660_v33 = vld [vmem:[%s27213_s5 + $0x918] ss:$52 sps:$4 sm:$0xff]  }
 0x5c4   :  { %11677 = vmatprep.subr.bf16.mxu1 %v19656_v9  ;;  %v19669_v9 = vld [vmem:[%s27213_s5 + $0x4a0] ss:$52 sps:$4 sm:$0xff]  }
 0x5c5   :  { %11655 = vmatpush2.bf16.msra.mxu0 %v19657_v34  ;;  %v19677_v34 = vld [vmem:[%s27213_s5 + $0x43c] ss:$52 sps:$4 sm:$0xff]  }
 0x5c6   :  { %11624 = vmatmul.mubr.bf16.vlgmr.msra.gmra.mxu1 %v23140_v41  ;;  %11656 = vmatprep.subr.bf16.mxu0 %v19665_v17  ;;  %v19666_v17 = vld [vmem:[%s27213_s5 + $0x8b0] ss:$52 sps:$4 sm:$0xff]  }
 0x5c7   :  { %11678 = vmatpush1.bf16.msra.mxu1 %v19654_v28  ;;  %11709 = vmatprep.mubr.bf16.mxu1 %v22593_v32  ;;  %v19674_v28 = vld [vmem:[%s27213_s5 + $0x84c] ss:$52 sps:$4 sm:$0xff]  }
 0x5c8   :  { %11679 = vmatprep.subr.bf16.mxu1 %v19662_v16  ;;  %v19675_v16 = vld [vmem:[%s27213_s5 + $0x438] ss:$52 sps:$4 sm:$0xff]  }
 0x5c9   :  { %11657 = vmatpush2.bf16.msra.mxu0 %v19663_v62  ;;  %v19683_v62 = vld [vmem:[%s27213_s5 + $0x3d4] ss:$52 sps:$4 sm:$0xff]  }
 0x5ca   :  { %11658 = vmatprep.subr.bf16.mxu0 %v19671_v43  ;;  %v19672_v43 = vld [vmem:[%s27213_s5 + $0x848] ss:$52 sps:$4 sm:$0xff]  }
 0x5cb   :  { %11680 = vmatpush1.bf16.msra.mxu1 %v19660_v33  ;;  %v19680_v33 = vld [vmem:[%s27213_s5 + $0x7e4] ss:$52 sps:$4 sm:$0xff]  }
 0x5cc   :  { %11681 = vmatprep.subr.bf16.mxu1 %v19668_v36  ;;  %v19681_v36 = vld [vmem:[%s27213_s5 + $0x3d0] ss:$52 sps:$4 sm:$0xff]  }
 0x5cd   :  { %11659 = vmatpush2.bf16.msra.mxu0 %v19669_v9  ;;  %v19689_v9 = vld [vmem:[%s27213_s5 + $0x36c] ss:$52 sps:$4 sm:$0xff]  }
 0x5ce   :  { %11660 = vmatprep.subr.bf16.mxu0 %v19677_v34  ;;  %v19678_v34 = vld [vmem:[%s27213_s5 + $0x7e0] ss:$52 sps:$4 sm:$0xff]  }
 0x5cf   :  { %11682 = vmatpush1.bf16.msra.mxu1 %v19666_v17  ;;  %v19686_v17 = vld [vmem:[%s27213_s5 + $0x77c] ss:$52 sps:$4 sm:$0xff]  }
 0x5d0   :  { %11683 = vmatprep.subr.bf16.mxu1 %v19674_v28  ;;  %v19687_v28 = vld [vmem:[%s27213_s5 + $0x368] ss:$52 sps:$4 sm:$0xff]  }
 0x5d1   :  { %11661 = vmatpush2.bf16.msra.mxu0 %v19675_v16  ;;  %v19695_v16 = vld [vmem:[%s27213_s5 + $0x1004] ss:$52 sps:$4 sm:$0xff]  }
 0x5d2   :  { %11662 = vmatprep.subr.bf16.mxu0 %v19683_v62  ;;  %v19684_v62 = vld [vmem:[%s27213_s5 + $0x778] ss:$52 sps:$4 sm:$0xff]  }
 0x5d3   :  { %11684 = vmatpush1.bf16.msra.mxu1 %v19672_v43  ;;  %v19692_v43 = vld [vmem:[%s27213_s5 + $0x714] ss:$52 sps:$4 sm:$0xff]  }
 0x5d4   :  { %11685 = vmatprep.subr.bf16.mxu1 %v19680_v33  ;;  %v19693_v33 = vld [vmem:[%s27213_s5 + $0x1000] ss:$52 sps:$4 sm:$0xff]  }
 0x5d5   :  { %11663 = vmatpush2.bf16.msra.mxu0 %v19681_v36  ;;  %v19701_v36 = vld [vmem:[%s27213_s5 + $0xf9c] ss:$52 sps:$4 sm:$0xff]  }
 0x5d6   :  { %11664 = vmatprep.subr.bf16.mxu0 %v19689_v9  ;;  %v19690_v9 = vld [vmem:[%s27213_s5 + $0x710] ss:$52 sps:$4 sm:$0xff]  }
 0x5d7   :  { %11686 = vmatpush1.bf16.msra.mxu1 %v19678_v34  ;;  %v19698_v34 = vld [vmem:[%s27213_s5 + $0x6ac] ss:$52 sps:$4 sm:$0xff]  }
 0x5d8   :  { %11687 = vmatprep.subr.bf16.mxu1 %v19686_v17  ;;  %v19699_v17 = vld [vmem:[%s27213_s5 + $0xf98] ss:$52 sps:$4 sm:$0xff]  }
 0x5d9   :  { %11665 = vmatpush2.bf16.msra.mxu0 %v19687_v28  ;;  %v19707_v28 = vld [vmem:[%s27213_s5 + $0xf34] ss:$52 sps:$4 sm:$0xff]  }
 0x5da   :  { %11720 = vmatprep.subr.bf16.mxu0 %v19695_v16  ;;  %v19696_v16 = vld [vmem:[%s27213_s5 + $0x6a8] ss:$52 sps:$4 sm:$0xff]  }
 0x5db   :  { %11688 = vmatpush1.bf16.msra.mxu1 %v19684_v62  ;;  %v19704_v62 = vld [vmem:[%s27213_s5 + $0xcc4] ss:$52 sps:$4 sm:$0xff]  }
 0x5dc   :  { %11689 = vmatprep.subr.bf16.mxu1 %v19692_v43  ;;  %11667 = vmatmul.mubr.bf16.vlgmr.msra.gmra.mxu0 %v22136_v4  ;;  %v19705_v43 = vld [vmem:[%s27213_s5 + $0xf30] ss:$52 sps:$4 sm:$0xff]  }
 0x5dd   :  { %11721 = vmatpush1.bf16.msra.mxu0 %v19693_v33  ;;  %11752 = vmatprep.mubr.bf16.mxu0 %v22833_v42  ;;  %v25138_v33 = vpop.f32.mrf.mxu0 }
 0x5de   :  { %11722 = vmatprep.subr.bf16.mxu0 %v19701_v36  ;;  %27237 = vst [vmem:[#allocation11_spill] sm:$0xff] %v25138_v33  ;;  %v19713_v36 = vld [vmem:[%s27213_s5 + $0xecc] ss:$52 sps:$4 sm:$0xff]  }
 0x5df   :  { %11690 = vmatpush1.bf16.msra.mxu1 %v19690_v9  ;;  %v19702_v9 = vld [vmem:[%s27213_s5 + $0xcc0] ss:$52 sps:$4 sm:$0xff]   ;;  %v11410_v1 = vpop.f32.mrf.mxu0 }
 0x5e0   :  { %11691 = vmatprep.subr.bf16.mxu1 %v19698_v34  ;;  %v25146_v34 = vpop.f32.mrf.mxu1 }
 0x5e1   :  { %11723 = vmatpush1.bf16.msra.mxu0 %v19699_v17  ;;  %v19710_v17 = vld [vmem:[%s27213_s5 + $0xc5c] ss:$52 sps:$4 sm:$0xff]   ;;  %v25161_v33 = vpop.f32.mrf.mxu0 }
 0x5e2   :  { %11724 = vmatprep.subr.bf16.mxu0 %v19707_v28  ;;  %v19711_v28 = vld [vmem:[%s27213_s5 + $0xec8] ss:$52 sps:$4 sm:$0xff]   ;;  %27238 = vst [vmem:[#allocation12_spill] sm:$0xff] %v25161_v33 }
 0x5e3   :  { %11692 = vmatpush1.bf16.msra.mxu1 %v19696_v16  ;;  %v19719_v16 = vld [vmem:[%s27213_s5 + $0xe64] ss:$52 sps:$4 sm:$0xff]  }
 0x5e4   :  { %11693 = vmatprep.subr.bf16.mxu1 %v19704_v62  ;;  %v19708_v62 = vld [vmem:[%s27213_s5 + $0xc58] ss:$52 sps:$4 sm:$0xff]  }
 0x5e5   :  { %11725 = vmatpush1.bf16.msra.mxu0 %v19705_v43 }
 0x5e6   :  { %v11367_v61 = vpop.f32.mrf.mxu1  ;;  %11726 = vmatprep.subr.bf16.mxu0 %v19713_v36  ;;  %v19716_v36 = vld [vmem:[%s27213_s5 + $0xbf4] ss:$52 sps:$4 sm:$0xff]  }
 0x5e7   :  { %v11368_v35 = vadd.f32 %v11367_v61, %v25017_v24  ;;  %11694 = vmatpush2.bf16.msra.mxu1 %v19702_v9  ;;  %v19717_v61 = vld [vmem:[%s27213_s5 + $0xe60] ss:$52 sps:$4 sm:$0xff]   ;;  %v19725_v9 = vld [vmem:[%s27213_s5 + $0xdfc] ss:$52 sps:$4 sm:$0xff]  }
 0x5e8   :  { %v25163_v43 = vpop.f32.mrf.mxu1  ;;  %11695 = vmatprep.subr.bf16.mxu1 %v19710_v17  ;;  %v19714_v17 = vld [vmem:[%s27213_s5 + $0xbf0] ss:$52 sps:$4 sm:$0xff]  }
 0x5e9   :  { %27239 = vst [vmem:[#allocation13_spill] sm:$0xff] %v25163_v43  ;;  %v11411_v48 = vadd.f32 %v11410_v1, %v11368_v35  ;;  %11727 = vmatpush1.bf16.msra.mxu0 %v19711_v28  ;;  %v11414_v43 = vpop.f32.mrf.mxu0  ;;  %v19722_v1 = vld [vmem:[%s27213_s5 + $0xb8c] ss:$52 sps:$4 sm:$0xff]  }
 0x5ea   :  { %v11371_v24 = vpop.f32.mrf.mxu1  ;;  %11728 = vmatprep.subr.bf16.mxu0 %v19719_v16  ;;  %v19723_v28 = vld [vmem:[%s27213_s5 + $0xdf8] ss:$52 sps:$4 sm:$0xff]  }
 0x5eb   :  { %v11372_v33 = vadd.f32 %v11371_v24, %v25033_v10  ;;  %11696 = vmatpush2.bf16.msra.mxu1 %v19708_v62  ;;  %v19731_v10 = vld [vmem:[%s27213_s5 + $0xd94] ss:$52 sps:$4 sm:$0xff]   ;;  %v12060_v16 = vmax.f32 %v11411_v48, 0.0  ;;  %v19737_v48 = vld [vmem:[%s27213_s5 + $0xd2c] ss:$52 sps:$4 sm:$0xff]  }
 0x5ec   :  { %11697 = vmatprep.subr.bf16.mxu1 %v19716_v36  ;;  %v19720_v36 = vld [vmem:[%s27213_s5 + $0xb88] ss:$52 sps:$4 sm:$0xff]   ;;  %v19726_v24 = vld [vmem:[%s27213_s5 + $0xb20] ss:$52 sps:$4 sm:$0xff]  }
 0x5ed   :  { %v11415_v35 = vadd.f32 %v11414_v43, %v11372_v33  ;;  %11729 = vmatpush1.bf16.msra.mxu0 %v19717_v61  ;;  %v19728_v33 = vld [vmem:[%s27213_s5 + $0xb24] ss:$52 sps:$4 sm:$0xff]  }
 0x5ee   :  { %11730 = vmatprep.subr.bf16.mxu0 %v19725_v9  ;;  %v19729_v61 = vld [vmem:[%s27213_s5 + $0xd90] ss:$52 sps:$4 sm:$0xff]  }
 0x5ef   :  { %v12073_v62 = vmax.f32 %v11415_v35, 0.0  ;;  %11698 = vmatpush2.bf16.msra.mxu1 %v19714_v17  ;;  %v19734_v9 = vld [vmem:[%s27213_s5 + $0xabc] ss:$52 sps:$4 sm:$0xff]   ;;  %v19732_v35 = vld [vmem:[%s27213_s5 + $0xab8] ss:$52 sps:$4 sm:$0xff]  }
 0x5f0   :  { %11699 = vmatprep.subr.bf16.mxu1 %v19722_v1  ;;  %v19735_v17 = vld [vmem:[%s27213_s5 + $0xd28] ss:$52 sps:$4 sm:$0xff]   ;;  %v19743_v1 = vld [vmem:[%s27213_s5 + $0x1344] ss:$52 sps:$4 sm:$0xff]  }
 0x5f1   :  { %v25193_v43 = vpack.c.bf16 %v12073_v62, %v12060_v16  ;;  %11731 = vmatpush1.bf16.msra.mxu0 %v19723_v28  ;;  %v19740_v28 = vld [vmem:[%s27213_s5 + $0xa54] ss:$52 sps:$4 sm:$0xff]   ;;  %v19749_v16 = vld [vmem:[%s27213_s5 + $0x12dc] ss:$52 sps:$4 sm:$0xff]  }
 0x5f2   :  { %11732 = vmatprep.subr.bf16.mxu0 %v19731_v10  ;;  %v19741_v10 = vld [vmem:[%s27213_s5 + $0x1340] ss:$52 sps:$4 sm:$0xff]   ;;  %v19738_v62 = vld [vmem:[%s27213_s5 + $0xa50] ss:$52 sps:$4 sm:$0xff]  }
 0x5f3   :  { %27240 = vst [vmem:[#allocation14_spill] sm:$0xff] %v25193_v43  ;;  %11700 = vmatpush2.bf16.msra.mxu1 %v19720_v36  ;;  %v19746_v36 = vld [vmem:[%s27213_s5 + $0x9ec] ss:$52 sps:$4 sm:$0xff]  }
 0x5f4   :  { %11701 = vmatprep.subr.bf16.mxu1 %v19728_v33  ;;  %v19747_v33 = vld [vmem:[%s27213_s5 + $0x12d8] ss:$52 sps:$4 sm:$0xff]  }
 0x5f5   :  { %11733 = vmatpush1.bf16.msra.mxu0 %v19729_v61  ;;  %v19755_v61 = vld [vmem:[%s27213_s5 + $0x1274] ss:$52 sps:$4 sm:$0xff]  }
 0x5f6   :  { %11734 = vmatprep.subr.bf16.mxu0 %v19737_v48  ;;  %v19744_v48 = vld [vmem:[%s27213_s5 + $0x9e8] ss:$52 sps:$4 sm:$0xff]  }
 0x5f7   :  { %11702 = vmatpush2.bf16.msra.mxu1 %v19726_v24  ;;  %v19752_v24 = vld [vmem:[%s27213_s5 + $0x1684] ss:$52 sps:$4 sm:$0xff]  }
 0x5f8   :  { %11703 = vmatprep.subr.bf16.mxu1 %v19734_v9  ;;  %v19753_v9 = vld [vmem:[%s27213_s5 + $0x1270] ss:$52 sps:$4 sm:$0xff]  }
 0x5f9   :  { %11735 = vmatpush1.bf16.msra.mxu0 %v19735_v17  ;;  %v19761_v17 = vld [vmem:[%s27213_s5 + $0x120c] ss:$52 sps:$4 sm:$0xff]  }
 0x5fa   :  { %11736 = vmatprep.subr.bf16.mxu0 %v19743_v1  ;;  %v19750_v1 = vld [vmem:[%s27213_s5 + $0x1680] ss:$52 sps:$4 sm:$0xff]  }
 0x5fb   :  { %11704 = vmatpush2.bf16.msra.mxu1 %v19732_v35  ;;  %v19758_v35 = vld [vmem:[%s27213_s5 + $0x161c] ss:$52 sps:$4 sm:$0xff]  }
 0x5fc   :  { %11705 = vmatprep.subr.bf16.mxu1 %v19740_v28  ;;  %v19759_v28 = vld [vmem:[%s27213_s5 + $0x1208] ss:$52 sps:$4 sm:$0xff]  }
 0x5fd   :  { %11737 = vmatpush2.bf16.msra.mxu0 %v19741_v10  ;;  %v19767_v10 = vld [vmem:[%s27213_s5 + $0x11a4] ss:$52 sps:$4 sm:$0xff]  }
 0x5fe   :  { %11738 = vmatprep.subr.bf16.mxu0 %v19749_v16  ;;  %v19756_v16 = vld [vmem:[%s27213_s5 + $0x1618] ss:$52 sps:$4 sm:$0xff]  }
 0x5ff   :  { %11706 = vmatpush2.bf16.msra.mxu1 %v19738_v62  ;;  %v19764_v62 = vld [vmem:[%s27213_s5 + $0x15b4] ss:$52 sps:$4 sm:$0xff]  }
 0x600   :  { %11707 = vmatprep.subr.bf16.mxu1 %v19746_v36  ;;  %v19765_v36 = vld [vmem:[%s27213_s5 + $0x11a0] ss:$52 sps:$4 sm:$0xff]  }
 0x601   :  { %11739 = vmatpush2.bf16.msra.mxu0 %v19747_v33  ;;  %v19773_v33 = vld [vmem:[%s27213_s5 + $0x113c] ss:$52 sps:$4 sm:$0xff]  }
 0x602   :  { %11740 = vmatprep.subr.bf16.mxu0 %v19755_v61  ;;  %v19762_v61 = vld [vmem:[%s27213_s5 + $0x15b0] ss:$52 sps:$4 sm:$0xff]  }
 0x603   :  { %11708 = vmatpush2.bf16.msra.mxu1 %v19744_v48  ;;  %v19770_v48 = vld [vmem:[%s27213_s5 + $0x154c] ss:$52 sps:$4 sm:$0xff]  }
 0x604   :  { %11763 = vmatprep.subr.bf16.mxu1 %v19752_v24  ;;  %v19771_v24 = vld [vmem:[%s27213_s5 + $0x1138] ss:$52 sps:$4 sm:$0xff]  }
 0x605   :  { %11741 = vmatpush2.bf16.msra.mxu0 %v19753_v9  ;;  %v19779_v9 = vld [vmem:[%s27213_s5 + $0x10d4] ss:$52 sps:$4 sm:$0xff]  }
 0x606   :  { %11710 = vmatmul.mubr.bf16.vlgmr.msra.gmra.mxu1 %v22455_v13  ;;  %11742 = vmatprep.subr.bf16.mxu0 %v19761_v17  ;;  %v19768_v17 = vld [vmem:[%s27213_s5 + $0x1548] ss:$52 sps:$4 sm:$0xff]  }
 0x607   :  { %11764 = vmatpush1.bf16.msra.mxu1 %v19750_v1  ;;  %11795 = vmatprep.mubr.bf16.mxu1 %v23067_v11  ;;  %v19776_v1 = vld [vmem:[%s27213_s5 + $0x14e4] ss:$52 sps:$4 sm:$0xff]  }
 0x608   :  { %11765 = vmatprep.subr.bf16.mxu1 %v19758_v35  ;;  %v19777_v35 = vld [vmem:[%s27213_s5 + $0x10d0] ss:$52 sps:$4 sm:$0xff]  }
 0x609   :  { %11743 = vmatpush2.bf16.msra.mxu0 %v19759_v28  ;;  %v19785_v28 = vld [vmem:[%s27213_s5 + $0x106c] ss:$52 sps:$4 sm:$0xff]  }
 0x60a   :  { %11744 = vmatprep.subr.bf16.mxu0 %v19767_v10  ;;  %v19774_v10 = vld [vmem:[%s27213_s5 + $0x14e0] ss:$52 sps:$4 sm:$0xff]  }
 0x60b   :  { %11766 = vmatpush1.bf16.msra.mxu1 %v19756_v16  ;;  %v19782_v16 = vld [vmem:[%s27213_s5 + $0x147c] ss:$52 sps:$4 sm:$0xff]  }
 0x60c   :  { %11767 = vmatprep.subr.bf16.mxu1 %v19764_v62  ;;  %v19783_v62 = vld [vmem:[%s27213_s5 + $0x1068] ss:$52 sps:$4 sm:$0xff]  }
 0x60d   :  { %11745 = vmatpush2.bf16.msra.mxu0 %v19765_v36  ;;  %v19791_v36 = vld [vmem:[%s27213_s5 + $0x1d04] ss:$52 sps:$4 sm:$0xff]  }
 0x60e   :  { %11746 = vmatprep.subr.bf16.mxu0 %v19773_v33  ;;  %v19780_v33 = vld [vmem:[%s27213_s5 + $0x1478] ss:$52 sps:$4 sm:$0xff]  }
 0x60f   :  { %11768 = vmatpush1.bf16.msra.mxu1 %v19762_v61  ;;  %v19788_v61 = vld [vmem:[%s27213_s5 + $0x1414] ss:$52 sps:$4 sm:$0xff]  }
 0x610   :  { %11769 = vmatprep.subr.bf16.mxu1 %v19770_v48  ;;  %v19789_v48 = vld [vmem:[%s27213_s5 + $0x1d00] ss:$52 sps:$4 sm:$0xff]  }
 0x611   :  { %11747 = vmatpush2.bf16.msra.mxu0 %v19771_v24  ;;  %v19797_v24 = vld [vmem:[%s27213_s5 + $0x1c9c] ss:$52 sps:$4 sm:$0xff]  }
 0x612   :  { %11748 = vmatprep.subr.bf16.mxu0 %v19779_v9  ;;  %v19786_v9 = vld [vmem:[%s27213_s5 + $0x1410] ss:$52 sps:$4 sm:$0xff]  }
 0x613   :  { %11770 = vmatpush1.bf16.msra.mxu1 %v19768_v17  ;;  %v19794_v17 = vld [vmem:[%s27213_s5 + $0x13ac] ss:$52 sps:$4 sm:$0xff]  }
 0x614   :  { %11771 = vmatprep.subr.bf16.mxu1 %v19776_v1  ;;  %v19795_v1 = vld [vmem:[%s27213_s5 + $0x1c98] ss:$52 sps:$4 sm:$0xff]  }
 0x615   :  { %11749 = vmatpush2.bf16.msra.mxu0 %v19777_v35  ;;  %v27241_v35 = vmov 0  }
 0x616   :  { %11750 = vmatprep.subr.bf16.mxu0 %v19785_v28  ;;  %v19803_v28 = vld [vmem:[%s27213_s5 + $0x1c34] ss:$52 sps:$4 sm:$0xff]  }
 0x617   :  { %11772 = vmatpush1.bf16.msra.mxu1 %v19774_v10  ;;  %v19792_v10 = vld [vmem:[%s27213_s5 + $0x13a8] ss:$52 sps:$4 sm:$0xff]  }
 0x618   :  { %11773 = vmatprep.subr.bf16.mxu1 %v19782_v16  ;;  %v25343_v16 = vld [vmem:[%s27214_s6 + $0x8] sm:$0x1f] }
 0x619   :  { %11751 = vmatpush2.bf16.msra.mxu0 %v19783_v62  ;;  %v19800_v62 = vld [vmem:[%s27213_s5 + $0x19c4] ss:$52 sps:$4 sm:$0xff]  }
 0x61a   :  { %11806 = vmatprep.subr.bf16.mxu0 %v19791_v36  ;;  %v19801_v36 = vld [vmem:[%s27213_s5 + $0x1c30] ss:$52 sps:$4 sm:$0xff]  }
 0x61b   :  { %11774 = vmatpush1.bf16.msra.mxu1 %v19780_v33  ;;  %v25351_v33 = vpop.f32.mrf.mxu0 }
 0x61c   :  { %11775 = vmatprep.subr.bf16.mxu1 %v19788_v61  ;;  %11753 = vmatmul.mubr.bf16.vlgmr.msra.gmra.mxu0 %v23006_v0  ;;  %27242 = vst [vmem:[#allocation15_spill] sm:$0xff] %v25351_v33  ;;  %v19809_v61 = vld [vmem:[%s27213_s5 + $0x1bcc] ss:$52 sps:$4 sm:$0xff]  }
 0x61d   :  { %11807 = vmatpush1.bf16.msra.mxu0 %v19789_v48  ;;  %11838 = vmatprep.mubr.bf16.mxu0 %v27241_v35  ;;  %v5777_v48 = vrot.slane %v25343_v16, %v21233_v55  ;;  %v19815_v55 = vld [vmem:[%s27213_s5 + $0x1b64] ss:$52 sps:$4 sm:$0xff]  }
 0x61e   :  { %11808 = vmatprep.subr.bf16.mxu0 %v19797_v24  ;;  %v19798_v24 = vld [vmem:[%s27213_s5 + $0x19c0] ss:$52 sps:$4 sm:$0xff]  }
 0x61f   :  { %11776 = vmatpush1.bf16.msra.mxu1 %v19786_v9  ;;  %v25361_v9 = vpop.f32.mrf.mxu1 }
 0x620   :  { %11777 = vmatprep.subr.bf16.mxu1 %v19794_v17  ;;  %27243 = vst [vmem:[#allocation16_spill] sm:$0xff] %v25361_v9  ;;  %v11496_v17 = vpop.f32.mrf.mxu0 }
 0x621   :  { %11809 = vmatpush1.bf16.msra.mxu0 %v19795_v1  ;;  %v19806_v1 = vld [vmem:[%s27213_s5 + $0x195c] ss:$52 sps:$4 sm:$0xff]  }
 0x622   :  { %11810 = vmatprep.subr.bf16.mxu0 %v19803_v28  ;;  %v19807_v28 = vld [vmem:[%s27213_s5 + $0x1bc8] ss:$52 sps:$4 sm:$0xff]   ;;  %v25375_v43 = vpop.f32.mrf.mxu0 }
 0x623   :  { %11778 = vmatpush1.bf16.msra.mxu1 %v19792_v10  ;;  %27244 = vst [vmem:[#allocation17_spill] sm:$0xff] %v25375_v43  ;;  %v19821_v43 = vld [vmem:[%s27213_s5 + $0x1afc] ss:$52 sps:$4 sm:$0xff]  }
 0x624   :  { %11779 = vmatprep.subr.bf16.mxu1 %v19800_v62  ;;  %v19804_v62 = vld [vmem:[%s27213_s5 + $0x1958] ss:$52 sps:$4 sm:$0xff]  }
 0x625   :  { %11811 = vmatpush1.bf16.msra.mxu0 %v19801_v36  ;;  %v19812_v36 = vld [vmem:[%s27213_s5 + $0x18f4] ss:$52 sps:$4 sm:$0xff]  }
 0x626   :  { %v11453_v10 = vpop.f32.mrf.mxu1  ;;  %11812 = vmatprep.subr.bf16.mxu0 %v19809_v61  ;;  %v19813_v61 = vld [vmem:[%s27213_s5 + $0x1b60] ss:$52 sps:$4 sm:$0xff]  }
 0x627   :  { %v11454_v35 = vadd.f32 %v11453_v10, %v5777_v48  ;;  %11780 = vmatpush2.bf16.msra.mxu1 %v19798_v24 }
 0x628   :  { %v25377_v33 = vpop.f32.mrf.mxu1  ;;  %11781 = vmatprep.subr.bf16.mxu1 %v19806_v1  ;;  %v19810_v1 = vld [vmem:[%s27213_s5 + $0x18f0] ss:$52 sps:$4 sm:$0xff]  }
 0x629   :  { %27245 = vst [vmem:[#allocation18_spill] sm:$0xff] %v25377_v33  ;;  %11813 = vmatpush1.bf16.msra.mxu0 %v19807_v28  ;;  %v25385_v10 = vadd.f32 %v11496_v17, %v11454_v35  ;;  %v11500_v33 = vpop.f32.mrf.mxu0  ;;  %v19818_v28 = vld [vmem:[%s27213_s5 + $0x188c] ss:$52 sps:$4 sm:$0xff]   ;;  %v19816_v17 = vld [vmem:[%s27213_s5 + $0x1888] ss:$52 sps:$4 sm:$0xff]  }
 0x62a   :  { %v11457_v24 = vpop.f32.mrf.mxu1  ;;  %11814 = vmatprep.subr.bf16.mxu0 %v19815_v55  ;;  %v19819_v55 = vld [vmem:[%s27213_s5 + $0x1af8] ss:$52 sps:$4 sm:$0xff]  }
 0x62b   :  { %v11458_v9 = vadd.f32 %v11457_v24, %v5777_v48  ;;  %11782 = vmatpush2.bf16.msra.mxu1 %v19804_v62  ;;  %v19827_v48 = vld [vmem:[%s27213_s5 + $0x1a94] ss:$52 sps:$4 sm:$0xff]   ;;  %v19824_v62 = vld [vmem:[%s27213_s5 + $0x1824] ss:$52 sps:$4 sm:$0xff]  }
 0x62c   :  { %11783 = vmatprep.subr.bf16.mxu1 %v19812_v36  ;;  %v19830_v36 = vld [vmem:[%s27213_s5 + $0x17bc] ss:$52 sps:$4 sm:$0xff]  }
 0x62d   :  { %11815 = vmatpush1.bf16.msra.mxu0 %v19813_v61  ;;  %v25399_v35 = vadd.f32 %v11500_v33, %v11458_v9  ;;  %v19825_v33 = vld [vmem:[%s27213_s5 + $0x1a90] ss:$52 sps:$4 sm:$0xff]   ;;  %v19822_v9 = vld [vmem:[%s27213_s5 + $0x1820] ss:$52 sps:$4 sm:$0xff]   ;;  %v19831_v61 = vld [vmem:[%s27213_s5 + $0x1a28] ss:$52 sps:$4 sm:$0xff]  }
 0x62e   :  { %11816 = vmatprep.subr.bf16.mxu0 %v19821_v43  ;;  %v19833_v43 = vld [vmem:[%s27213_s5 + $0x1a2c] ss:$52 sps:$4 sm:$0xff]   ;;  %v19837_v24 = vld [vmem:[%s27213_s5 + $0xcc8] ss:$52 sps:$4 sm:$0xff]  }
 0x62f   :  { %11784 = vmatpush2.bf16.msra.mxu1 %v19810_v1  ;;  %v19828_v1 = vld [vmem:[%s27213_s5 + $0x17b8] ss:$52 sps:$4 sm:$0xff]  }
 0x630   :  { %11785 = vmatprep.subr.bf16.mxu1 %v19818_v28  ;;  %v19836_v28 = vld [vmem:[%s27213_s5 + $0x1754] ss:$52 sps:$4 sm:$0xff]  }
 0x631   :  { %11817 = vmatpush1.bf16.msra.mxu0 %v19819_v55  ;;  %v19838_v55 = vld [vmem:[%s27213_s5 + $0x988] ss:$52 sps:$4 sm:$0xff]  }
 0x632   :  { %11818 = vmatprep.subr.bf16.mxu0 %v19827_v48  ;;  %v19842_v48 = vld [vmem:[%s27213_s5 + $0xc60] ss:$52 sps:$4 sm:$0xff]  }
 0x633   :  { %11786 = vmatpush2.bf16.msra.mxu1 %v19816_v17  ;;  %v19834_v17 = vld [vmem:[%s27213_s5 + $0x1750] ss:$52 sps:$4 sm:$0xff]  }
 0x634   :  { %11787 = vmatprep.subr.bf16.mxu1 %v19824_v62  ;;  %v19841_v62 = vld [vmem:[%s27213_s5 + $0x16ec] ss:$52 sps:$4 sm:$0xff]  }
 0x635   :  { %11819 = vmatpush1.bf16.msra.mxu0 %v19825_v33  ;;  %v19843_v33 = vld [vmem:[%s27213_s5 + $0x920] ss:$52 sps:$4 sm:$0xff]  }
 0x636   :  { %11820 = vmatprep.subr.bf16.mxu0 %v19833_v43  ;;  %v19846_v43 = vld [vmem:[%s27213_s5 + $0xbf8] ss:$52 sps:$4 sm:$0xff]  }
 0x637   :  { %11788 = vmatpush2.bf16.msra.mxu1 %v19822_v9  ;;  %v19839_v9 = vld [vmem:[%s27213_s5 + $0x16e8] ss:$52 sps:$4 sm:$0xff]  }
 0x638   :  { %11789 = vmatprep.subr.bf16.mxu1 %v19830_v36  ;;  %v19844_v36 = vld [vmem:[%s27213_s5 + $0x648] ss:$52 sps:$4 sm:$0xff]  }
 0x639   :  { %11821 = vmatpush1.bf16.msra.mxu0 %v19831_v61  ;;  %v19850_v61 = vld [vmem:[%s27213_s5 + $0xb90] ss:$52 sps:$4 sm:$0xff]  }
 0x63a   :  { %17593 = vmatprep.subr.bf16.mxu0 %v19837_v24  ;;  %v19845_v24 = vld [vmem:[%s27213_s5 + $0x308] ss:$52 sps:$4 sm:$0xff]  }
 0x63b   :  { %11790 = vmatpush2.bf16.msra.mxu1 %v19828_v1  ;;  %v19848_v1 = vld [vmem:[%s27213_s5 + $0x5e0] ss:$52 sps:$4 sm:$0xff]  }
 0x63c   :  { %11791 = vmatprep.subr.bf16.mxu1 %v19836_v28  ;;  %11839 = vmatmul.mubr.bf16.vlgmr.msra.gmra.mxu0 %v23140_v41  ;;  %v19851_v28 = vld [vmem:[%s27213_s5 + $0x850] ss:$52 sps:$4 sm:$0xff]  }
 0x63d   :  { %17594 = vmatpush3.bf16.msra.mxu0 %v19838_v55  ;;  %11922 = vmatprep.mubr.bf16.mxu0 %v22593_v32  ;;  %v19847_v32 = vld [vmem:[%s27213_s5 + $0x8b8] ss:$52 sps:$4 sm:$0xff]   ;;  %v19854_v55 = vld [vmem:[%s27213_s5 + $0xb28] ss:$52 sps:$4 sm:$0xff]  }
 0x63e   :  { %17595 = vmatprep.subr.bf16.mxu0 %v19842_v48  ;;  %v19849_v48 = vld [vmem:[%s27213_s5 + $0x2a0] ss:$52 sps:$4 sm:$0xff]  }
 0x63f   :  { %11792 = vmatpush2.bf16.msra.mxu1 %v19834_v17  ;;  %v19852_v17 = vld [vmem:[%s27213_s5 + $0x578] ss:$52 sps:$4 sm:$0xff]  }
 0x640   :  { %11793 = vmatprep.subr.bf16.mxu1 %v19841_v62  ;;  %v19855_v62 = vld [vmem:[%s27213_s5 + $0x7e8] ss:$52 sps:$4 sm:$0xff]  }
 0x641   :  { %17596 = vmatpush3.bf16.msra.mxu0 %v19843_v33  ;;  %v19858_v33 = vld [vmem:[%s27213_s5 + $0xac0] ss:$52 sps:$4 sm:$0xff]  }
 0x642   :  { %17597 = vmatprep.subr.bf16.mxu0 %v19846_v43  ;;  %v19856_v43 = vld [vmem:[%s27213_s5 + $0x510] ss:$52 sps:$4 sm:$0xff]  }
 0x643   :  { %11794 = vmatpush2.bf16.msra.mxu1 %v19839_v9  ;;  %v19859_v9 = vld [vmem:[%s27213_s5 + $0x780] ss:$52 sps:$4 sm:$0xff]  }
 0x644   :  { %17571 = vmatprep.subr.bf16.mxu1 %v19844_v36  ;;  %v19862_v36 = vld [vmem:[%s27213_s5 + $0xa58] ss:$52 sps:$4 sm:$0xff]  }
 0x645   :  { %17598 = vmatpush3.bf16.msra.mxu0 %v19847_v32  ;;  %v19857_v32 = vld [vmem:[%s27213_s5 + $0x1d0] ss:$52 sps:$4 sm:$0xff]  }
 0x646   :  { %11796 = vmatmul.mubr.bf16.vlgmr.msra.gmra.mxu1 %v23069_v21  ;;  %17599 = vmatprep.subr.bf16.mxu0 %v19850_v61  ;;  %v19860_v61 = vld [vmem:[%s27213_s5 + $0x4a8] ss:$52 sps:$4 sm:$0xff]  }
 0x647   :  { %17572 = vmatpush3.bf16.msra.mxu1 %v19845_v24  ;;  %11881 = vmatprep.mubr.bf16.mxu1 %v22583_v7  ;;  %v19853_v7 = vld [vmem:[%s27213_s5 + $0x238] ss:$52 sps:$4 sm:$0xff]  }
 0x648   :  { %17573 = vmatprep.subr.bf16.mxu1 %v19848_v1  ;;  %v19863_v24 = vld [vmem:[%s27213_s5 + $0x718] ss:$52 sps:$4 sm:$0xff]   ;;  %v19866_v1 = vld [vmem:[%s27213_s5 + $0x9f0] ss:$52 sps:$4 sm:$0xff]  }
 0x649   :  { %17600 = vmatpush3.bf16.msra.mxu0 %v19851_v28  ;;  %v19861_v28 = vld [vmem:[%s27213_s5 + $0x168] ss:$52 sps:$4 sm:$0xff]  }
 0x64a   :  { %17601 = vmatprep.subr.bf16.mxu0 %v19854_v55  ;;  %v19864_v55 = vld [vmem:[%s27213_s5 + $0x440] ss:$52 sps:$4 sm:$0xff]  }
 0x64b   :  { %17574 = vmatpush3.bf16.msra.mxu1 %v19849_v48  ;;  %v19867_v48 = vld [vmem:[%s27213_s5 + $0x6b0] ss:$52 sps:$4 sm:$0xff]  }
 0x64c   :  { %17575 = vmatprep.subr.bf16.mxu1 %v19852_v17  ;;  %v19870_v17 = vld [vmem:[%s27213_s5 + $0x19c8] ss:$52 sps:$4 sm:$0xff]  }
 0x64d   :  { %17602 = vmatpush3.bf16.msra.mxu0 %v19855_v62  ;;  %v19865_v62 = vld [vmem:[%s27213_s5 + $0x100] ss:$52 sps:$4 sm:$0xff]  }
 0x64e   :  { %17603 = vmatprep.subr.bf16.mxu0 %v19858_v33  ;;  %v19868_v33 = vld [vmem:[%s27213_s5 + $0x3d8] ss:$52 sps:$4 sm:$0xff]  }
 0x64f   :  { %17576 = vmatpush3.bf16.msra.mxu1 %v19853_v7  ;;  %v19871_v7 = vld [vmem:[%s27213_s5 + $0x1688] ss:$52 sps:$4 sm:$0xff]  }
 0x650   :  { %17577 = vmatprep.subr.bf16.mxu1 %v19856_v43  ;;  %v19874_v43 = vld [vmem:[%s27213_s5 + $0x1960] ss:$52 sps:$4 sm:$0xff]  }
 0x651   :  { %17604 = vmatpush3.bf16.msra.mxu0 %v19859_v9  ;;  %v19869_v9 = vld [vmem:[%s27213_s5 + $0x98] ss:$52 sps:$4 sm:$0xff]  }
 0x652   :  { %17605 = vmatprep.subr.bf16.mxu0 %v19862_v36  ;;  %v19872_v36 = vld [vmem:[%s27213_s5 + $0x370] ss:$52 sps:$4 sm:$0xff]  }
 0x653   :  { %17578 = vmatpush3.bf16.msra.mxu1 %v19857_v32  ;;  %v19875_v32 = vld [vmem:[%s27213_s5 + $0x1620] ss:$52 sps:$4 sm:$0xff]  }
 0x654   :  { %17579 = vmatprep.subr.bf16.mxu1 %v19860_v61  ;;  %v19878_v61 = vld [vmem:[%s27213_s5 + $0x18f8] ss:$52 sps:$4 sm:$0xff]  }
 0x655   :  { %17606 = vmatpush3.bf16.msra.mxu0 %v19863_v24  ;;  %v19876_v24 = vld [vmem:[%s27213_s5 + $0x1348] ss:$52 sps:$4 sm:$0xff]  }
 0x656   :  { %17607 = vmatprep.subr.bf16.mxu0 %v19866_v1  ;;  %v25563_v1 = vpop.f32.mrf.mxu0 }
 0x657   :  { %17580 = vmatpush3.bf16.msra.mxu1 %v19861_v28  ;;  %v19882_v28 = vld [vmem:[%s27213_s5 + $0x1890] ss:$52 sps:$4 sm:$0xff]  }
 0x658   :  { %17581 = vmatprep.subr.bf16.mxu1 %v19864_v55  ;;  %v19877_v55 = vld [vmem:[%s27213_s5 + $0x1008] ss:$52 sps:$4 sm:$0xff]  }
 0x659   :  { %17608 = vmatpush3.bf16.msra.mxu0 %v19867_v48  ;;  %v25571_v48 = vpop.f32.mrf.mxu1 }
 0x65a   :  { %17637 = vmatprep.subr.bf16.mxu0 %v19870_v17 }
 0x65b   :  { %17582 = vmatpush3.bf16.msra.mxu1 %v19865_v62  ;;  %v19880_v62 = vld [vmem:[%s27213_s5 + $0x12e0] ss:$52 sps:$4 sm:$0xff]  }
 0x65c   :  { %17583 = vmatprep.subr.bf16.mxu1 %v19868_v33  ;;  %11923 = vmatmul.mubr.bf16.vlgmr.msra.gmra.mxu0 %v22455_v13  ;;  %v19873_v13 = vld [vmem:[%s27213_s5 + $0x30] ss:$52 sps:$4 sm:$0xff]   ;;  %v11582_v17 = vpop.f32.mrf.mxu0 }
 0x65d   :  { %17638 = vmatpush3.bf16.msra.mxu0 %v19871_v7  ;;  %12004 = vmatprep.mubr.bf16.mxu0 %v23067_v11  ;;  %v19879_v11 = vld [vmem:[%s27213_s5 + $0x15b8] ss:$52 sps:$4 sm:$0xff]   ;;  %v19883_v33 = vld [vmem:[%s27213_s5 + $0x1550] ss:$52 sps:$4 sm:$0xff]  }
 0x65e   :  { %17639 = vmatprep.subr.bf16.mxu0 %v19874_v43  ;;  %v19886_v43 = vld [vmem:[%s27213_s5 + $0x1828] ss:$52 sps:$4 sm:$0xff]  }
 0x65f   :  { %17584 = vmatpush3.bf16.msra.mxu1 %v19869_v9  ;;  %v5749_v9 = vrot.slane %v24919_v5, %v21239_v57 }
 0x660   :  { %17585 = vmatprep.subr.bf16.mxu1 %v19872_v36 }
 0x661   :  { %17640 = vmatpush3.bf16.msra.mxu0 %v19875_v32  ;;  %v19881_v32 = vld [vmem:[%s27213_s5 + $0xfa0] ss:$52 sps:$4 sm:$0xff]   ;;  %v10600_v5 = vadd.f32 %v23495_v3, %v5749_v9  ;;  %v19885_v3 = vld [vmem:[%s27213_s5 + $0xf38] ss:$52 sps:$4 sm:$0xff]  }
 0x662   :  { %17641 = vmatprep.subr.bf16.mxu0 %v19878_v61  ;;  %v25590_v61 = vpop.f32.mrf.mxu0 }
 0x663   :  { %17586 = vmatpush3.bf16.msra.mxu1 %v19873_v13  ;;  %v19884_v13 = vld [vmem:[%s27213_s5 + $0x1278] ss:$52 sps:$4 sm:$0xff]  }
 0x664   :  { %17615 = vmatprep.subr.bf16.mxu1 %v19876_v24 }
 0x665   :  { %17642 = vmatpush3.bf16.msra.mxu0 %v19879_v11  ;;  %v19890_v11 = vld [vmem:[%s27213_s5 + $0x17c0] ss:$52 sps:$4 sm:$0xff]  }
 0x666   :  { %v11539_v7 = vpop.f32.mrf.mxu1  ;;  %11882 = vmatmul.mubr.bf16.vlgmr.msra.gmra.mxu1 %v22136_v4  ;;  %17643 = vmatprep.subr.bf16.mxu0 %v19882_v28  ;;  %v10596_v28 = vadd.f32 %v23305_v63, %v5749_v9  ;;  %v19891_v63 = vld [vmem:[%s27213_s5 + $0x1480] ss:$52 sps:$4 sm:$0xff]  }
 0x667   :  { %v11540_v36 = vadd.f32 %v11539_v7, %v25385_v10  ;;  %17616 = vmatpush3.bf16.msra.mxu1 %v19877_v55  ;;  %11963 = vmatprep.mubr.bf16.mxu1 %v22833_v42  ;;  %v19887_v42 = vld [vmem:[%s27213_s5 + $0x14e8] ss:$52 sps:$4 sm:$0xff]  }
 0x668   :  { %v25592_v4 = vpop.f32.mrf.mxu1  ;;  %17617 = vmatprep.subr.bf16.mxu1 %v19880_v62  ;;  %v11586_v62 = vpop.f32.mrf.mxu0 }
 0x669   :  { %17644 = vmatpush3.bf16.msra.mxu0 %v19883_v33  ;;  %v25601_v10 = vadd.f32 %v11582_v17, %v11540_v36  ;;  %v19888_v17 = vld [vmem:[%s27213_s5 + $0x1210] ss:$52 sps:$4 sm:$0xff]   ;;  %v10643_v33 = vadd.f32 %v23626_v54, %v10600_v5  ;;  %v19892_v36 = vld [vmem:[%s27213_s5 + $0x11a8] ss:$52 sps:$4 sm:$0xff]  }
 0x66a   :  { %v11543_v24 = vpop.f32.mrf.mxu1  ;;  %17645 = vmatprep.subr.bf16.mxu0 %v19886_v43  ;;  %v10639_v43 = vadd.f32 %v23300_v60, %v10596_v28  ;;  %v19889_v54 = vld [vmem:[%s27213_s5 + $0xed0] ss:$52 sps:$4 sm:$0xff]   ;;  %v19895_v60 = vld [vmem:[%s27213_s5 + $0x1418] ss:$52 sps:$4 sm:$0xff]   ;;  %v19897_v28 = vld [vmem:[%s27213_s5 + $0xe00] ss:$52 sps:$4 sm:$0xff]  }
 0x66b   :  { %v11544_v55 = vadd.f32 %v11543_v24, %v25399_v35  ;;  %17618 = vmatpush3.bf16.msra.mxu1 %v19881_v32  ;;  %v19894_v35 = vld [vmem:[%s27213_s5 + $0x1758] ss:$52 sps:$4 sm:$0xff]   ;;  %v10686_v9 = vadd.f32 %v23764_v39, %v10643_v33  ;;  %v19898_v39 = vld [vmem:[%s27213_s5 + $0x16f0] ss:$52 sps:$4 sm:$0xff]  }
 0x66c   :  { %17619 = vmatprep.subr.bf16.mxu1 %v19884_v13  ;;  %v10682_v32 = vadd.f32 %v23512_v19, %v10639_v43  ;;  %v19893_v19 = vld [vmem:[%s27213_s5 + $0xe68] ss:$52 sps:$4 sm:$0xff]   ;;  %v19901_v33 = vld [vmem:[%s27213_s5 + $0xd98] ss:$52 sps:$4 sm:$0xff]   ;;  %v19913_v43 = vld [vmem:[%s27215_s7 + $0xa4] ss:$16 sps:$4 sm:$0xff]  }
 0x66d   :  { %17646 = vmatpush3.bf16.msra.mxu0 %v19887_v42  ;;  %v25618_v7 = vadd.f32 %v11586_v62, %v11544_v55  ;;  %v10729_v13 = vadd.f32 %v23942_v12, %v10686_v9  ;;  %v19896_v12 = vld [vmem:[%s27213_s5 + $0x1140] ss:$52 sps:$4 sm:$0xff]  }
 0x66e   :  { %17647 = vmatprep.subr.bf16.mxu0 %v19890_v11  ;;  %v10725_v5 = vadd.f32 %v23643_v8, %v10682_v32  ;;  %v19899_v11 = vld [vmem:[%s27213_s5 + $0x13b0] ss:$52 sps:$4 sm:$0xff]   ;;  %v25694_v32 = vpop.f32.mrf.mxu1 }
 0x66f   :  { %17620 = vmatpush3.bf16.msra.mxu1 %v19885_v3  ;;  %v10772_v42 = vadd.f32 %v23979_v15, %v10729_v13  ;;  %v19904_v8 = vld [vmem:[%s27215_s7 + $0xe4] ss:$16 sps:$4 sm:$0xff]   ;;  %v19902_v3 = vld [vmem:[%s27215_s7 + $0xe0] ss:$16 sps:$4 sm:$0xff]   ;;  %v27246_v13 = vmov 0.0  }
 0x670   :  { %17621 = vmatprep.subr.bf16.mxu1 %v19888_v17  ;;  %v10768_v24 = vadd.f32 %v23781_v6, %v10725_v5  ;;  %v19900_v6 = vld [vmem:[%s27213_s5 + $0x10d8] ss:$52 sps:$4 sm:$0xff]   ;;  %v19909_v62 = vld [vmem:[%s27215_s7 + $0xc4] ss:$16 sps:$4 sm:$0xff]   ;;  %v19911_v9 = vld [vmem:[%s27215_s7 + $0xa0] ss:$16 sps:$4 sm:$0xff]  }
 0x671   :  { %17648 = vmatpush3.bf16.msra.mxu0 %v19891_v63  ;;  %v12068_v15 = vmax.f32 %v10772_v42, 0.0  ;;  %v19905_v63 = vld [vmem:[%s27213_s5 + $0x1070] ss:$52 sps:$4 sm:$0xff]  }
 0x672   :  { %17649 = vmatprep.subr.bf16.mxu0 %v19894_v35  ;;  %v12055_v55 = vmax.f32 %v10768_v24, 0.0  ;;  %v19907_v35 = vld [vmem:[%s27215_s7 + $0xc0] ss:$16 sps:$4 sm:$0xff]   ;;  %v19921_v5 = vld [vmem:[%s27215_s7 + $0x64] ss:$16 sps:$4 sm:$0xff]  }
 0x673   :  { %17622 = vmatpush3.bf16.msra.mxu1 %v19889_v54  ;;  %v19917_v54 = vld [vmem:[%s27215_s7 + $0x84] ss:$16 sps:$4 sm:$0xff]  }
 0x674   :  { %17623 = vmatprep.subr.bf16.mxu1 %v19892_v36  ;;  %v25666_v17 = vpack.c.bf16 %v12068_v15, %v12055_v55  ;;  %v19910_v36 = vld [vmem:[%s27213_s5 + $0x1d08] ss:$52 sps:$4 sm:$0xff]   ;;  %v19929_v55 = vld [vmem:[%s27215_s7 + $0x24] ss:$16 sps:$4 sm:$0xff]  }
 0x675   :  { %17650 = vmatpush3.bf16.msra.mxu0 %v19895_v60  ;;  %v19915_v60 = vld [vmem:[%s27215_s7 + $0x80] ss:$16 sps:$4 sm:$0xff]  }
 0x676   :  { %17651 = vmatprep.subr.bf16.mxu0 %v19898_v39 }
 0x677   :  { %17624 = vmatpush3.bf16.msra.mxu1 %v19893_v19  ;;  %v19914_v19 = vld [vmem:[%s27213_s5 + $0x1ca0] ss:$52 sps:$4 sm:$0xff]  }
 0x678   :  { %17625 = vmatprep.subr.bf16.mxu1 %v19896_v12 }
 0x679   :  { %17652 = vmatpush3.bf16.msra.mxu0 %v19899_v11 }
 0x67a   :  { %14519 = vmatprep.subr.bf16.mxu0 %v19904_v8  ;;  %v19918_v8 = vld [vmem:[%s27213_s5 + $0x1c38] ss:$52 sps:$4 sm:$0xff]  }
 0x67b   :  { %17626 = vmatpush3.bf16.msra.mxu1 %v19897_v28 }
 0x67c   :  { %17627 = vmatprep.subr.bf16.mxu1 %v19900_v6  ;;  %12005 = vmatmul.mubr.bf16.vlgmr.msra.gmra.mxu0 %v23069_v21  ;;  %v19906_v21 = vld [vmem:[%s27213_s5 + $0xd30] ss:$52 sps:$4 sm:$0xff]  }
 0x67d   :  { %14520 = vmatpush1.bf16.msra.mxu0 %v19902_v3  ;;  %14551 = vmatprep.mubr.bf16.mxu0 %v25666_v17  ;;  %v19923_v6 = vld [vmem:[%s27215_s7 + $0x40] ss:$16 sps:$4 sm:$0xff]  }
 0x67e   :  { %14521 = vmatprep.subr.bf16.mxu0 %v19909_v62  ;;  %v19922_v3 = vld [vmem:[%s27213_s5 + $0x1bd0] ss:$52 sps:$4 sm:$0xff]  }
 0x67f   :  { %17628 = vmatpush3.bf16.msra.mxu1 %v19901_v33  ;;  %v25739_v62 = vld [vmem:[%s27214_s6] sm:$0xff] }
 0x680   :  { %17629 = vmatprep.subr.bf16.mxu1 %v19905_v63  ;;  %v5757_v33 = vrot.slane %v25739_v62, %v21242_v58  ;;  %v19927_v63 = vld [vmem:[%s27215_s7 + $0x20] ss:$16 sps:$4 sm:$0xff]  }
 0x681   :  { %14522 = vmatpush1.bf16.msra.mxu0 %v19907_v35  ;;  %v19933_v35 = vld [vmem:[%s27215_s7 + $0x4] ss:$16 sps:$4 sm:$0xff]  }
 0x682   :  { %14523 = vmatprep.subr.bf16.mxu0 %v19913_v43  ;;  %v10815_v43 = vadd.f32 %v24051_v31, %v5757_v33  ;;  %v19937_v31 = vld [vmem:[%s27215_s7 + $0x1e4] ss:$16 sps:$4 sm:$0xff]  }
 0x683   :  { %17630 = vmatpush3.bf16.msra.mxu1 %v19906_v21  ;;  %v19926_v21 = vld [vmem:[%s27213_s5 + $0x1b68] ss:$52 sps:$4 sm:$0xff]  }
 0x684   :  { %17718 = vmatprep.subr.bf16.mxu1 %v27246_v13 }
 0x685   :  { %14524 = vmatpush1.bf16.msra.mxu0 %v19911_v9  ;;  %v10811_v9 = vadd.f32 %v23971_v27, %v5757_v33  ;;  %v19930_v27 = vld [vmem:[%s27213_s5 + $0x1b00] ss:$52 sps:$4 sm:$0xff]  }
 0x686   :  { %v11625_v39 = vpop.f32.mrf.mxu1  ;;  %11964 = vmatmul.mubr.bf16.vlgmr.msra.gmra.mxu1 %v23006_v0  ;;  %14525 = vmatprep.subr.bf16.mxu0 %v19917_v54  ;;  %v19919_v0 = vld [vmem:[%s27215_s7 + $0x60] ss:$16 sps:$4 sm:$0xff]   ;;  %v10858_v54 = vadd.f32 %v24191_v23, %v10815_v43 }
 0x687   :  { %v11626_v42 = vadd.f32 %v11625_v39, %v25601_v10  ;;  %17719 = vmatpush3.bf16.msra.mxu1 %v19910_v36  ;;  %17734 = vmatprep.mubr.msk.bf16.mxu1 %vm20614_vm15, %v27246_v13  ;;  %v19925_v10 = vld [vmem:[%s27215_s7 + $0x44] ss:$16 sps:$4 sm:$0xff]   ;;  %v19931_v36 = vld [vmem:[%s27215_s7] ss:$16 sps:$4 sm:$0xff]  }
 0x688   :  { %v25710_v12 = vpop.f32.mrf.mxu1  ;;  %17720 = vmatprep.subr.bf16.mxu1 %v27246_v13  ;;  %v10901_v39 = vadd.f32 %v24183_v29, %v10858_v54 }
 0x689   :  { %14526 = vmatpush1.bf16.msra.mxu0 %v19915_v60  ;;  %v12062_v15 = vmax.f32 %v11626_v42, 0.0  ;;  %v10854_v60 = vadd.f32 %v23995_v46, %v10811_v9  ;;  %v19935_v42 = vld [vmem:[%s27215_s7 + $0x1e0] ss:$16 sps:$4 sm:$0xff]   ;;  %v19941_v46 = vld [vmem:[%s27215_s7 + $0x1c4] ss:$16 sps:$4 sm:$0xff]  }
 0x68a   :  { %v11629_v24 = vpop.f32.mrf.mxu1  ;;  %14527 = vmatprep.subr.bf16.mxu0 %v19921_v5  ;;  %v10944_v5 = vadd.f32 %v24401_v25, %v10901_v39  ;;  %v19939_v25 = vld [vmem:[%s27215_s7 + $0x1c0] ss:$16 sps:$4 sm:$0xff]  }
 0x68b   :  { %v11630_v11 = vadd.f32 %v11629_v24, %v25618_v7  ;;  %17721 = vmatpush3.bf16.msra.mxu1 %v19914_v19  ;;  %v10897_v23 = vadd.f32 %v24067_v30, %v10854_v60  ;;  %v19934_v19 = vld [vmem:[%s27213_s5 + $0x1a98] ss:$52 sps:$4 sm:$0xff]   ;;  %v19938_v24 = vld [vmem:[%s27213_s5 + $0x1a30] ss:$52 sps:$4 sm:$0xff]  }
 0x68c   :  { %17722 = vmatprep.subr.bf16.mxu1 %v27246_v13  ;;  %v10987_v30 = vadd.f32 %v24391_v44, %v10944_v5  ;;  %v19944_v44 = vld [vmem:[%s27215_s7 + $0x2e4] ss:$16 sps:$4 sm:$0xff]   ;;  %v19960_v60 = vld [vmem:[%s27215_s7 + $0x280] ss:$16 sps:$4 sm:$0xff]  }
 0x68d   :  { %v12075_v28 = vmax.f32 %v11630_v11, 0.0  ;;  %14528 = vmatpush1.bf16.msra.mxu0 %v19919_v0  ;;  %v10940_v29 = vadd.f32 %v24208_v38, %v10897_v23  ;;  %v19947_v0 = vld [vmem:[%s27215_s7 + $0x1a4] ss:$16 sps:$4 sm:$0xff]   ;;  %v19945_v11 = vld [vmem:[%s27215_s7 + $0x1a0] ss:$16 sps:$4 sm:$0xff]  }
 0x68e   :  { %14529 = vmatprep.subr.bf16.mxu0 %v19925_v10  ;;  %v12070_v10 = vmax.f32 %v10987_v30, 0.0  ;;  %v19969_v39 = vld [vmem:[%s27215_s7 + $0x120] ss:$16 sps:$4 sm:$0xff]  }
 0x68f   :  { %v25730_v7 = vpack.c.bf16 %v12075_v28, %v12062_v15  ;;  %17723 = vmatpush3.bf16.msra.mxu1 %v19918_v8  ;;  %v10983_v38 = vadd.f32 %v24206_v2, %v10940_v29  ;;  %v19953_v2 = vld [vmem:[%s27215_s7 + $0x184] ss:$16 sps:$4 sm:$0xff]   ;;  %v5765_v28 = vrot.slane %v25739_v62, %v21344_v37  ;;  %v19948_v37 = vld [vmem:[%s27215_s7 + $0x2c0] ss:$16 sps:$4 sm:$0xff]  }
 0x690   :  { %17724 = vmatprep.subr.bf16.mxu1 %v27246_v13  ;;  %v19950_v15 = vld [vmem:[%s27215_s7 + $0x2c4] ss:$16 sps:$4 sm:$0xff]   ;;  %v19966_v5 = vld [vmem:[%s27215_s7 + $0x260] ss:$16 sps:$4 sm:$0xff]  }
 0x691   :  { %14530 = vmatpush1.bf16.msra.mxu0 %v19923_v6  ;;  %v12057_v8 = vmax.f32 %v10983_v38, 0.0  ;;  %v11030_v33 = vadd.f32 %v24609_v51, %v5765_v28  ;;  %v19965_v51 = vld [vmem:[%s27215_s7 + $0x144] ss:$16 sps:$4 sm:$0xff]   ;;  %v19972_v29 = vld [vmem:[%s27215_s7 + $0x240] ss:$16 sps:$4 sm:$0xff]  }
 0x692   :  { %14531 = vmatprep.subr.bf16.mxu0 %v19929_v55  ;;  %v19951_v55 = vld [vmem:[%s27215_s7 + $0x180] ss:$16 sps:$4 sm:$0xff]  }
 0x693   :  { %17725 = vmatpush3.bf16.msra.mxu1 %v19922_v3  ;;  %v25810_v6 = vpack.c.bf16 %v12070_v10, %v12057_v8  ;;  %v19959_v3 = vld [vmem:[%s27215_s7 + $0x164] ss:$16 sps:$4 sm:$0xff]   ;;  %v11073_v43 = vadd.f32 %v24601_v47, %v11030_v33  ;;  %v19981_v30 = vld [vmem:[%s27215_s7 + $0x4e0] ss:$16 sps:$4 sm:$0xff]  }
 0x694   :  { %17726 = vmatprep.subr.bf16.mxu1 %v27246_v13  ;;  %v19971_v47 = vld [vmem:[%s27215_s7 + $0x124] ss:$16 sps:$4 sm:$0xff]   ;;  %v19978_v38 = vld [vmem:[%s27215_s7 + $0x220] ss:$16 sps:$4 sm:$0xff]  }
 0x695   :  { %14532 = vmatpush1.bf16.msra.mxu0 %v19927_v63  ;;  %v19956_v63 = vld [vmem:[%s27215_s7 + $0x2a4] ss:$16 sps:$4 sm:$0xff]   ;;  %v11116_v54 = vadd.f32 %v24719_v49, %v11073_v43  ;;  %v19987_v10 = vld [vmem:[%s27215_s7 + $0x4c0] ss:$16 sps:$4 sm:$0xff]  }
 0x696   :  { %14533 = vmatprep.subr.bf16.mxu0 %v19933_v35  ;;  %v19957_v35 = vld [vmem:[%s27215_s7 + $0x160] ss:$16 sps:$4 sm:$0xff]  }
 0x697   :  { %17727 = vmatpush3.bf16.msra.mxu1 %v19926_v21  ;;  %v19954_v21 = vld [vmem:[%s27215_s7 + $0x2a0] ss:$16 sps:$4 sm:$0xff]   ;;  %v11159_v49 = vadd.f32 %v24897_v50, %v11116_v54  ;;  %v19974_v50 = vld [vmem:[%s27215_s7 + $0x244] ss:$16 sps:$4 sm:$0xff]  }
 0x698   :  { %17728 = vmatprep.subr.bf16.mxu1 %v27246_v13  ;;  %v19984_v8 = vld [vmem:[%s27215_s7 + $0x200] ss:$16 sps:$4 sm:$0xff]  }
 0x699   :  { %14534 = vmatpush1.bf16.msra.mxu0 %v19931_v36  ;;  %v19963_v36 = vld [vmem:[%s27215_s7 + $0x140] ss:$16 sps:$4 sm:$0xff]   ;;  %v11202_v23 = vadd.f32 %v24934_v52, %v11159_v49  ;;  %v19983_v52 = vld [vmem:[%s27215_s7 + $0x4e4] ss:$16 sps:$4 sm:$0xff]  }
 0x69a   :  { %14535 = vmatprep.subr.bf16.mxu0 %v19937_v31  ;;  %v19990_v33 = vld [vmem:[%s27215_s7 + $0x3e0] ss:$16 sps:$4 sm:$0xff]  }
 0x69b   :  { %17729 = vmatpush3.bf16.msra.mxu1 %v19930_v27 }
 0x69c   :  { %17730 = vmatprep.subr.bf16.mxu1 %v27246_v13 }
 0x69d   :  { %14536 = vmatpush2.bf16.msra.mxu0 %v19935_v42 }
 0x69e   :  { %14537 = vmatprep.subr.bf16.mxu0 %v19941_v46  ;;  %v19975_v46 = vld [vmem:[%s27215_s7 + $0x100] ss:$16 sps:$4 sm:$0xff]  }
 0x69f   :  { %17731 = vmatpush3.bf16.msra.mxu1 %v19934_v19 }
 0x6a0   :  { %17732 = vmatprep.subr.bf16.mxu1 %v27246_v13  ;;  %v19942_v13 = vld [vmem:[%s27215_s7 + $0x2e0] ss:$16 sps:$4 sm:$0xff]  }
 0x6a1   :  { %14538 = vmatpush2.bf16.msra.mxu0 %v19939_v25  ;;  %v19989_v25 = vld [vmem:[%s27215_s7 + $0x4c4] ss:$16 sps:$4 sm:$0xff]  }
 0x6a2   :  { %14539 = vmatprep.subr.bf16.mxu0 %v19947_v0 }
 0x6a3   :  { %17733 = vmatpush3.bf16.msra.mxu1 %v19938_v24  ;;  %v25895_v24 = vpop.f32.mrf.mxu0 }
 0x6a4   :  { %14562 = vmatprep.subr.bf16.mxu1 %v19944_v44  ;;  %v19986_v44 = vld [vmem:[%s27215_s7 + $0x204] ss:$16 sps:$4 sm:$0xff]  }
 0x6a5   :  { %14540 = vmatpush2.bf16.msra.mxu0 %v19945_v11  ;;  %v11668_v11 = vpop.f32.mrf.mxu0 }
 0x6a6   :  { %17735 = vmatmul.mubr.bf16.vlgmr.msra.gmra.mxu1 %v23140_v41  ;;  %14541 = vmatprep.subr.bf16.mxu0 %v19953_v2  ;;  %v11026_v41 = vadd.f32 %v24417_v40, %v5765_v28  ;;  %v19962_v40 = vld [vmem:[%s27215_s7 + $0x284] ss:$16 sps:$4 sm:$0xff]   ;;  %v19993_v28 = vld [vmem:[%s27215_s7 + $0x4a0] ss:$16 sps:$4 sm:$0xff]  }
 0x6a7   :  { %14563 = vmatpush1.bf16.msra.mxu1 %v19942_v13  ;;  %14594 = vmatprep.mubr.bf16.mxu1 %v25810_v6  ;;  %v19995_v2 = vld [vmem:[%s27215_s7 + $0x4a4] ss:$16 sps:$4 sm:$0xff]  }
 0x6a8   :  { %14564 = vmatprep.subr.bf16.mxu1 %v19950_v15  ;;  %v11069_v9 = vadd.f32 %v24415_v14, %v11026_v41  ;;  %v19968_v14 = vld [vmem:[%s27215_s7 + $0x264] ss:$16 sps:$4 sm:$0xff]   ;;  %v5785_v15 = vrot.slane %v25343_v16, %v21236_v56 }
 0x6a9   :  { %14542 = vmatpush2.bf16.msra.mxu0 %v19951_v55  ;;  %v19992_v13 = vld [vmem:[%s27215_s7 + $0x3e4] ss:$16 sps:$4 sm:$0xff]   ;;  %v25919_v55 = vpop.f32.mrf.mxu0 }
 0x6aa   :  { %14543 = vmatprep.subr.bf16.mxu0 %v19959_v3  ;;  %v11112_v31 = vadd.f32 %v24626_v20, %v11069_v9  ;;  %v19977_v20 = vld [vmem:[%s27215_s7 + $0x104] ss:$16 sps:$4 sm:$0xff]   ;;  %v11669_v41 = vadd.f32 %v11668_v11, %v5785_v15  ;;  %v19996_v9 = vld [vmem:[%s27215_s7 + $0x3c0] ss:$16 sps:$4 sm:$0xff]   ;;  %v27250_v11 = vld [vmem:[#allocation10_spill] sm:$0xff] }
 0x6ab   :  { %14565 = vmatpush1.bf16.msra.mxu1 %v19948_v37  ;;  %v20001_v3 = vld [vmem:[%s27215_s7 + $0x484] ss:$16 sps:$4 sm:$0xff]   ;;  %v25927_v37 = vpop.f32.mrf.mxu1 }
 0x6ac   :  { %14566 = vmatprep.subr.bf16.mxu1 %v19956_v63  ;;  %v11155_v27 = vadd.f32 %v24624_v22, %v11112_v31  ;;  %v12072_v22 = vmax.f32 %v11202_v23, 0.0  ;;  %v19998_v63 = vld [vmem:[%s27215_s7 + $0x3c4] ss:$16 sps:$4 sm:$0xff]   ;;  %v20005_v31 = vld [vmem:[%s27215_s7 + $0x460] ss:$16 sps:$4 sm:$0xff]  }
 0x6ad   :  { %14544 = vmatpush2.bf16.msra.mxu0 %v19957_v35  ;;  %v19999_v35 = vld [vmem:[%s27215_s7 + $0x480] ss:$16 sps:$4 sm:$0xff]   ;;  %v20019_v23 = vld [vmem:[%s27215_s7 + $0x424] ss:$16 sps:$4 sm:$0xff]  }
 0x6ae   :  { %14545 = vmatprep.subr.bf16.mxu0 %v19965_v51  ;;  %v11198_v42 = vadd.f32 %v24736_v59, %v11155_v27  ;;  %v19980_v59 = vld [vmem:[%s27215_s7 + $0x224] ss:$16 sps:$4 sm:$0xff]   ;;  %v11672_v51 = vpop.f32.mrf.mxu0  ;;  %v20011_v27 = vld [vmem:[%s27215_s7 + $0x440] ss:$16 sps:$4 sm:$0xff]  }
 0x6af   :  { %14567 = vmatpush1.bf16.msra.mxu1 %v19954_v21  ;;  %v20007_v21 = vld [vmem:[%s27215_s7 + $0x464] ss:$16 sps:$4 sm:$0xff]  }
 0x6b0   :  { %14568 = vmatprep.subr.bf16.mxu1 %v19962_v40  ;;  %v12059_v19 = vmax.f32 %v11198_v42, 0.0  ;;  %v27247_v42 = vsub.s32 7, %v21225_v53  ;;  %v20022_v53 = vld [vmem:[%s27215_s7 + $0x344] ss:$16 sps:$4 sm:$0xff]  }
 0x6b1   :  { %14546 = vmatpush2.bf16.msra.mxu0 %v19963_v36  ;;  %v20004_v36 = vld [vmem:[%s27215_s7 + $0x3a4] ss:$16 sps:$4 sm:$0xff]  }
 0x6b2   :  { %14547 = vmatprep.subr.bf16.mxu0 %v19971_v47  ;;  %v25890_v0 = vpack.c.bf16 %v12072_v22, %v12059_v19  ;;  %v11673_v47 = vadd.f32 %v11672_v51, %v5785_v15  ;;  %v20025_v22 = vld [vmem:[%s27215_s7 + $0x404] ss:$16 sps:$4 sm:$0xff]   ;;  %v20029_v15 = vld [vmem:[%s27215_s7 + $0x5e0] ss:$16 sps:$4 sm:$0xff]  }
 0x6b3   :  { %14569 = vmatpush1.bf16.msra.mxu1 %v19960_v60  ;;  %v20034_v51 = vld [vmem:[%s27215_s7 + $0x304] ss:$16 sps:$4 sm:$0xff]  }
 0x6b4   :  { %14570 = vmatprep.subr.bf16.mxu1 %v19968_v14  ;;  %v20013_v14 = vld [vmem:[%s27215_s7 + $0x444] ss:$16 sps:$4 sm:$0xff]  }
 0x6b5   :  { %14548 = vmatpush2.bf16.msra.mxu0 %v19969_v39  ;;  %v20002_v39 = vld [vmem:[%s27215_s7 + $0x3a0] ss:$16 sps:$4 sm:$0xff]  }
 0x6b6   :  { %14549 = vmatprep.subr.bf16.mxu0 %v19977_v20  ;;  %v20010_v20 = vld [vmem:[%s27215_s7 + $0x384] ss:$16 sps:$4 sm:$0xff]  }
 0x6b7   :  { %14571 = vmatpush1.bf16.msra.mxu1 %v19966_v5  ;;  %v20008_v5 = vld [vmem:[%s27215_s7 + $0x380] ss:$16 sps:$4 sm:$0xff]  }
 0x6b8   :  { %14572 = vmatprep.subr.bf16.mxu1 %v19974_v50  ;;  %v20016_v50 = vld [vmem:[%s27215_s7 + $0x364] ss:$16 sps:$4 sm:$0xff]  }
 0x6b9   :  { %14550 = vmatpush2.bf16.msra.mxu0 %v19975_v46  ;;  %v5773_v46 = vrot.slane %v25739_v62, %v27247_v42 }
 0x6ba   :  { %14605 = vmatprep.subr.bf16.mxu0 %v19983_v52  ;;  %v20017_v52 = vld [vmem:[%s27215_s7 + $0x420] ss:$16 sps:$4 sm:$0xff]  }
 0x6bb   :  { %14573 = vmatpush1.bf16.msra.mxu1 %v19972_v29  ;;  %v11245_v29 = vadd.f32 %v25006_v18, %v5773_v46  ;;  %v11241_v62 = vadd.f32 %v24926_v45, %v5773_v46  ;;  %v20031_v18 = vld [vmem:[%s27215_s7 + $0x5e4] ss:$16 sps:$4 sm:$0xff]   ;;  %v20020_v45 = vld [vmem:[%s27215_s7 + $0x340] ss:$16 sps:$4 sm:$0xff]  }
 0x6bc   :  { %14574 = vmatprep.subr.bf16.mxu1 %v19980_v59  ;;  %14552 = vmatmul.mubr.bf16.vlgmr.msra.gmra.mxu0 %v23805_v26  ;;  %v20014_v59 = vld [vmem:[%s27215_s7 + $0x360] ss:$16 sps:$4 sm:$0xff]  }
 0x6bd   :  { %14606 = vmatpush1.bf16.msra.mxu0 %v19981_v30  ;;  %14637 = vmatprep.mubr.bf16.mxu0 %v25890_v0  ;;  %v11288_v19 = vadd.f32 %v25146_v34, %v11245_v29  ;;  %v20023_v30 = vld [vmem:[%s27215_s7 + $0x400] ss:$16 sps:$4 sm:$0xff]   ;;  %v20028_v34 = vld [vmem:[%s27215_s7 + $0x324] ss:$16 sps:$4 sm:$0xff]  }
 0x6be   :  { %14607 = vmatprep.subr.bf16.mxu0 %v19989_v25  ;;  %v27248_v25 = vld [vmem:[#allocation9_spill] sm:$0xff] }
 0x6bf   :  { %14575 = vmatpush1.bf16.msra.mxu1 %v19978_v38  ;;  %v11284_v38 = vadd.f32 %v27248_v25, %v11241_v62  ;;  %v20038_v46 = vld [vmem:[%s27215_s7 + $0x6e0] ss:$16 sps:$4 sm:$0xff]  }
 0x6c0   :  { %14576 = vmatprep.subr.bf16.mxu1 %v19986_v44  ;;  %v27249_v44 = vld [vmem:[#allocation11_spill] sm:$0xff] }
 0x6c1   :  { %14608 = vmatpush1.bf16.msra.mxu0 %v19987_v10  ;;  %v11331_v10 = vadd.f32 %v27249_v44, %v11288_v19  ;;  %v20047_v29 = vld [vmem:[%s27215_s7 + $0x580] ss:$16 sps:$4 sm:$0xff]   ;;  %v20052_v19 = vld [vmem:[%s27215_s7 + $0x6a4] ss:$16 sps:$4 sm:$0xff]  }
 0x6c2   :  { %14609 = vmatprep.subr.bf16.mxu0 %v19995_v2  ;;  %v11327_v2 = vadd.f32 %v27250_v11, %v11284_v38  ;;  %v20053_v25 = vld [vmem:[%s27215_s7 + $0x560] ss:$16 sps:$4 sm:$0xff]  }
 0x6c3   :  { %14577 = vmatpush1.bf16.msra.mxu1 %v19984_v8  ;;  %v27251_v8 = vld [vmem:[#allocation16_spill] sm:$0xff]  ;;  %v20050_v44 = vld [vmem:[%s27215_s7 + $0x6a0] ss:$16 sps:$4 sm:$0xff]  }
 0x6c4   :  { %14578 = vmatprep.subr.bf16.mxu1 %v19992_v13  ;;  %v11374_v13 = vadd.f32 %v27251_v8, %v11331_v10  ;;  %v20058_v10 = vld [vmem:[%s27215_s7 + $0x684] ss:$16 sps:$4 sm:$0xff]  }
 0x6c5   :  { %14610 = vmatpush1.bf16.msra.mxu0 %v19993_v28  ;;  %v26007_v28 = vpop.f32.mrf.mxu0 }
 0x6c6   :  { %v11711_v43 = vpop.f32.mrf.mxu1  ;;  %14611 = vmatprep.subr.bf16.mxu0 %v20001_v3  ;;  %v20037_v3 = vld [vmem:[%s27215_s7 + $0x5c4] ss:$16 sps:$4 sm:$0xff]  }
 0x6c7   :  { %v11712_v40 = vadd.f32 %v11711_v43, %v11669_v41  ;;  %14579 = vmatpush2.bf16.msra.mxu1 %v19990_v33  ;;  %v27252_v33 = vld [vmem:[#allocation13_spill] sm:$0xff]  ;;  %v27253_v43 = vld [vmem:[#allocation15_spill] sm:$0xff] }
 0x6c8   :  { %v25941_v54 = vpop.f32.mrf.mxu1  ;;  %14580 = vmatprep.subr.bf16.mxu1 %v19998_v63  ;;  %v11370_v63 = vadd.f32 %v27252_v33, %v11327_v2  ;;  %v20026_v41 = vld [vmem:[%s27215_s7 + $0x320] ss:$16 sps:$4 sm:$0xff]  }
 0x6c9   :  { %14612 = vmatpush1.bf16.msra.mxu0 %v19999_v35  ;;  %v20059_v2 = vld [vmem:[%s27215_s7 + $0x540] ss:$16 sps:$4 sm:$0xff]  }
 0x6ca   :  { %v11715_v60 = vpop.f32.mrf.mxu1  ;;  %14613 = vmatprep.subr.bf16.mxu0 %v20007_v21  ;;  %v11417_v21 = vadd.f32 %v27253_v43, %v11374_v13  ;;  %v20056_v13 = vld [vmem:[%s27215_s7 + $0x680] ss:$16 sps:$4 sm:$0xff]  }
 0x6cb   :  { %v11716_v49 = vadd.f32 %v11715_v60, %v11673_v47  ;;  %14581 = vmatpush2.bf16.msra.mxu1 %v19996_v9  ;;  %v27254_v60 = vld [vmem:[#allocation12_spill] sm:$0xff]  ;;  %v20068_v43 = vld [vmem:[%s27215_s7 + $0x640] ss:$16 sps:$4 sm:$0xff]  }
 0x6cc   :  { %14582 = vmatprep.subr.bf16.mxu1 %v20004_v36  ;;  %v20035_v36 = vld [vmem:[%s27215_s7 + $0x5c0] ss:$16 sps:$4 sm:$0xff]  }
 0x6cd   :  { %14614 = vmatpush1.bf16.msra.mxu0 %v20005_v31  ;;  %v20043_v31 = vld [vmem:[%s27215_s7 + $0x5a4] ss:$16 sps:$4 sm:$0xff]  }
 0x6ce   :  { %14615 = vmatprep.subr.bf16.mxu0 %v20013_v14  ;;  %v11413_v14 = vadd.f32 %v27254_v60, %v11370_v63 }
 0x6cf   :  { %14583 = vmatpush2.bf16.msra.mxu1 %v20002_v39 }
 0x6d0   :  { %14584 = vmatprep.subr.bf16.mxu1 %v20010_v20  ;;  %v20040_v20 = vld [vmem:[%s27215_s7 + $0x6e4] ss:$16 sps:$4 sm:$0xff]   ;;  %v12061_v42 = vmax.f32 %v11413_v14, 0.0  ;;  %v20074_v14 = vld [vmem:[%s27215_s7 + $0x620] ss:$16 sps:$4 sm:$0xff]  }
 0x6d1   :  { %14616 = vmatpush1.bf16.msra.mxu0 %v20011_v27  ;;  %v12074_v27 = vmax.f32 %v11417_v21, 0.0 }
 0x6d2   :  { %14617 = vmatprep.subr.bf16.mxu0 %v20019_v23 }
 0x6d3   :  { %14585 = vmatpush2.bf16.msra.mxu1 %v20008_v5  ;;  %v20041_v5 = vld [vmem:[%s27215_s7 + $0x5a0] ss:$16 sps:$4 sm:$0xff]  }
 0x6d4   :  { %14586 = vmatprep.subr.bf16.mxu1 %v20016_v50  ;;  %v20049_v50 = vld [vmem:[%s27215_s7 + $0x584] ss:$16 sps:$4 sm:$0xff]  }
 0x6d5   :  { %14618 = vmatpush1.bf16.msra.mxu0 %v20017_v52  ;;  %v5781_v52 = vrot.slane %v25343_v16, %v21239_v57  ;;  %v20044_v16 = vld [vmem:[%s27215_s7 + $0x6c0] ss:$16 sps:$4 sm:$0xff]  }
 0x6d6   :  { %14619 = vmatprep.subr.bf16.mxu0 %v20025_v22  ;;  %v26053_v22 = vpack.c.bf16 %v12074_v27, %v12061_v42  ;;  %v20091_v27 = vld [vmem:[%s27215_s7 + $0x8a4] ss:$16 sps:$4 sm:$0xff]   ;;  %v20089_v42 = vld [vmem:[%s27215_s7 + $0x8a0] ss:$16 sps:$4 sm:$0xff]  }
 0x6d7   :  { %14587 = vmatpush2.bf16.msra.mxu1 %v20014_v59  ;;  %v27255_v59 = vld [vmem:[#allocation7_spill] sm:$0xff]  ;;  %v11460_v62 = vadd.f32 %v25571_v48, %v5781_v52 }
 0x6d8   :  { %14588 = vmatprep.subr.bf16.mxu1 %v20022_v53  ;;  %v20055_v53 = vld [vmem:[%s27215_s7 + $0x564] ss:$16 sps:$4 sm:$0xff]  }
 0x6d9   :  { %14620 = vmatpush1.bf16.msra.mxu0 %v20023_v30  ;;  %v27256_v30 = vld [vmem:[#allocation18_spill] sm:$0xff]  ;;  %v20061_v48 = vld [vmem:[%s27215_s7 + $0x544] ss:$16 sps:$4 sm:$0xff]   ;;  %v11503_v38 = vadd.f32 %v25563_v1, %v11460_v62 }
 0x6da   :  { %14621 = vmatprep.subr.bf16.mxu0 %v20031_v18  ;;  %v11456_v18 = vadd.f32 %v27256_v30, %v5781_v52  ;;  %v20067_v1 = vld [vmem:[%s27215_s7 + $0x524] ss:$16 sps:$4 sm:$0xff]   ;;  %v20086_v52 = vld [vmem:[%s27215_s7 + $0x7e0] ss:$16 sps:$4 sm:$0xff]  }
 0x6db   :  { %14589 = vmatpush2.bf16.msra.mxu1 %v20020_v45  ;;  %v27257_v45 = vld [vmem:[#allocation17_spill] sm:$0xff]  ;;  %v11546_v11 = vadd.f32 %v25694_v32, %v11503_v38 }
 0x6dc   :  { %14590 = vmatprep.subr.bf16.mxu1 %v20028_v34  ;;  %v11754_v35 = vpop.f32.mrf.mxu0  ;;  %v11499_v34 = vadd.f32 %v27257_v45, %v11456_v18  ;;  %v20064_v32 = vld [vmem:[%s27215_s7 + $0x664] ss:$16 sps:$4 sm:$0xff]   ;;  %v20101_v45 = vld [vmem:[%s27215_s7 + $0x860] ss:$16 sps:$4 sm:$0xff]  }
 0x6dd   :  { %v26020_v9 = vadd.f32 %v11754_v35, %v11712_v40  ;;  %14622 = vmatpush2.bf16.msra.mxu0 %v20029_v15  ;;  %v20032_v40 = vld [vmem:[%s27215_s7 + $0x300] ss:$16 sps:$4 sm:$0xff]   ;;  %v11589_v15 = vadd.f32 %v25895_v24, %v11546_v11  ;;  %v20070_v24 = vld [vmem:[%s27215_s7 + $0x644] ss:$16 sps:$4 sm:$0xff]  }
 0x6de   :  { %v26025_v47 = vpop.f32.mrf.mxu0  ;;  %14623 = vmatprep.subr.bf16.mxu0 %v20037_v3  ;;  %v11542_v8 = vadd.f32 %v25592_v4, %v11499_v34  ;;  %v20065_v3 = vld [vmem:[%s27215_s7 + $0x520] ss:$16 sps:$4 sm:$0xff]   ;;  %v20073_v4 = vld [vmem:[%s27215_s7 + $0x504] ss:$16 sps:$4 sm:$0xff]  }
 0x6df   :  { %14591 = vmatpush2.bf16.msra.mxu1 %v20026_v41  ;;  %v11632_v63 = vadd.f32 %v25927_v37, %v11589_v15  ;;  %v20062_v41 = vld [vmem:[%s27215_s7 + $0x660] ss:$16 sps:$4 sm:$0xff]   ;;  %v20094_v62 = vld [vmem:[%s27215_s7 + $0x7c4] ss:$16 sps:$4 sm:$0xff]  }
 0x6e0   :  { %14592 = vmatprep.subr.bf16.mxu1 %v20034_v51  ;;  %v11758_v39 = vpop.f32.mrf.mxu0  ;;  %v11585_v33 = vadd.f32 %v25590_v61, %v11542_v8  ;;  %v20071_v51 = vld [vmem:[%s27215_s7 + $0x500] ss:$16 sps:$4 sm:$0xff]   ;;  %v20079_v61 = vld [vmem:[%s27215_s7 + $0x8e4] ss:$16 sps:$4 sm:$0xff]  }
 0x6e1   :  { %v26037_v23 = vadd.f32 %v11758_v39, %v11716_v49  ;;  %14624 = vmatpush2.bf16.msra.mxu0 %v20035_v36  ;;  %v20046_v49 = vld [vmem:[%s27215_s7 + $0x6c4] ss:$16 sps:$4 sm:$0xff]   ;;  %v12076_v37 = vmax.f32 %v11632_v63, 0.0  ;;  %v20077_v36 = vld [vmem:[%s27215_s7 + $0x8e0] ss:$16 sps:$4 sm:$0xff]  }
 0x6e2   :  { %14625 = vmatprep.subr.bf16.mxu0 %v20043_v31  ;;  %v11628_v35 = vadd.f32 %v25710_v12, %v11585_v33  ;;  %v20076_v12 = vld [vmem:[%s27215_s7 + $0x624] ss:$16 sps:$4 sm:$0xff]   ;;  %v26212_v63 = vld [vmem:[%s27214_s6 + $0x8] sm:$0x1f] }
 0x6e3   :  { %14593 = vmatpush2.bf16.msra.mxu1 %v20032_v40  ;;  %v20085_v31 = vld [vmem:[%s27215_s7 + $0x8c4] ss:$16 sps:$4 sm:$0xff]   ;;  %v27258_v40 = vld [vmem:[#allocation8_spill] sm:$0xff] }
 0x6e4   :  { %14648 = vmatprep.subr.bf16.mxu1 %v20040_v20  ;;  %v12063_v21 = vmax.f32 %v11628_v35, 0.0  ;;  %v20082_v39 = vld [vmem:[%s27215_s7 + $0x604] ss:$16 sps:$4 sm:$0xff]   ;;  %v20083_v20 = vld [vmem:[%s27215_s7 + $0x8c0] ss:$16 sps:$4 sm:$0xff]  }
 0x6e5   :  { %14626 = vmatpush2.bf16.msra.mxu0 %v20041_v5  ;;  %v20080_v5 = vld [vmem:[%s27215_s7 + $0x600] ss:$16 sps:$4 sm:$0xff]   ;;  %v20103_v30 = vld [vmem:[%s27215_s7 + $0x864] ss:$16 sps:$4 sm:$0xff]  }
 0x6e6   :  { %14595 = vmatmul.mubr.bf16.vlgmr.msra.gmra.mxu1 %v27255_v59  ;;  %14627 = vmatprep.subr.bf16.mxu0 %v20049_v50  ;;  %v26133_v60 = vpack.c.bf16 %v12076_v37, %v12063_v21  ;;  %v20088_v50 = vld [vmem:[%s27215_s7 + $0x7e4] ss:$16 sps:$4 sm:$0xff]   ;;  %v20113_v35 = vld [vmem:[%s27215_s7 + $0x820] ss:$16 sps:$4 sm:$0xff]  }
 0x6e7   :  { %14649 = vmatpush1.bf16.msra.mxu1 %v20038_v46  ;;  %14680 = vmatprep.mubr.bf16.mxu1 %v26053_v22  ;;  %v26158_v46 = vpop.f32.mrf.mxu0  ;;  %v20109_v34 = vld [vmem:[%s27215_s7 + $0x844] ss:$16 sps:$4 sm:$0xff]   ;;  %v20110_v37 = vld [vmem:[%s27215_s7 + $0x760] ss:$16 sps:$4 sm:$0xff]  }
 0x6e8   :  { %14650 = vmatprep.subr.bf16.mxu1 %v20046_v49  ;;  %v20097_v49 = vld [vmem:[%s27215_s7 + $0x884] ss:$16 sps:$4 sm:$0xff]  }
 0x6e9   :  { %14628 = vmatpush2.bf16.msra.mxu0 %v20047_v29  ;;  %v11717_v29 = vpop.f32.mrf.mxu1  ;;  %v20106_v8 = vld [vmem:[%s27215_s7 + $0x784] ss:$16 sps:$4 sm:$0xff]  }
 0x6ea   :  { %14629 = vmatprep.subr.bf16.mxu0 %v20055_v53  ;;  %v20112_v33 = vld [vmem:[%s27215_s7 + $0x764] ss:$16 sps:$4 sm:$0xff]  }
 0x6eb   :  { %14651 = vmatpush1.bf16.msra.mxu1 %v20044_v16  ;;  %v20095_v16 = vld [vmem:[%s27215_s7 + $0x880] ss:$16 sps:$4 sm:$0xff]  }
 0x6ec   :  { %14652 = vmatprep.subr.bf16.mxu1 %v20052_v19 }
 0x6ed   :  { %14630 = vmatpush2.bf16.msra.mxu0 %v20053_v25  ;;  %v20092_v25 = vld [vmem:[%s27215_s7 + $0x7c0] ss:$16 sps:$4 sm:$0xff]  }
 0x6ee   :  { %14631 = vmatprep.subr.bf16.mxu0 %v20061_v48 }
 0x6ef   :  { %14653 = vmatpush1.bf16.msra.mxu1 %v20050_v44  ;;  %v20100_v44 = vld [vmem:[%s27215_s7 + $0x7a4] ss:$16 sps:$4 sm:$0xff]  }
 0x6f0   :  { %14654 = vmatprep.subr.bf16.mxu1 %v20058_v10 }
 0x6f1   :  { %14632 = vmatpush2.bf16.msra.mxu0 %v20059_v2  ;;  %v20098_v2 = vld [vmem:[%s27215_s7 + $0x7a0] ss:$16 sps:$4 sm:$0xff]  }
 0x6f2   :  { %14633 = vmatprep.subr.bf16.mxu0 %v20067_v1 }
 0x6f3   :  { %14655 = vmatpush1.bf16.msra.mxu1 %v20056_v13 }
 0x6f4   :  { %14656 = vmatprep.subr.bf16.mxu1 %v20064_v32  ;;  %v20107_v32 = vld [vmem:[%s27215_s7 + $0x840] ss:$16 sps:$4 sm:$0xff]  }
 0x6f5   :  { %14634 = vmatpush2.bf16.msra.mxu0 %v20065_v3 }
 0x6f6   :  { %14635 = vmatprep.subr.bf16.mxu0 %v20073_v4  ;;  %v20104_v4 = vld [vmem:[%s27215_s7 + $0x780] ss:$16 sps:$4 sm:$0xff]  }
 0x6f7   :  { %14657 = vmatpush1.bf16.msra.mxu1 %v20062_v41  ;;  %v5789_v41 = vrot.slane %v26212_v63, %v21242_v58 }
 0x6f8   :  { %14658 = vmatprep.subr.bf16.mxu1 %v20070_v24 }
 0x6f9   :  { %14636 = vmatpush2.bf16.msra.mxu0 %v20071_v51  ;;  %v20121_v51 = vld [vmem:[%s27215_s7 + $0x804] ss:$16 sps:$4 sm:$0xff]  }
 0x6fa   :  { %14691 = vmatprep.subr.bf16.mxu0 %v20079_v61  ;;  %v11675_v61 = vadd.f32 %v26007_v28, %v5789_v41  ;;  %v20127_v28 = vld [vmem:[%s27215_s7 + $0x9e4] ss:$16 sps:$4 sm:$0xff]  }
 0x6fb   :  { %14659 = vmatpush1.bf16.msra.mxu1 %v20068_v43  ;;  %v20118_v43 = vld [vmem:[%s27215_s7 + $0x744] ss:$16 sps:$4 sm:$0xff]  }
 0x6fc   :  { %14660 = vmatprep.subr.bf16.mxu1 %v20076_v12  ;;  %14638 = vmatmul.mubr.bf16.vlgmr.msra.gmra.mxu0 %v27258_v40  ;;  %v11840_v53 = vpop.f32.mrf.mxu0  ;;  %v11671_v12 = vadd.f32 %v25919_v55, %v5789_v41  ;;  %v11718_v21 = vadd.f32 %v11717_v29, %v11675_v61  ;;  %v20116_v55 = vld [vmem:[%s27215_s7 + $0x740] ss:$16 sps:$4 sm:$0xff]   ;;  %v20169_v41 = vld [vmem:[%s27215_s7 + $0x904] ss:$16 sps:$4 sm:$0xff]  }
 0x6fd   :  { %14692 = vmatpush1.bf16.msra.mxu0 %v20077_v36  ;;  %14723 = vmatprep.mubr.bf16.mxu0 %v26133_v60  ;;  %v20119_v36 = vld [vmem:[%s27215_s7 + $0x800] ss:$16 sps:$4 sm:$0xff]  }
 0x6fe   :  { %14693 = vmatprep.subr.bf16.mxu0 %v20085_v31  ;;  %v26179_v48 = vpop.f32.mrf.mxu0  ;;  %v20131_v29 = vld [vmem:[%s27215_s7 + $0x9c0] ss:$16 sps:$4 sm:$0xff]  }
 0x6ff   :  { %14661 = vmatpush1.bf16.msra.mxu1 %v20074_v14  ;;  %v11714_v14 = vadd.f32 %v25941_v54, %v11671_v12  ;;  %v20125_v54 = vld [vmem:[%s27215_s7 + $0x9e0] ss:$16 sps:$4 sm:$0xff]   ;;  %v20172_v12 = vld [vmem:[%s27215_s7 + $0xa24] ss:$16 sps:$4 sm:$0xff]  }
 0x700   :  { %14662 = vmatprep.subr.bf16.mxu1 %v20082_v39  ;;  %v11844_v1 = vpop.f32.mrf.mxu0  ;;  %v11761_v39 = vadd.f32 %v26158_v46, %v11718_v21  ;;  %v20122_v46 = vld [vmem:[%s27215_s7 + $0x720] ss:$16 sps:$4 sm:$0xff]  }
 0x701   :  { %14694 = vmatpush1.bf16.msra.mxu0 %v20083_v20  ;;  %v20124_v20 = vld [vmem:[%s27215_s7 + $0x724] ss:$16 sps:$4 sm:$0xff]   ;;  %v20167_v61 = vld [vmem:[%s27215_s7 + $0x900] ss:$16 sps:$4 sm:$0xff]  }
 0x702   :  { %14695 = vmatprep.subr.bf16.mxu0 %v20091_v27  ;;  %v11757_v27 = vadd.f32 %v26025_v47, %v11714_v14  ;;  %v20130_v47 = vld [vmem:[%s27215_s7 + $0x704] ss:$16 sps:$4 sm:$0xff]   ;;  %v20197_v21 = vld [vmem:[%s27215_s7 + $0xc60] ss:$16 sps:$4 sm:$0xff]  }
 0x703   :  { %14663 = vmatpush1.bf16.msra.mxu1 %v20080_v5  ;;  %v20203_v14 = vld [vmem:[%s27215_s7 + $0xc40] ss:$16 sps:$4 sm:$0xff]  }
 0x704   :  { %14664 = vmatprep.subr.bf16.mxu1 %v20088_v50  ;;  %v20133_v50 = vld [vmem:[%s27215_s7 + $0x9c4] ss:$16 sps:$4 sm:$0xff]  }
 0x705   :  { %14696 = vmatpush1.bf16.msra.mxu0 %v20089_v42 }
 0x706   :  { %v11797_v19 = vpop.f32.mrf.mxu1  ;;  %14697 = vmatprep.subr.bf16.mxu0 %v20097_v49  ;;  %v11846_v49 = vpop.f32.mrf.mxu0 }
 0x707   :  { %v11798_v18 = vadd.f32 %v11797_v19, %v26020_v9  ;;  %14665 = vmatpush2.bf16.msra.mxu1 %v20086_v52  ;;  %v20136_v19 = vld [vmem:[%s27215_s7 + $0xae4] ss:$16 sps:$4 sm:$0xff]  }
 0x708   :  { %v11799_v38 = vpop.f32.mrf.mxu1  ;;  %14666 = vmatprep.subr.bf16.mxu1 %v20094_v62 }
 0x709   :  { %v11841_v10 = vadd.f32 %v11840_v53, %v11798_v18  ;;  %14698 = vmatpush1.bf16.msra.mxu0 %v20095_v16  ;;  %v11800_v42 = vadd.f32 %v11799_v38, %v11757_v27  ;;  %v20139_v53 = vld [vmem:[%s27215_s7 + $0x9a4] ss:$16 sps:$4 sm:$0xff]   ;;  %v20128_v16 = vld [vmem:[%s27215_s7 + $0x700] ss:$16 sps:$4 sm:$0xff]  }
 0x70a   :  { %v11801_v9 = vpop.f32.mrf.mxu1  ;;  %14699 = vmatprep.subr.bf16.mxu0 %v20103_v30  ;;  %v20137_v18 = vld [vmem:[%s27215_s7 + $0x9a0] ss:$16 sps:$4 sm:$0xff]   ;;  %v20178_v27 = vld [vmem:[%s27215_s7 + $0xbe4] ss:$16 sps:$4 sm:$0xff]  }
 0x70b   :  { %v11802_v11 = vadd.f32 %v11801_v9, %v26037_v23  ;;  %14667 = vmatpush2.bf16.msra.mxu1 %v20092_v25  ;;  %v20115_v23 = vld [vmem:[%s27215_s7 + $0x824] ss:$16 sps:$4 sm:$0xff]   ;;  %v12064_v15 = vmax.f32 %v11841_v10, 0.0  ;;  %v11843_v62 = vadd.f32 %v26179_v48, %v11800_v42  ;;  %v20134_v38 = vld [vmem:[%s27215_s7 + $0xae0] ss:$16 sps:$4 sm:$0xff]   ;;  %v27259_v9 = vld [vmem:[#allocation14_spill] sm:$0xff] }
 0x70c   :  { %14668 = vmatprep.subr.bf16.mxu1 %v20100_v44  ;;  %v11803_v31 = vpop.f32.mrf.mxu1  ;;  %v20145_v25 = vld [vmem:[%s27215_s7 + $0x984] ss:$16 sps:$4 sm:$0xff]  }
 0x70d   :  { %v11845_v13 = vadd.f32 %v11844_v1, %v11802_v11  ;;  %14700 = vmatpush1.bf16.msra.mxu0 %v20101_v45  ;;  %v11804_v5 = vadd.f32 %v11803_v31, %v11761_v39  ;;  %v12065_v48 = vmax.f32 %v11843_v62, 0.0  ;;  %v20142_v44 = vld [vmem:[%s27215_s7 + $0xac4] ss:$16 sps:$4 sm:$0xff]   ;;  %v20143_v45 = vld [vmem:[%s27215_s7 + $0x980] ss:$16 sps:$4 sm:$0xff]   ;;  %v27260_v39 = vmov 0  }
 0x70e   :  { %14701 = vmatprep.subr.bf16.mxu0 %v20109_v34  ;;  %v20151_v34 = vld [vmem:[%s27215_s7 + $0x964] ss:$16 sps:$4 sm:$0xff]   ;;  %v20140_v11 = vld [vmem:[%s27215_s7 + $0xac0] ss:$16 sps:$4 sm:$0xff]  }
 0x70f   :  { %v12077_v3 = vmax.f32 %v11845_v13, 0.0  ;;  %14669 = vmatpush2.bf16.msra.mxu1 %v20098_v2  ;;  %v11847_v52 = vadd.f32 %v11846_v49, %v11804_v5  ;;  %v20148_v2 = vld [vmem:[%s27215_s7 + $0xaa4] ss:$16 sps:$4 sm:$0xff]   ;;  %v20149_v1 = vld [vmem:[%s27215_s7 + $0x960] ss:$16 sps:$4 sm:$0xff]  }
 0x710   :  { %14670 = vmatprep.subr.bf16.mxu1 %v20106_v8  ;;  %v20157_v8 = vld [vmem:[%s27215_s7 + $0x944] ss:$16 sps:$4 sm:$0xff]   ;;  %v20146_v13 = vld [vmem:[%s27215_s7 + $0xaa0] ss:$16 sps:$4 sm:$0xff]  }
 0x711   :  { %v26216_v24 = vpack.c.bf16 %v12077_v3, %v12064_v15  ;;  %14702 = vmatpush1.bf16.msra.mxu0 %v20107_v32  ;;  %v12078_v30 = vmax.f32 %v11847_v52, 0.0  ;;  %v20154_v32 = vld [vmem:[%s27215_s7 + $0xa84] ss:$16 sps:$4 sm:$0xff]   ;;  %v20152_v3 = vld [vmem:[%s27215_s7 + $0xa80] ss:$16 sps:$4 sm:$0xff]  }
 0x712   :  { %14703 = vmatprep.subr.bf16.mxu0 %v20115_v23  ;;  %v20155_v23 = vld [vmem:[%s27215_s7 + $0x940] ss:$16 sps:$4 sm:$0xff]   ;;  %v20163_v15 = vld [vmem:[%s27215_s7 + $0x924] ss:$16 sps:$4 sm:$0xff]  }
 0x713   :  { %14671 = vmatpush2.bf16.msra.mxu1 %v20104_v4  ;;  %v26284_v10 = vpack.c.bf16 %v12078_v30, %v12065_v48  ;;  %v20160_v4 = vld [vmem:[%s27215_s7 + $0xa64] ss:$16 sps:$4 sm:$0xff]   ;;  %v20170_v31 = vld [vmem:[%s27215_s7 + $0xa20] ss:$16 sps:$4 sm:$0xff]  }
 0x714   :  { %14672 = vmatprep.subr.bf16.mxu1 %v20112_v33  ;;  %v20161_v33 = vld [vmem:[%s27215_s7 + $0x920] ss:$16 sps:$4 sm:$0xff]   ;;  %v20187_v30 = vld [vmem:[%s27215_s7 + $0xb84] ss:$16 sps:$4 sm:$0xff]  }
 0x715   :  { %14704 = vmatpush1.bf16.msra.mxu0 %v20113_v35  ;;  %v20158_v35 = vld [vmem:[%s27215_s7 + $0xa60] ss:$16 sps:$4 sm:$0xff]  }
 0x716   :  { %14705 = vmatprep.subr.bf16.mxu0 %v20121_v51  ;;  %v20166_v51 = vld [vmem:[%s27215_s7 + $0xa44] ss:$16 sps:$4 sm:$0xff]   ;;  %v20209_v5 = vld [vmem:[%s27215_s7 + $0xc20] ss:$16 sps:$4 sm:$0xff]  }
 0x717   :  { %14673 = vmatpush2.bf16.msra.mxu1 %v20110_v37  ;;  %v20199_v37 = vld [vmem:[%s27215_s7 + $0xc64] ss:$16 sps:$4 sm:$0xff]   ;;  %v20215_v49 = vld [vmem:[%s27215_s7 + $0xc00] ss:$16 sps:$4 sm:$0xff]  }
 0x718   :  { %14674 = vmatprep.subr.bf16.mxu1 %v20118_v43  ;;  %v20164_v43 = vld [vmem:[%s27215_s7 + $0xa40] ss:$16 sps:$4 sm:$0xff]  }
 0x719   :  { %14706 = vmatpush1.bf16.msra.mxu0 %v20119_v36  ;;  %v20205_v36 = vld [vmem:[%s27215_s7 + $0xc44] ss:$16 sps:$4 sm:$0xff]   ;;  %v20179_v52 = vld [vmem:[%s27215_s7 + $0xbc0] ss:$16 sps:$4 sm:$0xff]  }
 0x71a   :  { %14707 = vmatprep.subr.bf16.mxu0 %v20127_v28  ;;  %v20175_v28 = vld [vmem:[%s27215_s7 + $0xa04] ss:$16 sps:$4 sm:$0xff]  }
 0x71b   :  { %14675 = vmatpush2.bf16.msra.mxu1 %v20116_v55  ;;  %v20211_v55 = vld [vmem:[%s27215_s7 + $0xc24] ss:$16 sps:$4 sm:$0xff]  }
 0x71c   :  { %14676 = vmatprep.subr.bf16.mxu1 %v20124_v20  ;;  %v20173_v20 = vld [vmem:[%s27215_s7 + $0xa00] ss:$16 sps:$4 sm:$0xff]   ;;  %v17609_v62 = vpop.f32.mrf.mxu0 }
 0x71d   :  { %14708 = vmatpush2.bf16.msra.mxu0 %v20125_v54  ;;  %v20217_v54 = vld [vmem:[%s27215_s7 + $0xc04] ss:$16 sps:$4 sm:$0xff]  }
 0x71e   :  { %14709 = vmatprep.subr.bf16.mxu0 %v20133_v50  ;;  %v20176_v50 = vld [vmem:[%s27215_s7 + $0xbe0] ss:$16 sps:$4 sm:$0xff]  }
 0x71f   :  { %14677 = vmatpush2.bf16.msra.mxu1 %v20122_v46  ;;  %v20181_v46 = vld [vmem:[%s27215_s7 + $0xbc4] ss:$16 sps:$4 sm:$0xff]  }
 0x720   :  { %14678 = vmatprep.subr.bf16.mxu1 %v20130_v47  ;;  %v20223_v47 = vld [vmem:[%s27215_s7 + $0xec] ss:$16 sps:$4 sm:$0xff]  }
 0x721   :  { %14710 = vmatpush2.bf16.msra.mxu0 %v20131_v29 }
 0x722   :  { %14711 = vmatprep.subr.bf16.mxu0 %v20139_v53  ;;  %v20184_v53 = vld [vmem:[%s27215_s7 + $0xba4] ss:$16 sps:$4 sm:$0xff]  }
 0x723   :  { %14679 = vmatpush2.bf16.msra.mxu1 %v20128_v16  ;;  %v20182_v16 = vld [vmem:[%s27215_s7 + $0xba0] ss:$16 sps:$4 sm:$0xff]  }
 0x724   :  { %14734 = vmatprep.subr.bf16.mxu1 %v20136_v19 }
 0x725   :  { %14712 = vmatpush2.bf16.msra.mxu0 %v20137_v18  ;;  %v17610_v18 = vpop.f32.mrf.mxu0 }
 0x726   :  { %14681 = vmatmul.mubr.bf16.vlgmr.msra.gmra.mxu1 %v27259_v9  ;;  %14713 = vmatprep.subr.bf16.mxu0 %v20145_v25  ;;  %v17587_v42 = vpop.f32.mrf.mxu1  ;;  %v20185_v25 = vld [vmem:[%s27215_s7 + $0xb80] ss:$16 sps:$4 sm:$0xff]  }
 0x727   :  { %14735 = vmatpush1.bf16.msra.mxu1 %v20134_v38  ;;  %14766 = vmatprep.mubr.bf16.mxu1 %v26284_v10  ;;  %v20190_v38 = vld [vmem:[%s27215_s7 + $0xb64] ss:$16 sps:$4 sm:$0xff]  }
 0x728   :  { %14736 = vmatprep.subr.bf16.mxu1 %v20142_v44  ;;  %v17588_v29 = vpop.f32.mrf.mxu1  ;;  %v17612_v44 = vpop.f32.mrf.mxu0 }
 0x729   :  { %14714 = vmatpush2.bf16.msra.mxu0 %v20143_v45 }
 0x72a   :  { %14715 = vmatprep.subr.bf16.mxu0 %v20151_v34  ;;  %v17590_v19 = vpop.f32.mrf.mxu1  ;;  %v20188_v34 = vld [vmem:[%s27215_s7 + $0xb60] ss:$16 sps:$4 sm:$0xff]  }
 0x72b   :  { %14737 = vmatpush1.bf16.msra.mxu1 %v20140_v11  ;;  %v20193_v11 = vld [vmem:[%s27215_s7 + $0xb44] ss:$16 sps:$4 sm:$0xff]  }
 0x72c   :  { %14738 = vmatprep.subr.bf16.mxu1 %v20148_v2  ;;  %v17591_v48 = vpop.f32.mrf.mxu1  ;;  %v17613_v2 = vpop.f32.mrf.mxu0 }
 0x72d   :  { %14716 = vmatpush2.bf16.msra.mxu0 %v20149_v1 }
 0x72e   :  { %14717 = vmatprep.subr.bf16.mxu0 %v20157_v8  ;;  %v20191_v8 = vld [vmem:[%s27215_s7 + $0xb40] ss:$16 sps:$4 sm:$0xff]  }
 0x72f   :  { %14739 = vmatpush1.bf16.msra.mxu1 %v20146_v13 }
 0x730   :  { %14740 = vmatprep.subr.bf16.mxu1 %v20154_v32  ;;  %v20196_v32 = vld [vmem:[%s27215_s7 + $0xb24] ss:$16 sps:$4 sm:$0xff]  }
 0x731   :  { %14718 = vmatpush2.bf16.msra.mxu0 %v20155_v23  ;;  %v27261_v23 = vld [vmem:[#allocation6_spill] sm:$0xff] }
 0x732   :  { %14719 = vmatprep.subr.bf16.mxu0 %v20163_v15  ;;  %v5793_v15 = vrot.slane %v26212_v63, %v27261_v23  ;;  %v20200_v63 = vld [vmem:[%s27215_s7 + $0xb00] ss:$16 sps:$4 sm:$0xff]   ;;  %v20238_v23 = vld [vmem:[%s27215_s7 + $0x24c] ss:$16 sps:$4 sm:$0xff]  }
 0x733   :  { %14741 = vmatpush1.bf16.msra.mxu1 %v20152_v3  ;;  %v17589_v3 = vadd.f32 %v17588_v29, %v17587_v42  ;;  %v20212_v29 = vld [vmem:[%s27215_s7 + $0x2c8] ss:$16 sps:$4 sm:$0xff]  }
 0x734   :  { %14742 = vmatprep.subr.bf16.mxu1 %v20160_v4 }
 0x735   :  { %14720 = vmatpush2.bf16.msra.mxu0 %v20161_v33  ;;  %v17592_v33 = vadd.f32 %v17591_v48, %v17590_v19  ;;  %v20226_v48 = vld [vmem:[%s27215_s7 + $0x28c] ss:$16 sps:$4 sm:$0xff]  }
 0x736   :  { %14721 = vmatprep.subr.bf16.mxu0 %v20169_v41  ;;  %v20194_v41 = vld [vmem:[%s27215_s7 + $0xb20] ss:$16 sps:$4 sm:$0xff]  }
 0x737   :  { %14743 = vmatpush1.bf16.msra.mxu1 %v20158_v35 }
 0x738   :  { %14744 = vmatprep.subr.bf16.mxu1 %v20166_v51  ;;  %v20202_v51 = vld [vmem:[%s27215_s7 + $0xb04] ss:$16 sps:$4 sm:$0xff]  }
 0x739   :  { %14722 = vmatpush2.bf16.msra.mxu0 %v20167_v61  ;;  %v11884_v61 = vadd.f32 %v17589_v3, %v5793_v15  ;;  %v20241_v3 = vld [vmem:[%s27215_s7 + $0x8c] ss:$16 sps:$4 sm:$0xff]  }
 0x73a   :  { %14785 = vmatprep.subr.bf16.mxu0 %v20199_v37 }
 0x73b   :  { %14745 = vmatpush1.bf16.msra.mxu1 %v20164_v43  ;;  %v17611_v43 = vadd.f32 %v17610_v18, %v17609_v62  ;;  %v20220_v62 = vld [vmem:[%s27215_s7 + $0x2ac] ss:$16 sps:$4 sm:$0xff]  }
 0x73c   :  { %14746 = vmatprep.subr.bf16.mxu1 %v20172_v12  ;;  %14724 = vmatmul.mubr.bf16.vlgmr.msra.gmra.mxu0 %v25730_v7  ;;  %v17653_v13 = vpop.f32.mrf.mxu0  ;;  %v11887_v12 = vadd.f32 %v17592_v33, %v5793_v15  ;;  %v20236_v15 = vld [vmem:[%s27215_s7 + $0x248] ss:$16 sps:$4 sm:$0xff]  }
 0x73d   :  { %14786 = vmatpush1.bf16.msra.mxu0 %v20197_v21  ;;  %14809 = vmatprep.mubr.bf16.mxu0 %v27260_v39  ;;  %v20239_v33 = vld [vmem:[%s27215_s7 + $0x88] ss:$16 sps:$4 sm:$0xff]  }
 0x73e   :  { %14787 = vmatprep.subr.bf16.mxu0 %v20205_v36  ;;  %v17654_v35 = vpop.f32.mrf.mxu0 }
 0x73f   :  { %14747 = vmatpush1.bf16.msra.mxu1 %v20170_v31  ;;  %v20208_v31 = vld [vmem:[%s27215_s7 + $0x2ec] ss:$16 sps:$4 sm:$0xff]   ;;  %v17655_v42 = vadd.f32 %v17654_v35, %v17653_v13  ;;  %v20230_v13 = vld [vmem:[%s27215_s7 + $0x268] ss:$16 sps:$4 sm:$0xff]  }
 0x740   :  { %14748 = vmatprep.subr.bf16.mxu1 %v20175_v28  ;;  %v17656_v36 = vpop.f32.mrf.mxu0  ;;  %v17614_v28 = vadd.f32 %v17613_v2, %v17612_v44  ;;  %v20229_v2 = vld [vmem:[%s27215_s7 + $0xcc] ss:$16 sps:$4 sm:$0xff]  }
 0x741   :  { %14788 = vmatpush1.bf16.msra.mxu0 %v20203_v14  ;;  %v11925_v14 = vadd.f32 %v17611_v43, %v11884_v61  ;;  %v20247_v35 = vld [vmem:[%s27215_s7 + $0x6c] ss:$16 sps:$4 sm:$0xff]   ;;  %v20245_v61 = vld [vmem:[%s27215_s7 + $0x68] ss:$16 sps:$4 sm:$0xff]  }
 0x742   :  { %14789 = vmatprep.subr.bf16.mxu0 %v20211_v55  ;;  %v20253_v43 = vld [vmem:[%s27215_s7 + $0x4c] ss:$16 sps:$4 sm:$0xff]  }
 0x743   :  { %14749 = vmatpush1.bf16.msra.mxu1 %v20173_v20 }
 0x744   :  { %14750 = vmatprep.subr.bf16.mxu1 %v20178_v27  ;;  %v11928_v27 = vadd.f32 %v17614_v28, %v11887_v12  ;;  %v20256_v12 = vld [vmem:[%s27215_s7 + $0x3ec] ss:$16 sps:$4 sm:$0xff]   ;;  %v20257_v28 = vld [vmem:[%s27215_s7 + $0x28] ss:$16 sps:$4 sm:$0xff]  }
 0x745   :  { %14790 = vmatpush1.bf16.msra.mxu0 %v20209_v5  ;;  %v20206_v5 = vld [vmem:[%s27215_s7 + $0x2e8] ss:$16 sps:$4 sm:$0xff]  }
 0x746   :  { %14791 = vmatprep.subr.bf16.mxu0 %v20217_v54  ;;  %v17631_v45 = vpop.f32.mrf.mxu1  ;;  %v17657_v54 = vpop.f32.mrf.mxu0 }
 0x747   :  { %14751 = vmatpush2.bf16.msra.mxu1 %v20176_v50  ;;  %v20214_v50 = vld [vmem:[%s27215_s7 + $0x2cc] ss:$16 sps:$4 sm:$0xff]  }
 0x748   :  { %14752 = vmatprep.subr.bf16.mxu1 %v20181_v46  ;;  %v17632_v1 = vpop.f32.mrf.mxu1 }
 0x749   :  { %14792 = vmatpush1.bf16.msra.mxu0 %v20215_v49  ;;  %v17633_v21 = vadd.f32 %v17632_v1, %v17631_v45  ;;  %v20221_v45 = vld [vmem:[%s27215_s7 + $0xe8] ss:$16 sps:$4 sm:$0xff]   ;;  %v20232_v1 = vld [vmem:[%s27215_s7 + $0x26c] ss:$16 sps:$4 sm:$0xff]  }
 0x74a   :  { %14820 = vmatprep.subr.bf16.mxu0 %v20223_v47  ;;  %v17634_v4 = vpop.f32.mrf.mxu1  ;;  %v17658_v47 = vadd.f32 %v17657_v54, %v17656_v36  ;;  %v20259_v36 = vld [vmem:[%s27215_s7 + $0x2c] ss:$16 sps:$4 sm:$0xff]  }
 0x74b   :  { %14753 = vmatpush2.bf16.msra.mxu1 %v20179_v52  ;;  %v11966_v20 = vadd.f32 %v17633_v21, %v11925_v14  ;;  %v20251_v21 = vld [vmem:[%s27215_s7 + $0x48] ss:$16 sps:$4 sm:$0xff]   ;;  %v20271_v54 = vld [vmem:[%s27215_s7 + $0x1ec] ss:$16 sps:$4 sm:$0xff]  }
 0x74c   :  { %14754 = vmatprep.subr.bf16.mxu1 %v20184_v53  ;;  %v17635_v37 = vpop.f32.mrf.mxu1  ;;  %v20260_v14 = vld [vmem:[%s27215_s7 + $0x3c8] ss:$16 sps:$4 sm:$0xff]  }
 0x74d   :  { %v17636_v55 = vadd.f32 %v17635_v37, %v17634_v4  ;;  %v12007_v52 = vadd.f32 %v17655_v42, %v11966_v20  ;;  %v20244_v4 = vld [vmem:[%s27215_s7 + $0x22c] ss:$16 sps:$4 sm:$0xff]   ;;  %v20248_v37 = vld [vmem:[%s27215_s7 + $0x208] ss:$16 sps:$4 sm:$0xff]  }
 0x74e   :  { %v20268_v20 = vld [vmem:[%s27215_s7 + $0x3ac] ss:$16 sps:$4 sm:$0xff]   ;;  %v20269_v42 = vld [vmem:[%s27215_s7 + $0x1e8] ss:$16 sps:$4 sm:$0xff]  }
 0x74f   :  { %14755 = vmatpush2.bf16.msra.mxu1 %v20182_v16  ;;  %v11969_v46 = vadd.f32 %v17636_v55, %v11928_v27  ;;  %v20265_v55 = vld [vmem:[%s27215_s7 + $0xc] ss:$16 sps:$4 sm:$0xff]   ;;  %v20263_v27 = vld [vmem:[%s27215_s7 + $0x8] ss:$16 sps:$4 sm:$0xff]  }
 0x750   :  { %14756 = vmatprep.subr.bf16.mxu1 %v20187_v30 }
 0x751   :  { %v12010_v19 = vadd.f32 %v17658_v47, %v11969_v46  ;;  %v20272_v46 = vld [vmem:[%s27215_s7 + $0x388] ss:$16 sps:$4 sm:$0xff]   ;;  %v20280_v47 = vld [vmem:[%s27215_s7 + $0x36c] ss:$16 sps:$4 sm:$0xff]  }
 0x753   :  { %14757 = vmatpush2.bf16.msra.mxu1 %v20185_v25  ;;  %v20218_v25 = vld [vmem:[%s27215_s7 + $0x2a8] ss:$16 sps:$4 sm:$0xff]  }
 0x754   :  { %14758 = vmatprep.subr.bf16.mxu1 %v20190_v38 }
 0x757   :  { %14759 = vmatpush2.bf16.msra.mxu1 %v20188_v34 }
 0x758   :  { %14760 = vmatprep.subr.bf16.mxu1 %v20193_v11  ;;  %v20224_v11 = vld [vmem:[%s27215_s7 + $0x288] ss:$16 sps:$4 sm:$0xff]  }
 0x75b   :  { %14761 = vmatpush2.bf16.msra.mxu1 %v20191_v8  ;;  %v20227_v8 = vld [vmem:[%s27215_s7 + $0xc8] ss:$16 sps:$4 sm:$0xff]  }
 0x75c   :  { %14762 = vmatprep.subr.bf16.mxu1 %v20196_v32  ;;  %v20235_v32 = vld [vmem:[%s27215_s7 + $0xac] ss:$16 sps:$4 sm:$0xff]  }
 0x75f   :  { %14763 = vmatpush2.bf16.msra.mxu1 %v20194_v41  ;;  %v20242_v41 = vld [vmem:[%s27215_s7 + $0x228] ss:$16 sps:$4 sm:$0xff]  }
 0x760   :  { %14764 = vmatprep.subr.bf16.mxu1 %v20202_v51  ;;  %v20250_v51 = vld [vmem:[%s27215_s7 + $0x20c] ss:$16 sps:$4 sm:$0xff]  }
 0x763   :  { %14765 = vmatpush2.bf16.msra.mxu1 %v20200_v63  ;;  %v20254_v63 = vld [vmem:[%s27215_s7 + $0x3e8] ss:$16 sps:$4 sm:$0xff]  }
 0x764   :  { %14863 = vmatprep.subr.bf16.mxu1 %v20208_v31  ;;  %v20262_v31 = vld [vmem:[%s27215_s7 + $0x3cc] ss:$16 sps:$4 sm:$0xff]  }
 0x766   :  { %v12047_v49 = vpop.f32.mrf.mxu1  ;;  %14767 = vmatmul.mubr.bf16.vlgmr.msra.gmra.mxu1 %v26216_v24 }
 0x767   :  { %14864 = vmatpush1.bf16.msra.mxu1 %v20206_v5  ;;  %14895 = vmatprep.mubr.bf16.mxu1 %v25810_v6  ;;  %v12048_v16 = vadd.f32 %v12047_v49, %v12007_v52  ;;  %v20266_v5 = vld [vmem:[%s27215_s7 + $0x3a8] ss:$16 sps:$4 sm:$0xff]   ;;  %v20277_v49 = vld [vmem:[%s27215_s7 + $0x1cc] ss:$16 sps:$4 sm:$0xff]  }
 0x768   :  { %v17736_v53 = vpop.f32.mrf.mxu1  ;;  %14865 = vmatprep.subr.bf16.mxu1 %v20214_v50  ;;  %v20274_v50 = vld [vmem:[%s27215_s7 + $0x38c] ss:$16 sps:$4 sm:$0xff]   ;;  %v20275_v52 = vld [vmem:[%s27215_s7 + $0x1c8] ss:$16 sps:$4 sm:$0xff]  }
 0x769   :  { %v12066_v38 = vmax.f32 %v12048_v16, 0.0  ;;  %v20283_v53 = vld [vmem:[%s27215_s7 + $0x1ac] ss:$16 sps:$4 sm:$0xff]   ;;  %v20281_v16 = vld [vmem:[%s27215_s7 + $0x1a8] ss:$16 sps:$4 sm:$0xff]  }
 0x76a   :  { %v12050_v30 = vpop.f32.mrf.mxu1 }
 0x76b   :  { %v12051_v18 = vadd.f32 %v12050_v30, %v12010_v19  ;;  %14866 = vmatpush1.bf16.msra.mxu1 %v20212_v29  ;;  %v20278_v29 = vld [vmem:[%s27215_s7 + $0x368] ss:$16 sps:$4 sm:$0xff]   ;;  %v20289_v30 = vld [vmem:[%s27215_s7 + $0x18c] ss:$16 sps:$4 sm:$0xff]  }
 0x76c   :  { %v17737_v6 = vpop.f32.mrf.mxu1  ;;  %14867 = vmatprep.subr.bf16.mxu1 %v20220_v62  ;;  %v20286_v62 = vld [vmem:[%s27215_s7 + $0x34c] ss:$16 sps:$4 sm:$0xff]   ;;  %v20284_v19 = vld [vmem:[%s27215_s7 + $0x348] ss:$16 sps:$4 sm:$0xff]  }
 0x76d   :  { %v12079_v44 = vmax.f32 %v12051_v18, 0.0  ;;  %v20292_v18 = vld [vmem:[%s27215_s7 + $0x32c] ss:$16 sps:$4 sm:$0xff]   ;;  %v20290_v6 = vld [vmem:[%s27215_s7 + $0x328] ss:$16 sps:$4 sm:$0xff]  }
 0x76f   :  { %v26459_v34 = vpack.c.bf16 %v12079_v44, %v12066_v38  ;;  %14868 = vmatpush1.bf16.msra.mxu1 %v20218_v25  ;;  %v20287_v25 = vld [vmem:[%s27215_s7 + $0x188] ss:$16 sps:$4 sm:$0xff]   ;;  %v20298_v38 = vld [vmem:[%s27215_s7 + $0x30c] ss:$16 sps:$4 sm:$0xff]  }
 0x770   :  { %14869 = vmatprep.subr.bf16.mxu1 %v20226_v48  ;;  %v20295_v48 = vld [vmem:[%s27215_s7 + $0x16c] ss:$16 sps:$4 sm:$0xff]   ;;  %v20293_v44 = vld [vmem:[%s27215_s7 + $0x168] ss:$16 sps:$4 sm:$0xff]  }
 0x771   :  { %17446 = vmatmul.mubr.msk.bf16.vlgmr.msra.gmra.mxu0 %vm14515_vm0, %v26459_v34 }
 0x772   :  { %14821 = vmatpush1.bf16.msra.mxu0 %v20221_v45  ;;  %14852 = vmatprep.mubr.bf16.mxu0 %v25666_v17  ;;  %v20233_v17 = vld [vmem:[%s27215_s7 + $0xa8] ss:$16 sps:$4 sm:$0xff]  }
 0x773   :  { %14870 = vmatpush1.bf16.msra.mxu1 %v20224_v11  ;;  %14822 = vmatprep.subr.bf16.mxu0 %v20229_v2  ;;  %v20296_v45 = vld [vmem:[%s27215_s7 + $0x308] ss:$16 sps:$4 sm:$0xff]   ;;  %v20301_v11 = vld [vmem:[%s27215_s7 + $0x14c] ss:$16 sps:$4 sm:$0xff]  }
 0x774   :  { %14871 = vmatprep.subr.bf16.mxu1 %v20232_v1  ;;  %v20304_v2 = vld [vmem:[%s27215_s7 + $0x6ec] ss:$16 sps:$4 sm:$0xff]   ;;  %v20299_v1 = vld [vmem:[%s27215_s7 + $0x148] ss:$16 sps:$4 sm:$0xff]  }
 0x776   :  { %14823 = vmatpush1.bf16.msra.mxu0 %v20227_v8  ;;  %v20302_v8 = vld [vmem:[%s27215_s7 + $0x6e8] ss:$16 sps:$4 sm:$0xff]  }
 0x777   :  { %14872 = vmatpush1.bf16.msra.mxu1 %v20230_v13  ;;  %14824 = vmatprep.subr.bf16.mxu0 %v20235_v32  ;;  %v20307_v13 = vld [vmem:[%s27215_s7 + $0x12c] ss:$16 sps:$4 sm:$0xff]  }
 0x778   :  { %14873 = vmatprep.subr.bf16.mxu1 %v20238_v23  ;;  %v20310_v32 = vld [vmem:[%s27215_s7 + $0x6cc] ss:$16 sps:$4 sm:$0xff]   ;;  %v20305_v23 = vld [vmem:[%s27215_s7 + $0x128] ss:$16 sps:$4 sm:$0xff]  }
 0x77a   :  { %14825 = vmatpush1.bf16.msra.mxu0 %v20233_v17  ;;  %v20308_v17 = vld [vmem:[%s27215_s7 + $0x6c8] ss:$16 sps:$4 sm:$0xff]  }
 0x77b   :  { %14874 = vmatpush1.bf16.msra.mxu1 %v20236_v15  ;;  %14826 = vmatprep.subr.bf16.mxu0 %v20241_v3  ;;  %v20313_v15 = vld [vmem:[%s27215_s7 + $0x10c] ss:$16 sps:$4 sm:$0xff]   ;;  %v20311_v3 = vld [vmem:[%s27215_s7 + $0x108] ss:$16 sps:$4 sm:$0xff]  }
 0x77c   :  { %14875 = vmatprep.subr.bf16.mxu1 %v20244_v4  ;;  %v20319_v4 = vld [vmem:[%s27215_s7 + $0x4ec] ss:$16 sps:$4 sm:$0xff]  }
 0x77e   :  { %14827 = vmatpush1.bf16.msra.mxu0 %v20239_v33  ;;  %v20322_v33 = vld [vmem:[%s27215_s7 + $0x68c] ss:$16 sps:$4 sm:$0xff]  }
 0x77f   :  { %14876 = vmatpush1.bf16.msra.mxu1 %v20242_v41  ;;  %14828 = vmatprep.subr.bf16.mxu0 %v20247_v35  ;;  %v20317_v41 = vld [vmem:[%s27215_s7 + $0x4e8] ss:$16 sps:$4 sm:$0xff]  }
 0x780   :  { %14877 = vmatprep.subr.bf16.mxu1 %v20250_v51  ;;  %v20320_v35 = vld [vmem:[%s27215_s7 + $0x688] ss:$16 sps:$4 sm:$0xff]   ;;  %v20325_v51 = vld [vmem:[%s27215_s7 + $0x4cc] ss:$16 sps:$4 sm:$0xff]  }
 0x782   :  { %14829 = vmatpush1.bf16.msra.mxu0 %v20245_v61  ;;  %v20328_v61 = vld [vmem:[%s27215_s7 + $0x66c] ss:$16 sps:$4 sm:$0xff]  }
 0x783   :  { %14878 = vmatpush1.bf16.msra.mxu1 %v20248_v37  ;;  %14830 = vmatprep.subr.bf16.mxu0 %v20253_v43  ;;  %v20323_v37 = vld [vmem:[%s27215_s7 + $0x4c8] ss:$16 sps:$4 sm:$0xff]  }
 0x784   :  { %14879 = vmatprep.subr.bf16.mxu1 %v20256_v12  ;;  %v20326_v43 = vld [vmem:[%s27215_s7 + $0x668] ss:$16 sps:$4 sm:$0xff]   ;;  %v20331_v12 = vld [vmem:[%s27215_s7 + $0x4ac] ss:$16 sps:$4 sm:$0xff]  }
 0x786   :  { %14831 = vmatpush1.bf16.msra.mxu0 %v20251_v21  ;;  %v20332_v21 = vld [vmem:[%s27215_s7 + $0x648] ss:$16 sps:$4 sm:$0xff]  }
 0x787   :  { %14880 = vmatpush2.bf16.msra.mxu1 %v20254_v63  ;;  %14832 = vmatprep.subr.bf16.mxu0 %v20259_v36  ;;  %v20337_v63 = vld [vmem:[%s27215_s7 + $0x48c] ss:$16 sps:$4 sm:$0xff]  }
 0x788   :  { %14881 = vmatprep.subr.bf16.mxu1 %v20262_v31  ;;  %v20340_v36 = vld [vmem:[%s27215_s7 + $0x62c] ss:$16 sps:$4 sm:$0xff]   ;;  %v20335_v31 = vld [vmem:[%s27215_s7 + $0x488] ss:$16 sps:$4 sm:$0xff]  }
 0x78a   :  { %14833 = vmatpush1.bf16.msra.mxu0 %v20257_v28  ;;  %v20338_v28 = vld [vmem:[%s27215_s7 + $0x628] ss:$16 sps:$4 sm:$0xff]  }
 0x78b   :  { %14882 = vmatpush2.bf16.msra.mxu1 %v20260_v14  ;;  %14834 = vmatprep.subr.bf16.mxu0 %v20265_v55  ;;  %v20343_v14 = vld [vmem:[%s27215_s7 + $0x46c] ss:$16 sps:$4 sm:$0xff]  }
 0x78c   :  { %14883 = vmatprep.subr.bf16.mxu1 %v20268_v20  ;;  %v20346_v55 = vld [vmem:[%s27215_s7 + $0x60c] ss:$16 sps:$4 sm:$0xff]   ;;  %v20341_v20 = vld [vmem:[%s27215_s7 + $0x468] ss:$16 sps:$4 sm:$0xff]  }
 0x78e   :  { %14835 = vmatpush1.bf16.msra.mxu0 %v20263_v27  ;;  %v20344_v27 = vld [vmem:[%s27215_s7 + $0x608] ss:$16 sps:$4 sm:$0xff]  }
 0x78f   :  { %14884 = vmatpush2.bf16.msra.mxu1 %v20266_v5  ;;  %14836 = vmatprep.subr.bf16.mxu0 %v20271_v54  ;;  %v20349_v5 = vld [vmem:[%s27215_s7 + $0x44c] ss:$16 sps:$4 sm:$0xff]  }
 0x790   :  { %14885 = vmatprep.subr.bf16.mxu1 %v20274_v50  ;;  %v20352_v54 = vld [vmem:[%s27215_s7 + $0x7ec] ss:$16 sps:$4 sm:$0xff]   ;;  %v20347_v50 = vld [vmem:[%s27215_s7 + $0x448] ss:$16 sps:$4 sm:$0xff]  }
 0x792   :  { %14837 = vmatpush2.bf16.msra.mxu0 %v20269_v42  ;;  %v20350_v42 = vld [vmem:[%s27215_s7 + $0x7e8] ss:$16 sps:$4 sm:$0xff]  }
 0x793   :  { %14886 = vmatpush2.bf16.msra.mxu1 %v20272_v46  ;;  %14838 = vmatprep.subr.bf16.mxu0 %v20277_v49  ;;  %v20355_v46 = vld [vmem:[%s27215_s7 + $0x42c] ss:$16 sps:$4 sm:$0xff]  }
 0x794   :  { %14887 = vmatprep.subr.bf16.mxu1 %v20280_v47  ;;  %v20358_v49 = vld [vmem:[%s27215_s7 + $0x7cc] ss:$16 sps:$4 sm:$0xff]   ;;  %v20353_v47 = vld [vmem:[%s27215_s7 + $0x428] ss:$16 sps:$4 sm:$0xff]  }
 0x796   :  { %14839 = vmatpush2.bf16.msra.mxu0 %v20275_v52  ;;  %v20356_v52 = vld [vmem:[%s27215_s7 + $0x7c8] ss:$16 sps:$4 sm:$0xff]  }
 0x797   :  { %14888 = vmatpush2.bf16.msra.mxu1 %v20278_v29  ;;  %14840 = vmatprep.subr.bf16.mxu0 %v20283_v53  ;;  %v20361_v29 = vld [vmem:[%s27215_s7 + $0x40c] ss:$16 sps:$4 sm:$0xff]  }
 0x798   :  { %14889 = vmatprep.subr.bf16.mxu1 %v20286_v62  ;;  %v20364_v53 = vld [vmem:[%s27215_s7 + $0x7ac] ss:$16 sps:$4 sm:$0xff]   ;;  %v20359_v62 = vld [vmem:[%s27215_s7 + $0x408] ss:$16 sps:$4 sm:$0xff]  }
 0x79a   :  { %14841 = vmatpush2.bf16.msra.mxu0 %v20281_v16  ;;  %v20362_v16 = vld [vmem:[%s27215_s7 + $0x7a8] ss:$16 sps:$4 sm:$0xff]  }
 0x79b   :  { %14890 = vmatpush2.bf16.msra.mxu1 %v20284_v19  ;;  %14842 = vmatprep.subr.bf16.mxu0 %v20289_v30  ;;  %v20367_v19 = vld [vmem:[%s27215_s7 + $0x5ec] ss:$16 sps:$4 sm:$0xff]  }
 0x79c   :  { %14891 = vmatprep.subr.bf16.mxu1 %v20292_v18  ;;  %v20370_v30 = vld [vmem:[%s27215_s7 + $0x78c] ss:$16 sps:$4 sm:$0xff]   ;;  %v20365_v18 = vld [vmem:[%s27215_s7 + $0x5e8] ss:$16 sps:$4 sm:$0xff]  }
 0x79e   :  { %14843 = vmatpush2.bf16.msra.mxu0 %v20287_v25  ;;  %v20368_v25 = vld [vmem:[%s27215_s7 + $0x788] ss:$16 sps:$4 sm:$0xff]  }
 0x79f   :  { %14892 = vmatpush2.bf16.msra.mxu1 %v20290_v6  ;;  %14844 = vmatprep.subr.bf16.mxu0 %v20295_v48  ;;  %v20373_v6 = vld [vmem:[%s27215_s7 + $0x5cc] ss:$16 sps:$4 sm:$0xff]  }
 0x7a0   :  { %14893 = vmatprep.subr.bf16.mxu1 %v20298_v38  ;;  %v20376_v48 = vld [vmem:[%s27215_s7 + $0x76c] ss:$16 sps:$4 sm:$0xff]   ;;  %v20371_v38 = vld [vmem:[%s27215_s7 + $0x5c8] ss:$16 sps:$4 sm:$0xff]  }
 0x7a2   :  { %14845 = vmatpush2.bf16.msra.mxu0 %v20293_v44  ;;  %v20374_v44 = vld [vmem:[%s27215_s7 + $0x768] ss:$16 sps:$4 sm:$0xff]  }
 0x7a3   :  { %14894 = vmatpush2.bf16.msra.mxu1 %v20296_v45  ;;  %14846 = vmatprep.subr.bf16.mxu0 %v20301_v11  ;;  %v20379_v45 = vld [vmem:[%s27215_s7 + $0x5ac] ss:$16 sps:$4 sm:$0xff]  }
 0x7a4   :  { %14949 = vmatprep.subr.bf16.mxu1 %v20304_v2  ;;  %v20382_v11 = vld [vmem:[%s27215_s7 + $0x74c] ss:$16 sps:$4 sm:$0xff]   ;;  %v20377_v2 = vld [vmem:[%s27215_s7 + $0x5a8] ss:$16 sps:$4 sm:$0xff]  }
 0x7a6   :  { %14847 = vmatpush2.bf16.msra.mxu0 %v20299_v1  ;;  %14896 = vmatmul.mubr.bf16.vlgmr.msra.gmra.mxu1 %v27255_v59  ;;  %v20316_v59 = vld [vmem:[%s27215_s7 + $0x6ac] ss:$16 sps:$4 sm:$0xff]   ;;  %v20380_v1 = vld [vmem:[%s27215_s7 + $0x748] ss:$16 sps:$4 sm:$0xff]  }
 0x7a7   :  { %14950 = vmatpush1.bf16.msra.mxu1 %v20302_v8  ;;  %14981 = vmatprep.mubr.bf16.mxu1 %v26053_v22  ;;  %v20314_v22 = vld [vmem:[%s27215_s7 + $0x6a8] ss:$16 sps:$4 sm:$0xff]   ;;  %v20385_v8 = vld [vmem:[%s27215_s7 + $0x58c] ss:$16 sps:$4 sm:$0xff]  }
 0x7a8   :  { %14848 = vmatprep.subr.bf16.mxu0 %v20307_v13  ;;  %14951 = vmatprep.subr.bf16.mxu1 %v20310_v32  ;;  %v20388_v13 = vld [vmem:[%s27215_s7 + $0x72c] ss:$16 sps:$4 sm:$0xff]   ;;  %v20383_v32 = vld [vmem:[%s27215_s7 + $0x588] ss:$16 sps:$4 sm:$0xff]  }
 0x7aa   :  { %14849 = vmatpush2.bf16.msra.mxu0 %v20305_v23  ;;  %v20386_v23 = vld [vmem:[%s27215_s7 + $0x728] ss:$16 sps:$4 sm:$0xff]  }
 0x7ab   :  { %14952 = vmatpush1.bf16.msra.mxu1 %v20308_v17  ;;  %14850 = vmatprep.subr.bf16.mxu0 %v20313_v15  ;;  %v20391_v17 = vld [vmem:[%s27215_s7 + $0x56c] ss:$16 sps:$4 sm:$0xff]  }
 0x7ac   :  { %14953 = vmatprep.subr.bf16.mxu1 %v20316_v59  ;;  %v20394_v15 = vld [vmem:[%s27215_s7 + $0x70c] ss:$16 sps:$4 sm:$0xff]   ;;  %v20389_v59 = vld [vmem:[%s27215_s7 + $0x568] ss:$16 sps:$4 sm:$0xff]  }
 0x7ae   :  { %14851 = vmatpush2.bf16.msra.mxu0 %v20311_v3  ;;  %v20392_v3 = vld [vmem:[%s27215_s7 + $0x708] ss:$16 sps:$4 sm:$0xff]  }
 0x7af   :  { %14954 = vmatpush1.bf16.msra.mxu1 %v20314_v22  ;;  %14906 = vmatprep.subr.bf16.mxu0 %v20319_v4  ;;  %v20397_v22 = vld [vmem:[%s27215_s7 + $0x54c] ss:$16 sps:$4 sm:$0xff]  }
 0x7b0   :  { %14955 = vmatprep.subr.bf16.mxu1 %v20322_v33  ;;  %v20400_v4 = vld [vmem:[%s27215_s7 + $0xaec] ss:$16 sps:$4 sm:$0xff]   ;;  %v20395_v33 = vld [vmem:[%s27215_s7 + $0x548] ss:$16 sps:$4 sm:$0xff]  }
 0x7b1   :  { %14853 = vmatmul.mubr.bf16.vlgmr.msra.gmra.mxu0 %v23805_v26  ;;  %v20334_v26 = vld [vmem:[%s27215_s7 + $0x64c] ss:$16 sps:$4 sm:$0xff]  }
 0x7b2   :  { %14907 = vmatpush1.bf16.msra.mxu0 %v20317_v41  ;;  %14938 = vmatprep.mubr.bf16.mxu0 %v25890_v0  ;;  %v20329_v0 = vld [vmem:[%s27215_s7 + $0x4a8] ss:$16 sps:$4 sm:$0xff]  }
 0x7b3   :  { %14956 = vmatpush1.bf16.msra.mxu1 %v20320_v35  ;;  %14908 = vmatprep.subr.bf16.mxu0 %v20325_v51  ;;  %v20398_v41 = vld [vmem:[%s27215_s7 + $0xae8] ss:$16 sps:$4 sm:$0xff]   ;;  %v20403_v35 = vld [vmem:[%s27215_s7 + $0x52c] ss:$16 sps:$4 sm:$0xff]  }
 0x7b4   :  { %14957 = vmatprep.subr.bf16.mxu1 %v20328_v61  ;;  %v20406_v51 = vld [vmem:[%s27215_s7 + $0xacc] ss:$16 sps:$4 sm:$0xff]   ;;  %v20401_v61 = vld [vmem:[%s27215_s7 + $0x528] ss:$16 sps:$4 sm:$0xff]  }
 0x7b6   :  { %14909 = vmatpush1.bf16.msra.mxu0 %v20323_v37  ;;  %v20404_v37 = vld [vmem:[%s27215_s7 + $0xac8] ss:$16 sps:$4 sm:$0xff]  }
 0x7b7   :  { %14958 = vmatpush1.bf16.msra.mxu1 %v20326_v43  ;;  %14910 = vmatprep.subr.bf16.mxu0 %v20331_v12  ;;  %v20409_v43 = vld [vmem:[%s27215_s7 + $0x50c] ss:$16 sps:$4 sm:$0xff]   ;;  %v20407_v12 = vld [vmem:[%s27215_s7 + $0x508] ss:$16 sps:$4 sm:$0xff]  }
 0x7b8   :  { %14959 = vmatprep.subr.bf16.mxu1 %v20334_v26  ;;  %v20415_v26 = vld [vmem:[%s27215_s7 + $0x8ec] ss:$16 sps:$4 sm:$0xff]  }
 0x7ba   :  { %14911 = vmatpush1.bf16.msra.mxu0 %v20329_v0  ;;  %v20418_v0 = vld [vmem:[%s27215_s7 + $0xa8c] ss:$16 sps:$4 sm:$0xff]  }
 0x7bb   :  { %14960 = vmatpush1.bf16.msra.mxu1 %v20332_v21  ;;  %14912 = vmatprep.subr.bf16.mxu0 %v20337_v63  ;;  %v20413_v21 = vld [vmem:[%s27215_s7 + $0x8e8] ss:$16 sps:$4 sm:$0xff]  }
 0x7bc   :  { %14961 = vmatprep.subr.bf16.mxu1 %v20340_v36  ;;  %v20416_v63 = vld [vmem:[%s27215_s7 + $0xa88] ss:$16 sps:$4 sm:$0xff]   ;;  %v20421_v36 = vld [vmem:[%s27215_s7 + $0x8cc] ss:$16 sps:$4 sm:$0xff]  }
 0x7be   :  { %14913 = vmatpush1.bf16.msra.mxu0 %v20335_v31  ;;  %v20424_v31 = vld [vmem:[%s27215_s7 + $0xa6c] ss:$16 sps:$4 sm:$0xff]  }
 0x7bf   :  { %14962 = vmatpush1.bf16.msra.mxu1 %v20338_v28  ;;  %14914 = vmatprep.subr.bf16.mxu0 %v20343_v14  ;;  %v20419_v28 = vld [vmem:[%s27215_s7 + $0x8c8] ss:$16 sps:$4 sm:$0xff]  }
 0x7c0   :  { %14963 = vmatprep.subr.bf16.mxu1 %v20346_v55  ;;  %v20422_v14 = vld [vmem:[%s27215_s7 + $0xa68] ss:$16 sps:$4 sm:$0xff]   ;;  %v20427_v55 = vld [vmem:[%s27215_s7 + $0x8ac] ss:$16 sps:$4 sm:$0xff]  }
 0x7c2   :  { %14915 = vmatpush1.bf16.msra.mxu0 %v20341_v20  ;;  %v20428_v20 = vld [vmem:[%s27215_s7 + $0xa48] ss:$16 sps:$4 sm:$0xff]  }
 0x7c3   :  { %14964 = vmatpush1.bf16.msra.mxu1 %v20344_v27  ;;  %14916 = vmatprep.subr.bf16.mxu0 %v20349_v5  ;;  %v20433_v27 = vld [vmem:[%s27215_s7 + $0x88c] ss:$16 sps:$4 sm:$0xff]  }
 0x7c4   :  { %14965 = vmatprep.subr.bf16.mxu1 %v20352_v54  ;;  %v20436_v5 = vld [vmem:[%s27215_s7 + $0xa2c] ss:$16 sps:$4 sm:$0xff]   ;;  %v20431_v54 = vld [vmem:[%s27215_s7 + $0x888] ss:$16 sps:$4 sm:$0xff]  }
 0x7c6   :  { %14917 = vmatpush1.bf16.msra.mxu0 %v20347_v50  ;;  %v20434_v50 = vld [vmem:[%s27215_s7 + $0xa28] ss:$16 sps:$4 sm:$0xff]  }
 0x7c7   :  { %14966 = vmatpush2.bf16.msra.mxu1 %v20350_v42  ;;  %14918 = vmatprep.subr.bf16.mxu0 %v20355_v46  ;;  %v20439_v42 = vld [vmem:[%s27215_s7 + $0x86c] ss:$16 sps:$4 sm:$0xff]  }
 0x7c8   :  { %14967 = vmatprep.subr.bf16.mxu1 %v20358_v49  ;;  %v20442_v46 = vld [vmem:[%s27215_s7 + $0xa0c] ss:$16 sps:$4 sm:$0xff]   ;;  %v20437_v49 = vld [vmem:[%s27215_s7 + $0x868] ss:$16 sps:$4 sm:$0xff]  }
 0x7ca   :  { %14919 = vmatpush1.bf16.msra.mxu0 %v20353_v47  ;;  %v20440_v47 = vld [vmem:[%s27215_s7 + $0xa08] ss:$16 sps:$4 sm:$0xff]  }
 0x7cb   :  { %14968 = vmatpush2.bf16.msra.mxu1 %v20356_v52  ;;  %14920 = vmatprep.subr.bf16.mxu0 %v20361_v29  ;;  %v20445_v52 = vld [vmem:[%s27215_s7 + $0x84c] ss:$16 sps:$4 sm:$0xff]  }
 0x7cc   :  { %14969 = vmatprep.subr.bf16.mxu1 %v20364_v53  ;;  %v20448_v29 = vld [vmem:[%s27215_s7 + $0xbec] ss:$16 sps:$4 sm:$0xff]   ;;  %v20443_v53 = vld [vmem:[%s27215_s7 + $0x848] ss:$16 sps:$4 sm:$0xff]  }
 0x7ce   :  { %14921 = vmatpush1.bf16.msra.mxu0 %v20359_v62  ;;  %v20446_v62 = vld [vmem:[%s27215_s7 + $0xbe8] ss:$16 sps:$4 sm:$0xff]  }
 0x7cf   :  { %14970 = vmatpush2.bf16.msra.mxu1 %v20362_v16  ;;  %14922 = vmatprep.subr.bf16.mxu0 %v20367_v19  ;;  %v20451_v16 = vld [vmem:[%s27215_s7 + $0x82c] ss:$16 sps:$4 sm:$0xff]  }
 0x7d0   :  { %14971 = vmatprep.subr.bf16.mxu1 %v20370_v30  ;;  %v20454_v19 = vld [vmem:[%s27215_s7 + $0xbcc] ss:$16 sps:$4 sm:$0xff]   ;;  %v20449_v30 = vld [vmem:[%s27215_s7 + $0x828] ss:$16 sps:$4 sm:$0xff]  }
 0x7d2   :  { %14923 = vmatpush2.bf16.msra.mxu0 %v20365_v18  ;;  %v26928_v18 = vpop.f32.mrf.mxu0 }
 0x7d3   :  { %14972 = vmatpush2.bf16.msra.mxu1 %v20368_v25  ;;  %14924 = vmatprep.subr.bf16.mxu0 %v20373_v6  ;;  %v20452_v25 = vld [vmem:[%s27215_s7 + $0xbc8] ss:$16 sps:$4 sm:$0xff]   ;;  %v20457_v6 = vld [vmem:[%s27215_s7 + $0x80c] ss:$16 sps:$4 sm:$0xff]  }
 0x7d4   :  { %14973 = vmatprep.subr.bf16.mxu1 %v20376_v48  ;;  %v20460_v48 = vld [vmem:[%s27215_s7 + $0xbac] ss:$16 sps:$4 sm:$0xff]  }
 0x7d6   :  { %14925 = vmatpush2.bf16.msra.mxu0 %v20371_v38  ;;  %v20455_v38 = vld [vmem:[%s27215_s7 + $0x808] ss:$16 sps:$4 sm:$0xff]  }
 0x7d7   :  { %14974 = vmatpush2.bf16.msra.mxu1 %v20374_v44  ;;  %14926 = vmatprep.subr.bf16.mxu0 %v20379_v45  ;;  %v26942_v44 = vpop.f32.mrf.mxu0  ;;  %v26944_v45 = vpop.f32.mrf.mxu1 }
 0x7d8   :  { %14975 = vmatprep.subr.bf16.mxu1 %v20382_v11  ;;  %v20458_v11 = vld [vmem:[%s27215_s7 + $0xba8] ss:$16 sps:$4 sm:$0xff]  }
 0x7da   :  { %14927 = vmatpush2.bf16.msra.mxu0 %v20377_v2  ;;  %v20463_v2 = vld [vmem:[%s27215_s7 + $0x9ec] ss:$16 sps:$4 sm:$0xff]  }
 0x7db   :  { %14976 = vmatpush2.bf16.msra.mxu1 %v20380_v1  ;;  %14928 = vmatprep.subr.bf16.mxu0 %v20385_v8  ;;  %v20466_v1 = vld [vmem:[%s27215_s7 + $0xb8c] ss:$16 sps:$4 sm:$0xff]   ;;  %v20461_v8 = vld [vmem:[%s27215_s7 + $0x9e8] ss:$16 sps:$4 sm:$0xff]  }
 0x7dc   :  { %14977 = vmatprep.subr.bf16.mxu1 %v20388_v13  ;;  %v26958_v13 = vpop.f32.mrf.mxu0 }
 0x7de   :  { %14929 = vmatpush2.bf16.msra.mxu0 %v20383_v32  ;;  %v26960_v32 = vpop.f32.mrf.mxu1 }
 0x7df   :  { %14978 = vmatpush2.bf16.msra.mxu1 %v20386_v23  ;;  %14930 = vmatprep.subr.bf16.mxu0 %v20391_v17  ;;  %v20464_v23 = vld [vmem:[%s27215_s7 + $0xb88] ss:$16 sps:$4 sm:$0xff]   ;;  %v20469_v17 = vld [vmem:[%s27215_s7 + $0x9cc] ss:$16 sps:$4 sm:$0xff]  }
 0x7e0   :  { %14979 = vmatprep.subr.bf16.mxu1 %v20394_v15  ;;  %v20472_v15 = vld [vmem:[%s27215_s7 + $0xb6c] ss:$16 sps:$4 sm:$0xff]  }
 0x7e2   :  { %14931 = vmatpush2.bf16.msra.mxu0 %v20389_v59  ;;  %v20467_v59 = vld [vmem:[%s27215_s7 + $0x9c8] ss:$16 sps:$4 sm:$0xff]  }
 0x7e3   :  { %14980 = vmatpush2.bf16.msra.mxu1 %v20392_v3  ;;  %14932 = vmatprep.subr.bf16.mxu0 %v20397_v22  ;;  %v26974_v3 = vpop.f32.mrf.mxu0  ;;  %v26976_v22 = vpop.f32.mrf.mxu1 }
 0x7e4   :  { %15035 = vmatprep.subr.bf16.mxu1 %v20400_v4  ;;  %v20470_v4 = vld [vmem:[%s27215_s7 + $0xb68] ss:$16 sps:$4 sm:$0xff]  }
 0x7e6   :  { %14933 = vmatpush2.bf16.msra.mxu0 %v20395_v33  ;;  %14982 = vmatmul.mubr.bf16.vlgmr.msra.gmra.mxu1 %v27259_v9  ;;  %v20412_v9 = vld [vmem:[%s27215_s7 + $0xaac] ss:$16 sps:$4 sm:$0xff]  }
 0x7e7   :  { %15036 = vmatpush1.bf16.msra.mxu1 %v20398_v41  ;;  %15067 = vmatprep.mubr.bf16.mxu1 %v26284_v10  ;;  %v20410_v10 = vld [vmem:[%s27215_s7 + $0xaa8] ss:$16 sps:$4 sm:$0xff]   ;;  %v20475_v33 = vld [vmem:[%s27215_s7 + $0x9ac] ss:$16 sps:$4 sm:$0xff]  }
 0x7e8   :  { %14934 = vmatprep.subr.bf16.mxu0 %v20403_v35  ;;  %15037 = vmatprep.subr.bf16.mxu1 %v20406_v51  ;;  %v20478_v41 = vld [vmem:[%s27215_s7 + $0xb4c] ss:$16 sps:$4 sm:$0xff]   ;;  %v26987_v35 = vpop.f32.mrf.mxu0  ;;  %v20473_v51 = vld [vmem:[%s27215_s7 + $0x9a8] ss:$16 sps:$4 sm:$0xff]  }
 0x7ea   :  { %14935 = vmatpush2.bf16.msra.mxu0 %v20401_v61  ;;  %v26992_v61 = vpop.f32.mrf.mxu1 }
 0x7eb   :  { %15038 = vmatpush1.bf16.msra.mxu1 %v20404_v37  ;;  %14936 = vmatprep.subr.bf16.mxu0 %v20409_v43  ;;  %v20476_v37 = vld [vmem:[%s27215_s7 + $0xb48] ss:$16 sps:$4 sm:$0xff]   ;;  %v20481_v43 = vld [vmem:[%s27215_s7 + $0x98c] ss:$16 sps:$4 sm:$0xff]  }
 0x7ec   :  { %15039 = vmatprep.subr.bf16.mxu1 %v20412_v9  ;;  %v20484_v9 = vld [vmem:[%s27215_s7 + $0xb2c] ss:$16 sps:$4 sm:$0xff]  }
 0x7ee   :  { %14937 = vmatpush2.bf16.msra.mxu0 %v20407_v12  ;;  %v14641_v12 = vpop.f32.mrf.mxu0 }
 0x7ef   :  { %15040 = vmatpush1.bf16.msra.mxu1 %v20410_v10  ;;  %14992 = vmatprep.subr.bf16.mxu0 %v20415_v26  ;;  %v27003_v10 = vpop.f32.mrf.mxu1  ;;  %v20479_v26 = vld [vmem:[%s27215_s7 + $0x988] ss:$16 sps:$4 sm:$0xff]  }
 0x7f0   :  { %15041 = vmatprep.subr.bf16.mxu1 %v20418_v0  ;;  %v20482_v0 = vld [vmem:[%s27215_s7 + $0xb28] ss:$16 sps:$4 sm:$0xff]  }
 0x7f1   :  { %14939 = vmatmul.mubr.bf16.vlgmr.msra.gmra.mxu0 %v27258_v40  ;;  %v20430_v40 = vld [vmem:[%s27215_s7 + $0xa4c] ss:$16 sps:$4 sm:$0xff]  }
 0x7f2   :  { %14993 = vmatpush1.bf16.msra.mxu0 %v20413_v21  ;;  %15024 = vmatprep.mubr.bf16.mxu0 %v26133_v60  ;;  %v20425_v60 = vld [vmem:[%s27215_s7 + $0x8a8] ss:$16 sps:$4 sm:$0xff]   ;;  %v20487_v21 = vld [vmem:[%s27215_s7 + $0x96c] ss:$16 sps:$4 sm:$0xff]  }
 0x7f3   :  { %15042 = vmatpush1.bf16.msra.mxu1 %v20416_v63  ;;  %14994 = vmatprep.subr.bf16.mxu0 %v20421_v36  ;;  %v20490_v63 = vld [vmem:[%s27215_s7 + $0xb0c] ss:$16 sps:$4 sm:$0xff]   ;;  %v27017_v36 = vpop.f32.mrf.mxu0 }
 0x7f4   :  { %15043 = vmatprep.subr.bf16.mxu1 %v20424_v31  ;;  %v14684_v31 = vpop.f32.mrf.mxu1 }
 0x7f6   :  { %14995 = vmatpush1.bf16.msra.mxu0 %v20419_v28  ;;  %v20485_v28 = vld [vmem:[%s27215_s7 + $0x968] ss:$16 sps:$4 sm:$0xff]  }
 0x7f7   :  { %15044 = vmatpush1.bf16.msra.mxu1 %v20422_v14  ;;  %14996 = vmatprep.subr.bf16.mxu0 %v20427_v55  ;;  %v20488_v14 = vld [vmem:[%s27215_s7 + $0xb08] ss:$16 sps:$4 sm:$0xff]   ;;  %v20493_v55 = vld [vmem:[%s27215_s7 + $0x94c] ss:$16 sps:$4 sm:$0xff]  }
 0x7f8   :  { %15045 = vmatprep.subr.bf16.mxu1 %v20430_v40  ;;  %v20494_v40 = vld [vmem:[%s27217_s9 + $0x78] sm:$0xff]  }
 0x7fa   :  { %14997 = vmatpush1.bf16.msra.mxu0 %v20425_v60  ;;  %v14645_v60 = vpop.f32.mrf.mxu0 }
 0x7fb   :  { %15046 = vmatpush1.bf16.msra.mxu1 %v20428_v20  ;;  %14998 = vmatprep.subr.bf16.mxu0 %v20433_v27  ;;  %v27031_v20 = vpop.f32.mrf.mxu1  ;;  %v20491_v27 = vld [vmem:[%s27215_s7 + $0x948] ss:$16 sps:$4 sm:$0xff]  }
 0x7fc   :  { %15047 = vmatprep.subr.bf16.mxu1 %v20436_v5  ;;  %v27036_v5 = vpop.f32.mrf.mxu0 }
 0x7fe   :  { %14999 = vmatpush1.bf16.msra.mxu0 %v20431_v54  ;;  %v20495_v54 = vld [vmem:[%s27217_s9 + $0x38] sm:$0xff]  }
 0x7ff   :  { %15048 = vmatpush1.bf16.msra.mxu1 %v20434_v50  ;;  %15000 = vmatprep.subr.bf16.mxu0 %v20439_v42  ;;  %v20498_v50 = vld [vmem:[%s27215_s7 + $0x92c] ss:$16 sps:$4 sm:$0xff]   ;;  %v20499_v42 = vld [vmem:[%s27217_s9 + $0x70] sm:$0xff]  }
 0x800   :  { %15049 = vmatprep.subr.bf16.mxu1 %v20442_v46  ;;  %v27050_v46 = vld [vmem:[%s27216_s8] sm:$0xf] }
 0x802   :  { %15001 = vmatpush1.bf16.msra.mxu0 %v20437_v49  ;;  %v14688_v49 = vpop.f32.mrf.mxu1 }
 0x803   :  { %15050 = vmatpush1.bf16.msra.mxu1 %v20440_v47  ;;  %15002 = vmatprep.subr.bf16.mxu0 %v20445_v52  ;;  %v12502_v47 = vrot.slane %v27050_v46, %v21239_v57  ;;  %v20496_v52 = vld [vmem:[%s27215_s7 + $0x928] ss:$16 sps:$4 sm:$0xff]   ;;  %v20503_v57 = vld [vmem:[%s27215_s7 + $0x90c] ss:$16 sps:$4 sm:$0xff]  }
 0x804   :  { %15051 = vmatprep.subr.bf16.mxu1 %v20448_v29  ;;  %v14727_v29 = vpop.f32.mrf.mxu0 }
 0x806   :  { %15003 = vmatpush1.bf16.msra.mxu0 %v20443_v53 }
 0x807   :  { %15052 = vmatpush2.bf16.msra.mxu1 %v20446_v62  ;;  %15004 = vmatprep.subr.bf16.mxu0 %v20451_v16  ;;  %v20500_v62 = vld [vmem:[%s27217_s9 + $0x30] sm:$0xff]   ;;  %v14556_v16 = vadd.f32 %v26942_v44, %v12502_v47 }
 0x808   :  { %15053 = vmatprep.subr.bf16.mxu1 %v20454_v19  ;;  %v20501_v19 = vld [vmem:[%s27215_s7 + $0x908] ss:$16 sps:$4 sm:$0xff]  }
 0x809   :  { %v14599_v44 = vadd.f32 %v26960_v32, %v14556_v16  ;;  %v20510_v32 = vld [vmem:[%s27217_s9 + $0x20] sm:$0xff]  }
 0x80a   :  { %15005 = vmatpush1.bf16.msra.mxu0 %v20449_v30  ;;  %v14729_v30 = vpop.f32.mrf.mxu0 }
 0x80b   :  { %15054 = vmatpush2.bf16.msra.mxu1 %v20452_v25  ;;  %15006 = vmatprep.subr.bf16.mxu0 %v20457_v6  ;;  %v20505_v6 = vld [vmem:[%s27217_s9 + $0x28] sm:$0xff]  }
 0x80c   :  { %15055 = vmatprep.subr.bf16.mxu1 %v20460_v48  ;;  %v20508_v48 = vld [vmem:[%s27215_s7 + $0xc6c] ss:$16 sps:$4 sm:$0xff]  }
 0x80e   :  { %15007 = vmatpush1.bf16.msra.mxu0 %v20455_v38  ;;  %v14560_v38 = vadd.f32 %v26974_v3, %v12502_v47  ;;  %v20513_v3 = vld [vmem:[%s27215_s7 + $0xc4c] ss:$16 sps:$4 sm:$0xff]  }
 0x80f   :  { %15056 = vmatpush2.bf16.msra.mxu1 %v20458_v11  ;;  %15008 = vmatprep.subr.bf16.mxu0 %v20463_v2  ;;  %v20509_v11 = vld [vmem:[%s27217_s9 + $0x60] sm:$0xff]  }
 0x810   :  { %15057 = vmatprep.subr.bf16.mxu1 %v20466_v1  ;;  %v27262_v2 = vld [vmem:[#allocation5_spill] sm:$0xff] }
 0x811   :  { %v12498_v1 = vrot.slane %v27050_v46, %v27262_v2  ;;  %v20533_v2 = vld [vmem:[%s27217_s9 + $0xa8] sm:$0xff]  }
 0x812   :  { %15009 = vmatpush2.bf16.msra.mxu0 %v20461_v8  ;;  %v14603_v8 = vadd.f32 %v26992_v61, %v14560_v38  ;;  %v20529_v38 = vld [vmem:[%s27217_s9 + $0xb8] sm:$0xff]  }
 0x813   :  { %15058 = vmatpush2.bf16.msra.mxu1 %v20464_v23  ;;  %15010 = vmatprep.subr.bf16.mxu0 %v20469_v17  ;;  %v14642_v23 = vadd.f32 %v14641_v12, %v14599_v44  ;;  %v20506_v17 = vld [vmem:[%s27215_s7 + $0xc68] ss:$16 sps:$4 sm:$0xff]   ;;  %v14554_v61 = vadd.f32 %v26928_v18, %v12498_v1  ;;  %v20518_v18 = vld [vmem:[%s27215_s7 + $0xc2c] ss:$16 sps:$4 sm:$0xff]   ;;  %v20530_v44 = vld [vmem:[%s27217_s9 + $0xf0] sm:$0xff]  }
 0x814   :  { %15059 = vmatprep.subr.bf16.mxu1 %v20472_v15  ;;  %v14731_v15 = vpop.f32.mrf.mxu0 }
 0x816   :  { %15011 = vmatpush2.bf16.msra.mxu0 %v20467_v59 }
 0x817   :  { %15060 = vmatpush2.bf16.msra.mxu1 %v20470_v4  ;;  %15012 = vmatprep.subr.bf16.mxu0 %v20475_v33  ;;  %v14558_v4 = vadd.f32 %v26958_v13, %v12498_v1  ;;  %v14646_v33 = vadd.f32 %v14645_v60, %v14603_v8  ;;  %v20511_v13 = vld [vmem:[%s27215_s7 + $0xc48] ss:$16 sps:$4 sm:$0xff]   ;;  %v20534_v1 = vld [vmem:[%s27217_s9 + $0xe0] sm:$0xff]  }
 0x818   :  { %15061 = vmatprep.subr.bf16.mxu1 %v20478_v41  ;;  %v14685_v41 = vadd.f32 %v14684_v31, %v14642_v23  ;;  %v20535_v8 = vld [vmem:[%s27217_s9 + $0xa0] sm:$0xff]   ;;  %v20536_v23 = vld [vmem:[%s27217_s9 + $0xd8] sm:$0xff]  }
 0x81a   :  { %15013 = vmatpush2.bf16.msra.mxu0 %v20473_v51  ;;  %v20514_v51 = vld [vmem:[%s27217_s9 + $0x58] sm:$0xff]   ;;  %v14728_v12 = vadd.f32 %v14727_v29, %v14685_v41 }
 0x81b   :  { %15062 = vmatpush2.bf16.msra.mxu1 %v20476_v37  ;;  %15014 = vmatprep.subr.bf16.mxu0 %v20481_v43  ;;  %v14601_v43 = vadd.f32 %v26976_v22, %v14558_v4  ;;  %v14597_v22 = vadd.f32 %v26944_v45, %v14554_v61  ;;  %v20516_v45 = vld [vmem:[%s27215_s7 + $0xc28] ss:$16 sps:$4 sm:$0xff]   ;;  %v20542_v4 = vld [vmem:[%s27217_s9 + $0xc0] sm:$0xff]  }
 0x81c   :  { %15063 = vmatprep.subr.bf16.mxu1 %v20484_v9  ;;  %v14689_v9 = vadd.f32 %v14688_v49, %v14646_v33  ;;  %v20543_v33 = vld [vmem:[%s27217_s9 + $0x80] sm:$0xff]  }
 0x81e   :  { %15015 = vmatpush2.bf16.msra.mxu0 %v20479_v26 }
 0x81f   :  { %15064 = vmatpush2.bf16.msra.mxu1 %v20482_v0  ;;  %15016 = vmatprep.subr.bf16.mxu0 %v20487_v21  ;;  %v14644_v21 = vadd.f32 %v27017_v36, %v14601_v43 }
 0x820   :  { %15065 = vmatprep.subr.bf16.mxu1 %v20490_v63  ;;  %v14732_v63 = vadd.f32 %v14731_v15, %v14689_v9  ;;  %v20538_v15 = vld [vmem:[%s27217_s9 + $0xd0] sm:$0xff]  }
 0x822   :  { %15017 = vmatpush2.bf16.msra.mxu0 %v20485_v28 }
 0x823   :  { %15066 = vmatpush2.bf16.msra.mxu1 %v20488_v14  ;;  %15018 = vmatprep.subr.bf16.mxu0 %v20493_v55  ;;  %v14640_v14 = vadd.f32 %v26987_v35, %v14597_v22  ;;  %v14687_v55 = vadd.f32 %v27031_v20, %v14644_v21  ;;  %v20523_v35 = vld [vmem:[%s27215_s7 + $0xc0c] ss:$16 sps:$4 sm:$0xff]   ;;  %v12510_v21 = vrot.slane %v27050_v46, %v21242_v58 }
 0x824   :  { %17668 = vmatprep.subr.bf16.mxu1 %v20494_v40 }
 0x825   :  { %v14683_v20 = vadd.f32 %v27003_v10, %v14640_v14  ;;  %v20525_v10 = vld [vmem:[%s27217_s9 + $0x8] sm:$0xff]  }
 0x826   :  { %15019 = vmatpush2.bf16.msra.mxu0 %v20491_v27  ;;  %15068 = vmatmul.mubr.bf16.vlgmr.msra.gmra.mxu1 %v26216_v24  ;;  %v27058_v53 = vpop.f32.mrf.mxu1  ;;  %v20504_v24 = vld [vmem:[%s27217_s9 + $0x68] sm:$0xff]   ;;  %v20520_v27 = vld [vmem:[%s27217_s9 + $0x10] sm:$0xff]  }
 0x827   :  { %17669 = vmatpush3.bf16.msra.mxu1 %v20495_v54  ;;  %15020 = vmatprep.subr.bf16.mxu0 %v20498_v50  ;;  %v14730_v54 = vadd.f32 %v14729_v30, %v14687_v55  ;;  %v14726_v49 = vadd.f32 %v27036_v5, %v14683_v20  ;;  %v20526_v5 = vld [vmem:[%s27217_s9 + $0x40] sm:$0xff]  }
 0x828   :  { %17670 = vmatprep.subr.bf16.mxu1 %v20499_v42  ;;  %v14770_v25 = vpop.f32.mrf.mxu1  ;;  %v20524_v42 = vld [vmem:[%s27217_s9 + $0x48] sm:$0xff]   ;;  %v20527_v30 = vld [vmem:[%s27217_s9] sm:$0xff]  }
 0x829   :  { %v14771_v31 = vadd.f32 %v14770_v25, %v14728_v12 }
 0x82a   :  { %15021 = vmatpush2.bf16.msra.mxu0 %v20496_v52  ;;  %v14772_v59 = vpop.f32.mrf.mxu1 }
 0x82b   :  { %17671 = vmatpush3.bf16.msra.mxu1 %v20500_v62  ;;  %15022 = vmatprep.subr.bf16.mxu0 %v20503_v57  ;;  %v14773_v47 = vadd.f32 %v14772_v59, %v14730_v54  ;;  %v20521_v62 = vld [vmem:[%s27215_s7 + $0xc08] ss:$16 sps:$4 sm:$0xff]   ;;  %v14769_v57 = vadd.f32 %v27058_v53, %v14726_v49  ;;  %v20539_v59 = vld [vmem:[%s27217_s9 + $0x90] sm:$0xff]  }
 0x82c   :  { %17672 = vmatprep.subr.bf16.mxu1 %v20504_v24  ;;  %v14774_v26 = vpop.f32.mrf.mxu1 }
 0x82d   :  { %v14775_v40 = vadd.f32 %v14774_v26, %v14732_v63  ;;  %v12506_v63 = vrot.slane %v27050_v46, %v21236_v56 }
 0x82e   :  { %15023 = vmatpush2.bf16.msra.mxu0 %v20501_v19 }
 0x82f   :  { %17673 = vmatpush3.bf16.msra.mxu1 %v20505_v6  ;;  %15086 = vmatprep.subr.bf16.mxu0 %v20508_v48  ;;  %v20528_v48 = vld [vmem:[%s27217_s9 + $0xf8] sm:$0xff]  }
 0x830   :  { %17674 = vmatprep.subr.bf16.mxu1 %v20509_v11  ;;  %v20532_v11 = vld [vmem:[%s27217_s9 + $0xe8] sm:$0xff]  }
 0x831   :  { %15025 = vmatmul.mubr.bf16.vlgmr.msra.gmra.mxu0 %v25730_v7  ;;  %v14811_v37 = vpop.f32.mrf.mxu0  ;;  %v20515_v7 = vld [vmem:[%s27217_s9 + $0x18] sm:$0xff]  }
 0x832   :  { %15087 = vmatpush1.bf16.msra.mxu0 %v20506_v17  ;;  %15110 = vmatprep.mubr.bf16.mxu0 %v27260_v39  ;;  %v20519_v39 = vld [vmem:[%s27217_s9 + $0x50] sm:$0xff]   ;;  %v14812_v19 = vadd.f32 %v14811_v37, %v14769_v57  ;;  %v20537_v17 = vld [vmem:[%s27217_s9 + $0x98] sm:$0xff]  }
 0x833   :  { %v14813_v0 = vpop.f32.mrf.mxu0  ;;  %17675 = vmatpush3.bf16.msra.mxu1 %v20510_v32  ;;  %15088 = vmatprep.subr.bf16.mxu0 %v20513_v3  ;;  %v20540_v32 = vld [vmem:[%s27217_s9 + $0xc8] sm:$0xff]  }
 0x834   :  { %17676 = vmatprep.subr.bf16.mxu1 %v20514_v51  ;;  %v14814_v60 = vadd.f32 %v14813_v0, %v14771_v31  ;;  %v15121_v53 = vmax.f32 %v14812_v19, 0.0  ;;  %v20541_v3 = vld [vmem:[%s27217_s9 + $0x88] sm:$0xff]  }
 0x835   :  { %v14815_v28 = vpop.f32.mrf.mxu0 }
 0x836   :  { %15089 = vmatpush1.bf16.msra.mxu0 %v20511_v13  ;;  %v15122_v52 = vmax.f32 %v14814_v60, 0.0  ;;  %v14816_v24 = vadd.f32 %v14815_v28, %v14773_v47 }
 0x837   :  { %v14817_v36 = vpop.f32.mrf.mxu0  ;;  %17677 = vmatpush3.bf16.msra.mxu1 %v20515_v7  ;;  %15090 = vmatprep.subr.bf16.mxu0 %v20518_v18 }
 0x838   :  { %v14818_v50 = vadd.f32 %v14817_v36, %v14775_v40  ;;  %17678 = vmatprep.subr.bf16.mxu1 %v20519_v39  ;;  %v15125_v25 = vmax.f32 %v14816_v24, 0.0 }
 0x83a   :  { %v15126_v29 = vmax.f32 %v14818_v50, 0.0  ;;  %15091 = vmatpush1.bf16.msra.mxu0 %v20516_v45  ;;  %v15129_v6 = vpack.c.bf16 %v15125_v25, %v15121_v53 }
 0x83b   :  { %17679 = vmatpush3.bf16.msra.mxu1 %v20520_v27  ;;  %15092 = vmatprep.subr.bf16.mxu0 %v20523_v35 }
 0x83c   :  { %v15130_v16 = vpack.c.bf16 %v15126_v29, %v15122_v52  ;;  %17680 = vmatprep.subr.bf16.mxu1 %v20524_v42 }
 0x83e   :  { %15093 = vmatpush1.bf16.msra.mxu0 %v20521_v62  ;;  %15428 = vmatprep.mubr.bf16.mxu1 %v15130_v16 }
 0x83f   :  { %17681 = vmatpush3.bf16.msra.mxu1 %v20525_v10  ;;  %17690 = vmatprep.subr.bf16.mxu0 %v20528_v48 }
 0x840   :  { %17682 = vmatprep.subr.bf16.mxu1 %v20526_v5 }
 0x841   :  { %17447 = vmatmul.mubr.msk.bf16.vlgmr.msra.gmra.mxu0 %vm14515_vm0, %v26459_v34  ;;  %v20531_v34 = vld [vmem:[%s27217_s9 + $0xb0] sm:$0xff]  }
 0x842   :  { %17691 = vmatpush3.bf16.msra.mxu0 %v20529_v38 }
 0x843   :  { %17683 = vmatpush3.bf16.msra.mxu1 %v20527_v30  ;;  %17692 = vmatprep.subr.bf16.mxu0 %v20530_v44 }
 0x846   :  { %15429 = vmatmul.mubr.bf16.vlgmr.msra.gmra.mxu1 %v15129_v6  ;;  %17693 = vmatpush3.bf16.msra.mxu0 %v20531_v34 }
 0x847   :  { %17694 = vmatprep.subr.bf16.mxu0 %v20532_v11 }
 0x84a   :  { %17695 = vmatpush3.bf16.msra.mxu0 %v20533_v2 }
 0x84b   :  { %17696 = vmatprep.subr.bf16.mxu0 %v20534_v1 }
 0x84e   :  { %17697 = vmatpush3.bf16.msra.mxu0 %v20535_v8 }
 0x84f   :  { %17698 = vmatprep.subr.bf16.mxu0 %v20536_v23 }
 0x852   :  { %17699 = vmatpush3.bf16.msra.mxu0 %v20537_v17 }
 0x853   :  { %17700 = vmatprep.subr.bf16.mxu0 %v20538_v15 }
 0x856   :  { %17701 = vmatpush3.bf16.msra.mxu0 %v20539_v59 }
 0x857   :  { %17702 = vmatprep.subr.bf16.mxu0 %v20540_v32 }
 0x85a   :  { %17703 = vmatpush3.bf16.msra.mxu0 %v20541_v3 }
 0x85b   :  { %17704 = vmatprep.subr.bf16.mxu0 %v20542_v4 }
 0x85e   :  { %17705 = vmatpush3.bf16.msra.mxu0 %v20543_v33 }
 0x866   :  { %v14897_v61 = vpop.f32.mrf.mxu1 }
 0x868   :  { %v14899_v43 = vpop.f32.mrf.mxu1 }
 0x86a   :  { %v14901_v12 = vpop.f32.mrf.mxu1 }
 0x86c   :  { %v14903_v26 = vpop.f32.mrf.mxu1 }
 0x871   :  { %v14854_v41 = vpop.f32.mrf.mxu0 }
 0x872   :  { %v14855_v40 = vadd.f32 %v14854_v41, %v12506_v63 }
 0x873   :  { %v14856_v51 = vpop.f32.mrf.mxu0 }
 0x874   :  { %v14857_v14 = vadd.f32 %v14856_v51, %v12510_v21  ;;  %v14898_v20 = vadd.f32 %v14897_v61, %v14855_v40 }
 0x875   :  { %v14858_v37 = vpop.f32.mrf.mxu0 }
 0x876   :  { %v14859_v55 = vadd.f32 %v14858_v37, %v12506_v63  ;;  %v14900_v27 = vadd.f32 %v14899_v43, %v14857_v14  ;;  %v17448_v43 = vld [vmem:[%s27218_s10] ss:$0 sm:$0xff]  ;;  %s20615_s10 = smov [#allocation2]  }
 0x877   :  { %v14860_v9 = vpop.f32.mrf.mxu0  ;;  %s15524_s23 = sshll.u32 %s20615_s10, 4  ;;  %s15525_s23 = int_to_ptr.vmem [resolvable:$true] %s15524_s23 }
 0x878   :  { %v14861_v60 = vadd.f32 %v14860_v9, %v12510_v21  ;;  %v14902_v35 = vadd.f32 %v14901_v12, %v14859_v55  ;;  %s20590_s0 = scalar_lea.vmem %s15525_s23, 512  ;;  %p20595_p1 = scmp.lt.s32.totalorder %s15525_s23, %s15525_s23 }
 0x879   :  { %p20591_p0 = scmp.ne.s32.totalorder %s15525_s23, %s20590_s0  ;;  %p20596_p2 = scmp.lt.s32.totalorder %s20590_s0, %s20590_s0 }
 0x87a   :  { %v14904_v49 = vadd.f32 %v14903_v26, %v14861_v60 }
 0x87b   :  { %p20597_p3 = por %p20596_p2, %p20595_p1 }
 0x87d   :  { %p20598_p4 = pnand %p20597_p3, %p20591_p0 }
 0x8a6   :  { %v14983_v7 = vpop.f32.mrf.mxu1 }
 0x8a8   :  { %v14985_v22 = vpop.f32.mrf.mxu1 }
 0x8aa   :  { %v14987_v39 = vpop.f32.mrf.mxu1 }
 0x8ac   :  { %v14989_v45 = vpop.f32.mrf.mxu1 }
 0x8b1   :  { %v14940_v13 = vpop.f32.mrf.mxu0 }
 0x8b2   :  { %v14941_v58 = vadd.f32 %v14940_v13, %v14898_v20 }
 0x8b3   :  { %v14942_v0 = vpop.f32.mrf.mxu0 }
 0x8b4   :  { %v14943_v50 = vadd.f32 %v14942_v0, %v14900_v27  ;;  %v14984_v62 = vadd.f32 %v14983_v7, %v14941_v58 }
 0x8b5   :  { %v14944_v18 = vpop.f32.mrf.mxu0 }
 0x8b6   :  { %v14945_v42 = vadd.f32 %v14944_v18, %v14902_v35  ;;  %v14986_v46 = vadd.f32 %v14985_v22, %v14943_v50 }
 0x8b7   :  { %v14946_v31 = vpop.f32.mrf.mxu0 }
 0x8b8   :  { %v14947_v52 = vadd.f32 %v14946_v31, %v14904_v49  ;;  %v14988_v29 = vadd.f32 %v14987_v39, %v14945_v42  ;;  %v27263_v42 = vlaneseq }
 0x8ba   :  { %v14990_v16 = vadd.f32 %v14989_v45, %v14947_v52  ;;  %v15511_v49 = vand.u32 127, %v27263_v42 }
 0x8bc   :  { %vm15514_vm1 = vcmp.lt.s32.totalorder %v15511_v49, 7 }
 0x8e6   :  { %v15069_v54 = vpop.f32.mrf.mxu1 }
 0x8e8   :  { %v15071_v56 = vpop.f32.mrf.mxu1 }
 0x8ea   :  { %v15073_v5 = vpop.f32.mrf.mxu1 }
 0x8ec   :  { %v15075_v38 = vpop.f32.mrf.mxu1 }
 0x8f1   :  { %v15026_v28 = vpop.f32.mrf.mxu0 }
 0x8f2   :  { %v15027_v19 = vadd.f32 %v15026_v28, %v14984_v62 }
 0x8f3   :  { %v15028_v36 = vpop.f32.mrf.mxu0 }
 0x8f4   :  { %v15029_v57 = vadd.f32 %v15028_v36, %v14986_v46  ;;  %v15070_v44 = vadd.f32 %v15069_v54, %v15027_v19 }
 0x8f5   :  { %v15030_v47 = vpop.f32.mrf.mxu0 }
 0x8f6   :  { %v15031_v24 = vadd.f32 %v15030_v47, %v14988_v29  ;;  %v15072_v6 = vadd.f32 %v15071_v56, %v15029_v57 }
 0x8f7   :  { %v15032_v10 = vpop.f32.mrf.mxu0 }
 0x8f8   :  { %v15033_v25 = vadd.f32 %v15032_v10, %v14990_v16  ;;  %v15074_v48 = vadd.f32 %v15073_v5, %v15031_v24 }
 0x8fa   :  { %v15076_v1 = vadd.f32 %v15075_v38, %v15033_v25 }
 0x901   :  { %v15112_v30 = vpop.f32.mrf.mxu0 }
 0x902   :  { %v15113_v8 = vadd.f32 %v15112_v30, %v15070_v44 }
 0x903   :  { %v15114_v53 = vpop.f32.mrf.mxu0 }
 0x904   :  { %v15115_v11 = vadd.f32 %v15114_v53, %v15072_v6  ;;  %v15123_v3 = vmax.f32 %v15113_v8, 0.0 }
 0x905   :  { %v15116_v34 = vpop.f32.mrf.mxu0 }
 0x906   :  { %v15117_v2 = vadd.f32 %v15116_v34, %v15074_v48  ;;  %v15124_v59 = vmax.f32 %v15115_v11, 0.0  ;;  %v17684_v41 = vpop.f32.mrf.mxu1 }
 0x907   :  { %v15118_v23 = vpop.f32.mrf.mxu0 }
 0x908   :  { %v15119_v17 = vadd.f32 %v15118_v23, %v15076_v1  ;;  %v15127_v15 = vmax.f32 %v15117_v2, 0.0  ;;  %v17685_v51 = vpop.f32.mrf.mxu1 }
 0x909   :  { %v17686_v37 = vadd.f32 %v17685_v51, %v17684_v41 }
 0x90a   :  { %v15128_v32 = vmax.f32 %v15119_v17, 0.0  ;;  %v15131_v33 = vpack.c.bf16 %v15127_v15, %v15123_v3  ;;  %v17687_v61 = vpop.f32.mrf.mxu1 }
 0x90b   :  { %v15431_v26 = vadd.f32 %v17686_v37, %v17448_v43 }
 0x90c   :  { %v15132_v4 = vpack.c.bf16 %v15128_v32, %v15124_v59  ;;  %v17688_v9 = vpop.f32.mrf.mxu1 }
 0x90d   :  { %v17689_v0 = vadd.f32 %v17688_v9, %v17687_v61 }
 0x90e   :  { %15469 = vmatprep.mubr.bf16.mxu0 %v15132_v4 }
 0x90f   :  { %15470 = vmatmul.mubr.bf16.vlgmr.msra.gmra.mxu0 %v15131_v33  ;;  %v15434_v63 = vadd.f32 %v17689_v0, %v17448_v43 }
 0x9cf   :  { %v17706_v12 = vpop.f32.mrf.mxu0 }
 0x9d1   :  { %v17707_v13 = vpop.f32.mrf.mxu0 }
 0x9d2   :  { %v17708_v7 = vadd.f32 %v17707_v13, %v17706_v12 }
 0x9d3   :  { %v17709_v18 = vpop.f32.mrf.mxu0 }
 0x9d4   :  { %v15472_v22 = vadd.f32 %v17708_v7, %v15431_v26 }
 0x9d5   :  { %v17710_v21 = vpop.f32.mrf.mxu0 }
 0x9d6   :  { %15512 = vst [vmem:[#allocation2] sm:$0xff] %v15472_v22  ;;  %v17711_v31 = vadd.f32 %v17710_v21, %v17709_v18  ;;  %15478 = vmax.xlane.f32.xlu0 %v15472_v22 }
 0x9d8   :  { %v15475_v39 = vadd.f32 %v17711_v31, %v15434_v63 }
 0x9da   :  { %15513 = vst [vmem:[#allocation2 + $0x10] sm:$0xff] %v15475_v39  ;;  %15480 = vmax.xlane.f32.xlu0 %v15475_v39 }
 0xa5f   :  { %v15479_v28 = vpop.xlane.xlu0 %15478 }
 0xa60   :  { %v15482_v14 = vsub.f32 %v15472_v22, %v15479_v28 }
 0xa62   :  { %v15484_v55 = vmul.f32 1.442695, %v15482_v14 }
 0xa63   :  { %v15481_v40 = vpop.xlane.xlu0 %15480 }
 0xa64   :  { %20572 = vpow2.f32 %v15484_v55  ;;  %v15483_v60 = vsub.f32 %v15475_v39, %v15481_v40 }
 0xa66   :  { %v15486_v45 = vmul.f32 1.442695, %v15483_v60 }
 0xa68   :  { %20574 = vpow2.f32 %v15486_v45 }
 0xa71   :  { %v20573_v36 = vpop.eup %20572 }
 0xa72   :  { %15488 = vadd.xlane.f32.xlu1 %v20573_v36  ;;  %v15498_v27 = vmul.f32 %v20573_v36, %v15482_v14 }
 0xa74   :  { %15500 = vadd.xlane.f32.xlu0 %v15498_v27 }
 0xa75   :  { %v20575_v35 = vpop.eup %20574 }
 0xa76   :  { %15490 = vadd.xlane.f32.xlu1 %v20575_v35  ;;  %v15499_v20 = vmul.f32 %v20575_v35, %v15483_v60 }
 0xa7a   :  { %15502 = vadd.xlane.f32.xlu1 %v15499_v20 }
 0xafb   :  { %v15489_v54 = vpop.xlane.xlu1 %15488 }
 0xafc   :  { %20576 = vlog2.f32 %v15489_v54 }
 0xafd   :  { %20578 = vrcp.f32 %v15489_v54  ;;  %v15501_v56 = vpop.xlane.xlu0 %15500 }
 0xaff   :  { %v15491_v50 = vpop.xlane.xlu1 %15490 }
 0xb00   :  { %20580 = vlog2.f32 %v15491_v50 }
 0xb01   :  { %20582 = vrcp.f32 %v15491_v50 }
 0xb03   :  { %v15503_v16 = vpop.xlane.xlu1 %15502 }
 0xb09   :  { %v20577_v58 = vpop.eup %20576 }
 0xb0a   :  { %v20579_v47 = vpop.eup %20578  ;;  %v15493_v52 = vmul.f32 0.6931472, %v20577_v58 }
 0xb0b   :  { %v15505_v46 = vmul.f32 %v20579_v47, %v15501_v56 }
 0xb0c   :  { %v15496_v29 = vsub.f32 %v15482_v14, %v15493_v52 }
 0xb0d   :  { %v20581_v62 = vpop.eup %20580  ;;  %v15508_v10 = vsub.f32 %v15493_v52, %v15505_v46 }
 0xb0e   :  { %v20583_v57 = vpop.eup %20582  ;;  %v15495_v24 = vmul.f32 0.6931472, %v20581_v62 }
 0xb0f   :  { %v15515_v5 = vsel %vm15514_vm1, %v15496_v29, %v15508_v10  ;;  %v15507_v19 = vmul.f32 %v20583_v57, %v15503_v16 }
 0xb10   :  { %15517 = vst [vmem:[#allocation2 + $0x8] sm:$0xff] %v15515_v5  ;;  %v15497_v30 = vsub.f32 %v15483_v60, %v15495_v24 }
 0xb11   :  { %v15509_v25 = vsub.f32 %v15495_v24, %v15507_v19 }
 0xb13   :  { %v15516_v53 = vsel %vm15514_vm1, %v15497_v30, %v15509_v25 }
 0xb14   :  { %15518 = vst [vmem:[#allocation2 + $0x18] sm:$0xff] %v15516_v53 }
 0xb15   :  { %20601 = shalt.err (!%p20598_p4)
}
 0xb16   :  { %s20616_s24 = smov 256   ;;  %s20617_s25 = smov 16  }
 0xb17   :  { %15530 = dma.vmem_to_hbm [thread:$0]  %s15525_s23, 512, %s27219_s11, [#allocation3], %s20616_s24, %s20616_s24, %s20617_s25  }
 0xb18   :  { %20610 = dma.done.wait [#allocation3], 512  }
 0xb19   :  { %20611 = vsyncadd [#allocation3], 4294966784 }
 0xb1a   :  { %15534 = vsyncpa [#allocation3], 1 }

</bundles_post_ra>
